<compile_context>
chip_gen: v6e
topology: v6e:2x2x1
jax: 0.10.0
libtpu: 0.0.40
codegen_flags: <defaults>
</compile_context>

<pallas_src>
import numpy as np
import jax
import jax.numpy as jnp
from jax.experimental import pallas as pl
from jax.experimental.pallas import tpu as pltpu


# ------------------------- static problem geometry --------------------------
B_TILE = 8                 # images per grid step (keeps all tap blocks aligned)
H1, W1 = 32, 32            # conv1 input spatial
K = 5                      # conv kernel size
HO1, WO1 = 28, 28          # conv1 output spatial
L1 = HO1 * W1              # 896: conv1 full-width slab length (row stride 32)
PAD1 = 1152                # >= 1024 + 4*32+4, multiple of 128

HP1, WP1 = 14, 14          # pool1 output spatial
P1_COLS = 256              # pooled1 slab width (196 valid + zero tail)

HO2, WO2 = 10, 10          # conv2 output spatial
L2 = HO2 * WP1             # 140: conv2 full-width slab length (row stride 14)
HP2, WP2 = 5, 5            # pool2 output spatial

BC1 = B_TILE * 4           # rows per conv1 im2col tap block (3 ch + 1 zero ch)
BC2 = B_TILE * 6           # rows per conv2 im2col tap block


def _pool_matrix(n_rows, w_row, hp, wp, n_cols):
    """[n_rows, n_cols]: column ph*wp+pw averages the 2x2 window; rest is 0."""
    m = np.zeros((n_rows, n_cols), np.float32)
    for ph in range(hp):
        for pw in range(wp):
            p = ph * wp + pw
            for dh in (0, 1):
                for dw in (0, 1):
                    q = (2 * ph + dh) * w_row + (2 * pw + dw)
                    m[q, p] = 0.25
    return m


# ------------------------------ fused kernel --------------------------------
def lenet5_kernel(x_ref, w1_ref, b1_ref, p1m_ref, w2_ref, b2_ref, p2m_ref,
                  wf1_ref, bf1_ref, wf2_ref, bf2_ref, wf3_ref, bf3_ref,
                  o_ref, col1_s, col2_s):
    f32 = jnp.float32
    bf16 = jnp.bfloat16

    # conv1 im2col-in-VMEM: 25 tap blocks of [B_TILE*4, 896]; the lane-shifted
    # source reads are the same cost the old per-tap dots paid, the stores are
    # 16-sublane / 128-lane aligned.
    for ki in range(K):
        for kj in range(K):
            t = ki * K + kj
            off = ki * W1 + kj
            col1_s[t * BC1:(t + 1) * BC1, :] = x_ref[:, off:off + L1]

    # one MXU pass for all taps / channels / images of the tile.
    conv1 = jnp.dot(w1_ref[...], col1_s[...],
                    preferred_element_type=f32)              # [B*6, 896] f32

    # avgpool1 fused as a matmul; the whole tile is stacked on M so the
    # [896,256] pool matrix streams once per tile.  Invalid/wrapped columns
    # only feed discarded outputs; bias after the pool is exactly equivalent.
    p1 = jnp.dot(conv1.astype(bf16), p1m_ref[...],
                 preferred_element_type=f32)
    p1 = (p1 + b1_ref[...]).astype(bf16)                     # [B*6, 256]

    # conv2 im2col (aligned 48-row tap blocks).
    for ki in range(K):
        for kj in range(K):
            t = ki * K + kj
            off = ki * WP1 + kj
            col2_s[t * BC2:(t + 1) * BC2, :] = p1[:, off:off + L2]

    conv2 = jnp.dot(w2_ref[...], col2_s[...],
                    preferred_element_type=f32)              # [16*B, 140] f32

    # avgpool2 fused as matmul; output rows are channel-major (c*B_TILE + b).
    p2 = jnp.dot(conv2.astype(bf16), p2m_ref[...],
                 preferred_element_type=f32) + b2_ref[...]   # [16*B, 25] f32

    # fc1 (400->120): contract the 16 channel chunks; each chunk is an aligned
    # contiguous [B_TILE, 25] row block thanks to the channel-major ordering.
    h = jnp.zeros((B_TILE, 120), f32)
    for c in range(16):
        chunk = p2[c * B_TILE:(c + 1) * B_TILE, :].astype(bf16)
        h = h + jnp.dot(chunk, wf1_ref[c], preferred_element_type=f32)
    h = jnp.maximum(h + bf1_ref[...], 0.0).astype(bf16)

    # fc2 (120->84) + relu, fc3 (84->10); one lane-dense (B_TILE,10) store.
    h = jnp.maximum(jnp.dot(h, wf2_ref[...], preferred_element_type=f32)
                    + bf2_ref[...], 0.0).astype(bf16)
    o_ref[...] = (jnp.dot(h, wf3_ref[...], preferred_element_type=f32)
                  + bf3_ref[...])


# ------------------------------- wrapper -------------------------------------
def _const_spec(shape):
    nd = len(shape)
    return pl.BlockSpec(shape, lambda b: (0,) * nd)


@jax.jit
def lenet5_forward(x, kp):
    bsz = x.shape[0]
    b_pad = ((bsz + B_TILE - 1) // B_TILE) * B_TILE
    # lane-dense bf16 slab [b_pad*4, PAD1]; 4th channel and the column tail
    # are zeros (they only ever feed discarded conv columns anyway).
    x3 = x.reshape(bsz, 3, H1 * W1).astype(jnp.bfloat16)
    x3 = jnp.pad(x3, ((0, b_pad - bsz), (0, 1), (0, PAD1 - H1 * W1)))
    x2 = x3.reshape(b_pad * 4, PAD1)

    grid_spec = pltpu.PrefetchScalarGridSpec(
        num_scalar_prefetch=0,
        grid=(b_pad // B_TILE,),
        in_specs=[
            pl.BlockSpec((B_TILE * 4, PAD1), lambda b: (b, 0)),  # image slab
            _const_spec((B_TILE * 6, 25 * BC1)),     # conv1 block-diag weight
            _const_spec((B_TILE * 6, 1)),            # conv1 bias rows
            _const_spec((L1, P1_COLS)),              # pool1 matrix (bf16)
            _const_spec((16 * B_TILE, 25 * BC2)),    # conv2 block-diag weight
            _const_spec((16 * B_TILE, 1)),           # conv2 bias rows
            _const_spec((L2, 25)),                   # pool2 matrix (bf16)
            _const_spec((16, 25, 120)),              # fc1 w per channel
            _const_spec((1, 120)),                   # fc1 b
            _const_spec((120, 84)),                  # fc2 w
            _const_spec((1, 84)),                    # fc2 b
            _const_spec((84, 10)),                   # fc3 w
            _const_spec((1, 10)),                    # fc3 b
        ],
        out_specs=pl.BlockSpec((B_TILE, 10), lambda b: (b, 0)),
        scratch_shapes=[
            pltpu.VMEM((25 * BC1, L1), jnp.bfloat16),   # conv1 im2col stack
            pltpu.VMEM((25 * BC2, L2), jnp.bfloat16),   # conv2 im2col stack
        ],
    )
    out = pl.pallas_call(
        lenet5_kernel,
        out_shape=jax.ShapeDtypeStruct((b_pad, 10), jnp.float32),
        grid_spec=grid_spec,
        compiler_params=pltpu.CompilerParams(
            dimension_semantics=("parallel",),
            vmem_limit_bytes=32 * 1024 * 1024),
    )(x2, kp["w1blk"], kp["b1"], kp["pool1"], kp["w2blk"], kp["b2"],
      kp["pool2"], kp["wf1"], kp["bf1"], kp["wf2"], kp["bf2"],
      kp["wf3"], kp["bf3"])
    return out[:bsz]


# ----------------------------- parameters ------------------------------------
def init_params(key):
    def uni(k, shape, fan_in):
        bound = 1.0 / float(fan_in) ** 0.5
        return jax.random.uniform(k, shape, jnp.float32, -bound, bound)

    ks = jax.random.split(key, 10)
    return {
        "conv1_w": uni(ks[0], (6, 3, 5, 5), 3 * 25),
        "conv1_b": uni(ks[1], (6,), 3 * 25),
        "conv2_w": uni(ks[2], (16, 6, 5, 5), 6 * 25),
        "conv2_b": uni(ks[3], (16,), 6 * 25),
        "fc1_w": uni(ks[4], (120, 400), 400),
        "fc1_b": uni(ks[5], (120,), 400),
        "fc2_w": uni(ks[6], (84, 120), 120),
        "fc2_b": uni(ks[7], (84,), 120),
        "fc3_w": uni(ks[8], (10, 84), 84),
        "fc3_b": uni(ks[9], (10,), 84),
    }


def prepare_params(p):
    """One-time host-side re-layout of the PyTorch-style parameters."""
    B = B_TILE
    bf16 = jnp.bfloat16
    w1 = np.asarray(p["conv1_w"], np.float32)   # [6,3,5,5]
    b1 = np.asarray(p["conv1_b"], np.float32)
    w2 = np.asarray(p["conv2_w"], np.float32)   # [16,6,5,5]
    b2 = np.asarray(p["conv2_b"], np.float32)

    # conv1 as one matmul: lhs [B*6, 25*B*4], block-diagonal per image; the
    # 4th (padded) input channel's columns stay zero.
    wblk1 = np.zeros((B * 6, 25 * BC1), np.float32)
    for t in range(25):
        ki, kj = divmod(t, K)
        for b in range(B):
            wblk1[b * 6:(b + 1) * 6,
                  t * BC1 + b * 4: t * BC1 + b * 4 + 3] = w1[:, :, ki, kj]

    # conv2 as one matmul: lhs [16*B, 25*B*6]; output row = c2*B + b.
    wblk2 = np.zeros((16 * B, 25 * BC2), np.float32)
    for t in range(25):
        ki, kj = divmod(t, K)
        for b in range(B):
            rows = np.arange(16) * B + b
            wblk2[rows, t * BC2 + b * 6: t * BC2 + (b + 1) * 6] = w2[:, :, ki, kj]

    return {
        "w1blk": jnp.asarray(wblk1, bf16),
        "b1": jnp.asarray(np.tile(b1, B).reshape(B * 6, 1), jnp.float32),
        "pool1": jnp.asarray(_pool_matrix(L1, W1, HP1, WP1, P1_COLS), bf16),
        "w2blk": jnp.asarray(wblk2, bf16),
        "b2": jnp.asarray(np.repeat(b2, B).reshape(16 * B, 1), jnp.float32),
        "pool2": jnp.asarray(_pool_matrix(L2, WP1, HP2, WP2, 25), bf16),
        # fc1 weight as [channel, 5*5, 120]; fc2/fc3 pre-transposed to [in,out]
        "wf1": jnp.asarray(np.asarray(p["fc1_w"], np.float32).T
                           .reshape(16, 25, 120), bf16),
        "bf1": jnp.asarray(np.asarray(p["fc1_b"], np.float32).reshape(1, 120)),
        "wf2": jnp.asarray(np.asarray(p["fc2_w"], np.float32).T, bf16),
        "bf2": jnp.asarray(np.asarray(p["fc2_b"], np.float32).reshape(1, 84)),
        "wf3": jnp.asarray(np.asarray(p["fc3_w"], np.float32).T, bf16),
        "bf3": jnp.asarray(np.asarray(p["fc3_b"], np.float32).reshape(1, 10)),
    }


def reference_forward(x, p):
    # Pure-JAX f32 reference mirroring the PyTorch module.
    def conv(x, w, b):
        y = jax.lax.conv_general_dilated(
            x, w, window_strides=(1, 1), padding="VALID",
            dimension_numbers=("NCHW", "OIHW", "NCHW"))
        return y + b[None, :, None, None]

    def pool(x):
        s = jax.lax.reduce_window(x, 0.0, jax.lax.add,
                                  (1, 1, 2, 2), (1, 1, 2, 2), "VALID")
        return s * 0.25

    h = pool(conv(x, p["conv1_w"], p["conv1_b"]))
    h = pool(conv(h, p["conv2_w"], p["conv2_b"]))
    h = h.reshape(x.shape[0], 400)
    h = jnp.maximum(h @ p["fc1_w"].T + p["fc1_b"], 0.0)
    h = jnp.maximum(h @ p["fc2_w"].T + p["fc2_b"], 0.0)
    return h @ p["fc3_w"].T + p["fc3_b"]


if __name__ == "__main__":
    key = jax.random.PRNGKey(0)
    k_x, k_p = jax.random.split(key)
    # LeNet5's fc_unit hard-codes 16*5*5, so spatial must be 32x32, channels 3.
    # Batch 16 = 2 grid steps of B_TILE=8 (exercises the batched tiling path).
    x = jax.random.normal(k_x, (16, 3, 32, 32), dtype=jnp.float32)
    params = init_params(k_p)
    kparams = prepare_params(params)

    logits = jax.block_until_ready(lenet5_forward(x, kparams))
    assert logits.shape == (16, 10) and logits.dtype == jnp.float32

    ref = jax.block_until_ready(reference_forward(x, params))
    assert bool(jnp.all(jnp.isfinite(logits)))
    assert bool(jnp.allclose(logits, ref, atol=5e-2, rtol=5e-2)), (
        f"max abs diff {float(jnp.max(jnp.abs(logits - ref)))}")

    print("KERNEL_OK")
</pallas_src>

<mosaic_0001>
module attributes {stable_mosaic.version = 11 : i64} {
  func.func @lenet5_kernel(%arg0: i32, %arg1: memref<32x1152xbf16, #tpu.memory_space<vmem>>, %arg2: memref<48x800xbf16, #tpu.memory_space<vmem>>, %arg3: memref<48x1xf32, #tpu.memory_space<vmem>>, %arg4: memref<896x256xbf16, #tpu.memory_space<vmem>>, %arg5: memref<128x1200xbf16, #tpu.memory_space<vmem>>, %arg6: memref<128x1xf32, #tpu.memory_space<vmem>>, %arg7: memref<140x25xbf16, #tpu.memory_space<vmem>>, %arg8: memref<16x25x120xbf16, #tpu.memory_space<vmem>>, %arg9: memref<1x120xf32, #tpu.memory_space<vmem>>, %arg10: memref<120x84xbf16, #tpu.memory_space<vmem>>, %arg11: memref<1x84xf32, #tpu.memory_space<vmem>>, %arg12: memref<84x10xbf16, #tpu.memory_space<vmem>>, %arg13: memref<1x10xf32, #tpu.memory_space<vmem>>, %arg14: memref<8x10xf32, #tpu.memory_space<vmem>>, %arg15: memref<800x896xbf16, #tpu.memory_space<vmem>>, %arg16: memref<1200x140xbf16, #tpu.memory_space<vmem>>) attributes {dimension_semantics = [#tpu.dimension_semantics<parallel>], iteration_bounds = array<i64: 2>, scalar_prefetch = 0 : i64, scratch_operands = 2 : i64, tpu.core_type = #tpu.core_type<tc>, window_params = [{transform_indices = @transform_0, window_bounds = array<i64: 32, 1152>}, {pipeline_mode = #tpu.pipeline_mode<synchronous>, transform_indices = @transform_1, window_bounds = array<i64: 48, 800>}, {pipeline_mode = #tpu.pipeline_mode<synchronous>, transform_indices = @transform_2, window_bounds = array<i64: 48, 1>}, {pipeline_mode = #tpu.pipeline_mode<synchronous>, transform_indices = @transform_3, window_bounds = array<i64: 896, 256>}, {pipeline_mode = #tpu.pipeline_mode<synchronous>, transform_indices = @transform_4, window_bounds = array<i64: 128, 1200>}, {pipeline_mode = #tpu.pipeline_mode<synchronous>, transform_indices = @transform_5, window_bounds = array<i64: 128, 1>}, {pipeline_mode = #tpu.pipeline_mode<synchronous>, transform_indices = @transform_6, window_bounds = array<i64: 140, 25>}, {pipeline_mode = #tpu.pipeline_mode<synchronous>, transform_indices = @transform_7, window_bounds = array<i64: 16, 25, 120>}, {pipeline_mode = #tpu.pipeline_mode<synchronous>, transform_indices = @transform_8, window_bounds = array<i64: 1, 120>}, {pipeline_mode = #tpu.pipeline_mode<synchronous>, transform_indices = @transform_9, window_bounds = array<i64: 120, 84>}, {pipeline_mode = #tpu.pipeline_mode<synchronous>, transform_indices = @transform_10, window_bounds = array<i64: 1, 84>}, {pipeline_mode = #tpu.pipeline_mode<synchronous>, transform_indices = @transform_11, window_bounds = array<i64: 84, 10>}, {pipeline_mode = #tpu.pipeline_mode<synchronous>, transform_indices = @transform_12, window_bounds = array<i64: 1, 10>}, {transform_indices = @transform_13, window_bounds = array<i64: 8, 10>}]} {
    %c0 = arith.constant 0 : index
    %c0_0 = arith.constant 0 : index
    %0 = vector.load %arg1[%c0, %c0_0] : memref<32x1152xbf16, #tpu.memory_space<vmem>>, vector<32x896xbf16>
    %c0_1 = arith.constant 0 : index
    %c0_2 = arith.constant 0 : index
    %1 = vector.load %arg15[%c0_1, %c0_2] : memref<800x896xbf16, #tpu.memory_space<vmem>>, vector<32x896xbf16>
    tpu.vector_store %arg15[%c0_1, %c0_2], %0 {strides = array<i32>} : memref<800x896xbf16, #tpu.memory_space<vmem>>, vector<32x896xbf16>,
    %c0_3 = arith.constant 0 : index
    %c1 = arith.constant 1 : index
    %2 = vector.load %arg1[%c0_3, %c1] : memref<32x1152xbf16, #tpu.memory_space<vmem>>, vector<32x896xbf16>
    %c32 = arith.constant 32 : index
    %c0_4 = arith.constant 0 : index
    %3 = vector.load %arg15[%c32, %c0_4] : memref<800x896xbf16, #tpu.memory_space<vmem>>, vector<32x896xbf16>
    tpu.vector_store %arg15[%c32, %c0_4], %2 {strides = array<i32>} : memref<800x896xbf16, #tpu.memory_space<vmem>>, vector<32x896xbf16>,
    %c0_5 = arith.constant 0 : index
    %c2 = arith.constant 2 : index
    %4 = vector.load %arg1[%c0_5, %c2] : memref<32x1152xbf16, #tpu.memory_space<vmem>>, vector<32x896xbf16>
    %c64 = arith.constant 64 : index
    %c0_6 = arith.constant 0 : index
    %5 = vector.load %arg15[%c64, %c0_6] : memref<800x896xbf16, #tpu.memory_space<vmem>>, vector<32x896xbf16>
    tpu.vector_store %arg15[%c64, %c0_6], %4 {strides = array<i32>} : memref<800x896xbf16, #tpu.memory_space<vmem>>, vector<32x896xbf16>,
    %c0_7 = arith.constant 0 : index
    %c3 = arith.constant 3 : index
    %6 = vector.load %arg1[%c0_7, %c3] : memref<32x1152xbf16, #tpu.memory_space<vmem>>, vector<32x896xbf16>
    %c96 = arith.constant 96 : index
    %c0_8 = arith.constant 0 : index
    %7 = vector.load %arg15[%c96, %c0_8] : memref<800x896xbf16, #tpu.memory_space<vmem>>, vector<32x896xbf16>
    tpu.vector_store %arg15[%c96, %c0_8], %6 {strides = array<i32>} : memref<800x896xbf16, #tpu.memory_space<vmem>>, vector<32x896xbf16>,
    %c0_9 = arith.constant 0 : index
    %c4 = arith.constant 4 : index
    %8 = vector.load %arg1[%c0_9, %c4] : memref<32x1152xbf16, #tpu.memory_space<vmem>>, vector<32x896xbf16>
    %c128 = arith.constant 128 : index
    %c0_10 = arith.constant 0 : index
    %9 = vector.load %arg15[%c128, %c0_10] : memref<800x896xbf16, #tpu.memory_space<vmem>>, vector<32x896xbf16>
    tpu.vector_store %arg15[%c128, %c0_10], %8 {strides = array<i32>} : memref<800x896xbf16, #tpu.memory_space<vmem>>, vector<32x896xbf16>,
    %c0_11 = arith.constant 0 : index
    %c32_12 = arith.constant 32 : index
    %10 = vector.load %arg1[%c0_11, %c32_12] : memref<32x1152xbf16, #tpu.memory_space<vmem>>, vector<32x896xbf16>
    %c160 = arith.constant 160 : index
    %c0_13 = arith.constant 0 : index
    %11 = vector.load %arg15[%c160, %c0_13] : memref<800x896xbf16, #tpu.memory_space<vmem>>, vector<32x896xbf16>
    tpu.vector_store %arg15[%c160, %c0_13], %10 {strides = array<i32>} : memref<800x896xbf16, #tpu.memory_space<vmem>>, vector<32x896xbf16>,
    %c0_14 = arith.constant 0 : index
    %c33 = arith.constant 33 : index
    %12 = vector.load %arg1[%c0_14, %c33] : memref<32x1152xbf16, #tpu.memory_space<vmem>>, vector<32x896xbf16>
    %c192 = arith.constant 192 : index
    %c0_15 = arith.constant 0 : index
    %13 = vector.load %arg15[%c192, %c0_15] : memref<800x896xbf16, #tpu.memory_space<vmem>>, vector<32x896xbf16>
    tpu.vector_store %arg15[%c192, %c0_15], %12 {strides = array<i32>} : memref<800x896xbf16, #tpu.memory_space<vmem>>, vector<32x896xbf16>,
    %c0_16 = arith.constant 0 : index
    %c34 = arith.constant 34 : index
    %14 = vector.load %arg1[%c0_16, %c34] : memref<32x1152xbf16, #tpu.memory_space<vmem>>, vector<32x896xbf16>
    %c224 = arith.constant 224 : index
    %c0_17 = arith.constant 0 : index
    %15 = vector.load %arg15[%c224, %c0_17] : memref<800x896xbf16, #tpu.memory_space<vmem>>, vector<32x896xbf16>
    tpu.vector_store %arg15[%c224, %c0_17], %14 {strides = array<i32>} : memref<800x896xbf16, #tpu.memory_space<vmem>>, vector<32x896xbf16>,
    %c0_18 = arith.constant 0 : index
    %c35 = arith.constant 35 : index
    %16 = vector.load %arg1[%c0_18, %c35] : memref<32x1152xbf16, #tpu.memory_space<vmem>>, vector<32x896xbf16>
    %c256 = arith.constant 256 : index
    %c0_19 = arith.constant 0 : index
    %17 = vector.load %arg15[%c256, %c0_19] : memref<800x896xbf16, #tpu.memory_space<vmem>>, vector<32x896xbf16>
    tpu.vector_store %arg15[%c256, %c0_19], %16 {strides = array<i32>} : memref<800x896xbf16, #tpu.memory_space<vmem>>, vector<32x896xbf16>,
    %c0_20 = arith.constant 0 : index
    %c36 = arith.constant 36 : index
    %18 = vector.load %arg1[%c0_20, %c36] : memref<32x1152xbf16, #tpu.memory_space<vmem>>, vector<32x896xbf16>
    %c288 = arith.constant 288 : index
    %c0_21 = arith.constant 0 : index
    %19 = vector.load %arg15[%c288, %c0_21] : memref<800x896xbf16, #tpu.memory_space<vmem>>, vector<32x896xbf16>
    tpu.vector_store %arg15[%c288, %c0_21], %18 {strides = array<i32>} : memref<800x896xbf16, #tpu.memory_space<vmem>>, vector<32x896xbf16>,
    %c0_22 = arith.constant 0 : index
    %c64_23 = arith.constant 64 : index
    %20 = vector.load %arg1[%c0_22, %c64_23] : memref<32x1152xbf16, #tpu.memory_space<vmem>>, vector<32x896xbf16>
    %c320 = arith.constant 320 : index
    %c0_24 = arith.constant 0 : index
    %21 = vector.load %arg15[%c320, %c0_24] : memref<800x896xbf16, #tpu.memory_space<vmem>>, vector<32x896xbf16>
    tpu.vector_store %arg15[%c320, %c0_24], %20 {strides = array<i32>} : memref<800x896xbf16, #tpu.memory_space<vmem>>, vector<32x896xbf16>,
    %c0_25 = arith.constant 0 : index
    %c65 = arith.constant 65 : index
    %22 = vector.load %arg1[%c0_25, %c65] : memref<32x1152xbf16, #tpu.memory_space<vmem>>, vector<32x896xbf16>
    %c352 = arith.constant 352 : index
    %c0_26 = arith.constant 0 : index
    %23 = vector.load %arg15[%c352, %c0_26] : memref<800x896xbf16, #tpu.memory_space<vmem>>, vector<32x896xbf16>
    tpu.vector_store %arg15[%c352, %c0_26], %22 {strides = array<i32>} : memref<800x896xbf16, #tpu.memory_space<vmem>>, vector<32x896xbf16>,
    %c0_27 = arith.constant 0 : index
    %c66 = arith.constant 66 : index
    %24 = vector.load %arg1[%c0_27, %c66] : memref<32x1152xbf16, #tpu.memory_space<vmem>>, vector<32x896xbf16>
    %c384 = arith.constant 384 : index
    %c0_28 = arith.constant 0 : index
    %25 = vector.load %arg15[%c384, %c0_28] : memref<800x896xbf16, #tpu.memory_space<vmem>>, vector<32x896xbf16>
    tpu.vector_store %arg15[%c384, %c0_28], %24 {strides = array<i32>} : memref<800x896xbf16, #tpu.memory_space<vmem>>, vector<32x896xbf16>,
    %c0_29 = arith.constant 0 : index
    %c67 = arith.constant 67 : index
    %26 = vector.load %arg1[%c0_29, %c67] : memref<32x1152xbf16, #tpu.memory_space<vmem>>, vector<32x896xbf16>
    %c416 = arith.constant 416 : index
    %c0_30 = arith.constant 0 : index
    %27 = vector.load %arg15[%c416, %c0_30] : memref<800x896xbf16, #tpu.memory_space<vmem>>, vector<32x896xbf16>
    tpu.vector_store %arg15[%c416, %c0_30], %26 {strides = array<i32>} : memref<800x896xbf16, #tpu.memory_space<vmem>>, vector<32x896xbf16>,
    %c0_31 = arith.constant 0 : index
    %c68 = arith.constant 68 : index
    %28 = vector.load %arg1[%c0_31, %c68] : memref<32x1152xbf16, #tpu.memory_space<vmem>>, vector<32x896xbf16>
    %c448 = arith.constant 448 : index
    %c0_32 = arith.constant 0 : index
    %29 = vector.load %arg15[%c448, %c0_32] : memref<800x896xbf16, #tpu.memory_space<vmem>>, vector<32x896xbf16>
    tpu.vector_store %arg15[%c448, %c0_32], %28 {strides = array<i32>} : memref<800x896xbf16, #tpu.memory_space<vmem>>, vector<32x896xbf16>,
    %c0_33 = arith.constant 0 : index
    %c96_34 = arith.constant 96 : index
    %30 = vector.load %arg1[%c0_33, %c96_34] : memref<32x1152xbf16, #tpu.memory_space<vmem>>, vector<32x896xbf16>
    %c480 = arith.constant 480 : index
    %c0_35 = arith.constant 0 : index
    %31 = vector.load %arg15[%c480, %c0_35] : memref<800x896xbf16, #tpu.memory_space<vmem>>, vector<32x896xbf16>
    tpu.vector_store %arg15[%c480, %c0_35], %30 {strides = array<i32>} : memref<800x896xbf16, #tpu.memory_space<vmem>>, vector<32x896xbf16>,
    %c0_36 = arith.constant 0 : index
    %c97 = arith.constant 97 : index
    %32 = vector.load %arg1[%c0_36, %c97] : memref<32x1152xbf16, #tpu.memory_space<vmem>>, vector<32x896xbf16>
    %c512 = arith.constant 512 : index
    %c0_37 = arith.constant 0 : index
    %33 = vector.load %arg15[%c512, %c0_37] : memref<800x896xbf16, #tpu.memory_space<vmem>>, vector<32x896xbf16>
    tpu.vector_store %arg15[%c512, %c0_37], %32 {strides = array<i32>} : memref<800x896xbf16, #tpu.memory_space<vmem>>, vector<32x896xbf16>,
    %c0_38 = arith.constant 0 : index
    %c98 = arith.constant 98 : index
    %34 = vector.load %arg1[%c0_38, %c98] : memref<32x1152xbf16, #tpu.memory_space<vmem>>, vector<32x896xbf16>
    %c544 = arith.constant 544 : index
    %c0_39 = arith.constant 0 : index
    %35 = vector.load %arg15[%c544, %c0_39] : memref<800x896xbf16, #tpu.memory_space<vmem>>, vector<32x896xbf16>
    tpu.vector_store %arg15[%c544, %c0_39], %34 {strides = array<i32>} : memref<800x896xbf16, #tpu.memory_space<vmem>>, vector<32x896xbf16>,
    %c0_40 = arith.constant 0 : index
    %c99 = arith.constant 99 : index
    %36 = vector.load %arg1[%c0_40, %c99] : memref<32x1152xbf16, #tpu.memory_space<vmem>>, vector<32x896xbf16>
    %c576 = arith.constant 576 : index
    %c0_41 = arith.constant 0 : index
    %37 = vector.load %arg15[%c576, %c0_41] : memref<800x896xbf16, #tpu.memory_space<vmem>>, vector<32x896xbf16>
    tpu.vector_store %arg15[%c576, %c0_41], %36 {strides = array<i32>} : memref<800x896xbf16, #tpu.memory_space<vmem>>, vector<32x896xbf16>,
    %c0_42 = arith.constant 0 : index
    %c100 = arith.constant 100 : index
    %38 = vector.load %arg1[%c0_42, %c100] : memref<32x1152xbf16, #tpu.memory_space<vmem>>, vector<32x896xbf16>
    %c608 = arith.constant 608 : index
    %c0_43 = arith.constant 0 : index
    %39 = vector.load %arg15[%c608, %c0_43] : memref<800x896xbf16, #tpu.memory_space<vmem>>, vector<32x896xbf16>
    tpu.vector_store %arg15[%c608, %c0_43], %38 {strides = array<i32>} : memref<800x896xbf16, #tpu.memory_space<vmem>>, vector<32x896xbf16>,
    %c0_44 = arith.constant 0 : index
    %c128_45 = arith.constant 128 : index
    %40 = vector.load %arg1[%c0_44, %c128_45] : memref<32x1152xbf16, #tpu.memory_space<vmem>>, vector<32x896xbf16>
    %c640 = arith.constant 640 : index
    %c0_46 = arith.constant 0 : index
    %41 = vector.load %arg15[%c640, %c0_46] : memref<800x896xbf16, #tpu.memory_space<vmem>>, vector<32x896xbf16>
    tpu.vector_store %arg15[%c640, %c0_46], %40 {strides = array<i32>} : memref<800x896xbf16, #tpu.memory_space<vmem>>, vector<32x896xbf16>,
    %c0_47 = arith.constant 0 : index
    %c129 = arith.constant 129 : index
    %42 = vector.load %arg1[%c0_47, %c129] : memref<32x1152xbf16, #tpu.memory_space<vmem>>, vector<32x896xbf16>
    %c672 = arith.constant 672 : index
    %c0_48 = arith.constant 0 : index
    %43 = vector.load %arg15[%c672, %c0_48] : memref<800x896xbf16, #tpu.memory_space<vmem>>, vector<32x896xbf16>
    tpu.vector_store %arg15[%c672, %c0_48], %42 {strides = array<i32>} : memref<800x896xbf16, #tpu.memory_space<vmem>>, vector<32x896xbf16>,
    %c0_49 = arith.constant 0 : index
    %c130 = arith.constant 130 : index
    %44 = vector.load %arg1[%c0_49, %c130] : memref<32x1152xbf16, #tpu.memory_space<vmem>>, vector<32x896xbf16>
    %c704 = arith.constant 704 : index
    %c0_50 = arith.constant 0 : index
    %45 = vector.load %arg15[%c704, %c0_50] : memref<800x896xbf16, #tpu.memory_space<vmem>>, vector<32x896xbf16>
    tpu.vector_store %arg15[%c704, %c0_50], %44 {strides = array<i32>} : memref<800x896xbf16, #tpu.memory_space<vmem>>, vector<32x896xbf16>,
    %c0_51 = arith.constant 0 : index
    %c131 = arith.constant 131 : index
    %46 = vector.load %arg1[%c0_51, %c131] : memref<32x1152xbf16, #tpu.memory_space<vmem>>, vector<32x896xbf16>
    %c736 = arith.constant 736 : index
    %c0_52 = arith.constant 0 : index
    %47 = vector.load %arg15[%c736, %c0_52] : memref<800x896xbf16, #tpu.memory_space<vmem>>, vector<32x896xbf16>
    tpu.vector_store %arg15[%c736, %c0_52], %46 {strides = array<i32>} : memref<800x896xbf16, #tpu.memory_space<vmem>>, vector<32x896xbf16>,
    %c0_53 = arith.constant 0 : index
    %c132 = arith.constant 132 : index
    %48 = vector.load %arg1[%c0_53, %c132] : memref<32x1152xbf16, #tpu.memory_space<vmem>>, vector<32x896xbf16>
    %c768 = arith.constant 768 : index
    %c0_54 = arith.constant 0 : index
    %49 = vector.load %arg15[%c768, %c0_54] : memref<800x896xbf16, #tpu.memory_space<vmem>>, vector<32x896xbf16>
    tpu.vector_store %arg15[%c768, %c0_54], %48 {strides = array<i32>} : memref<800x896xbf16, #tpu.memory_space<vmem>>, vector<32x896xbf16>,
    %c0_55 = arith.constant 0 : index
    %c0_56 = arith.constant 0 : index
    %50 = vector.load %arg2[%c0_55, %c0_56] : memref<48x800xbf16, #tpu.memory_space<vmem>>, vector<48x800xbf16>
    %c0_57 = arith.constant 0 : index
    %c0_58 = arith.constant 0 : index
    %51 = vector.load %arg15[%c0_57, %c0_58] : memref<800x896xbf16, #tpu.memory_space<vmem>>, vector<800x896xbf16>
    %cst = arith.constant dense<0.000000e+00> : vector<48x896xf32>
    %52 = tpu.matmul %50, %51, %cst {dimension_numbers = #tpu.dot_dimension_numbers<[1], [0], [0], [1], [0, 0, 1, 1], [], []>} : vector<48x800xbf16>, vector<800x896xbf16>, vector<48x896xf32> -> vector<48x896xf32>
    %53 = arith.truncf %52 : vector<48x896xf32> to vector<48x896xbf16>
    %c0_59 = arith.constant 0 : index
    %c0_60 = arith.constant 0 : index
    %54 = vector.load %arg4[%c0_59, %c0_60] : memref<896x256xbf16, #tpu.memory_space<vmem>>, vector<896x256xbf16>
    %cst_61 = arith.constant dense<0.000000e+00> : vector<48x256xf32>
    %55 = tpu.matmul %53, %54, %cst_61 {dimension_numbers = #tpu.dot_dimension_numbers<[1], [0], [0], [1], [0, 0, 1, 1], [], []>} : vector<48x896xbf16>, vector<896x256xbf16>, vector<48x256xf32> -> vector<48x256xf32>
    %c0_62 = arith.constant 0 : index
    %c0_63 = arith.constant 0 : index
    %56 = vector.load %arg3[%c0_62, %c0_63] : memref<48x1xf32, #tpu.memory_space<vmem>>, vector<48x1xf32>
    %57 = vector.broadcast %56 : vector<48x1xf32> to vector<48x256xf32>
    %58 = arith.addf %55, %57 : vector<48x256xf32>
    %59 = arith.truncf %58 : vector<48x256xf32> to vector<48x256xbf16>
    %60 = vector.extract_strided_slice %59 {offsets = [0, 0], sizes = [48, 140], strides = [1, 1]} : vector<48x256xbf16> to vector<48x140xbf16>
    %c0_64 = arith.constant 0 : index
    %c0_65 = arith.constant 0 : index
    %61 = vector.load %arg16[%c0_64, %c0_65] : memref<1200x140xbf16, #tpu.memory_space<vmem>>, vector<48x140xbf16>
    tpu.vector_store %arg16[%c0_64, %c0_65], %60 {strides = array<i32>} : memref<1200x140xbf16, #tpu.memory_space<vmem>>, vector<48x140xbf16>,
    %62 = vector.extract_strided_slice %59 {offsets = [0, 1], sizes = [48, 140], strides = [1, 1]} : vector<48x256xbf16> to vector<48x140xbf16>
    %c48 = arith.constant 48 : index
    %c0_66 = arith.constant 0 : index
    %63 = vector.load %arg16[%c48, %c0_66] : memref<1200x140xbf16, #tpu.memory_space<vmem>>, vector<48x140xbf16>
    tpu.vector_store %arg16[%c48, %c0_66], %62 {strides = array<i32>} : memref<1200x140xbf16, #tpu.memory_space<vmem>>, vector<48x140xbf16>,
    %64 = vector.extract_strided_slice %59 {offsets = [0, 2], sizes = [48, 140], strides = [1, 1]} : vector<48x256xbf16> to vector<48x140xbf16>
    %c96_67 = arith.constant 96 : index
    %c0_68 = arith.constant 0 : index
    %65 = vector.load %arg16[%c96_67, %c0_68] : memref<1200x140xbf16, #tpu.memory_space<vmem>>, vector<48x140xbf16>
    tpu.vector_store %arg16[%c96_67, %c0_68], %64 {strides = array<i32>} : memref<1200x140xbf16, #tpu.memory_space<vmem>>, vector<48x140xbf16>,
    %66 = vector.extract_strided_slice %59 {offsets = [0, 3], sizes = [48, 140], strides = [1, 1]} : vector<48x256xbf16> to vector<48x140xbf16>
    %c144 = arith.constant 144 : index
    %c0_69 = arith.constant 0 : index
    %67 = vector.load %arg16[%c144, %c0_69] : memref<1200x140xbf16, #tpu.memory_space<vmem>>, vector<48x140xbf16>
    tpu.vector_store %arg16[%c144, %c0_69], %66 {strides = array<i32>} : memref<1200x140xbf16, #tpu.memory_space<vmem>>, vector<48x140xbf16>,
    %68 = vector.extract_strided_slice %59 {offsets = [0, 4], sizes = [48, 140], strides = [1, 1]} : vector<48x256xbf16> to vector<48x140xbf16>
    %c192_70 = arith.constant 192 : index
    %c0_71 = arith.constant 0 : index
    %69 = vector.load %arg16[%c192_70, %c0_71] : memref<1200x140xbf16, #tpu.memory_space<vmem>>, vector<48x140xbf16>
    tpu.vector_store %arg16[%c192_70, %c0_71], %68 {strides = array<i32>} : memref<1200x140xbf16, #tpu.memory_space<vmem>>, vector<48x140xbf16>,
    %70 = vector.extract_strided_slice %59 {offsets = [0, 14], sizes = [48, 140], strides = [1, 1]} : vector<48x256xbf16> to vector<48x140xbf16>
    %c240 = arith.constant 240 : index
    %c0_72 = arith.constant 0 : index
    %71 = vector.load %arg16[%c240, %c0_72] : memref<1200x140xbf16, #tpu.memory_space<vmem>>, vector<48x140xbf16>
    tpu.vector_store %arg16[%c240, %c0_72], %70 {strides = array<i32>} : memref<1200x140xbf16, #tpu.memory_space<vmem>>, vector<48x140xbf16>,
    %72 = vector.extract_strided_slice %59 {offsets = [0, 15], sizes = [48, 140], strides = [1, 1]} : vector<48x256xbf16> to vector<48x140xbf16>
    %c288_73 = arith.constant 288 : index
    %c0_74 = arith.constant 0 : index
    %73 = vector.load %arg16[%c288_73, %c0_74] : memref<1200x140xbf16, #tpu.memory_space<vmem>>, vector<48x140xbf16>
    tpu.vector_store %arg16[%c288_73, %c0_74], %72 {strides = array<i32>} : memref<1200x140xbf16, #tpu.memory_space<vmem>>, vector<48x140xbf16>,
    %74 = vector.extract_strided_slice %59 {offsets = [0, 16], sizes = [48, 140], strides = [1, 1]} : vector<48x256xbf16> to vector<48x140xbf16>
    %c336 = arith.constant 336 : index
    %c0_75 = arith.constant 0 : index
    %75 = vector.load %arg16[%c336, %c0_75] : memref<1200x140xbf16, #tpu.memory_space<vmem>>, vector<48x140xbf16>
    tpu.vector_store %arg16[%c336, %c0_75], %74 {strides = array<i32>} : memref<1200x140xbf16, #tpu.memory_space<vmem>>, vector<48x140xbf16>,
    %76 = vector.extract_strided_slice %59 {offsets = [0, 17], sizes = [48, 140], strides = [1, 1]} : vector<48x256xbf16> to vector<48x140xbf16>
    %c384_76 = arith.constant 384 : index
    %c0_77 = arith.constant 0 : index
    %77 = vector.load %arg16[%c384_76, %c0_77] : memref<1200x140xbf16, #tpu.memory_space<vmem>>, vector<48x140xbf16>
    tpu.vector_store %arg16[%c384_76, %c0_77], %76 {strides = array<i32>} : memref<1200x140xbf16, #tpu.memory_space<vmem>>, vector<48x140xbf16>,
    %78 = vector.extract_strided_slice %59 {offsets = [0, 18], sizes = [48, 140], strides = [1, 1]} : vector<48x256xbf16> to vector<48x140xbf16>
    %c432 = arith.constant 432 : index
    %c0_78 = arith.constant 0 : index
    %79 = vector.load %arg16[%c432, %c0_78] : memref<1200x140xbf16, #tpu.memory_space<vmem>>, vector<48x140xbf16>
    tpu.vector_store %arg16[%c432, %c0_78], %78 {strides = array<i32>} : memref<1200x140xbf16, #tpu.memory_space<vmem>>, vector<48x140xbf16>,
    %80 = vector.extract_strided_slice %59 {offsets = [0, 28], sizes = [48, 140], strides = [1, 1]} : vector<48x256xbf16> to vector<48x140xbf16>
    %c480_79 = arith.constant 480 : index
    %c0_80 = arith.constant 0 : index
    %81 = vector.load %arg16[%c480_79, %c0_80] : memref<1200x140xbf16, #tpu.memory_space<vmem>>, vector<48x140xbf16>
    tpu.vector_store %arg16[%c480_79, %c0_80], %80 {strides = array<i32>} : memref<1200x140xbf16, #tpu.memory_space<vmem>>, vector<48x140xbf16>,
    %82 = vector.extract_strided_slice %59 {offsets = [0, 29], sizes = [48, 140], strides = [1, 1]} : vector<48x256xbf16> to vector<48x140xbf16>
    %c528 = arith.constant 528 : index
    %c0_81 = arith.constant 0 : index
    %83 = vector.load %arg16[%c528, %c0_81] : memref<1200x140xbf16, #tpu.memory_space<vmem>>, vector<48x140xbf16>
    tpu.vector_store %arg16[%c528, %c0_81], %82 {strides = array<i32>} : memref<1200x140xbf16, #tpu.memory_space<vmem>>, vector<48x140xbf16>,
    %84 = vector.extract_strided_slice %59 {offsets = [0, 30], sizes = [48, 140], strides = [1, 1]} : vector<48x256xbf16> to vector<48x140xbf16>
    %c576_82 = arith.constant 576 : index
    %c0_83 = arith.constant 0 : index
    %85 = vector.load %arg16[%c576_82, %c0_83] : memref<1200x140xbf16, #tpu.memory_space<vmem>>, vector<48x140xbf16>
    tpu.vector_store %arg16[%c576_82, %c0_83], %84 {strides = array<i32>} : memref<1200x140xbf16, #tpu.memory_space<vmem>>, vector<48x140xbf16>,
    %86 = vector.extract_strided_slice %59 {offsets = [0, 31], sizes = [48, 140], strides = [1, 1]} : vector<48x256xbf16> to vector<48x140xbf16>
    %c624 = arith.constant 624 : index
    %c0_84 = arith.constant 0 : index
    %87 = vector.load %arg16[%c624, %c0_84] : memref<1200x140xbf16, #tpu.memory_space<vmem>>, vector<48x140xbf16>
    tpu.vector_store %arg16[%c624, %c0_84], %86 {strides = array<i32>} : memref<1200x140xbf16, #tpu.memory_space<vmem>>, vector<48x140xbf16>,
    %88 = vector.extract_strided_slice %59 {offsets = [0, 32], sizes = [48, 140], strides = [1, 1]} : vector<48x256xbf16> to vector<48x140xbf16>
    %c672_85 = arith.constant 672 : index
    %c0_86 = arith.constant 0 : index
    %89 = vector.load %arg16[%c672_85, %c0_86] : memref<1200x140xbf16, #tpu.memory_space<vmem>>, vector<48x140xbf16>
    tpu.vector_store %arg16[%c672_85, %c0_86], %88 {strides = array<i32>} : memref<1200x140xbf16, #tpu.memory_space<vmem>>, vector<48x140xbf16>,
    %90 = vector.extract_strided_slice %59 {offsets = [0, 42], sizes = [48, 140], strides = [1, 1]} : vector<48x256xbf16> to vector<48x140xbf16>
    %c720 = arith.constant 720 : index
    %c0_87 = arith.constant 0 : index
    %91 = vector.load %arg16[%c720, %c0_87] : memref<1200x140xbf16, #tpu.memory_space<vmem>>, vector<48x140xbf16>
    tpu.vector_store %arg16[%c720, %c0_87], %90 {strides = array<i32>} : memref<1200x140xbf16, #tpu.memory_space<vmem>>, vector<48x140xbf16>,
    %92 = vector.extract_strided_slice %59 {offsets = [0, 43], sizes = [48, 140], strides = [1, 1]} : vector<48x256xbf16> to vector<48x140xbf16>
    %c768_88 = arith.constant 768 : index
    %c0_89 = arith.constant 0 : index
    %93 = vector.load %arg16[%c768_88, %c0_89] : memref<1200x140xbf16, #tpu.memory_space<vmem>>, vector<48x140xbf16>
    tpu.vector_store %arg16[%c768_88, %c0_89], %92 {strides = array<i32>} : memref<1200x140xbf16, #tpu.memory_space<vmem>>, vector<48x140xbf16>,
    %94 = vector.extract_strided_slice %59 {offsets = [0, 44], sizes = [48, 140], strides = [1, 1]} : vector<48x256xbf16> to vector<48x140xbf16>
    %c816 = arith.constant 816 : index
    %c0_90 = arith.constant 0 : index
    %95 = vector.load %arg16[%c816, %c0_90] : memref<1200x140xbf16, #tpu.memory_space<vmem>>, vector<48x140xbf16>
    tpu.vector_store %arg16[%c816, %c0_90], %94 {strides = array<i32>} : memref<1200x140xbf16, #tpu.memory_space<vmem>>, vector<48x140xbf16>,
    %96 = vector.extract_strided_slice %59 {offsets = [0, 45], sizes = [48, 140], strides = [1, 1]} : vector<48x256xbf16> to vector<48x140xbf16>
    %c864 = arith.constant 864 : index
    %c0_91 = arith.constant 0 : index
    %97 = vector.load %arg16[%c864, %c0_91] : memref<1200x140xbf16, #tpu.memory_space<vmem>>, vector<48x140xbf16>
    tpu.vector_store %arg16[%c864, %c0_91], %96 {strides = array<i32>} : memref<1200x140xbf16, #tpu.memory_space<vmem>>, vector<48x140xbf16>,
    %98 = vector.extract_strided_slice %59 {offsets = [0, 46], sizes = [48, 140], strides = [1, 1]} : vector<48x256xbf16> to vector<48x140xbf16>
    %c912 = arith.constant 912 : index
    %c0_92 = arith.constant 0 : index
    %99 = vector.load %arg16[%c912, %c0_92] : memref<1200x140xbf16, #tpu.memory_space<vmem>>, vector<48x140xbf16>
    tpu.vector_store %arg16[%c912, %c0_92], %98 {strides = array<i32>} : memref<1200x140xbf16, #tpu.memory_space<vmem>>, vector<48x140xbf16>,
    %100 = vector.extract_strided_slice %59 {offsets = [0, 56], sizes = [48, 140], strides = [1, 1]} : vector<48x256xbf16> to vector<48x140xbf16>
    %c960 = arith.constant 960 : index
    %c0_93 = arith.constant 0 : index
    %101 = vector.load %arg16[%c960, %c0_93] : memref<1200x140xbf16, #tpu.memory_space<vmem>>, vector<48x140xbf16>
    tpu.vector_store %arg16[%c960, %c0_93], %100 {strides = array<i32>} : memref<1200x140xbf16, #tpu.memory_space<vmem>>, vector<48x140xbf16>,
    %102 = vector.extract_strided_slice %59 {offsets = [0, 57], sizes = [48, 140], strides = [1, 1]} : vector<48x256xbf16> to vector<48x140xbf16>
    %c1008 = arith.constant 1008 : index
    %c0_94 = arith.constant 0 : index
    %103 = vector.load %arg16[%c1008, %c0_94] : memref<1200x140xbf16, #tpu.memory_space<vmem>>, vector<48x140xbf16>
    tpu.vector_store %arg16[%c1008, %c0_94], %102 {strides = array<i32>} : memref<1200x140xbf16, #tpu.memory_space<vmem>>, vector<48x140xbf16>,
    %104 = vector.extract_strided_slice %59 {offsets = [0, 58], sizes = [48, 140], strides = [1, 1]} : vector<48x256xbf16> to vector<48x140xbf16>
    %c1056 = arith.constant 1056 : index
    %c0_95 = arith.constant 0 : index
    %105 = vector.load %arg16[%c1056, %c0_95] : memref<1200x140xbf16, #tpu.memory_space<vmem>>, vector<48x140xbf16>
    tpu.vector_store %arg16[%c1056, %c0_95], %104 {strides = array<i32>} : memref<1200x140xbf16, #tpu.memory_space<vmem>>, vector<48x140xbf16>,
    %106 = vector.extract_strided_slice %59 {offsets = [0, 59], sizes = [48, 140], strides = [1, 1]} : vector<48x256xbf16> to vector<48x140xbf16>
    %c1104 = arith.constant 1104 : index
    %c0_96 = arith.constant 0 : index
    %107 = vector.load %arg16[%c1104, %c0_96] : memref<1200x140xbf16, #tpu.memory_space<vmem>>, vector<48x140xbf16>
    tpu.vector_store %arg16[%c1104, %c0_96], %106 {strides = array<i32>} : memref<1200x140xbf16, #tpu.memory_space<vmem>>, vector<48x140xbf16>,
    %108 = vector.extract_strided_slice %59 {offsets = [0, 60], sizes = [48, 140], strides = [1, 1]} : vector<48x256xbf16> to vector<48x140xbf16>
    %c1152 = arith.constant 1152 : index
    %c0_97 = arith.constant 0 : index
    %109 = vector.load %arg16[%c1152, %c0_97] : memref<1200x140xbf16, #tpu.memory_space<vmem>>, vector<48x140xbf16>
    tpu.vector_store %arg16[%c1152, %c0_97], %108 {strides = array<i32>} : memref<1200x140xbf16, #tpu.memory_space<vmem>>, vector<48x140xbf16>,
    %c0_98 = arith.constant 0 : index
    %c0_99 = arith.constant 0 : index
    %110 = vector.load %arg5[%c0_98, %c0_99] : memref<128x1200xbf16, #tpu.memory_space<vmem>>, vector<128x1200xbf16>
    %c0_100 = arith.constant 0 : index
    %c0_101 = arith.constant 0 : index
    %111 = vector.load %arg16[%c0_100, %c0_101] : memref<1200x140xbf16, #tpu.memory_space<vmem>>, vector<1200x140xbf16>
    %cst_102 = arith.constant dense<0.000000e+00> : vector<128x140xf32>
    %112 = tpu.matmul %110, %111, %cst_102 {dimension_numbers = #tpu.dot_dimension_numbers<[1], [0], [0], [1], [0, 0, 1, 1], [], []>} : vector<128x1200xbf16>, vector<1200x140xbf16>, vector<128x140xf32> -> vector<128x140xf32>
    %113 = arith.truncf %112 : vector<128x140xf32> to vector<128x140xbf16>
    %c0_103 = arith.constant 0 : index
    %c0_104 = arith.constant 0 : index
    %114 = vector.load %arg7[%c0_103, %c0_104] : memref<140x25xbf16, #tpu.memory_space<vmem>>, vector<140x25xbf16>
    %cst_105 = arith.constant dense<0.000000e+00> : vector<128x25xf32>
    %115 = tpu.matmul %113, %114, %cst_105 {dimension_numbers = #tpu.dot_dimension_numbers<[1], [0], [0], [1], [0, 0, 1, 1], [], []>} : vector<128x140xbf16>, vector<140x25xbf16>, vector<128x25xf32> -> vector<128x25xf32>
    %c0_106 = arith.constant 0 : index
    %c0_107 = arith.constant 0 : index
    %116 = vector.load %arg6[%c0_106, %c0_107] : memref<128x1xf32, #tpu.memory_space<vmem>>, vector<128x1xf32>
    %117 = vector.broadcast %116 : vector<128x1xf32> to vector<128x25xf32>
    %118 = arith.addf %115, %117 : vector<128x25xf32>
    %cst_108 = arith.constant 0.000000e+00 : f32
    %119 = vector.broadcast %cst_108 : f32 to vector<8x120xf32>
    %120 = vector.extract_strided_slice %118 {offsets = [0, 0], sizes = [8, 25], strides = [1, 1]} : vector<128x25xf32> to vector<8x25xf32>
    %121 = arith.truncf %120 : vector<8x25xf32> to vector<8x25xbf16>
    %c0_109 = arith.constant 0 : index
    %c0_110 = arith.constant 0 : index
    %c0_111 = arith.constant 0 : index
    %122 = vector.load %arg8[%c0_109, %c0_110, %c0_111] : memref<16x25x120xbf16, #tpu.memory_space<vmem>>, vector<1x25x120xbf16>
    %123 = vector.shape_cast %122 : vector<1x25x120xbf16> to vector<25x120xbf16>
    %cst_112 = arith.constant dense<0.000000e+00> : vector<8x120xf32>
    %124 = tpu.matmul %121, %123, %cst_112 {dimension_numbers = #tpu.dot_dimension_numbers<[1], [0], [0], [1], [0, 0, 1, 1], [], []>} : vector<8x25xbf16>, vector<25x120xbf16>, vector<8x120xf32> -> vector<8x120xf32>
    %125 = arith.addf %119, %124 : vector<8x120xf32>
    %126 = vector.extract_strided_slice %118 {offsets = [8, 0], sizes = [8, 25], strides = [1, 1]} : vector<128x25xf32> to vector<8x25xf32>
    %127 = arith.truncf %126 : vector<8x25xf32> to vector<8x25xbf16>
    %c1_113 = arith.constant 1 : index
    %c0_114 = arith.constant 0 : index
    %c0_115 = arith.constant 0 : index
    %128 = vector.load %arg8[%c1_113, %c0_114, %c0_115] : memref<16x25x120xbf16, #tpu.memory_space<vmem>>, vector<1x25x120xbf16>
    %129 = vector.shape_cast %128 : vector<1x25x120xbf16> to vector<25x120xbf16>
    %cst_116 = arith.constant dense<0.000000e+00> : vector<8x120xf32>
    %130 = tpu.matmul %127, %129, %cst_116 {dimension_numbers = #tpu.dot_dimension_numbers<[1], [0], [0], [1], [0, 0, 1, 1], [], []>} : vector<8x25xbf16>, vector<25x120xbf16>, vector<8x120xf32> -> vector<8x120xf32>
    %131 = arith.addf %125, %130 : vector<8x120xf32>
    %132 = vector.extract_strided_slice %118 {offsets = [16, 0], sizes = [8, 25], strides = [1, 1]} : vector<128x25xf32> to vector<8x25xf32>
    %133 = arith.truncf %132 : vector<8x25xf32> to vector<8x25xbf16>
    %c2_117 = arith.constant 2 : index
    %c0_118 = arith.constant 0 : index
    %c0_119 = arith.constant 0 : index
    %134 = vector.load %arg8[%c2_117, %c0_118, %c0_119] : memref<16x25x120xbf16, #tpu.memory_space<vmem>>, vector<1x25x120xbf16>
    %135 = vector.shape_cast %134 : vector<1x25x120xbf16> to vector<25x120xbf16>
    %cst_120 = arith.constant dense<0.000000e+00> : vector<8x120xf32>
    %136 = tpu.matmul %133, %135, %cst_120 {dimension_numbers = #tpu.dot_dimension_numbers<[1], [0], [0], [1], [0, 0, 1, 1], [], []>} : vector<8x25xbf16>, vector<25x120xbf16>, vector<8x120xf32> -> vector<8x120xf32>
    %137 = arith.addf %131, %136 : vector<8x120xf32>
    %138 = vector.extract_strided_slice %118 {offsets = [24, 0], sizes = [8, 25], strides = [1, 1]} : vector<128x25xf32> to vector<8x25xf32>
    %139 = arith.truncf %138 : vector<8x25xf32> to vector<8x25xbf16>
    %c3_121 = arith.constant 3 : index
    %c0_122 = arith.constant 0 : index
    %c0_123 = arith.constant 0 : index
    %140 = vector.load %arg8[%c3_121, %c0_122, %c0_123] : memref<16x25x120xbf16, #tpu.memory_space<vmem>>, vector<1x25x120xbf16>
    %141 = vector.shape_cast %140 : vector<1x25x120xbf16> to vector<25x120xbf16>
    %cst_124 = arith.constant dense<0.000000e+00> : vector<8x120xf32>
    %142 = tpu.matmul %139, %141, %cst_124 {dimension_numbers = #tpu.dot_dimension_numbers<[1], [0], [0], [1], [0, 0, 1, 1], [], []>} : vector<8x25xbf16>, vector<25x120xbf16>, vector<8x120xf32> -> vector<8x120xf32>
    %143 = arith.addf %137, %142 : vector<8x120xf32>
    %144 = vector.extract_strided_slice %118 {offsets = [32, 0], sizes = [8, 25], strides = [1, 1]} : vector<128x25xf32> to vector<8x25xf32>
    %145 = arith.truncf %144 : vector<8x25xf32> to vector<8x25xbf16>
    %c4_125 = arith.constant 4 : index
    %c0_126 = arith.constant 0 : index
    %c0_127 = arith.constant 0 : index
    %146 = vector.load %arg8[%c4_125, %c0_126, %c0_127] : memref<16x25x120xbf16, #tpu.memory_space<vmem>>, vector<1x25x120xbf16>
    %147 = vector.shape_cast %146 : vector<1x25x120xbf16> to vector<25x120xbf16>
    %cst_128 = arith.constant dense<0.000000e+00> : vector<8x120xf32>
    %148 = tpu.matmul %145, %147, %cst_128 {dimension_numbers = #tpu.dot_dimension_numbers<[1], [0], [0], [1], [0, 0, 1, 1], [], []>} : vector<8x25xbf16>, vector<25x120xbf16>, vector<8x120xf32> -> vector<8x120xf32>
    %149 = arith.addf %143, %148 : vector<8x120xf32>
    %150 = vector.extract_strided_slice %118 {offsets = [40, 0], sizes = [8, 25], strides = [1, 1]} : vector<128x25xf32> to vector<8x25xf32>
    %151 = arith.truncf %150 : vector<8x25xf32> to vector<8x25xbf16>
    %c5 = arith.constant 5 : index
    %c0_129 = arith.constant 0 : index
    %c0_130 = arith.constant 0 : index
    %152 = vector.load %arg8[%c5, %c0_129, %c0_130] : memref<16x25x120xbf16, #tpu.memory_space<vmem>>, vector<1x25x120xbf16>
    %153 = vector.shape_cast %152 : vector<1x25x120xbf16> to vector<25x120xbf16>
    %cst_131 = arith.constant dense<0.000000e+00> : vector<8x120xf32>
    %154 = tpu.matmul %151, %153, %cst_131 {dimension_numbers = #tpu.dot_dimension_numbers<[1], [0], [0], [1], [0, 0, 1, 1], [], []>} : vector<8x25xbf16>, vector<25x120xbf16>, vector<8x120xf32> -> vector<8x120xf32>
    %155 = arith.addf %149, %154 : vector<8x120xf32>
    %156 = vector.extract_strided_slice %118 {offsets = [48, 0], sizes = [8, 25], strides = [1, 1]} : vector<128x25xf32> to vector<8x25xf32>
    %157 = arith.truncf %156 : vector<8x25xf32> to vector<8x25xbf16>
    %c6 = arith.constant 6 : index
    %c0_132 = arith.constant 0 : index
    %c0_133 = arith.constant 0 : index
    %158 = vector.load %arg8[%c6, %c0_132, %c0_133] : memref<16x25x120xbf16, #tpu.memory_space<vmem>>, vector<1x25x120xbf16>
    %159 = vector.shape_cast %158 : vector<1x25x120xbf16> to vector<25x120xbf16>
    %cst_134 = arith.constant dense<0.000000e+00> : vector<8x120xf32>
    %160 = tpu.matmul %157, %159, %cst_134 {dimension_numbers = #tpu.dot_dimension_numbers<[1], [0], [0], [1], [0, 0, 1, 1], [], []>} : vector<8x25xbf16>, vector<25x120xbf16>, vector<8x120xf32> -> vector<8x120xf32>
    %161 = arith.addf %155, %160 : vector<8x120xf32>
    %162 = vector.extract_strided_slice %118 {offsets = [56, 0], sizes = [8, 25], strides = [1, 1]} : vector<128x25xf32> to vector<8x25xf32>
    %163 = arith.truncf %162 : vector<8x25xf32> to vector<8x25xbf16>
    %c7 = arith.constant 7 : index
    %c0_135 = arith.constant 0 : index
    %c0_136 = arith.constant 0 : index
    %164 = vector.load %arg8[%c7, %c0_135, %c0_136] : memref<16x25x120xbf16, #tpu.memory_space<vmem>>, vector<1x25x120xbf16>
    %165 = vector.shape_cast %164 : vector<1x25x120xbf16> to vector<25x120xbf16>
    %cst_137 = arith.constant dense<0.000000e+00> : vector<8x120xf32>
    %166 = tpu.matmul %163, %165, %cst_137 {dimension_numbers = #tpu.dot_dimension_numbers<[1], [0], [0], [1], [0, 0, 1, 1], [], []>} : vector<8x25xbf16>, vector<25x120xbf16>, vector<8x120xf32> -> vector<8x120xf32>
    %167 = arith.addf %161, %166 : vector<8x120xf32>
    %168 = vector.extract_strided_slice %118 {offsets = [64, 0], sizes = [8, 25], strides = [1, 1]} : vector<128x25xf32> to vector<8x25xf32>
    %169 = arith.truncf %168 : vector<8x25xf32> to vector<8x25xbf16>
    %c8 = arith.constant 8 : index
    %c0_138 = arith.constant 0 : index
    %c0_139 = arith.constant 0 : index
    %170 = vector.load %arg8[%c8, %c0_138, %c0_139] : memref<16x25x120xbf16, #tpu.memory_space<vmem>>, vector<1x25x120xbf16>
    %171 = vector.shape_cast %170 : vector<1x25x120xbf16> to vector<25x120xbf16>
    %cst_140 = arith.constant dense<0.000000e+00> : vector<8x120xf32>
    %172 = tpu.matmul %169, %171, %cst_140 {dimension_numbers = #tpu.dot_dimension_numbers<[1], [0], [0], [1], [0, 0, 1, 1], [], []>} : vector<8x25xbf16>, vector<25x120xbf16>, vector<8x120xf32> -> vector<8x120xf32>
    %173 = arith.addf %167, %172 : vector<8x120xf32>
    %174 = vector.extract_strided_slice %118 {offsets = [72, 0], sizes = [8, 25], strides = [1, 1]} : vector<128x25xf32> to vector<8x25xf32>
    %175 = arith.truncf %174 : vector<8x25xf32> to vector<8x25xbf16>
    %c9 = arith.constant 9 : index
    %c0_141 = arith.constant 0 : index
    %c0_142 = arith.constant 0 : index
    %176 = vector.load %arg8[%c9, %c0_141, %c0_142] : memref<16x25x120xbf16, #tpu.memory_space<vmem>>, vector<1x25x120xbf16>
    %177 = vector.shape_cast %176 : vector<1x25x120xbf16> to vector<25x120xbf16>
    %cst_143 = arith.constant dense<0.000000e+00> : vector<8x120xf32>
    %178 = tpu.matmul %175, %177, %cst_143 {dimension_numbers = #tpu.dot_dimension_numbers<[1], [0], [0], [1], [0, 0, 1, 1], [], []>} : vector<8x25xbf16>, vector<25x120xbf16>, vector<8x120xf32> -> vector<8x120xf32>
    %179 = arith.addf %173, %178 : vector<8x120xf32>
    %180 = vector.extract_strided_slice %118 {offsets = [80, 0], sizes = [8, 25], strides = [1, 1]} : vector<128x25xf32> to vector<8x25xf32>
    %181 = arith.truncf %180 : vector<8x25xf32> to vector<8x25xbf16>
    %c10 = arith.constant 10 : index
    %c0_144 = arith.constant 0 : index
    %c0_145 = arith.constant 0 : index
    %182 = vector.load %arg8[%c10, %c0_144, %c0_145] : memref<16x25x120xbf16, #tpu.memory_space<vmem>>, vector<1x25x120xbf16>
    %183 = vector.shape_cast %182 : vector<1x25x120xbf16> to vector<25x120xbf16>
    %cst_146 = arith.constant dense<0.000000e+00> : vector<8x120xf32>
    %184 = tpu.matmul %181, %183, %cst_146 {dimension_numbers = #tpu.dot_dimension_numbers<[1], [0], [0], [1], [0, 0, 1, 1], [], []>} : vector<8x25xbf16>, vector<25x120xbf16>, vector<8x120xf32> -> vector<8x120xf32>
    %185 = arith.addf %179, %184 : vector<8x120xf32>
    %186 = vector.extract_strided_slice %118 {offsets = [88, 0], sizes = [8, 25], strides = [1, 1]} : vector<128x25xf32> to vector<8x25xf32>
    %187 = arith.truncf %186 : vector<8x25xf32> to vector<8x25xbf16>
    %c11 = arith.constant 11 : index
    %c0_147 = arith.constant 0 : index
    %c0_148 = arith.constant 0 : index
    %188 = vector.load %arg8[%c11, %c0_147, %c0_148] : memref<16x25x120xbf16, #tpu.memory_space<vmem>>, vector<1x25x120xbf16>
    %189 = vector.shape_cast %188 : vector<1x25x120xbf16> to vector<25x120xbf16>
    %cst_149 = arith.constant dense<0.000000e+00> : vector<8x120xf32>
    %190 = tpu.matmul %187, %189, %cst_149 {dimension_numbers = #tpu.dot_dimension_numbers<[1], [0], [0], [1], [0, 0, 1, 1], [], []>} : vector<8x25xbf16>, vector<25x120xbf16>, vector<8x120xf32> -> vector<8x120xf32>
    %191 = arith.addf %185, %190 : vector<8x120xf32>
    %192 = vector.extract_strided_slice %118 {offsets = [96, 0], sizes = [8, 25], strides = [1, 1]} : vector<128x25xf32> to vector<8x25xf32>
    %193 = arith.truncf %192 : vector<8x25xf32> to vector<8x25xbf16>
    %c12 = arith.constant 12 : index
    %c0_150 = arith.constant 0 : index
    %c0_151 = arith.constant 0 : index
    %194 = vector.load %arg8[%c12, %c0_150, %c0_151] : memref<16x25x120xbf16, #tpu.memory_space<vmem>>, vector<1x25x120xbf16>
    %195 = vector.shape_cast %194 : vector<1x25x120xbf16> to vector<25x120xbf16>
    %cst_152 = arith.constant dense<0.000000e+00> : vector<8x120xf32>
    %196 = tpu.matmul %193, %195, %cst_152 {dimension_numbers = #tpu.dot_dimension_numbers<[1], [0], [0], [1], [0, 0, 1, 1], [], []>} : vector<8x25xbf16>, vector<25x120xbf16>, vector<8x120xf32> -> vector<8x120xf32>
    %197 = arith.addf %191, %196 : vector<8x120xf32>
    %198 = vector.extract_strided_slice %118 {offsets = [104, 0], sizes = [8, 25], strides = [1, 1]} : vector<128x25xf32> to vector<8x25xf32>
    %199 = arith.truncf %198 : vector<8x25xf32> to vector<8x25xbf16>
    %c13 = arith.constant 13 : index
    %c0_153 = arith.constant 0 : index
    %c0_154 = arith.constant 0 : index
    %200 = vector.load %arg8[%c13, %c0_153, %c0_154] : memref<16x25x120xbf16, #tpu.memory_space<vmem>>, vector<1x25x120xbf16>
    %201 = vector.shape_cast %200 : vector<1x25x120xbf16> to vector<25x120xbf16>
    %cst_155 = arith.constant dense<0.000000e+00> : vector<8x120xf32>
    %202 = tpu.matmul %199, %201, %cst_155 {dimension_numbers = #tpu.dot_dimension_numbers<[1], [0], [0], [1], [0, 0, 1, 1], [], []>} : vector<8x25xbf16>, vector<25x120xbf16>, vector<8x120xf32> -> vector<8x120xf32>
    %203 = arith.addf %197, %202 : vector<8x120xf32>
    %204 = vector.extract_strided_slice %118 {offsets = [112, 0], sizes = [8, 25], strides = [1, 1]} : vector<128x25xf32> to vector<8x25xf32>
    %205 = arith.truncf %204 : vector<8x25xf32> to vector<8x25xbf16>
    %c14 = arith.constant 14 : index
    %c0_156 = arith.constant 0 : index
    %c0_157 = arith.constant 0 : index
    %206 = vector.load %arg8[%c14, %c0_156, %c0_157] : memref<16x25x120xbf16, #tpu.memory_space<vmem>>, vector<1x25x120xbf16>
    %207 = vector.shape_cast %206 : vector<1x25x120xbf16> to vector<25x120xbf16>
    %cst_158 = arith.constant dense<0.000000e+00> : vector<8x120xf32>
    %208 = tpu.matmul %205, %207, %cst_158 {dimension_numbers = #tpu.dot_dimension_numbers<[1], [0], [0], [1], [0, 0, 1, 1], [], []>} : vector<8x25xbf16>, vector<25x120xbf16>, vector<8x120xf32> -> vector<8x120xf32>
    %209 = arith.addf %203, %208 : vector<8x120xf32>
    %210 = vector.extract_strided_slice %118 {offsets = [120, 0], sizes = [8, 25], strides = [1, 1]} : vector<128x25xf32> to vector<8x25xf32>
    %211 = arith.truncf %210 : vector<8x25xf32> to vector<8x25xbf16>
    %c15 = arith.constant 15 : index
    %c0_159 = arith.constant 0 : index
    %c0_160 = arith.constant 0 : index
    %212 = vector.load %arg8[%c15, %c0_159, %c0_160] : memref<16x25x120xbf16, #tpu.memory_space<vmem>>, vector<1x25x120xbf16>
    %213 = vector.shape_cast %212 : vector<1x25x120xbf16> to vector<25x120xbf16>
    %cst_161 = arith.constant dense<0.000000e+00> : vector<8x120xf32>
    %214 = tpu.matmul %211, %213, %cst_161 {dimension_numbers = #tpu.dot_dimension_numbers<[1], [0], [0], [1], [0, 0, 1, 1], [], []>} : vector<8x25xbf16>, vector<25x120xbf16>, vector<8x120xf32> -> vector<8x120xf32>
    %215 = arith.addf %209, %214 : vector<8x120xf32>
    %c0_162 = arith.constant 0 : index
    %c0_163 = arith.constant 0 : index
    %216 = vector.load %arg9[%c0_162, %c0_163] : memref<1x120xf32, #tpu.memory_space<vmem>>, vector<1x120xf32>
    %217 = vector.broadcast %216 : vector<1x120xf32> to vector<8x120xf32>
    %218 = arith.addf %215, %217 : vector<8x120xf32>
    %cst_164 = arith.constant 0.000000e+00 : f32
    %219 = vector.broadcast %cst_164 : f32 to vector<8x120xf32>
    %220 = arith.maximumf %218, %219 : vector<8x120xf32>
    %221 = arith.truncf %220 : vector<8x120xf32> to vector<8x120xbf16>
    %c0_165 = arith.constant 0 : index
    %c0_166 = arith.constant 0 : index
    %222 = vector.load %arg10[%c0_165, %c0_166] : memref<120x84xbf16, #tpu.memory_space<vmem>>, vector<120x84xbf16>
    %cst_167 = arith.constant dense<0.000000e+00> : vector<8x84xf32>
    %223 = tpu.matmul %221, %222, %cst_167 {dimension_numbers = #tpu.dot_dimension_numbers<[1], [0], [0], [1], [0, 0, 1, 1], [], []>} : vector<8x120xbf16>, vector<120x84xbf16>, vector<8x84xf32> -> vector<8x84xf32>
    %c0_168 = arith.constant 0 : index
    %c0_169 = arith.constant 0 : index
    %224 = vector.load %arg11[%c0_168, %c0_169] : memref<1x84xf32, #tpu.memory_space<vmem>>, vector<1x84xf32>
    %225 = vector.broadcast %224 : vector<1x84xf32> to vector<8x84xf32>
    %226 = arith.addf %223, %225 : vector<8x84xf32>
    %cst_170 = arith.constant 0.000000e+00 : f32
    %227 = vector.broadcast %cst_170 : f32 to vector<8x84xf32>
    %228 = arith.maximumf %226, %227 : vector<8x84xf32>
    %229 = arith.truncf %228 : vector<8x84xf32> to vector<8x84xbf16>
    %c0_171 = arith.constant 0 : index
    %c0_172 = arith.constant 0 : index
    %230 = vector.load %arg12[%c0_171, %c0_172] : memref<84x10xbf16, #tpu.memory_space<vmem>>, vector<84x10xbf16>
    %cst_173 = arith.constant dense<0.000000e+00> : vector<8x10xf32>
    %231 = tpu.matmul %229, %230, %cst_173 {dimension_numbers = #tpu.dot_dimension_numbers<[1], [0], [0], [1], [0, 0, 1, 1], [], []>} : vector<8x84xbf16>, vector<84x10xbf16>, vector<8x10xf32> -> vector<8x10xf32>
    %c0_174 = arith.constant 0 : index
    %c0_175 = arith.constant 0 : index
    %232 = vector.load %arg13[%c0_174, %c0_175] : memref<1x10xf32, #tpu.memory_space<vmem>>, vector<1x10xf32>
    %233 = vector.broadcast %232 : vector<1x10xf32> to vector<8x10xf32>
    %234 = arith.addf %231, %233 : vector<8x10xf32>
    %c0_176 = arith.constant 0 : index
    %c0_177 = arith.constant 0 : index
    %235 = vector.load %arg14[%c0_176, %c0_177] : memref<8x10xf32, #tpu.memory_space<vmem>>, vector<8x10xf32>
    tpu.vector_store %arg14[%c0_176, %c0_177], %234 {strides = array<i32>} : memref<8x10xf32, #tpu.memory_space<vmem>>, vector<8x10xf32>,
    return
  }
  func.func @transform_0(%arg0: i32) -> (i32, i32) {
    %c0_i32 = arith.constant 0 : i32
    %c0_i32_0 = arith.constant 0 : i32
    return %arg0, %c0_i32 : i32, i32
  }
  func.func @transform_1(%arg0: i32) -> (i32, i32) {
    %c0_i32 = arith.constant 0 : i32
    %c0_i32_0 = arith.constant 0 : i32
    %c0_i32_1 = arith.constant 0 : i32
    return %c0_i32, %c0_i32_0 : i32, i32
  }
  func.func @transform_2(%arg0: i32) -> (i32, i32) {
    %c0_i32 = arith.constant 0 : i32
    %c0_i32_0 = arith.constant 0 : i32
    %c0_i32_1 = arith.constant 0 : i32
    return %c0_i32, %c0_i32_0 : i32, i32
  }
  func.func @transform_3(%arg0: i32) -> (i32, i32) {
    %c0_i32 = arith.constant 0 : i32
    %c0_i32_0 = arith.constant 0 : i32
    %c0_i32_1 = arith.constant 0 : i32
    return %c0_i32, %c0_i32_0 : i32, i32
  }
  func.func @transform_4(%arg0: i32) -> (i32, i32) {
    %c0_i32 = arith.constant 0 : i32
    %c0_i32_0 = arith.constant 0 : i32
    %c0_i32_1 = arith.constant 0 : i32
    return %c0_i32, %c0_i32_0 : i32, i32
  }
  func.func @transform_5(%arg0: i32) -> (i32, i32) {
    %c0_i32 = arith.constant 0 : i32
    %c0_i32_0 = arith.constant 0 : i32
    %c0_i32_1 = arith.constant 0 : i32
    return %c0_i32, %c0_i32_0 : i32, i32
  }
  func.func @transform_6(%arg0: i32) -> (i32, i32) {
    %c0_i32 = arith.constant 0 : i32
    %c0_i32_0 = arith.constant 0 : i32
    %c0_i32_1 = arith.constant 0 : i32
    return %c0_i32, %c0_i32_0 : i32, i32
  }
  func.func @transform_7(%arg0: i32) -> (i32, i32, i32) {
    %c0_i32 = arith.constant 0 : i32
    %c0_i32_0 = arith.constant 0 : i32
    %c0_i32_1 = arith.constant 0 : i32
    %c0_i32_2 = arith.constant 0 : i32
    return %c0_i32, %c0_i32_0, %c0_i32_1 : i32, i32, i32
  }
  func.func @transform_8(%arg0: i32) -> (i32, i32) {
    %c0_i32 = arith.constant 0 : i32
    %c0_i32_0 = arith.constant 0 : i32
    %c0_i32_1 = arith.constant 0 : i32
    return %c0_i32, %c0_i32_0 : i32, i32
  }
  func.func @transform_9(%arg0: i32) -> (i32, i32) {
    %c0_i32 = arith.constant 0 : i32
    %c0_i32_0 = arith.constant 0 : i32
    %c0_i32_1 = arith.constant 0 : i32
    return %c0_i32, %c0_i32_0 : i32, i32
  }
  func.func @transform_10(%arg0: i32) -> (i32, i32) {
    %c0_i32 = arith.constant 0 : i32
    %c0_i32_0 = arith.constant 0 : i32
    %c0_i32_1 = arith.constant 0 : i32
    return %c0_i32, %c0_i32_0 : i32, i32
  }
  func.func @transform_11(%arg0: i32) -> (i32, i32) {
    %c0_i32 = arith.constant 0 : i32
    %c0_i32_0 = arith.constant 0 : i32
    %c0_i32_1 = arith.constant 0 : i32
    return %c0_i32, %c0_i32_0 : i32, i32
  }
  func.func @transform_12(%arg0: i32) -> (i32, i32) {
    %c0_i32 = arith.constant 0 : i32
    %c0_i32_0 = arith.constant 0 : i32
    %c0_i32_1 = arith.constant 0 : i32
    return %c0_i32, %c0_i32_0 : i32, i32
  }
  func.func @transform_13(%arg0: i32) -> (i32, i32) {
    %c0_i32 = arith.constant 0 : i32
    %c0_i32_0 = arith.constant 0 : i32
    return %arg0, %c0_i32 : i32, i32
  }
}

</mosaic_0001>

<bundles_post_ra>
// kernel: lenet5_forward.1
= control target key start
LH: loop header
LB: loop body
LE: loop exit
PB: predicated region body
PF: predicated region fallthrough
CT: control target
= control target key end

     0   :  { %s20752_s0 = inlined_call_operand.vmem [shape: bf16[64,1152], index: 0, kind: input, shape index: {}]   ;;  %s20753_s1 = inlined_call_operand.vmem [shape: bf16[48,800], index: 1, kind: input, shape index: {}]   ;;  %s20754_s2 = inlined_call_operand.vmem [shape: f32[48,1], index: 2, kind: input, shape index: {}]   ;;  %s20755_s3 = inlined_call_operand.vmem [shape: bf16[896,256], index: 3, kind: input, shape index: {}]   ;;  %s20756_s4 = inlined_call_operand.vmem [shape: bf16[128,1200], index: 4, kind: input, shape index: {}]   ;;  %s20757_s5 = inlined_call_operand.vmem [shape: f32[128,1], index: 5, kind: input, shape index: {}]   ;;  %s20758_s6 = inlined_call_operand.vmem [shape: bf16[140,25], index: 6, kind: input, shape index: {}]   ;;  %s20759_s7 = inlined_call_operand.vmem [shape: bf16[16,25,120], index: 7, kind: input, shape index: {}]   ;;  %s20760_s8 = inlined_call_operand.vmem [shape: f32[1,120], index: 8, kind: input, shape index: {}]   ;;  %s20761_s9 = inlined_call_operand.vmem [shape: bf16[120,84], index: 9, kind: input, shape index: {}]   ;;  %s20762_s10 = inlined_call_operand.vmem [shape: f32[1,84], index: 10, kind: input, shape index: {}]   ;;  %s20763_s11 = inlined_call_operand.vmem [shape: bf16[84,10], index: 11, kind: input, shape index: {}]   ;;  %s20764_s12 = inlined_call_operand.vmem [shape: f32[1,10], index: 12, kind: input, shape index: {}]   ;;  %s20765_s13 = inlined_call_operand.hbm [shape: f32[16,10], index: 13, kind: output, shape index: {}]  }
   0x1   :  { %21218 = sst [smem:[#allocation87_spill]] %s20752_s0 }
   0x2   :  { %21219 = sst [smem:[#allocation88_spill]] %s20760_s8 }
   0x3   :  { %21220 = sst [smem:[#allocation89_spill]] %s20762_s10 }
   0x4   :  { %21221 = sst [smem:[#allocation90_spill]] %s20763_s11 }
   0x5   :  { %21222 = sst [smem:[#allocation91_spill]] %s20764_s12 }
   0x6   :  { %21223 = sst [smem:[#allocation92_spill]] %s20765_s13 }
   0x7   :  { %18 = vsyncpa [#allocation5], 0 }
   0x8   :  { %20 = vsyncpa [#allocation5 + $0x1], 0  ;;  %s14815_s25 = smov 0   ;;  %s14817_s26 = smov 0  }
   0x9   :  { %s14819_s27 = smov 0   ;;  %s14821_s28 = smov 0  }
   0xa LB: > { %21224 = sst [smem:[#allocation7_spill]] %s14688_s25  ;;  %s14836_s29 = sadd.s32 4294967295, %s14700_s28   ;;  %s14700_s28 = sphi %s14821_s28, %s21817_s28   ;;  %s14696_s27 = sphi %s14819_s27, %s21820_s27   ;;  %s14692_s26 = sphi %s14817_s26, %s21819_s26   ;;  %s14688_s25 = sphi %s14815_s25, %s21818_s25  }
   0xb   : > { %21225 = sst [smem:[#allocation8_spill]] %s14692_s26  ;;  %s12577_s30 = sadd.s32 4294967294, %s14700_s28  }
   0xc   : > { %21226 = sst [smem:[#allocation9_spill]] %s14696_s27  ;;  %s14840_s14 = sadd.s32 1, %s14700_s28  }
   0xd   : > { %21227 = sst [smem:[#allocation10_spill]] %s14700_s28  ;;  %s311_s15 = sadd.s32 1, %s14696_s27 }
   0xe   : > { %21228 = sst [smem:[#allocation11_spill]] %s14836_s29  ;;  %s308_s16 = ssub.s32 %s14700_s28, %s14840_s14 }
   0xf   : > { %21229 = sst [smem:[#allocation12_spill]] %s14840_s14  ;;  %p321_p0 = scmp.ne.s32.totalorder %s14696_s27, %s14692_s26 }
  0x10   : > { %p309_p1 = scmp.eq.s32.totalorder %s308_s16, 0  ;;  %p322_p2 = scmp.eq.s32.totalorder %s14836_s29, 1 }
  0x11   : > { %p327_p3 = scmp.ne.s32.totalorder %s14692_s26, %s14688_s25  ;;  %p328_p4 = scmp.eq.s32.totalorder %s12577_s30, 1 }
  0x12   : > { %s14851_s17 = scalar_select %p309_p1, %s14696_s27, %s311_s15  }
  0x13   : > { %p14853_p5 = por %p322_p2, %p321_p0  ;;  %p14857_p6 = por %p328_p4, %p327_p3 }
  0x14   : > { %21230 = sst [smem:[#allocation13_spill]] %s14851_s17  ;;  %p12580_p7 = scmp.ge.s32.totalorder %s14700_s28, 1 }
  0x15   : > { %s21231_s18 = scalar_select %p14853_p5, 1, 0 }
  0x16   : > { %s21233_s19 = scalar_select %p14857_p6, 1, 0 }
  0x17   : > { %21232 = sst [smem:[#allocation14_spill]] %s21231_s18  ;;  %p392_p8 = scmp.lt.s32.totalorder %s14700_s28, 3 }
  0x18   : > { %21234 = sst [smem:[#allocation15_spill]] %s21233_s19 }
  0x19   : > { %p393_p9 = pnand %p12580_p7, %p392_p8 }
  0x1b   : > { %396 = sbr.rel (%p393_p9) target bundleno = 2843 (0xb1b), region = 72 }
  0x20   : > { %s12582_s20 = sshll.u32 %s14836_s29, 2  ;;  %s21235_s0 = sld [smem:[#allocation87_spill]]  ;;  %vm21212_vm0 = vcmask 1043456   ;;  %vm1969_vm1 = vcmask 515072   ;;  %vm1828_vm2 = vcmask 523264   ;;  %vm841_vm3 = vcmask 1022976  }
  0x21   : > { %p438_p10 = scmp.lt.s32.totalorder %s12582_s20, 7  ;;  %s20779_s30 = smov 63   ;;  %vm1687_vm4 = vcmask 752640   ;;  %vm700_vm5 = vcmask 1031168   ;;  %vm1546_vm6 = vcmask 760832   ;;  %vm559_vm7 = vcmask 1039360  }
  0x22   : > { %s20774_s15 = smov 64   ;;  %s20932_s16 = smov 125   ;;  %vm20965_vm8 = vcmask 261120   ;;  %vm20948_vm9 = vcmask 490496   ;;  %vm1405_vm10 = vcmask 769024   ;;  %vm20925_vm11 = vcmask 498688  }
  0x23   : > { %s21822_s20 = smov (!%p438_p10, %s12582_s20), 7  ;;  %s20766_s22 = smov 93   ;;  %vm1264_vm12 = vcmask 777216   ;;  %vm20897_vm13 = vcmask 506880   ;;  %vm1123_vm14 = vcmask 785408   ;;  %vm982_vm15 = vcmask 1014784  }
  0x24   : > { %s13828_s21 = smul.u32 36, %s21822_s20  ;;  %s20768_s20 = smov 92  }
  0x25   : > { %s20956_s23 = smov 127   ;;  %s21289_s17 = smov 64  }
  0x26   : > { %s14867_s24 = scalar_lea.vmem %s21235_s0, %s13828_s21  ;;  %s20887_s21 = smov 126  }
  0x27   : > { %v14870_v0 = vld [vmem:[%s14867_s24 + $0x6c] sm:$0xff]  ;;  %v14880_v2 = vld [vmem:[%s14867_s24 + $0x74] sm:$0xff]  ;;  %v14889_v5 = vld [vmem:[%s14867_s24] sm:$0xff]  ;;  %s21294_s0 = smov 28   ;;  %s21302_s27 = smov 29  }
  0x28   : > { %v14873_v1 = vld [vmem:[%s14867_s24 + $0x48] sm:$0xff]  ;;  %1944 = vrot.lane.b32.xlu1 %v14870_v0, %s20779_s30  ;;  %v14883_v3 = vld [vmem:[%s14867_s24 + $0x50] sm:$0xff]  ;;  %v15006_v10 = vld [vmem:[%s14867_s24] sm:$0xff]  ;;  %s21303_s14 = smov 93   ;;  %s21309_s19 = smov 30  }
  0x29   : > { %1936 = vrot.lane.b32.xlu0 %v14873_v1, %s20779_s30  ;;  %v14886_v4 = vld [vmem:[%s14867_s24 + $0x8] sm:$0xff]  ;;  %461 = vst [vmem:[#allocation2] sm:$0xff] %v15006_v10  ;;  %s21312_s25 = smov 32   ;;  %s21314_s28 = smov 31  }
  0x2a   : > { %v14896_v6 = vld [vmem:[%s14867_s24 + $0x2c] sm:$0xff]  ;;  %v14899_v7 = vld [vmem:[%s14867_s24 + $0x24] sm:$0xff]  ;;  %s21317_s13 = smov 60   ;;  %s21322_s18 = smov 125  }
  0x2b   : > { %v14990_v8 = vld [vmem:[%s14867_s24 + $0x48] sm:$0xff]  ;;  %s21326_s12 = smov 61   ;;  %s21341_s10 = smov 62  }
  0x2c   : > { %1946 = vrot.lane.b32.xlu1 %v14880_v2, %s20779_s30  ;;  %469 = vst [vmem:[#allocation2 + $0x38] sm:$0xff] %v14990_v8  ;;  %v14998_v9 = vld [vmem:[%s14867_s24 + $0x6c] sm:$0xff]  ;;  %v15014_v11 = vld [vmem:[%s14867_s24 + $0x24] sm:$0xff]  ;;  %s21351_s8 = smov 127   ;;  %s14726_s11 = smov 112  }
  0x2d   : > { %1938 = vrot.lane.b32.xlu0 %v14883_v3, %s20779_s30  ;;  %473 = vst [vmem:[#allocation2 + $0x54] sm:$0xff] %v14998_v9  ;;  %465 = vst [vmem:[#allocation2 + $0x1c] sm:$0xff] %v15014_v11  ;;  %s14730_s26 = smov 100   ;;  %s14731_s29 = smov 86  }
  0x30   : > { %1922 = vrot.lane.b32.xlu1 %v14886_v4, %s20779_s30 }
  0x31   : > { %1920 = vrot.lane.b32.xlu0 %v14889_v5, %s20779_s30 }
  0x34   : > { %1930 = vrot.lane.b32.xlu1 %v14896_v6, %s20779_s30 }
  0x35   : > { %1928 = vrot.lane.b32.xlu0 %v14899_v7, %s20779_s30  ;;  %s20799_s30 = smov 96  }
  0x38   : > { %1797 = vrot.lane.b32.xlu1 %v14883_v3, %s20774_s15 }
  0x39   : > { %1795 = vrot.lane.b32.xlu0 %v14873_v1, %s20774_s15 }
  0x3c   : > { %1805 = vrot.lane.b32.xlu1 %v14880_v2, %s20774_s15 }
  0x3d   : > { %1803 = vrot.lane.b32.xlu0 %v14870_v0, %s20774_s15 }
  0x40   : > { %810 = vrot.lane.b32.xlu1 %v14883_v3, %s20932_s16 }
  0x41   : > { %808 = vrot.lane.b32.xlu0 %v14873_v1, %s20932_s16 }
  0x44   : > { %818 = vrot.lane.b32.xlu1 %v14880_v2, %s20932_s16 }
  0x45   : > { %816 = vrot.lane.b32.xlu0 %v14870_v0, %s20932_s16 }
  0x48   : > { %1781 = vrot.lane.b32.xlu1 %v14886_v4, %s20774_s15 }
  0x49   : > { %1779 = vrot.lane.b32.xlu0 %v14889_v5, %s20774_s15 }
  0x4c   : > { %1789 = vrot.lane.b32.xlu1 %v14896_v6, %s20774_s15 }
  0x4d   : > { %1787 = vrot.lane.b32.xlu0 %v14899_v7, %s20774_s15  ;;  %s20801_s15 = smov 95  }
  0x50   : > { %794 = vrot.lane.b32.xlu1 %v14886_v4, %s20932_s16 }
  0x51   : > { %792 = vrot.lane.b32.xlu0 %v14889_v5, %s20932_s16 }
  0x54   : > { %802 = vrot.lane.b32.xlu1 %v14896_v6, %s20932_s16 }
  0x55   : > { %800 = vrot.lane.b32.xlu0 %v14899_v7, %s20932_s16 }
  0x58   : > { %1656 = vrot.lane.b32.xlu1 %v14883_v3, %s20768_s20 }
  0x59   : > { %1654 = vrot.lane.b32.xlu0 %v14873_v1, %s20768_s20 }
  0x5c   : > { %1664 = vrot.lane.b32.xlu1 %v14880_v2, %s20768_s20 }
  0x5d   : > { %1662 = vrot.lane.b32.xlu0 %v14870_v0, %s20768_s20 }
  0x60   : > { %669 = vrot.lane.b32.xlu1 %v14883_v3, %s20887_s21 }
  0x61   : > { %667 = vrot.lane.b32.xlu0 %v14873_v1, %s20887_s21 }
  0x64   : > { %677 = vrot.lane.b32.xlu1 %v14880_v2, %s20887_s21 }
  0x65   : > { %675 = vrot.lane.b32.xlu0 %v14870_v0, %s20887_s21 }
  0x68   : > { %1640 = vrot.lane.b32.xlu1 %v14886_v4, %s20768_s20 }
  0x69   : > { %1638 = vrot.lane.b32.xlu0 %v14889_v5, %s20768_s20 }
  0x6c   : > { %1648 = vrot.lane.b32.xlu1 %v14896_v6, %s20768_s20 }
  0x6d   : > { %1646 = vrot.lane.b32.xlu0 %v14899_v7, %s20768_s20  ;;  %s20772_s20 = smov 60  }
  0x70   : > { %653 = vrot.lane.b32.xlu1 %v14886_v4, %s20887_s21 }
  0x71   : > { %651 = vrot.lane.b32.xlu0 %v14889_v5, %s20887_s21 }
  0x74   : > { %661 = vrot.lane.b32.xlu1 %v14896_v6, %s20887_s21 }
  0x75   : > { %659 = vrot.lane.b32.xlu0 %v14899_v7, %s20887_s21 }
  0x78   : > { %1515 = vrot.lane.b32.xlu1 %v14883_v3, %s20766_s22 }
  0x79   : > { %1513 = vrot.lane.b32.xlu0 %v14873_v1, %s20766_s22 }
  0x7c   : > { %1523 = vrot.lane.b32.xlu1 %v14880_v2, %s20766_s22 }
  0x7d   : > { %1521 = vrot.lane.b32.xlu0 %v14870_v0, %s20766_s22 }
  0x80   : > { %527 = vrot.lane.b32.xlu1 %v14883_v3, %s20956_s23 }
  0x81   : > { %525 = vrot.lane.b32.xlu0 %v14873_v1, %s20956_s23 }
  0x84   : > { %535 = vrot.lane.b32.xlu1 %v14880_v2, %s20956_s23 }
  0x85   : > { %533 = vrot.lane.b32.xlu0 %v14870_v0, %s20956_s23 }
  0x88   : > { %1499 = vrot.lane.b32.xlu1 %v14886_v4, %s20766_s22 }
  0x89   : > { %1497 = vrot.lane.b32.xlu0 %v14889_v5, %s20766_s22 }
  0x8c   : > { %1507 = vrot.lane.b32.xlu1 %v14896_v6, %s20766_s22 }
  0x8d   : > { %1505 = vrot.lane.b32.xlu0 %v14899_v7, %s20766_s22  ;;  %s20770_s22 = smov 32  }
  0x90   : > { %511 = vrot.lane.b32.xlu1 %v14886_v4, %s20956_s23 }
  0x91   : > { %509 = vrot.lane.b32.xlu0 %v14889_v5, %s20956_s23 }
  0x94   : > { %519 = vrot.lane.b32.xlu1 %v14896_v6, %s20956_s23 }
  0x95   : > { %517 = vrot.lane.b32.xlu0 %v14899_v7, %s20956_s23 }
  0x98   : > { %2502 = vrot.lane.b32.xlu1 %v14883_v3, %s20770_s22 }
  0x99   : > { %2500 = vrot.lane.b32.xlu0 %v14873_v1, %s20770_s22 }
  0x9a   : > { %v1945_v12 = vpop.permute.xlu1 %1944 }
  0x9b   : > { %v1937_v13 = vpop.permute.xlu0 %1936  ;;  %v1964_v16 = vrot.slane %v1945_v12, 4 }
  0x9c   : > { %2510 = vrot.lane.b32.xlu1 %v14880_v2, %s20770_s22  ;;  %v1960_v17 = vrot.slane %v1937_v13, 4 }
  0x9d   : > { %2508 = vrot.lane.b32.xlu0 %v14870_v0, %s20770_s22 }
  0x9e   : > { %v15029_v14 = vpop.permute.xlu1 %1946 }
  0x9f   : > { %v15031_v15 = vpop.permute.xlu0 %1938  ;;  %v20798_v18 = vrot.slane %v15029_v14, 4 }
  0xa0   : > { %v20797_v19 = vrot.slane %v15031_v15, 4  ;;  %2486 = vrot.lane.b32.xlu1 %v14886_v4, %s20770_s22 }
  0xa1   : > { %2484 = vrot.lane.b32.xlu0 %v14889_v5, %s20770_s22  ;;  %v1990_v20 = vsel %vm21212_vm0, %v1964_v16, %v20798_v18 }
  0xa2   : > { %v1983_v21 = vsel %vm21212_vm0, %v1960_v17, %v20797_v19  ;;  %v1991_v22 = vsel %vm1969_vm1, %v1945_v12, %v1990_v20  ;;  %v15047_v24 = vpop.permute.xlu1 %1922 }
  0xa3   : > { %v1984_v23 = vsel %vm1969_vm1, %v1937_v13, %v1983_v21  ;;  %v1921_v25 = vpop.permute.xlu0 %1920  ;;  %v20794_v26 = vrot.slane %v15047_v24, 4 }
  0xa4   : > { %v1952_v27 = vrot.slane %v1921_v25, 4  ;;  %v12767_v28 = vcombine.high %v1984_v23, %v1991_v22  ;;  %v12766_v29 = vcombine.low %v1984_v23, %v1991_v22  ;;  %2494 = vrot.lane.b32.xlu1 %v14896_v6, %s20770_s22 }
  0xa5   : > { %2492 = vrot.lane.b32.xlu0 %v14899_v7, %s20770_s22  ;;  %s20809_s22 = smov 94  }
  0xa6   : > { %v1968_v30 = vsel %vm21212_vm0, %v1952_v27, %v20794_v26  ;;  %6151 = vmatprep.subr.bf16.mxu1 %v12767_v28  ;;  %v15058_v32 = vpop.permute.xlu1 %1930  ;;  %v12606_v26 = vcombine.high %v15006_v10, %v15014_v11 }
  0xa7   : > { %v1970_v31 = vsel %vm1969_vm1, %v1921_v25, %v1968_v30  ;;  %v1929_v33 = vpop.permute.xlu0 %1928  ;;  %6152 = vmatpush1.bf16.msra.mxu1 %v12766_v29  ;;  %v20796_v34 = vrot.slane %v15058_v32, 4 }
  0xa8   : > { %v1956_v35 = vrot.slane %v1929_v33, 4  ;;  %2361 = vrot.lane.b32.xlu1 %v14883_v3, %s20772_s20 }
  0xa9   : > { %2359 = vrot.lane.b32.xlu0 %v14873_v1, %s20772_s20 }
  0xaa   : > { %v1976_v36 = vsel %vm21212_vm0, %v1956_v35, %v20796_v34  ;;  %v15069_v38 = vpop.permute.xlu1 %1797 }
  0xab   : > { %v1977_v37 = vsel %vm1969_vm1, %v1929_v33, %v1976_v36  ;;  %v1796_v39 = vpop.permute.xlu0 %1795  ;;  %v20792_v40 = vrot.slane %v15069_v38, 4 }
  0xac   : > { %v1819_v41 = vrot.slane %v1796_v39, 4  ;;  %v12760_v42 = vcombine.high %v1970_v31, %v1977_v37  ;;  %v12759_v43 = vcombine.low %v1970_v31, %v1977_v37  ;;  %2369 = vrot.lane.b32.xlu1 %v14880_v2, %s20772_s20 }
  0xad   : > { %2367 = vrot.lane.b32.xlu0 %v14870_v0, %s20772_s20 }
  0xae   : > { %v1842_v44 = vsel %vm21212_vm0, %v1819_v41, %v20792_v40  ;;  %6153 = vmatprep.subr.bf16.mxu1 %v12760_v42  ;;  %v15080_v46 = vpop.permute.xlu1 %1805 }
  0xaf   : > { %v1843_v45 = vsel %vm1828_vm2, %v1796_v39, %v1842_v44  ;;  %v1804_v47 = vpop.permute.xlu0 %1803  ;;  %6154 = vmatpush1.bf16.msra.mxu1 %v12759_v43  ;;  %v20793_v48 = vrot.slane %v15080_v46, 4 }
  0xb0   : > { %v1823_v49 = vrot.slane %v1804_v47, 4  ;;  %1374 = vrot.lane.b32.xlu1 %v14883_v3, %s20809_s22 }
  0xb1   : > { %1372 = vrot.lane.b32.xlu0 %v14873_v1, %s20809_s22 }
  0xb2   : > { %v1849_v50 = vsel %vm21212_vm0, %v1823_v49, %v20793_v48  ;;  %v15091_v52 = vpop.permute.xlu1 %810 }
  0xb3   : > { %v1850_v51 = vsel %vm1828_vm2, %v1804_v47, %v1849_v50  ;;  %v809_v53 = vpop.permute.xlu0 %808  ;;  %v20825_v54 = vrot.slane %v15091_v52, 4 }
  0xb4   : > { %v832_v55 = vrot.slane %v809_v53, 4  ;;  %v12753_v56 = vcombine.high %v1843_v45, %v1850_v51  ;;  %v12752_v57 = vcombine.low %v1843_v45, %v1850_v51  ;;  %1382 = vrot.lane.b32.xlu1 %v14880_v2, %s20809_s22 }
  0xb5   : > { %1380 = vrot.lane.b32.xlu0 %v14870_v0, %s20809_s22 }
  0xb6   : > { %v855_v58 = vsel %vm21212_vm0, %v832_v55, %v20825_v54  ;;  %6155 = vmatprep.subr.bf16.mxu1 %v12753_v56  ;;  %v15102_v60 = vpop.permute.xlu1 %818  ;;  %v15164_v55 = vld [vmem:[%s14867_s24 + $0x74] sm:$0xff]  ;;  %v15169_v56 = vld [vmem:[%s14867_s24 + $0x6c] sm:$0xff] }
  0xb7   : > { %v856_v59 = vsel %vm841_vm3, %v809_v53, %v855_v58  ;;  %v817_v61 = vpop.permute.xlu0 %816  ;;  %6156 = vmatpush1.bf16.msra.mxu1 %v12752_v57  ;;  %v20826_v62 = vrot.slane %v15102_v60, 4 }
  0xb8   : > { %v836_v63 = vrot.slane %v817_v61, 4  ;;  %2345 = vrot.lane.b32.xlu1 %v14886_v4, %s20772_s20 }
  0xb9   : > { %2343 = vrot.lane.b32.xlu0 %v14889_v5, %s20772_s20 }
  0xba   : > { %v862_v0 = vsel %vm21212_vm0, %v836_v63, %v20826_v62  ;;  %v15113_v2 = vpop.permute.xlu1 %1781 }
  0xbb   : > { %v863_v1 = vsel %vm841_vm3, %v817_v61, %v862_v0  ;;  %21236 = vst [vmem:[#allocation16_spill] sm:$0xff] %v15113_v2  ;;  %v1780_v12 = vpop.permute.xlu0 %1779  ;;  %v20787_v13 = vrot.slane %v15113_v2, 4 }
  0xbc   : > { %v1811_v16 = vrot.slane %v1780_v12, 4  ;;  %v12655_v17 = vcombine.high %v856_v59, %v863_v1  ;;  %v12654_v20 = vcombine.low %v856_v59, %v863_v1  ;;  %2353 = vrot.lane.b32.xlu1 %v14896_v6, %s20772_s20  ;;  %v15181_v1 = vld [vmem:[%s14867_s24 + $0x50] sm:$0xff] }
  0xbd   : > { %2351 = vrot.lane.b32.xlu0 %v14899_v7, %s20772_s20  ;;  %s20776_s20 = smov 61  }
  0xbe   : > { %v1827_v21 = vsel %vm21212_vm0, %v1811_v16, %v20787_v13  ;;  %6088 = vmatprep.subr.bf16.mxu0 %v12655_v17  ;;  %v15124_v23 = vpop.permute.xlu1 %1789 }
  0xbf   : > { %v1829_v22 = vsel %vm1828_vm2, %v1780_v12, %v1827_v21  ;;  %21237 = vst [vmem:[#allocation17_spill] sm:$0xff] %v15124_v23  ;;  %v1788_v25 = vpop.permute.xlu0 %1787  ;;  %6089 = vmatpush1.bf16.msra.mxu0 %v12654_v20  ;;  %v20791_v27 = vrot.slane %v15124_v23, 4 }
  0xc0   : > { %v1815_v28 = vrot.slane %v1788_v25, 4  ;;  %1358 = vrot.lane.b32.xlu1 %v14886_v4, %s20809_s22 }
  0xc1   : > { %1356 = vrot.lane.b32.xlu0 %v14889_v5, %s20809_s22 }
  0xc2   : > { %v1835_v29 = vsel %vm21212_vm0, %v1815_v28, %v20791_v27  ;;  %v15135_v31 = vpop.permute.xlu1 %794 }
  0xc3   : > { %v1836_v30 = vsel %vm1828_vm2, %v1788_v25, %v1835_v29  ;;  %v793_v33 = vpop.permute.xlu0 %792  ;;  %v20822_v35 = vrot.slane %v15135_v31, 4 }
  0xc4   : > { %v824_v36 = vrot.slane %v793_v33, 4  ;;  %v12746_v37 = vcombine.high %v1829_v22, %v1836_v30  ;;  %v12745_v39 = vcombine.low %v1829_v22, %v1836_v30  ;;  %1366 = vrot.lane.b32.xlu1 %v14896_v6, %s20809_s22  ;;  %v15152_v6 = vld [vmem:[%s14867_s24 + $0x48] sm:$0xff] }
  0xc5   : > { %1364 = vrot.lane.b32.xlu0 %v14899_v7, %s20809_s22  ;;  %s20881_s22 = smov 29  }
  0xc6   : > { %v840_v4 = vsel %vm21212_vm0, %v824_v36, %v20822_v35  ;;  %6157 = vmatprep.subr.bf16.mxu1 %v12746_v37  ;;  %v15146_v41 = vpop.permute.xlu1 %802 }
  0xc7   : > { %v842_v5 = vsel %vm841_vm3, %v793_v33, %v840_v4  ;;  %v801_v42 = vpop.permute.xlu0 %800  ;;  %6158 = vmatpush1.bf16.msra.mxu1 %v12745_v39  ;;  %v20824_v43 = vrot.slane %v15146_v41, 4  ;;  %v15206_v4 = vld [vmem:[%s14867_s24 + $0x8] sm:$0xff] }
  0xc8   : > { %v828_v44 = vrot.slane %v801_v42, 4  ;;  %2220 = vrot.lane.b32.xlu1 %v14883_v3, %s20776_s20 }
  0xc9   : > { %2218 = vrot.lane.b32.xlu0 %v15152_v6, %s20776_s20 }
  0xca   : > { %v848_v7 = vsel %vm21212_vm0, %v828_v44, %v20824_v43  ;;  %v15160_v47 = vpop.permute.xlu1 %1656 }
  0xcb   : > { %v849_v45 = vsel %vm841_vm3, %v801_v42, %v848_v7  ;;  %21238 = vst [vmem:[#allocation18_spill] sm:$0xff] %v15160_v47  ;;  %v1655_v49 = vpop.permute.xlu0 %1654  ;;  %v20784_v50 = vrot.slane %v15160_v47, 4 }
  0xcc   : > { %v1678_v51 = vrot.slane %v1655_v49, 4  ;;  %v12648_v3 = vcombine.high %v842_v5, %v849_v45  ;;  %v12647_v53 = vcombine.low %v842_v5, %v849_v45  ;;  %2228 = vrot.lane.b32.xlu1 %v15164_v55, %s20776_s20  ;;  %v15211_v5 = vld [vmem:[%s14867_s24] sm:$0xff] }
  0xcd   : > { %2226 = vrot.lane.b32.xlu0 %v15169_v56, %s20776_s20 }
  0xce   : > { %v1701_v57 = vsel %vm21212_vm0, %v1678_v51, %v20784_v50  ;;  %6090 = vmatprep.subr.bf16.mxu0 %v12648_v3  ;;  %v15177_v59 = vpop.permute.xlu1 %1664 }
  0xcf   : > { %v1702_v58 = vsel %vm1687_vm4, %v1655_v49, %v1701_v57  ;;  %21239 = vst [vmem:[#allocation19_spill] sm:$0xff] %v15177_v59  ;;  %v1663_v61 = vpop.permute.xlu0 %1662  ;;  %6091 = vmatpush1.bf16.msra.mxu0 %v12647_v53  ;;  %v20785_v63 = vrot.slane %v15177_v59, 4  ;;  %v15223_v57 = vld [vmem:[%s14867_s24 + $0x2c] sm:$0xff] }
  0xd0   : > { %v1682_v0 = vrot.slane %v1663_v61, 4  ;;  %1233 = vrot.lane.b32.xlu1 %v15181_v1, %s20801_s15 }
  0xd1   : > { %1231 = vrot.lane.b32.xlu0 %v15152_v6, %s20801_s15 }
  0xd2   : > { %v1708_v12 = vsel %vm21212_vm0, %v1682_v0, %v20785_v63  ;;  %v15191_v17 = vpop.permute.xlu1 %669 }
  0xd3   : > { %v1709_v16 = vsel %vm1687_vm4, %v1663_v61, %v1708_v12  ;;  %v668_v20 = vpop.permute.xlu0 %667  ;;  %v20818_v21 = vrot.slane %v15191_v17, 4 }
  0xd4   : > { %v691_v22 = vrot.slane %v668_v20, 4  ;;  %v12739_v25 = vcombine.high %v1702_v58, %v1709_v16  ;;  %v12738_v28 = vcombine.low %v1702_v58, %v1709_v16  ;;  %1241 = vrot.lane.b32.xlu1 %v15164_v55, %s20801_s15  ;;  %v15228_v58 = vld [vmem:[%s14867_s24 + $0x24] sm:$0xff] }
  0xd5   : > { %1239 = vrot.lane.b32.xlu0 %v15169_v56, %s20801_s15 }
  0xd6   : > { %v714_v29 = vsel %vm21212_vm0, %v691_v22, %v20818_v21  ;;  %6159 = vmatprep.subr.bf16.mxu1 %v12739_v25  ;;  %v15202_v33 = vpop.permute.xlu1 %677 }
  0xd7   : > { %v715_v30 = vsel %vm700_vm5, %v668_v20, %v714_v29  ;;  %v676_v36 = vpop.permute.xlu0 %675  ;;  %6160 = vmatpush1.bf16.msra.mxu1 %v12738_v28  ;;  %v20820_v37 = vrot.slane %v15202_v33, 4 }
  0xd8   : > { %v695_v39 = vrot.slane %v676_v36, 4  ;;  %2204 = vrot.lane.b32.xlu1 %v15206_v4, %s20776_s20 }
  0xd9   : > { %2202 = vrot.lane.b32.xlu0 %v15211_v5, %s20776_s20 }
  0xda   : > { %v721_v42 = vsel %vm21212_vm0, %v695_v39, %v20820_v37  ;;  %v15219_v7 = vpop.permute.xlu1 %1640 }
  0xdb   : > { %v722_v44 = vsel %vm700_vm5, %v676_v36, %v721_v42  ;;  %21240 = vst [vmem:[#allocation20_spill] sm:$0xff] %v15219_v7  ;;  %v1639_v45 = vpop.permute.xlu0 %1638  ;;  %v20778_v49 = vrot.slane %v15219_v7, 4 }
  0xdc   : > { %v1670_v51 = vrot.slane %v1639_v45, 4  ;;  %v12641_v3 = vcombine.high %v715_v30, %v722_v44  ;;  %v12640_v53 = vcombine.low %v715_v30, %v722_v44  ;;  %2212 = vrot.lane.b32.xlu1 %v15223_v57, %s20776_s20 }
  0xdd   : > { %2210 = vrot.lane.b32.xlu0 %v15228_v58, %s20776_s20  ;;  %s20788_s20 = smov 62  }
  0xde   : > { %v1686_v61 = vsel %vm21212_vm0, %v1670_v51, %v20778_v49  ;;  %6092 = vmatprep.subr.bf16.mxu0 %v12641_v3  ;;  %v15236_v12 = vpop.permute.xlu1 %1648 }
  0xdf   : > { %v1688_v0 = vsel %vm1687_vm4, %v1639_v45, %v1686_v61  ;;  %21241 = vst [vmem:[#allocation21_spill] sm:$0xff] %v15236_v12  ;;  %v1647_v16 = vpop.permute.xlu0 %1646  ;;  %6093 = vmatpush1.bf16.msra.mxu0 %v12640_v53  ;;  %v20782_v20 = vrot.slane %v15236_v12, 4 }
  0xe0   : > { %v1674_v22 = vrot.slane %v1647_v16, 4  ;;  %1217 = vrot.lane.b32.xlu1 %v15206_v4, %s20801_s15 }
  0xe1   : > { %1215 = vrot.lane.b32.xlu0 %v15211_v5, %s20801_s15 }
  0xe2   : > { %v1694_v25 = vsel %vm21212_vm0, %v1674_v22, %v20782_v20  ;;  %v15247_v29 = vpop.permute.xlu1 %653 }
  0xe3   : > { %v1695_v28 = vsel %vm1687_vm4, %v1647_v16, %v1694_v25  ;;  %v652_v30 = vpop.permute.xlu0 %651  ;;  %v20815_v36 = vrot.slane %v15247_v29, 4 }
  0xe4   : > { %v683_v39 = vrot.slane %v652_v30, 4  ;;  %v12732_v42 = vcombine.high %v1688_v0, %v1695_v28  ;;  %v12731_v44 = vcombine.low %v1688_v0, %v1695_v28  ;;  %1225 = vrot.lane.b32.xlu1 %v15223_v57, %s20801_s15 }
  0xe5   : > { %1223 = vrot.lane.b32.xlu0 %v15228_v58, %s20801_s15  ;;  %s20875_s15 = smov 30  }
  0xe6   : > { %v699_v45 = vsel %vm21212_vm0, %v683_v39, %v20815_v36  ;;  %6161 = vmatprep.subr.bf16.mxu1 %v12732_v42  ;;  %v15258_v3 = vpop.permute.xlu1 %661 }
  0xe7   : > { %v701_v51 = vsel %vm700_vm5, %v652_v30, %v699_v45  ;;  %v660_v53 = vpop.permute.xlu0 %659  ;;  %6162 = vmatpush1.bf16.msra.mxu1 %v12731_v44  ;;  %v20816_v61 = vrot.slane %v15258_v3, 4 }
  0xe8   : > { %v687_v0 = vrot.slane %v660_v53, 4  ;;  %2079 = vrot.lane.b32.xlu1 %v15181_v1, %s20788_s20 }
  0xe9   : > { %2077 = vrot.lane.b32.xlu0 %v15152_v6, %s20788_s20 }
  0xea   : > { %v707_v16 = vsel %vm21212_vm0, %v687_v0, %v20816_v61  ;;  %v15269_v25 = vpop.permute.xlu1 %1515 }
  0xeb   : > { %v708_v22 = vsel %vm700_vm5, %v660_v53, %v707_v16  ;;  %21242 = vst [vmem:[#allocation22_spill] sm:$0xff] %v15269_v25  ;;  %v1514_v28 = vpop.permute.xlu0 %1513  ;;  %v20781_v30 = vrot.slane %v15269_v25, 4 }
  0xec   : > { %v1537_v39 = vrot.slane %v1514_v28, 4  ;;  %v12634_v42 = vcombine.high %v701_v51, %v708_v22  ;;  %v12633_v44 = vcombine.low %v701_v51, %v708_v22  ;;  %2087 = vrot.lane.b32.xlu1 %v15164_v55, %s20788_s20 }
  0xed   : > { %2085 = vrot.lane.b32.xlu0 %v15169_v56, %s20788_s20 }
  0xee   : > { %v1560_v45 = vsel %vm21212_vm0, %v1537_v39, %v20781_v30  ;;  %6094 = vmatprep.subr.bf16.mxu0 %v12634_v42  ;;  %v15280_v0 = vpop.permute.xlu1 %1523 }
  0xef   : > { %v1561_v53 = vsel %vm1546_vm6, %v1514_v28, %v1560_v45  ;;  %21243 = vst [vmem:[#allocation23_spill] sm:$0xff] %v15280_v0  ;;  %v1522_v16 = vpop.permute.xlu0 %1521  ;;  %6095 = vmatpush1.bf16.msra.mxu0 %v12633_v44  ;;  %v20783_v49 = vrot.slane %v15280_v0, 4 }
  0xf0   : > { %v1541_v51 = vrot.slane %v1522_v16, 4  ;;  %1092 = vrot.lane.b32.xlu1 %v15181_v1, %s20799_s30 }
  0xf1   : > { %1090 = vrot.lane.b32.xlu0 %v15152_v6, %s20799_s30 }
  0xf2   : > { %v1567_v22 = vsel %vm21212_vm0, %v1541_v51, %v20783_v49  ;;  %v15291_v39 = vpop.permute.xlu1 %527 }
  0xf3   : > { %v1568_v28 = vsel %vm1546_vm6, %v1522_v16, %v1567_v22  ;;  %v526_v42 = vpop.permute.xlu0 %525  ;;  %v20811_v44 = vrot.slane %v15291_v39, 4 }
  0xf4   : > { %v549_v45 = vrot.slane %v526_v42, 4  ;;  %v12725_v30 = vcombine.high %v1561_v53, %v1568_v28  ;;  %v12724_v20 = vcombine.low %v1561_v53, %v1568_v28  ;;  %1100 = vrot.lane.b32.xlu1 %v15164_v55, %s20799_s30 }
  0xf5   : > { %1098 = vrot.lane.b32.xlu0 %v15169_v56, %s20799_s30 }
  0xf6   : > { %v573_v6 = vsel %vm21212_vm0, %v549_v45, %v20811_v44  ;;  %6163 = vmatprep.subr.bf16.mxu1 %v12725_v30  ;;  %v15302_v51 = vpop.permute.xlu1 %535  ;;  %v13919_v44 = vld [vmem:[%s20753_s1 + $0xc] ss:$28 sps:$4 sm:$0xff]  }
  0xf7   : > { %v574_v16 = vsel %vm559_vm7, %v526_v42, %v573_v6  ;;  %v534_v22 = vpop.permute.xlu0 %533  ;;  %6164 = vmatpush1.bf16.msra.mxu1 %v12724_v20  ;;  %v20814_v49 = vrot.slane %v15302_v51, 4  ;;  %6183 = vmatprep.mubr.bf16.mxu1 %v13919_v44  ;;  %v15477_v44 = vld [vmem:[%s14867_s24 + $0x78] sm:$0xff] }
  0xf8   : > { %v553_v53 = vrot.slane %v534_v22, 4  ;;  %2063 = vrot.lane.b32.xlu1 %v15206_v4, %s20788_s20 }
  0xf9   : > { %2061 = vrot.lane.b32.xlu0 %v15211_v5, %s20788_s20 }
  0xfa   : > { %v580_v55 = vsel %vm21212_vm0, %v553_v53, %v20814_v49  ;;  %v15313_v30 = vpop.permute.xlu1 %1499 }
  0xfb   : > { %v581_v56 = vsel %vm559_vm7, %v534_v22, %v580_v55  ;;  %21244 = vst [vmem:[#allocation24_spill] sm:$0xff] %v15313_v30  ;;  %v1498_v28 = vpop.permute.xlu0 %1497  ;;  %v20786_v20 = vrot.slane %v15313_v30, 4 }
  0xfc   : > { %v1529_v42 = vrot.slane %v1498_v28, 4  ;;  %v12627_v45 = vcombine.high %v574_v16, %v581_v56  ;;  %v12626_v6 = vcombine.low %v574_v16, %v581_v56  ;;  %2071 = vrot.lane.b32.xlu1 %v15223_v57, %s20788_s20 }
  0xfd   : > { %2069 = vrot.lane.b32.xlu0 %v15228_v58, %s20788_s20  ;;  %s20885_s20 = smov 124  }
  0xfe   : > { %v1545_v53 = vsel %vm21212_vm0, %v1529_v42, %v20786_v20  ;;  %6096 = vmatprep.subr.bf16.mxu0 %v12627_v45  ;;  %v15324_v55 = vpop.permute.xlu1 %1507 }
  0xff   : > { %v1547_v22 = vsel %vm1546_vm6, %v1498_v28, %v1545_v53  ;;  %21245 = vst [vmem:[#allocation25_spill] sm:$0xff] %v15324_v55  ;;  %v1506_v50 = vpop.permute.xlu0 %1505  ;;  %6097 = vmatpush1.bf16.msra.mxu0 %v12626_v6  ;;  %v20790_v63 = vrot.slane %v15324_v55, 4 }
 0x100   : > { %v1533_v16 = vrot.slane %v1506_v50, 4  ;;  %1076 = vrot.lane.b32.xlu1 %v15206_v4, %s20799_s30 }
 0x101   : > { %1074 = vrot.lane.b32.xlu0 %v15211_v5, %s20799_s30 }
 0x102   : > { %v1553_v56 = vsel %vm21212_vm0, %v1533_v16, %v20790_v63  ;;  %v15335_v28 = vpop.permute.xlu1 %511 }
 0x103   : > { %v1554_v42 = vsel %vm1546_vm6, %v1506_v50, %v1553_v56  ;;  %v510_v45 = vpop.permute.xlu0 %509  ;;  %v20806_v6 = vrot.slane %v15335_v28, 4 }
 0x104   : > { %v541_v53 = vrot.slane %v510_v45, 4  ;;  %v12718_v20 = vcombine.high %v1547_v22, %v1554_v42  ;;  %v12717_v13 = vcombine.low %v1547_v22, %v1554_v42  ;;  %1084 = vrot.lane.b32.xlu1 %v15223_v57, %s20799_s30 }
 0x105   : > { %1082 = vrot.lane.b32.xlu0 %v15228_v58, %s20799_s30  ;;  %v15357_v58 = vld [vmem:[%s14867_s24 + $0x74] sm:$0xff]  ;;  %s20883_s30 = smov 28  }
 0x106   : > { %v558_v4 = vsel %vm21212_vm0, %v541_v53, %v20806_v6  ;;  %6165 = vmatprep.subr.bf16.mxu1 %v12718_v20  ;;  %v15346_v5 = vpop.permute.xlu1 %519 }
 0x107   : > { %v560_v50 = vsel %vm559_vm7, %v510_v45, %v558_v4  ;;  %v518_v16 = vpop.permute.xlu0 %517  ;;  %6166 = vmatpush1.bf16.msra.mxu1 %v12717_v13  ;;  %v20808_v56 = vrot.slane %v15346_v5, 4  ;;  %v12613_v45 = vcombine.high %v14990_v8, %v14998_v9 }
 0x108   : > { %v545_v22 = vrot.slane %v518_v16, 4  ;;  %951 = vrot.lane.b32.xlu1 %v15181_v1, %s20885_s20 }
 0x109   : > { %949 = vrot.lane.b32.xlu0 %v14990_v8, %s20885_s20 }
 0x10a   : > { %v566_v57 = vsel %vm21212_vm0, %v545_v22, %v20808_v56  ;;  %v15360_v13 = vpop.permute.xlu1 %2502  ;;  %v15373_v22 = vld [vmem:[%s14867_s24 + $0x8] sm:$0xff] }
 0x10b   : > { %v567_v20 = vsel %vm559_vm7, %v518_v16, %v566_v57  ;;  %21246 = vst [vmem:[#allocation26_spill] sm:$0xff] %v15360_v13  ;;  %v2501_v42 = vpop.permute.xlu0 %2500  ;;  %v20795_v1 = vrot.slane %v15360_v13, 4  ;;  %v15600_v13 = vld [vmem:[#allocation2 + $0x38] sm:$0xff] }
 0x10c   : > { %v2524_v53 = vrot.slane %v2501_v42, 4  ;;  %v12620_v4 = vcombine.high %v560_v50, %v567_v20  ;;  %v12619_v63 = vcombine.low %v560_v50, %v567_v20  ;;  %959 = vrot.lane.b32.xlu1 %v15357_v58, %s20885_s20  ;;  %v12612_v50 = vcombine.low %v14990_v8, %v14998_v9 }
 0x10d   : > { %957 = vrot.lane.b32.xlu0 %v14998_v9, %s20885_s20 }
 0x10e   : > { %v2547_v16 = vsel %vm21212_vm0, %v2524_v53, %v20795_v1  ;;  %6098 = vmatprep.subr.bf16.mxu0 %v12620_v4  ;;  %v15376_v27 = vpop.permute.xlu1 %2510 }
 0x10f   : > { %v2548_v57 = vsel %vm20965_vm8, %v2501_v42, %v2547_v16  ;;  %21247 = vst [vmem:[#allocation27_spill] sm:$0xff] %v15376_v27  ;;  %v2509_v40 = vpop.permute.xlu0 %2508  ;;  %6099 = vmatpush1.bf16.msra.mxu0 %v12619_v63  ;;  %v20803_v20 = vrot.slane %v15376_v27, 4  ;;  %v15391_v42 = vld [vmem:[%s14867_s24 + $0x2c] sm:$0xff]  ;;  %v12605_v16 = vcombine.low %v15006_v10, %v15014_v11  ;;  %v15613_v27 = vld [vmem:[#allocation2 + $0x54] sm:$0xff] }
 0x110   : > { %v2528_v48 = vrot.slane %v2509_v40, 4  ;;  %6100 = vmatprep.subr.bf16.mxu0 %v12613_v45  ;;  %935 = vrot.lane.b32.xlu1 %v15373_v22, %s20885_s20 }
 0x111   : > { %933 = vrot.lane.b32.xlu0 %v15006_v10, %s20885_s20 }
 0x112   : > { %v2554_v63 = vsel %vm21212_vm0, %v2528_v48, %v20803_v20  ;;  %v15394_v4 = vpop.permute.xlu1 %2486  ;;  %v13916_v48 = vld [vmem:[%s20753_s1 + $0x4] ss:$28 sps:$4 sm:$0xff]  }
 0x113   : > { %v2555_v53 = vsel %vm20965_vm8, %v2509_v40, %v2554_v63  ;;  %21248 = vst [vmem:[#allocation28_spill] sm:$0xff] %v15394_v4  ;;  %v2485_v45 = vpop.permute.xlu0 %2484  ;;  %6101 = vmatpush1.bf16.msra.mxu0 %v12612_v50  ;;  %v20804_v1 = vrot.slane %v15394_v4, 4  ;;  %v15410_v50 = vld [vmem:[%s14867_s24 + $0x50] sm:$0xff]  ;;  %6120 = vmatprep.mubr.bf16.mxu0 %v13916_v48 }
 0x114   : > { %v2516_v34 = vrot.slane %v2485_v45, 4  ;;  %v12823_v19 = vcombine.high %v2548_v57, %v2555_v53  ;;  %v12822_v18 = vcombine.low %v2548_v57, %v2555_v53  ;;  %6102 = vmatprep.subr.bf16.mxu0 %v12606_v26  ;;  %943 = vrot.lane.b32.xlu1 %v15391_v42, %s20885_s20 }
 0x115   : > { %941 = vrot.lane.b32.xlu0 %v15014_v11, %s20885_s20 }
 0x116   : > { %v2532_v40 = vsel %vm21212_vm0, %v2516_v34, %v20804_v1  ;;  %6167 = vmatprep.subr.bf16.mxu1 %v12823_v19  ;;  %v15413_v57 = vpop.permute.xlu1 %2494 }
 0x117   : > { %v2534_v26 = vsel %vm20965_vm8, %v2485_v45, %v2532_v40  ;;  %21249 = vst [vmem:[#allocation29_spill] sm:$0xff] %v15413_v57  ;;  %v2493_v63 = vpop.permute.xlu0 %2492  ;;  %6168 = vmatpush2.bf16.msra.mxu1 %v12822_v18  ;;  %6103 = vmatpush1.bf16.msra.mxu0 %v12605_v16  ;;  %v20805_v53 = vrot.slane %v15413_v57, 4 }
 0x118   : > { %v2520_v20 = vrot.slane %v2493_v63, 4  ;;  %3066 = vrot.lane.b32.xlu1 %v15410_v50, %s20883_s30 }
 0x119   : > { %3064 = vrot.lane.b32.xlu0 %v14990_v8, %s20883_s30 }
 0x11a   : > { %v2540_v19 = vsel %vm21212_vm0, %v2520_v20, %v20805_v53  ;;  %v15424_v45 = vpop.permute.xlu1 %2361 }
 0x11b   : > { %v2541_v34 = vsel %vm20965_vm8, %v2493_v63, %v2540_v19  ;;  %21250 = vst [vmem:[#allocation30_spill] sm:$0xff] %v15424_v45  ;;  %v2360_v18 = vpop.permute.xlu0 %2359  ;;  %v20807_v16 = vrot.slane %v15424_v45, 4 }
 0x11c   : > { %v2383_v48 = vrot.slane %v2360_v18, 4  ;;  %v12816_v40 = vcombine.high %v2534_v26, %v2541_v34  ;;  %v12815_v1 = vcombine.low %v2534_v26, %v2541_v34  ;;  %3074 = vrot.lane.b32.xlu1 %v15357_v58, %s20883_s30 }
 0x11d   : > { %3072 = vrot.lane.b32.xlu0 %v14998_v9, %s20883_s30 }
 0x11e   : > { %v2406_v20 = vsel %vm21212_vm0, %v2383_v48, %v20807_v16  ;;  %6169 = vmatprep.subr.bf16.mxu1 %v12816_v40  ;;  %v15435_v19 = vpop.permute.xlu1 %2369 }
 0x11f   : > { %v2407_v63 = vsel %vm20948_vm9, %v2360_v18, %v2406_v20  ;;  %21251 = vst [vmem:[#allocation31_spill] sm:$0xff] %v15435_v19  ;;  %v2368_v53 = vpop.permute.xlu0 %2367  ;;  %6170 = vmatpush2.bf16.msra.mxu1 %v12815_v1  ;;  %v20812_v6 = vrot.slane %v15435_v19, 4 }
 0x120   : > { %v2387_v26 = vrot.slane %v2368_v53, 4  ;;  %3050 = vrot.lane.b32.xlu1 %v15373_v22, %s20883_s30 }
 0x121   : > { %3048 = vrot.lane.b32.xlu0 %v15006_v10, %s20883_s30 }
 0x122   : > { %v2413_v34 = vsel %vm21212_vm0, %v2387_v26, %v20812_v6  ;;  %v15446_v48 = vpop.permute.xlu1 %1374  ;;  %v15463_v26 = vld [vmem:[%s14867_s24 + $0x4c] sm:$0xff] }
 0x123   : > { %v2414_v18 = vsel %vm20948_vm9, %v2368_v53, %v2413_v34  ;;  %v1373_v1 = vpop.permute.xlu0 %1372  ;;  %v20813_v40 = vrot.slane %v15446_v48, 4  ;;  %v15460_v53 = vld [vmem:[%s14867_s24 + $0x54] sm:$0xff] }
 0x124   : > { %v1396_v20 = vrot.slane %v1373_v1, 4  ;;  %v12809_v16 = vcombine.high %v2407_v63, %v2414_v18  ;;  %v12808_v56 = vcombine.low %v2407_v63, %v2414_v18  ;;  %3058 = vrot.lane.b32.xlu1 %v15391_v42, %s20883_s30 }
 0x125   : > { %3056 = vrot.lane.b32.xlu0 %v15014_v11, %s20883_s30  ;;  %s21275_s30 = smov 95  }
 0x126   : > { %v1419_v10 = vsel %vm21212_vm0, %v1396_v20, %v20813_v40  ;;  %6171 = vmatprep.subr.bf16.mxu1 %v12809_v16  ;;  %v15466_v34 = vpop.permute.xlu1 %1382 }
 0x127   : > { %v1420_v63 = vsel %vm1405_vm10, %v1373_v1, %v1419_v10  ;;  %v1381_v18 = vpop.permute.xlu0 %1380  ;;  %6172 = vmatpush2.bf16.msra.mxu1 %v12808_v56  ;;  %v20817_v6 = vrot.slane %v15466_v34, 4  ;;  %v15480_v1 = vld [vmem:[%s14867_s24 + $0x70] sm:$0xff] }
 0x128   : > { %v1400_v11 = vrot.slane %v1381_v18, 4  ;;  %3659 = vrot.lane.b32.xlu1 %v15460_v53, %s20885_s20 }
 0x129   : > { %3657 = vrot.lane.b32.xlu0 %v15463_v26, %s20885_s20 }
 0x12a   : > { %v1426_v16 = vsel %vm21212_vm0, %v1400_v11, %v20817_v6  ;;  %v15483_v56 = vpop.permute.xlu1 %2345 }
 0x12b   : > { %v1427_v20 = vsel %vm1405_vm10, %v1381_v18, %v1426_v16  ;;  %21252 = vst [vmem:[#allocation32_spill] sm:$0xff] %v15483_v56  ;;  %v2344_v10 = vpop.permute.xlu0 %2343  ;;  %v20819_v40 = vrot.slane %v15483_v56, 4 }
 0x12c   : > { %v2375_v49 = vrot.slane %v2344_v10, 4  ;;  %v12711_v36 = vcombine.high %v1420_v63, %v1427_v20  ;;  %v12710_v61 = vcombine.low %v1420_v63, %v1427_v20  ;;  %3667 = vrot.lane.b32.xlu1 %v15477_v44, %s20885_s20 }
 0x12d   : > { %3665 = vrot.lane.b32.xlu0 %v15480_v1, %s20885_s20 }
 0x12e   : > { %v2391_v11 = vsel %vm21212_vm0, %v2375_v49, %v20819_v40  ;;  %6104 = vmatprep.subr.bf16.mxu0 %v12711_v36  ;;  %v15494_v16 = vpop.permute.xlu1 %2353 }
 0x12f   : > { %v2393_v18 = vsel %vm20948_vm9, %v2344_v10, %v2391_v11  ;;  %21253 = vst [vmem:[#allocation33_spill] sm:$0xff] %v15494_v16  ;;  %v2352_v6 = vpop.permute.xlu0 %2351  ;;  %6105 = vmatpush2.bf16.msra.mxu0 %v12710_v61  ;;  %v20821_v21 = vrot.slane %v15494_v16, 4 }
 0x130   : > { %v2379_v63 = vrot.slane %v2352_v6, 4  ;;  %2925 = vrot.lane.b32.xlu1 %v15410_v50, %s20881_s22 }
 0x131   : > { %2923 = vrot.lane.b32.xlu0 %v14990_v8, %s20881_s22 }
 0x132   : > { %v2399_v49 = vsel %vm21212_vm0, %v2379_v63, %v20821_v21  ;;  %v15505_v20 = vpop.permute.xlu1 %1358  ;;  %v15519_v63 = vld [vmem:[%s14867_s24 + $0x4] sm:$0xff] }
 0x133   : > { %v2400_v36 = vsel %vm20948_vm9, %v2352_v6, %v2399_v49  ;;  %v1357_v61 = vpop.permute.xlu0 %1356  ;;  %v20823_v10 = vrot.slane %v15505_v20, 4  ;;  %v15516_v6 = vld [vmem:[%s14867_s24 + $0xc] sm:$0xff]  ;;  %vm2815_vm9 = vcmask 244736  }
 0x134   : > { %v1388_v11 = vrot.slane %v1357_v61, 4  ;;  %v12802_v40 = vcombine.high %v2393_v18, %v2400_v36  ;;  %v12801_v37 = vcombine.low %v2393_v18, %v2400_v36  ;;  %2933 = vrot.lane.b32.xlu1 %v15357_v58, %s20881_s22 }
 0x135   : > { %2931 = vrot.lane.b32.xlu0 %v14998_v9, %s20881_s22 }
 0x136   : > { %v1404_v8 = vsel %vm21212_vm0, %v1388_v11, %v20823_v10  ;;  %6173 = vmatprep.subr.bf16.mxu1 %v12802_v40  ;;  %v15522_v18 = vpop.permute.xlu1 %1366  ;;  %v15533_v40 = vld [vmem:[%s14867_s24 + $0x30] sm:$0xff] }
 0x137   : > { %v1406_v49 = vsel %vm1405_vm10, %v1357_v61, %v1404_v8  ;;  %v1365_v36 = vpop.permute.xlu0 %1364  ;;  %6174 = vmatpush2.bf16.msra.mxu1 %v12801_v37  ;;  %v20827_v21 = vrot.slane %v15522_v18, 4  ;;  %v15536_v61 = vld [vmem:[%s14867_s24 + $0x28] sm:$0xff] }
 0x138   : > { %v1392_v35 = vrot.slane %v1365_v36, 4  ;;  %3643 = vrot.lane.b32.xlu1 %v15516_v6, %s20885_s20 }
 0x139   : > { %3641 = vrot.lane.b32.xlu0 %v15519_v63, %s20885_s20 }
 0x13a   : > { %v1412_v9 = vsel %vm21212_vm0, %v1392_v35, %v20827_v21  ;;  %v15539_v37 = vpop.permute.xlu1 %2220 }
 0x13b   : > { %v1413_v11 = vsel %vm1405_vm10, %v1365_v36, %v1412_v9  ;;  %21254 = vst [vmem:[#allocation34_spill] sm:$0xff] %v15539_v37  ;;  %v2219_v8 = vpop.permute.xlu0 %2218  ;;  %v20830_v10 = vrot.slane %v15539_v37, 4 }
 0x13c   : > { %v2242_v43 = vrot.slane %v2219_v8, 4  ;;  %v12704_v54 = vcombine.high %v1406_v49, %v1413_v11  ;;  %v12703_v62 = vcombine.low %v1406_v49, %v1413_v11  ;;  %3651 = vrot.lane.b32.xlu1 %v15533_v40, %s20885_s20  ;;  %v15555_v11 = vld [vmem:[#allocation2] sm:$0xff] }
 0x13d   : > { %3649 = vrot.lane.b32.xlu0 %v15536_v61, %s20885_s20  ;;  %s21266_s20 = smov 126  }
 0x13e   : > { %v2265_v35 = vsel %vm21212_vm0, %v2242_v43, %v20830_v10  ;;  %6106 = vmatprep.subr.bf16.mxu0 %v12704_v54  ;;  %v15550_v9 = vpop.permute.xlu1 %2228  ;;  %v20838_v43 = vmov 0  }
 0x13f   : > { %v2266_v36 = vsel %vm20925_vm11, %v2219_v8, %v2265_v35  ;;  %21255 = vst [vmem:[#allocation35_spill] sm:$0xff] %v15550_v9  ;;  %v2227_v21 = vpop.permute.xlu0 %2226  ;;  %6107 = vmatpush2.bf16.msra.mxu0 %v12703_v62  ;;  %v20837_v56 = vrot.slane %v15550_v9, 4  ;;  %13911 = vset.pattern.permute.xlu1 %v20838_v43 }
 0x140   : > { %v2246_v49 = vrot.slane %v2227_v21, 4  ;;  %2909 = vrot.lane.b32.xlu1 %v15373_v22, %s20881_s22  ;;  %13910 = vset.pattern.permute.xlu0 %v20838_v43 }
 0x141   : > { %2907 = vrot.lane.b32.xlu0 %v15555_v11, %s20881_s22 }
 0x142   : > { %v2272_v54 = vsel %vm21212_vm0, %v2246_v49, %v20837_v56  ;;  %v15565_v8 = vpop.permute.xlu1 %1233  ;;  %v15570_v49 = vld [vmem:[#allocation2 + $0x1c] sm:$0xff] }
 0x143   : > { %v2273_v62 = vsel %vm20925_vm11, %v2227_v21, %v2272_v54  ;;  %v1232_v35 = vpop.permute.xlu0 %1231  ;;  %v20844_v10 = vrot.slane %v15565_v8, 4  ;;  %v15578_v54 = vld [vmem:[%s14867_s24 + $0x7c] sm:$0xff] }
 0x144   : > { %v1255_v37 = vrot.slane %v1232_v35, 4  ;;  %v12795_v16 = vcombine.high %v2266_v36, %v2273_v62  ;;  %v12794_v9 = vcombine.low %v2266_v36, %v2273_v62  ;;  %2917 = vrot.lane.b32.xlu1 %v15391_v42, %s20881_s22  ;;  %v15581_v56 = vld [vmem:[%s14867_s24 + $0x58] sm:$0xff] }
 0x145   : > { %2915 = vrot.lane.b32.xlu0 %v15570_v49, %s20881_s22  ;;  %s21281_s22 = smov 63  }
 0x146   : > { %v1278_v21 = vsel %vm21212_vm0, %v1255_v37, %v20844_v10  ;;  %6175 = vmatprep.subr.bf16.mxu1 %v12795_v16  ;;  %v15584_v36 = vpop.permute.xlu1 %1241 }
 0x147   : > { %v1279_v43 = vsel %vm1264_vm12, %v1232_v35, %v1278_v21  ;;  %v1240_v62 = vpop.permute.xlu0 %1239  ;;  %6176 = vmatpush2.bf16.msra.mxu1 %v12794_v9  ;;  %v20851_v45 = vrot.slane %v15584_v36, 4 }
 0x148   : > { %v1259_v19 = vrot.slane %v1240_v62, 4  ;;  %820 = vrot.lane.b32.xlu1 %v15578_v54, %s20932_s16 }
 0x149   : > { %812 = vrot.lane.b32.xlu0 %v15581_v56, %s20932_s16 }
 0x14a   : > { %v1285_v37 = vsel %vm21212_vm0, %v1259_v19, %v20851_v45  ;;  %v15595_v35 = vpop.permute.xlu1 %2204 }
 0x14b   : > { %v1286_v16 = vsel %vm1264_vm12, %v1240_v62, %v1285_v37  ;;  %21256 = vst [vmem:[#allocation36_spill] sm:$0xff] %v15595_v35  ;;  %v2203_v21 = vpop.permute.xlu0 %2202  ;;  %v20854_v9 = vrot.slane %v15595_v35, 4 }
 0x14c   : > { %v2234_v10 = vrot.slane %v2203_v21, 4  ;;  %v12697_v4 = vcombine.high %v1279_v43, %v1286_v16  ;;  %v12696_v57 = vcombine.low %v1279_v43, %v1286_v16  ;;  %2784 = vrot.lane.b32.xlu1 %v15410_v50, %s20875_s15 }
 0x14d   : > { %2782 = vrot.lane.b32.xlu0 %v15600_v13, %s20875_s15 }
 0x14e   : > { %v2250_v19 = vsel %vm21212_vm0, %v2234_v10, %v20854_v9  ;;  %6108 = vmatprep.subr.bf16.mxu0 %v12697_v4  ;;  %v15608_v37 = vpop.permute.xlu1 %2212  ;;  %v15621_v10 = vld [vmem:[%s14867_s24 + $0x34] sm:$0xff] }
 0x14f   : > { %v2252_v62 = vsel %vm20925_vm11, %v2203_v21, %v2250_v19  ;;  %21257 = vst [vmem:[#allocation37_spill] sm:$0xff] %v15608_v37  ;;  %v2211_v43 = vpop.permute.xlu0 %2210  ;;  %6109 = vmatpush2.bf16.msra.mxu0 %v12696_v57  ;;  %v20863_v16 = vrot.slane %v15608_v37, 4  ;;  %v15624_v21 = vld [vmem:[%s14867_s24 + $0x10] sm:$0xff] }
 0x150   : > { %v2238_v45 = vrot.slane %v2211_v43, 4  ;;  %2792 = vrot.lane.b32.xlu1 %v15357_v58, %s20875_s15 }
 0x151   : > { %2790 = vrot.lane.b32.xlu0 %v15613_v27, %s20875_s15 }
 0x152   : > { %v2258_v4 = vsel %vm21212_vm0, %v2238_v45, %v20863_v16  ;;  %v15627_v19 = vpop.permute.xlu1 %1217 }
 0x153   : > { %v2259_v57 = vsel %vm20925_vm11, %v2211_v43, %v2258_v4  ;;  %v1216_v9 = vpop.permute.xlu0 %1215  ;;  %v20866_v35 = vrot.slane %v15627_v19, 4  ;;  %vm21104_vm11 = vcmask 236544  }
 0x154   : > { %v1247_v30 = vrot.slane %v1216_v9, 4  ;;  %v12788_v55 = vcombine.high %v2252_v62, %v2259_v57  ;;  %v12787_v25 = vcombine.low %v2252_v62, %v2259_v57  ;;  %804 = vrot.lane.b32.xlu1 %v15621_v10, %s20932_s16 }
 0x155   : > { %796 = vrot.lane.b32.xlu0 %v15624_v21, %s20932_s16 }
 0x156   : > { %v1263_v45 = vsel %vm21212_vm0, %v1247_v30, %v20866_v35  ;;  %6177 = vmatprep.subr.bf16.mxu1 %v12788_v55  ;;  %v15638_v4 = vpop.permute.xlu1 %1225 }
 0x157   : > { %v1265_v43 = vsel %vm1264_vm12, %v1216_v9, %v1263_v45  ;;  %v1224_v16 = vpop.permute.xlu0 %1223  ;;  %6178 = vmatpush2.bf16.msra.mxu1 %v12787_v25  ;;  %v20869_v37 = vrot.slane %v15638_v4, 4 }
 0x158   : > { %v1251_v62 = vrot.slane %v1224_v16, 4  ;;  %2768 = vrot.lane.b32.xlu1 %v15373_v22, %s20875_s15 }
 0x159   : > { %2766 = vrot.lane.b32.xlu0 %v15555_v11, %s20875_s15 }
 0x15a   : > { %v1271_v30 = vsel %vm21212_vm0, %v1251_v62, %v20869_v37  ;;  %v15649_v9 = vpop.permute.xlu1 %2079 }
 0x15b   : > { %v1272_v55 = vsel %vm1264_vm12, %v1224_v16, %v1271_v30  ;;  %21258 = vst [vmem:[#allocation38_spill] sm:$0xff] %v15649_v9  ;;  %v2078_v57 = vpop.permute.xlu0 %2077  ;;  %v20872_v25 = vrot.slane %v15649_v9, 4 }
 0x15c   : > { %v2101_v45 = vrot.slane %v2078_v57, 4  ;;  %v12690_v35 = vcombine.high %v1265_v43, %v1272_v55  ;;  %v12689_v0 = vcombine.low %v1265_v43, %v1272_v55  ;;  %2776 = vrot.lane.b32.xlu1 %v15391_v42, %s20875_s15 }
 0x15d   : > { %2774 = vrot.lane.b32.xlu0 %v15570_v49, %s20875_s15  ;;  %s20934_s15 = smov 31  }
 0x15e   : > { %v2124_v62 = vsel %vm21212_vm0, %v2101_v45, %v20872_v25  ;;  %6110 = vmatprep.subr.bf16.mxu0 %v12690_v35  ;;  %v15660_v30 = vpop.permute.xlu1 %2087 }
 0x15f   : > { %v2125_v16 = vsel %vm20897_vm13, %v2078_v57, %v2124_v62  ;;  %21259 = vst [vmem:[#allocation39_spill] sm:$0xff] %v15660_v30  ;;  %v2086_v37 = vpop.permute.xlu0 %2085  ;;  %6111 = vmatpush2.bf16.msra.mxu0 %v12689_v0  ;;  %v20877_v7 = vrot.slane %v15660_v30, 4 }
 0x160   : > { %v2105_v43 = vrot.slane %v2086_v37, 4  ;;  %679 = vrot.lane.b32.xlu1 %v15578_v54, %s20887_s21 }
 0x161   : > { %671 = vrot.lane.b32.xlu0 %v15581_v56, %s20887_s21 }
 0x162   : > { %v2131_v55 = vsel %vm21212_vm0, %v2105_v43, %v20877_v7  ;;  %v15671_v57 = vpop.permute.xlu1 %1092 }
 0x163   : > { %v2132_v35 = vsel %vm20897_vm13, %v2086_v37, %v2131_v55  ;;  %v1091_v45 = vpop.permute.xlu0 %1090  ;;  %v20878_v0 = vrot.slane %v15671_v57, 4 }
 0x164   : > { %v1114_v62 = vrot.slane %v1091_v45, 4  ;;  %v12781_v25 = vcombine.high %v2125_v16, %v2132_v35  ;;  %v12780_v9 = vcombine.low %v2125_v16, %v2132_v35  ;;  %2643 = vrot.lane.b32.xlu1 %v15410_v50, %s20934_s15 }
 0x165   : > { %2641 = vrot.lane.b32.xlu0 %v15600_v13, %s20934_s15 }
 0x166   : > { %v1137_v37 = vsel %vm21212_vm0, %v1114_v62, %v20878_v0  ;;  %6179 = vmatprep.subr.bf16.mxu1 %v12781_v25  ;;  %v15682_v55 = vpop.permute.xlu1 %1100 }
 0x167   : > { %v1138_v43 = vsel %vm1123_vm14, %v1091_v45, %v1137_v37  ;;  %v1099_v7 = vpop.permute.xlu0 %1098  ;;  %6180 = vmatpush2.bf16.msra.mxu1 %v12780_v9  ;;  %v20880_v16 = vrot.slane %v15682_v55, 4 }
 0x168   : > { %v1118_v35 = vrot.slane %v1099_v7, 4  ;;  %2651 = vrot.lane.b32.xlu1 %v15357_v58, %s20934_s15 }
 0x169   : > { %2649 = vrot.lane.b32.xlu0 %v15613_v27, %s20934_s15 }
 0x16a   : > { %v1144_v13 = vsel %vm21212_vm0, %v1118_v35, %v20880_v16  ;;  %v15693_v25 = vpop.permute.xlu1 %2063 }
 0x16b   : > { %v1145_v50 = vsel %vm1123_vm14, %v1099_v7, %v1144_v13  ;;  %21260 = vst [vmem:[#allocation40_spill] sm:$0xff] %v15693_v25  ;;  %v2062_v45 = vpop.permute.xlu0 %2061  ;;  %v20879_v9 = vrot.slane %v15693_v25, 4 }
 0x16c   : > { %v2093_v62 = vrot.slane %v2062_v45, 4  ;;  %v12683_v37 = vcombine.high %v1138_v43, %v1145_v50  ;;  %v12682_v0 = vcombine.low %v1138_v43, %v1145_v50  ;;  %663 = vrot.lane.b32.xlu1 %v15621_v10, %s20887_s21 }
 0x16d   : > { %655 = vrot.lane.b32.xlu0 %v15624_v21, %s20887_s21  ;;  %s21270_s21 = smov 94  }
 0x16e   : > { %v2109_v27 = vsel %vm21212_vm0, %v2093_v62, %v20879_v9  ;;  %6112 = vmatprep.subr.bf16.mxu0 %v12683_v37  ;;  %v15704_v58 = vpop.permute.xlu1 %2071 }
 0x16f   : > { %v2111_v7 = vsel %vm20897_vm13, %v2062_v45, %v2109_v27  ;;  %21261 = vst [vmem:[#allocation41_spill] sm:$0xff] %v15704_v58  ;;  %v2070_v35 = vpop.permute.xlu0 %2069  ;;  %6113 = vmatpush2.bf16.msra.mxu0 %v12682_v0  ;;  %v20889_v13 = vrot.slane %v15704_v58, 4 }
 0x170   : > { %v2097_v43 = vrot.slane %v2070_v35, 4  ;;  %2627 = vrot.lane.b32.xlu1 %v15373_v22, %s20934_s15 }
 0x171   : > { %2625 = vrot.lane.b32.xlu0 %v15555_v11, %s20934_s15  ;;  %v13921_v11 = vld [vmem:[%s20753_s1 + $0x8] ss:$28 sps:$4 sm:$0xff]  }
 0x172   : > { %v2117_v50 = vsel %vm21212_vm0, %v2097_v43, %v20889_v13  ;;  %v15715_v45 = vpop.permute.xlu1 %1076 }
 0x173   : > { %v2118_v62 = vsel %vm20897_vm13, %v2070_v35, %v2117_v50  ;;  %v1075_v37 = vpop.permute.xlu0 %1074  ;;  %v20890_v0 = vrot.slane %v15715_v45, 4  ;;  %vm21105_vm13 = vcmask 228352  }
 0x174   : > { %v1106_v27 = vrot.slane %v1075_v37, 4  ;;  %v12774_v9 = vcombine.high %v2111_v7, %v2118_v62  ;;  %v12773_v16 = vcombine.low %v2111_v7, %v2118_v62  ;;  %2635 = vrot.lane.b32.xlu1 %v15391_v42, %s20934_s15  ;;  %v13922_v42 = vld [vmem:[%s20753_s1 + $0x44] ss:$28 sps:$4 sm:$0xff]  }
 0x175   : > { %2633 = vrot.lane.b32.xlu0 %v15570_v49, %s20934_s15  ;;  %s21280_s15 = smov 96  }
 0x176   : > { %v1122_v22 = vsel %vm21212_vm0, %v1106_v27, %v20890_v0  ;;  %6181 = vmatprep.subr.bf16.mxu1 %v12774_v9  ;;  %v15729_v43 = vpop.permute.xlu1 %1084 }
 0x177   : > { %v1124_v35 = vsel %vm1123_vm14, %v1075_v37, %v1122_v22  ;;  %v1083_v7 = vpop.permute.xlu0 %1082  ;;  %6182 = vmatpush2.bf16.msra.mxu1 %v12773_v16  ;;  %v20891_v49 = vrot.slane %v15729_v43, 4 }
 0x178   : > { %v1110_v50 = vrot.slane %v1083_v7, 4  ;;  %537 = vrot.lane.b32.xlu1 %v15578_v54, %s20956_s23 }
 0x179   : > { %529 = vrot.lane.b32.xlu0 %v15581_v56, %s20956_s23 }
 0x17a   : > { %v1130_v9 = vsel %vm21212_vm0, %v1110_v50, %v20891_v49  ;;  %6184 = vmatmul.mubr.bf16.vlgmr.msra.gmra.mxu1 %v13921_v11  ;;  %v15743_v62 = vpop.permute.xlu1 %951 }
 0x17b   : > { %v1131_v16 = vsel %vm1123_vm14, %v1083_v7, %v1130_v9  ;;  %v950_v37 = vpop.permute.xlu0 %949  ;;  %6193 = vmatprep.mubr.bf16.mxu1 %v13922_v42  ;;  %v20892_v27 = vrot.slane %v15743_v62, 4  ;;  %v13924_v7 = vld [vmem:[%s20753_s1 + $0x40] ss:$28 sps:$4 sm:$0xff]  }
 0x17c   : > { %v973_v22 = vrot.slane %v950_v37, 4  ;;  %v12676_v13 = vcombine.high %v1124_v35, %v1131_v16  ;;  %v12675_v0 = vcombine.low %v1124_v35, %v1131_v16  ;;  %3519 = vrot.lane.b32.xlu1 %v15460_v53, %s20932_s16  ;;  %v13925_v9 = vld [vmem:[%s20753_s1 + $0x7c] ss:$28 sps:$4 sm:$0xff]  }
 0x17d   : > { %3517 = vrot.lane.b32.xlu0 %v15463_v26, %s20932_s16 }
 0x17e   : > { %v996_v11 = vsel %vm21212_vm0, %v973_v22, %v20892_v27  ;;  %6114 = vmatprep.subr.bf16.mxu0 %v12676_v13  ;;  %v15757_v50 = vpop.permute.xlu1 %959 }
 0x17f   : > { %v997_v42 = vsel %vm982_vm15, %v950_v37, %v996_v11  ;;  %v958_v35 = vpop.permute.xlu0 %957  ;;  %6115 = vmatpush2.bf16.msra.mxu0 %v12675_v0  ;;  %v20899_v16 = vrot.slane %v15757_v50, 4 }
 0x180   : > { %v977_v49 = vrot.slane %v958_v35, 4  ;;  %3527 = vrot.lane.b32.xlu1 %v15477_v44, %s20932_s16 }
 0x181   : > { %3525 = vrot.lane.b32.xlu0 %v15480_v1, %s20932_s16 }
 0x182   : > { %v1003_v13 = vsel %vm21212_vm0, %v977_v49, %v20899_v16  ;;  %6194 = vmatmul.mubr.bf16.gmra.mxu1 %v13924_v7  ;;  %v15771_v37 = vpop.permute.xlu1 %935  ;;  %v13927_v7 = vld [vmem:[%s20753_s1 + $0x78] ss:$28 sps:$4 sm:$0xff]  }
 0x183   : > { %v1004_v0 = vsel %vm982_vm15, %v958_v35, %v1003_v13  ;;  %21262 = vst [vmem:[#allocation42_spill] sm:$0xff] %v15771_v37  ;;  %v934_v22 = vpop.permute.xlu0 %933  ;;  %6203 = vmatprep.mubr.bf16.mxu1 %v13925_v9  ;;  %v20898_v11 = vrot.slane %v15771_v37, 4 }
 0x184   : > { %v965_v27 = vrot.slane %v934_v22, 4  ;;  %v12669_v25 = vcombine.high %v997_v42, %v1004_v0  ;;  %v12668_v58 = vcombine.low %v997_v42, %v1004_v0  ;;  %521 = vrot.lane.b32.xlu1 %v15621_v10, %s20956_s23 }
 0x185   : > { %513 = vrot.lane.b32.xlu0 %v15624_v21, %s20956_s23 }
 0x186   : > { %v981_v49 = vsel %vm21212_vm0, %v965_v27, %v20898_v11  ;;  %6116 = vmatprep.subr.bf16.mxu0 %v12669_v25  ;;  %v15785_v9 = vpop.permute.xlu1 %943 }
 0x187   : > { %v983_v35 = vsel %vm982_vm15, %v934_v22, %v981_v49  ;;  %21263 = vst [vmem:[#allocation43_spill] sm:$0xff] %v15785_v9  ;;  %v942_v42 = vpop.permute.xlu0 %941  ;;  %6117 = vmatpush2.bf16.msra.mxu0 %v12668_v58  ;;  %v20904_v13 = vrot.slane %v15785_v9, 4  ;;  %v21265_v49 = vmov 0  }
 0x188   : > { %v969_v0 = vrot.slane %v942_v42, 4  ;;  %3503 = vrot.lane.b32.xlu1 %v15516_v6, %s20932_s16 }
 0x189   : > { %3501 = vrot.lane.b32.xlu0 %v15519_v63, %s20932_s16 }
 0x18a   : > { %v989_v25 = vsel %vm21212_vm0, %v969_v0, %v20904_v13  ;;  %6204 = vmatmul.mubr.bf16.gmra.mxu1 %v13927_v7  ;;  %v15796_v22 = vpop.permute.xlu1 %3066  ;;  %v15817_v13 = vld [vmem:[%s14867_s24 + $0x74] sm:$0xff] }
 0x18b   : > { %v990_v27 = vsel %vm982_vm15, %v942_v42, %v989_v25  ;;  %21264 = vst [vmem:[#allocation44_spill] sm:$0xff] %v15796_v22  ;;  %v3065_v58 = vpop.permute.xlu0 %3064  ;;  %6309 = vmatprep.mubr.bf16.mxu1 %v21265_v49  ;;  %v20907_v11 = vrot.slane %v15796_v22, 4  ;;  %v13918_v42 = vld [vmem:[%s20753_s1] ss:$28 sps:$4 sm:$0xff]   ;;  %v15838_v22 = vld [vmem:[%s14867_s24 + $0x2c] sm:$0xff] }
 0x18c   : > { %v3088_v16 = vrot.slane %v3065_v58, 4  ;;  %v12662_v30 = vcombine.high %v983_v35, %v990_v27  ;;  %v12661_v12 = vcombine.low %v983_v35, %v990_v27  ;;  %3511 = vrot.lane.b32.xlu1 %v15533_v40, %s20932_s16  ;;  %v15814_v27 = vld [vmem:[%s14867_s24 + $0x50] sm:$0xff] }
 0x18d   : > { %3509 = vrot.lane.b32.xlu0 %v15536_v61, %s20932_s16  ;;  %s21297_s16 = smov 92  }
 0x18e   : > { %v3111_v7 = vsel %vm21212_vm0, %v3088_v16, %v20907_v11  ;;  %6118 = vmatprep.subr.bf16.mxu0 %v12662_v30  ;;  %v15811_v25 = vpop.permute.xlu1 %3074  ;;  %v15835_v30 = vld [vmem:[%s14867_s24 + $0x8] sm:$0xff] }
 0x18f   : > { %v3112_v0 = vsel %vm21105_vm13, %v3065_v58, %v3111_v7  ;;  %v3073_v35 = vpop.permute.xlu0 %3072  ;;  %6119 = vmatpush2.bf16.msra.mxu0 %v12661_v12  ;;  %v20920_v47 = vrot.slane %v15811_v25, 4 }
 0x190   : > { %v3092_v16 = vrot.slane %v3073_v35, 4  ;;  %3379 = vrot.lane.b32.xlu1 %v15460_v53, %s21266_s20 }
 0x191   : > { %3377 = vrot.lane.b32.xlu0 %v15463_v26, %s21266_s20 }
 0x192   : > { %v3118_v12 = vsel %vm21212_vm0, %v3092_v16, %v20920_v47  ;;  %6121 = vmatmul.mubr.bf16.vlgmr.msra.gmra.mxu0 %v13918_v42  ;;  %v15832_v11 = vpop.permute.xlu1 %3050 }
 0x193   : > { %v3119_v7 = vsel %vm21105_vm13, %v3073_v35, %v3118_v12  ;;  %21267 = vst [vmem:[#allocation45_spill] sm:$0xff] %v15832_v11  ;;  %v3049_v59 = vpop.permute.xlu0 %3048  ;;  %v20921_v2 = vrot.slane %v15832_v11, 4 }
 0x194   : > { %v3080_v23 = vrot.slane %v3049_v59, 4  ;;  %v12878_v37 = vcombine.low %v3112_v0, %v3119_v7  ;;  %v12879_v9 = vcombine.high %v3112_v0, %v3119_v7  ;;  %3387 = vrot.lane.b32.xlu1 %v15477_v44, %s21266_s20 }
 0x195   : > { %3385 = vrot.lane.b32.xlu0 %v15480_v1, %s21266_s20 }
 0x196   : > { %v3096_v16 = vsel %vm21212_vm0, %v3080_v23, %v20921_v2  ;;  %6214 = vmatprep.subr.bf16.mxu0 %v12879_v9  ;;  %v15853_v0 = vpop.permute.xlu1 %3058 }
 0x197   : > { %v3098_v12 = vsel %vm21105_vm13, %v3049_v59, %v3096_v16  ;;  %v3057_v7 = vpop.permute.xlu0 %3056  ;;  %6215 = vmatpush1.bf16.msra.mxu0 %v12878_v37  ;;  %v20922_v47 = vrot.slane %v15853_v0, 4 }
 0x198   : > { %v3084_v58 = vrot.slane %v3057_v7, 4  ;;  %3363 = vrot.lane.b32.xlu1 %v15516_v6, %s21266_s20 }
 0x199   : > { %3361 = vrot.lane.b32.xlu0 %v15519_v63, %s21266_s20 }
 0x19a   : > { %v3104_v23 = vsel %vm21212_vm0, %v3084_v58, %v20922_v47  ;;  %v15864_v59 = vpop.permute.xlu1 %3659 }
 0x19b   : > { %v3105_v9 = vsel %vm21105_vm13, %v3057_v7, %v3104_v23  ;;  %21268 = vst [vmem:[#allocation46_spill] sm:$0xff] %v15864_v59  ;;  %v3658_v16 = vpop.permute.xlu0 %3657  ;;  %v20926_v37 = vrot.slane %v15864_v59, 4 }
 0x19c   : > { %v3681_v2 = vrot.slane %v3658_v16, 4  ;;  %v12871_v42 = vcombine.low %v3098_v12, %v3105_v9  ;;  %v12872_v35 = vcombine.high %v3098_v12, %v3105_v9  ;;  %3371 = vrot.lane.b32.xlu1 %v15533_v40, %s21266_s20 }
 0x19d   : > { %3369 = vrot.lane.b32.xlu0 %v15536_v61, %s21266_s20 }
 0x19e   : > { %v3703_v58 = vsel %vm21212_vm0, %v3681_v2, %v20926_v37  ;;  %6216 = vmatprep.subr.bf16.mxu0 %v12872_v35  ;;  %v15875_v23 = vpop.permute.xlu1 %3667 }
 0x19f   : > { %v3704_v7 = vsel %vm982_vm15, %v3658_v16, %v3703_v58  ;;  %21269 = vst [vmem:[#allocation47_spill] sm:$0xff] %v15875_v23  ;;  %v3666_v47 = vpop.permute.xlu0 %3665  ;;  %6217 = vmatpush1.bf16.msra.mxu0 %v12871_v42  ;;  %v20929_v11 = vrot.slane %v15875_v23, 4 }
 0x1a0   : > { %v3685_v12 = vrot.slane %v3666_v47, 4  ;;  %1384 = vrot.lane.b32.xlu1 %v15578_v54, %s21270_s21 }
 0x1a1   : > { %1376 = vrot.lane.b32.xlu0 %v15581_v56, %s21270_s21 }
 0x1a2   : > { %v3710_v2 = vsel %vm21212_vm0, %v3685_v12, %v20929_v11  ;;  %v15886_v9 = vpop.permute.xlu1 %2925 }
 0x1a3   : > { %v3711_v35 = vsel %vm982_vm15, %v3666_v47, %v3710_v2  ;;  %v2924_v16 = vpop.permute.xlu0 %2923  ;;  %v20936_v42 = vrot.slane %v15886_v9, 4 }
 0x1a4   : > { %v2947_v58 = vrot.slane %v2924_v16, 4  ;;  %v12948_v37 = vcombine.low %v3704_v7, %v3711_v35  ;;  %v12949_v59 = vcombine.high %v3704_v7, %v3711_v35  ;;  %3239 = vrot.lane.b32.xlu1 %v15460_v53, %s20956_s23 }
 0x1a5   : > { %3237 = vrot.lane.b32.xlu0 %v15463_v26, %s20956_s23 }
 0x1a6   : > { %v2970_v12 = vsel %vm21212_vm0, %v2947_v58, %v20936_v42  ;;  %6289 = vmatprep.subr.bf16.mxu1 %v12949_v59  ;;  %v15897_v2 = vpop.permute.xlu1 %2933 }
 0x1a7   : > { %v2971_v47 = vsel %vm21104_vm11, %v2924_v16, %v2970_v12  ;;  %v2932_v11 = vpop.permute.xlu0 %2931  ;;  %6290 = vmatpush1.bf16.msra.mxu1 %v12948_v37  ;;  %v20938_v23 = vrot.slane %v15897_v2, 4 }
 0x1a8   : > { %v2951_v7 = vrot.slane %v2932_v11, 4  ;;  %3247 = vrot.lane.b32.xlu1 %v15477_v44, %s20956_s23  ;;  %v13933_v44 = vld [vmem:[%s20753_s1 + $0x3c] ss:$28 sps:$4 sm:$0xff]  }
 0x1a9   : > { %3245 = vrot.lane.b32.xlu0 %v15480_v1, %s20956_s23  ;;  %v13935_v1 = vld [vmem:[%s20753_s1 + $0x38] ss:$28 sps:$4 sm:$0xff]   ;;  %6130 = vmatprep.mubr.bf16.mxu0 %v13933_v44 }
 0x1aa   : > { %v2977_v53 = vsel %vm21212_vm0, %v2951_v7, %v20938_v23  ;;  %v15908_v59 = vpop.permute.xlu1 %3643  ;;  %6131 = vmatmul.mubr.bf16.gmra.mxu0 %v13935_v1 }
 0x1ab   : > { %v2978_v26 = vsel %vm21104_vm11, %v2932_v11, %v2977_v53  ;;  %21271 = vst [vmem:[#allocation48_spill] sm:$0xff] %v15908_v59  ;;  %v3642_v35 = vpop.permute.xlu0 %3641  ;;  %v20937_v37 = vrot.slane %v15908_v59, 4 }
 0x1ac   : > { %v3673_v16 = vrot.slane %v3642_v35, 4  ;;  %v12864_v58 = vcombine.low %v2971_v47, %v2978_v26  ;;  %v12865_v12 = vcombine.high %v2971_v47, %v2978_v26  ;;  %1368 = vrot.lane.b32.xlu1 %v15621_v10, %s21270_s21 }
 0x1ad   : > { %1360 = vrot.lane.b32.xlu0 %v15624_v21, %s21270_s21 }
 0x1ae   : > { %v3689_v11 = vsel %vm21212_vm0, %v3673_v16, %v20937_v37  ;;  %6218 = vmatprep.subr.bf16.mxu0 %v12865_v12  ;;  %v15925_v7 = vpop.permute.xlu1 %3651 }
 0x1af   : > { %v3690_v47 = vsel %vm982_vm15, %v3642_v35, %v3689_v11  ;;  %21272 = vst [vmem:[#allocation49_spill] sm:$0xff] %v15925_v7  ;;  %v3650_v53 = vpop.permute.xlu0 %3649  ;;  %6219 = vmatpush1.bf16.msra.mxu0 %v12864_v58  ;;  %v20939_v26 = vrot.slane %v15925_v7, 4  ;;  %v15939_v58 = vld [vmem:[%s14867_s24 + $0x4c] sm:$0xff] }
 0x1b0   : > { %v3677_v42 = vrot.slane %v3650_v53, 4  ;;  %3223 = vrot.lane.b32.xlu1 %v15516_v6, %s20956_s23  ;;  %v15942_v11 = vld [vmem:[%s14867_s24 + $0x70] sm:$0xff] }
 0x1b1   : > { %3221 = vrot.lane.b32.xlu0 %v15519_v63, %s20956_s23  ;;  %v13936_v63 = vld [vmem:[%s20753_s1 + $0x74] ss:$28 sps:$4 sm:$0xff]  }
 0x1b2   : > { %v3696_v16 = vsel %vm21212_vm0, %v3677_v42, %v20939_v26  ;;  %v15936_v12 = vpop.permute.xlu1 %2909  ;;  %6140 = vmatprep.mubr.bf16.mxu0 %v13936_v63  ;;  %v15969_v42 = vld [vmem:[%s14867_s24 + $0x4] sm:$0xff] }
 0x1b3   : > { %v3697_v35 = vsel %vm982_vm15, %v3650_v53, %v3696_v16  ;;  %21273 = vst [vmem:[#allocation50_spill] sm:$0xff] %v15936_v12  ;;  %v2908_v44 = vpop.permute.xlu0 %2907  ;;  %v20944_v1 = vrot.slane %v15936_v12, 4  ;;  %v15972_v53 = vld [vmem:[%s14867_s24 + $0x28] sm:$0xff] }
 0x1b4   : > { %v2939_v37 = vrot.slane %v2908_v44, 4  ;;  %v12941_v6 = vcombine.low %v3690_v47, %v3697_v35  ;;  %v12942_v23 = vcombine.high %v3690_v47, %v3697_v35  ;;  %3231 = vrot.lane.b32.xlu1 %v15533_v40, %s20956_s23  ;;  %v13940_v47 = vld [vmem:[%s20753_s1 + $0x70] ss:$28 sps:$4 sm:$0xff]   ;;  %v13928_v40 = vld [vmem:[%s20753_s1 + $0x18] ss:$28 sps:$4 sm:$0xff]  }
 0x1b5   : > { %3229 = vrot.lane.b32.xlu0 %v15536_v61, %s20956_s23  ;;  %6141 = vmatmul.mubr.bf16.gmra.mxu0 %v13940_v47  ;;  %s21286_s23 = smov 124  }
 0x1b6   : > { %v2955_v16 = vsel %vm21212_vm0, %v2939_v37, %v20944_v1  ;;  %6291 = vmatprep.subr.bf16.mxu1 %v12942_v23  ;;  %v15966_v35 = vpop.permute.xlu1 %2917 }
 0x1b7   : > { %v2957_v61 = vsel %vm21104_vm11, %v2908_v44, %v2955_v16  ;;  %21274 = vst [vmem:[#allocation51_spill] sm:$0xff] %v15966_v35  ;;  %v2916_v26 = vpop.permute.xlu0 %2915  ;;  %6292 = vmatpush1.bf16.msra.mxu1 %v12941_v6  ;;  %v20945_v59 = vrot.slane %v15966_v35, 4 }
 0x1b8   : > { %v2943_v7 = vrot.slane %v2916_v26, 4  ;;  %1243 = vrot.lane.b32.xlu1 %v15578_v54, %s21275_s30 }
 0x1b9   : > { %1235 = vrot.lane.b32.xlu0 %v15581_v56, %s21275_s30 }
 0x1ba   : > { %v2963_v44 = vsel %vm21212_vm0, %v2943_v7, %v20945_v59  ;;  %12955 = vmatmul.mubr.msk.bf16.vlgmr.msra.gmra.mxu1 %vm20965_vm8, %v13928_v40  ;;  %v15988_v63 = vpop.permute.xlu1 %820  ;;  %v13945_v7 = vld [vmem:[%s20753_s1 + $0x14] ss:$28 sps:$4 sm:$0xff]  }
 0x1bb   : > { %v2964_v6 = vsel %vm21104_vm11, %v2916_v26, %v2963_v44  ;;  %21276 = vst [vmem:[#allocation52_spill] sm:$0xff] %v15988_v63  ;;  %v15990_v47 = vpop.permute.xlu0 %812  ;;  %6319 = vmatprep.mubr.bf16.mxu1 %v21265_v49  ;;  %v20951_v16 = vrot.slane %v15988_v63, 4  ;;  %v21278_v26 = vrot.slane %v15102_v60, 4  ;;  %6246 = vmatprep.mubr.bf16.mxu0 %v13945_v7 }
 0x1bc   : > { %21277 = vst [vmem:[#allocation53_spill] sm:$0xff] %v15990_v47  ;;  %v20958_v1 = vrot.slane %v15990_v47, 4  ;;  %v12857_v23 = vcombine.low %v2957_v61, %v2964_v6  ;;  %v12858_v37 = vcombine.high %v2957_v61, %v2964_v6  ;;  %1227 = vrot.lane.b32.xlu1 %v15621_v10, %s21275_s30  ;;  %v21279_v61 = vrot.slane %v15091_v52, 4 }
 0x1bd   : > { %1219 = vrot.lane.b32.xlu0 %v15624_v21, %s21275_s30  ;;  %v864_v40 = vsel %vm21212_vm0, %v21278_v26, %v20951_v16 }
 0x1be   : > { %v857_v44 = vsel %vm21212_vm0, %v21279_v61, %v20958_v1  ;;  %6220 = vmatprep.subr.bf16.mxu0 %v12858_v37  ;;  %v865_v6 = vsel %vm841_vm3, %v15102_v60, %v864_v40  ;;  %v16016_v12 = vpop.permute.xlu1 %2784 }
 0x1bf   : > { %v858_v59 = vsel %vm841_vm3, %v15091_v52, %v857_v44  ;;  %v2783_v63 = vpop.permute.xlu0 %2782  ;;  %6221 = vmatpush1.bf16.msra.mxu0 %v12857_v23  ;;  %v20960_v26 = vrot.slane %v16016_v12, 4 }
 0x1c0   : > { %v2806_v16 = vrot.slane %v2783_v63, 4  ;;  %v12656_v47 = vcombine.low %v858_v59, %v865_v6  ;;  %v12657_v35 = vcombine.high %v858_v59, %v865_v6  ;;  %1102 = vrot.lane.b32.xlu1 %v15578_v54, %s21280_s15 }
 0x1c1   : > { %1094 = vrot.lane.b32.xlu0 %v15581_v56, %s21280_s15 }
 0x1c2   : > { %v2829_v52 = vsel %vm21212_vm0, %v2806_v16, %v20960_v26  ;;  %6340 = vmatprep.subr.bf16.mxu1 %v12657_v35  ;;  %v16027_v37 = vpop.permute.xlu1 %2792 }
 0x1c3   : > { %v2830_v60 = vsel %vm2815_vm9, %v2783_v63, %v2829_v52  ;;  %v2791_v23 = vpop.permute.xlu0 %2790  ;;  %6341 = vmatpush1.bf16.msra.mxu1 %v12656_v47  ;;  %v20964_v7 = vrot.slane %v16027_v37, 4 }
 0x1c4   : > { %v2810_v59 = vrot.slane %v2791_v23, 4  ;;  %1948 = vrot.lane.b32.xlu1 %v15578_v54, %s21281_s22  ;;  %v21284_v54 = vrot.slane %v15146_v41, 4 }
 0x1c5   : > { %1940 = vrot.lane.b32.xlu0 %v15581_v56, %s21281_s22  ;;  %v13946_v56 = vld [vmem:[%s20753_s1 + $0x50] ss:$28 sps:$4 sm:$0xff]  }
 0x1c6   : > { %v2836_v16 = vsel %vm21212_vm0, %v2810_v59, %v20964_v7  ;;  %v16038_v63 = vpop.permute.xlu1 %804  ;;  %12956 = vmatmul.mubr.msk.bf16.gmra.mxu1 %vm20965_vm8, %v13946_v56 }
 0x1c7   : > { %v2837_v35 = vsel %vm2815_vm9, %v2791_v23, %v2836_v16  ;;  %21282 = vst [vmem:[#allocation54_spill] sm:$0xff] %v16038_v63  ;;  %v16040_v40 = vpop.permute.xlu0 %796  ;;  %v20959_v47 = vrot.slane %v16038_v63, 4  ;;  %6329 = vmatprep.mubr.bf16.mxu1 %v21265_v49 }
 0x1c8   : > { %21283 = vst [vmem:[#allocation55_spill] sm:$0xff] %v16040_v40  ;;  %v20961_v61 = vrot.slane %v16040_v40, 4  ;;  %v12850_v44 = vcombine.low %v2830_v60, %v2837_v35  ;;  %v12851_v6 = vcombine.high %v2830_v60, %v2837_v35  ;;  %1086 = vrot.lane.b32.xlu1 %v15621_v10, %s21280_s15  ;;  %v21285_v60 = vrot.slane %v15135_v31, 4 }
 0x1c9   : > { %1078 = vrot.lane.b32.xlu0 %v15624_v21, %s21280_s15  ;;  %v850_v52 = vsel %vm21212_vm0, %v21284_v54, %v20959_v47 }
 0x1ca   : > { %v843_v23 = vsel %vm21212_vm0, %v21285_v60, %v20961_v61  ;;  %6222 = vmatprep.subr.bf16.mxu0 %v12851_v6  ;;  %v851_v59 = vsel %vm841_vm3, %v15146_v41, %v850_v52  ;;  %v16065_v35 = vpop.permute.xlu1 %2768  ;;  %v16078_v41 = vld [vmem:[%s14867_s24 + $0x7c] sm:$0xff] }
 0x1cb   : > { %v844_v16 = vsel %vm841_vm3, %v15135_v31, %v843_v23  ;;  %v2767_v1 = vpop.permute.xlu0 %2766  ;;  %6223 = vmatpush1.bf16.msra.mxu0 %v12850_v44  ;;  %v20962_v54 = vrot.slane %v16065_v35, 4  ;;  %v16081_v44 = vld [vmem:[%s14867_s24 + $0x58] sm:$0xff] }
 0x1cc   : > { %v2798_v47 = vrot.slane %v2767_v1, 4  ;;  %v12649_v26 = vcombine.low %v844_v16, %v851_v59  ;;  %v12650_v60 = vcombine.high %v844_v16, %v851_v59  ;;  %1932 = vrot.lane.b32.xlu1 %v15621_v10, %s21281_s22 }
 0x1cd   : > { %1924 = vrot.lane.b32.xlu0 %v15624_v21, %s21281_s22  ;;  %v13947_v21 = vld [vmem:[%s20753_s1 + $0x88] ss:$28 sps:$4 sm:$0xff]  }
 0x1ce   : > { %v2814_v31 = vsel %vm21212_vm0, %v2798_v47, %v20962_v54  ;;  %6342 = vmatprep.subr.bf16.mxu1 %v12650_v60  ;;  %v16084_v56 = vpop.permute.xlu1 %2776  ;;  %12957 = vmatmul.mubr.msk.bf16.gmra.mxu1 %vm20965_vm8, %v13947_v21  ;;  %v14596_v54 = vld [vmem:[%s20753_s1 + $0x4] ss:$28 sps:$4 sm:$0xff]   ;;  %vm2674_vm8 = vcmask 252928  }
 0x1cf   : > { %v2816_v6 = vsel %vm2815_vm9, %v2767_v1, %v2814_v31  ;;  %v2775_v52 = vpop.permute.xlu0 %2774  ;;  %6343 = vmatpush1.bf16.msra.mxu1 %v12649_v26  ;;  %v20963_v10 = vrot.slane %v16084_v56, 4  ;;  %6372 = vmatprep.mubr.bf16.mxu1 %v14596_v54  ;;  %v16126_v54 = vld [vmem:[%s14867_s24 + $0x10] sm:$0xff] }
 0x1d0   : > { %v2802_v23 = vrot.slane %v2775_v52, 4  ;;  %961 = vrot.lane.b32.xlu1 %v16078_v41, %s21286_s23 }
 0x1d1   : > { %953 = vrot.lane.b32.xlu0 %v16081_v44, %s21286_s23 }
 0x1d2   : > { %v2822_v1 = vsel %vm21212_vm0, %v2802_v23, %v20963_v10  ;;  %v16098_v47 = vpop.permute.xlu1 %679 }
 0x1d3   : > { %v2823_v26 = vsel %vm2815_vm9, %v2775_v52, %v2822_v1  ;;  %21287 = vst [vmem:[#allocation56_spill] sm:$0xff] %v16098_v47  ;;  %v16100_v59 = vpop.permute.xlu0 %671  ;;  %v20966_v16 = vrot.slane %v16098_v47, 4  ;;  %v21290_v52 = vrot.slane %v15202_v33, 4  ;;  %v16123_v1 = vld [vmem:[%s14867_s24 + $0x34] sm:$0xff] }
 0x1d4   : > { %21288 = vst [vmem:[#allocation57_spill] sm:$0xff] %v16100_v59  ;;  %v20969_v60 = vrot.slane %v16100_v59, 4  ;;  %v12843_v31 = vcombine.low %v2816_v6, %v2823_v26  ;;  %v12844_v61 = vcombine.high %v2816_v6, %v2823_v26  ;;  %1807 = vrot.lane.b32.xlu1 %v16078_v41, %s21289_s17  ;;  %v21291_v6 = vrot.slane %v15191_v17, 4 }
 0x1d5   : > { %1799 = vrot.lane.b32.xlu0 %v16081_v44, %s21289_s17  ;;  %v723_v23 = vsel %vm21212_vm0, %v21290_v52, %v20966_v16 }
 0x1d6   : > { %v716_v21 = vsel %vm21212_vm0, %v21291_v6, %v20969_v60  ;;  %6224 = vmatprep.subr.bf16.mxu0 %v12844_v61  ;;  %v724_v26 = vsel %vm700_vm5, %v15202_v33, %v723_v23  ;;  %v16132_v7 = vpop.permute.xlu1 %2643 }
 0x1d7   : > { %v717_v10 = vsel %vm700_vm5, %v15191_v17, %v716_v21  ;;  %v2642_v52 = vpop.permute.xlu0 %2641  ;;  %6225 = vmatpush1.bf16.msra.mxu0 %v12843_v31  ;;  %v20970_v16 = vrot.slane %v16132_v7, 4 }
 0x1d8   : > { %v2665_v59 = vrot.slane %v2642_v52, 4  ;;  %v12642_v6 = vcombine.low %v717_v10, %v724_v26  ;;  %v12643_v60 = vcombine.high %v717_v10, %v724_v26  ;;  %945 = vrot.lane.b32.xlu1 %v16123_v1, %s21286_s23 }
 0x1d9   : > { %937 = vrot.lane.b32.xlu0 %v16126_v54, %s21286_s23 }
 0x1da   : > { %v2688_v17 = vsel %vm21212_vm0, %v2665_v59, %v20970_v16  ;;  %6344 = vmatprep.subr.bf16.mxu1 %v12643_v60  ;;  %v16143_v61 = vpop.permute.xlu1 %2651 }
 0x1db   : > { %v2689_v33 = vsel %vm2674_vm8, %v2642_v52, %v2688_v17  ;;  %v2650_v31 = vpop.permute.xlu0 %2649  ;;  %6345 = vmatpush1.bf16.msra.mxu1 %v12642_v6  ;;  %v20971_v23 = vrot.slane %v16143_v61, 4 }
 0x1dc   : > { %v2669_v10 = vrot.slane %v2650_v31, 4  ;;  %1791 = vrot.lane.b32.xlu1 %v16123_v1, %s21289_s17 }
 0x1dd   : > { %1783 = vrot.lane.b32.xlu0 %v16126_v54, %s21289_s17 }
 0x1de   : > { %v2695_v59 = vsel %vm21212_vm0, %v2669_v10, %v20971_v23  ;;  %v16154_v21 = vpop.permute.xlu1 %663 }
 0x1df   : > { %v2696_v60 = vsel %vm2674_vm8, %v2650_v31, %v2695_v59  ;;  %21292 = vst [vmem:[#allocation58_spill] sm:$0xff] %v16154_v21  ;;  %v16156_v26 = vpop.permute.xlu0 %655  ;;  %v20978_v52 = vrot.slane %v16154_v21, 4  ;;  %v21295_v31 = vrot.slane %v15258_v3, 4  ;;  %v21296_v59 = vrot.slane %v15247_v29, 4 }
 0x1e0   : > { %21293 = vst [vmem:[#allocation59_spill] sm:$0xff] %v16156_v26  ;;  %v20981_v6 = vrot.slane %v16156_v26, 4  ;;  %v12836_v17 = vcombine.low %v2689_v33, %v2696_v60  ;;  %v12837_v16 = vcombine.high %v2689_v33, %v2696_v60  ;;  %3076 = vrot.lane.b32.xlu1 %v16078_v41, %s21294_s0 }
 0x1e1   : > { %3068 = vrot.lane.b32.xlu0 %v16081_v44, %s21294_s0  ;;  %v709_v10 = vsel %vm21212_vm0, %v21295_v31, %v20978_v52 }
 0x1e2   : > { %v702_v23 = vsel %vm21212_vm0, %v21296_v59, %v20981_v6  ;;  %6226 = vmatprep.subr.bf16.mxu0 %v12837_v16  ;;  %v710_v33 = vsel %vm700_vm5, %v15258_v3, %v709_v10  ;;  %v16178_v47 = vpop.permute.xlu1 %2627 }
 0x1e3   : > { %v703_v60 = vsel %vm700_vm5, %v15247_v29, %v702_v23  ;;  %v2626_v21 = vpop.permute.xlu0 %2625  ;;  %6227 = vmatpush1.bf16.msra.mxu0 %v12836_v17  ;;  %v20982_v40 = vrot.slane %v16178_v47, 4 }
 0x1e4   : > { %v2657_v31 = vrot.slane %v2626_v21, 4  ;;  %v12635_v52 = vcombine.low %v703_v60, %v710_v33  ;;  %v12636_v26 = vcombine.high %v703_v60, %v710_v33  ;;  %1666 = vrot.lane.b32.xlu1 %v16078_v41, %s21297_s16 }
 0x1e5   : > { %1658 = vrot.lane.b32.xlu0 %v16081_v44, %s21297_s16 }
 0x1e6   : > { %v2673_v3 = vsel %vm21212_vm0, %v2657_v31, %v20982_v40  ;;  %6346 = vmatprep.subr.bf16.mxu1 %v12636_v26  ;;  %v16189_v16 = vpop.permute.xlu1 %2635 }
 0x1e7   : > { %v2675_v29 = vsel %vm2674_vm8, %v2626_v21, %v2673_v3  ;;  %v2634_v23 = vpop.permute.xlu0 %2633  ;;  %6347 = vmatpush1.bf16.msra.mxu1 %v12635_v52  ;;  %v20983_v17 = vrot.slane %v16189_v16, 4 }
 0x1e8   : > { %v2661_v10 = vrot.slane %v2634_v23, 4  ;;  %3060 = vrot.lane.b32.xlu1 %v16123_v1, %s21294_s0 }
 0x1e9   : > { %3052 = vrot.lane.b32.xlu0 %v16126_v54, %s21294_s0 }
 0x1ea   : > { %v2681_v59 = vsel %vm21212_vm0, %v2661_v10, %v20983_v17  ;;  %v16200_v21 = vpop.permute.xlu1 %537 }
 0x1eb   : > { %v2682_v26 = vsel %vm2674_vm8, %v2634_v23, %v2681_v59  ;;  %21298 = vst [vmem:[#allocation60_spill] sm:$0xff] %v16200_v21  ;;  %v16202_v33 = vpop.permute.xlu0 %529  ;;  %v20986_v52 = vrot.slane %v16200_v21, 4  ;;  %v21300_v23 = vrot.slane %v15302_v51, 4  ;;  %v21301_v59 = vrot.slane %v15291_v39, 4 }
 0x1ec   : > { %21299 = vst [vmem:[#allocation61_spill] sm:$0xff] %v16202_v33  ;;  %v20992_v60 = vrot.slane %v16202_v33, 4  ;;  %v12829_v31 = vcombine.low %v2675_v29, %v2682_v26  ;;  %v12830_v3 = vcombine.high %v2675_v29, %v2682_v26  ;;  %1650 = vrot.lane.b32.xlu1 %v16123_v1, %s21297_s16 }
 0x1ed   : > { %1642 = vrot.lane.b32.xlu0 %v16126_v54, %s21297_s16  ;;  %v582_v10 = vsel %vm21212_vm0, %v21300_v23, %v20986_v52 }
 0x1ee   : > { %v575_v6 = vsel %vm21212_vm0, %v21301_v59, %v20992_v60  ;;  %6228 = vmatprep.subr.bf16.mxu0 %v12830_v3  ;;  %v583_v29 = vsel %vm559_vm7, %v15302_v51, %v582_v10  ;;  %v16224_v40 = vpop.permute.xlu1 %3519 }
 0x1ef   : > { %v576_v26 = vsel %vm559_vm7, %v15291_v39, %v575_v6  ;;  %v3518_v17 = vpop.permute.xlu0 %3517  ;;  %6229 = vmatpush1.bf16.msra.mxu0 %v12829_v31  ;;  %v20993_v21 = vrot.slane %v16224_v40, 4 }
 0x1f0   : > { %v3541_v23 = vrot.slane %v3518_v17, 4  ;;  %v12628_v52 = vcombine.low %v576_v26, %v583_v29  ;;  %v12629_v33 = vcombine.high %v576_v26, %v583_v29  ;;  %2935 = vrot.lane.b32.xlu1 %v16078_v41, %s21302_s27 }
 0x1f1   : > { %2927 = vrot.lane.b32.xlu0 %v16081_v44, %s21302_s27 }
 0x1f2   : > { %v3563_v51 = vsel %vm21212_vm0, %v3541_v23, %v20993_v21  ;;  %6348 = vmatprep.subr.bf16.mxu1 %v12629_v33  ;;  %v16235_v6 = vpop.permute.xlu1 %3527 }
 0x1f3   : > { %v3564_v39 = vsel %vm841_vm3, %v3518_v17, %v3563_v51  ;;  %v3526_v31 = vpop.permute.xlu0 %3525  ;;  %6349 = vmatpush1.bf16.msra.mxu1 %v12628_v52  ;;  %v20994_v3 = vrot.slane %v16235_v6, 4 }
 0x1f4   : > { %v3545_v10 = vrot.slane %v3526_v31, 4  ;;  %1525 = vrot.lane.b32.xlu1 %v16078_v41, %s21303_s14 }
 0x1f5   : > { %1517 = vrot.lane.b32.xlu0 %v16081_v44, %s21303_s14 }
 0x1f6   : > { %v3570_v59 = vsel %vm21212_vm0, %v3545_v10, %v20994_v3  ;;  %v16246_v17 = vpop.permute.xlu1 %521 }
 0x1f7   : > { %v3571_v33 = vsel %vm841_vm3, %v3526_v31, %v3570_v59  ;;  %21304 = vst [vmem:[#allocation62_spill] sm:$0xff] %v16246_v17  ;;  %v16248_v29 = vpop.permute.xlu0 %513  ;;  %v20997_v52 = vrot.slane %v16246_v17, 4  ;;  %v21306_v31 = vrot.slane %v15346_v5, 4  ;;  %v21307_v59 = vrot.slane %v15335_v28, 4 }
 0x1f8   : > { %21305 = vst [vmem:[#allocation63_spill] sm:$0xff] %v16248_v29  ;;  %v21001_v26 = vrot.slane %v16248_v29, 4  ;;  %v12934_v23 = vcombine.low %v3564_v39, %v3571_v33  ;;  %v12935_v51 = vcombine.high %v3564_v39, %v3571_v33  ;;  %2919 = vrot.lane.b32.xlu1 %v16123_v1, %s21302_s27 }
 0x1f9   : > { %2911 = vrot.lane.b32.xlu0 %v16126_v54, %s21302_s27  ;;  %v568_v10 = vsel %vm21212_vm0, %v21306_v31, %v20997_v52 }
 0x1fa   : > { %v561_v60 = vsel %vm21212_vm0, %v21307_v59, %v21001_v26  ;;  %6230 = vmatprep.subr.bf16.mxu0 %v12935_v51  ;;  %v569_v39 = vsel %vm559_vm7, %v15346_v5, %v568_v10  ;;  %v16270_v21 = vpop.permute.xlu1 %3503  ;;  %v21308_v59 = vcombine.high %v15814_v27, %v15817_v13 }
 0x1fb   : > { %v562_v33 = vsel %vm559_vm7, %v15335_v28, %v561_v60  ;;  %v3502_v3 = vpop.permute.xlu0 %3501  ;;  %6231 = vmatpush2.bf16.msra.mxu0 %v12934_v23  ;;  %v21002_v17 = vrot.slane %v16270_v21, 4 }
 0x1fc   : > { %v3533_v31 = vrot.slane %v3502_v3, 4  ;;  %v12621_v52 = vcombine.low %v562_v33, %v569_v39  ;;  %v12622_v29 = vcombine.high %v562_v33, %v569_v39  ;;  %1509 = vrot.lane.b32.xlu1 %v16123_v1, %s21303_s14  ;;  %v21310_v33 = vcombine.low %v15814_v27, %v15817_v13 }
 0x1fd   : > { %1501 = vrot.lane.b32.xlu0 %v16126_v54, %s21303_s14 }
 0x1fe   : > { %v3549_v5 = vsel %vm21212_vm0, %v3533_v31, %v21002_v17  ;;  %6350 = vmatprep.subr.bf16.mxu1 %v12622_v29  ;;  %v16281_v60 = vpop.permute.xlu1 %3511  ;;  %v21311_v17 = vcombine.high %v15835_v30, %v15838_v22 }
 0x1ff   : > { %v3550_v28 = vsel %vm841_vm3, %v3502_v3, %v3549_v5  ;;  %v3510_v23 = vpop.permute.xlu0 %3509  ;;  %6351 = vmatpush1.bf16.msra.mxu1 %v12621_v52  ;;  %v21010_v51 = vrot.slane %v16281_v60, 4 }
 0x200   : > { %v3537_v10 = vrot.slane %v3510_v23, 4  ;;  %6352 = vmatprep.subr.bf16.mxu1 %v21308_v59  ;;  %2794 = vrot.lane.b32.xlu1 %v16078_v41, %s21309_s19 }
 0x201   : > { %2786 = vrot.lane.b32.xlu0 %v16081_v44, %s21309_s19 }
 0x202   : > { %v3556_v3 = vsel %vm21212_vm0, %v3537_v10, %v21010_v51  ;;  %v16295_v52 = vpop.permute.xlu1 %3379 }
 0x203   : > { %v3557_v29 = vsel %vm841_vm3, %v3510_v23, %v3556_v3  ;;  %v3378_v39 = vpop.permute.xlu0 %3377  ;;  %6353 = vmatpush1.bf16.msra.mxu1 %v21310_v33  ;;  %v21006_v31 = vrot.slane %v16295_v52, 4 }
 0x204   : > { %v3401_v5 = vrot.slane %v3378_v39, 4  ;;  %v12927_v59 = vcombine.low %v3550_v28, %v3557_v29  ;;  %v12928_v26 = vcombine.high %v3550_v28, %v3557_v29  ;;  %6354 = vmatprep.subr.bf16.mxu1 %v21311_v17  ;;  %2512 = vrot.lane.b32.xlu1 %v16078_v41, %s21312_s25  ;;  %v21313_v17 = vcombine.low %v15835_v30, %v15838_v22 }
 0x205   : > { %2504 = vrot.lane.b32.xlu0 %v16081_v44, %s21312_s25 }
 0x206   : > { %v3423_v13 = vsel %vm21212_vm0, %v3401_v5, %v21006_v31  ;;  %6232 = vmatprep.subr.bf16.mxu0 %v12928_v26  ;;  %v16312_v23 = vpop.permute.xlu1 %3387 }
 0x207   : > { %v3424_v27 = vsel %vm700_vm5, %v3378_v39, %v3423_v13  ;;  %v3386_v28 = vpop.permute.xlu0 %3385  ;;  %6233 = vmatpush2.bf16.msra.mxu0 %v12927_v59  ;;  %6355 = vmatpush1.bf16.msra.mxu1 %v21313_v17  ;;  %v21009_v10 = vrot.slane %v16312_v23, 4 }
 0x208   : > { %v3405_v3 = vrot.slane %v3386_v28, 4  ;;  %2778 = vrot.lane.b32.xlu1 %v16123_v1, %s21309_s19 }
 0x209   : > { %2770 = vrot.lane.b32.xlu0 %v16126_v54, %s21309_s19 }
 0x20a   : > { %v3430_v26 = vsel %vm21212_vm0, %v3405_v3, %v21009_v10  ;;  %v16326_v39 = vpop.permute.xlu1 %3363 }
 0x20b   : > { %v3431_v29 = vsel %vm700_vm5, %v3386_v28, %v3430_v26  ;;  %v3362_v33 = vpop.permute.xlu0 %3361  ;;  %v21005_v22 = vrot.slane %v16326_v39, 4 }
 0x20c   : > { %v3393_v30 = vrot.slane %v3362_v33, 4  ;;  %v12920_v5 = vcombine.low %v3424_v27, %v3431_v29  ;;  %v12921_v59 = vcombine.high %v3424_v27, %v3431_v29  ;;  %2496 = vrot.lane.b32.xlu1 %v16123_v1, %s21312_s25 }
 0x20d   : > { %2488 = vrot.lane.b32.xlu0 %v16126_v54, %s21312_s25 }
 0x20e   : > { %v3409_v13 = vsel %vm21212_vm0, %v3393_v30, %v21005_v22  ;;  %6234 = vmatprep.subr.bf16.mxu0 %v12921_v59  ;;  %v16337_v17 = vpop.permute.xlu1 %3371 }
 0x20f   : > { %v3410_v28 = vsel %vm700_vm5, %v3362_v33, %v3409_v13  ;;  %v3370_v3 = vpop.permute.xlu0 %3369  ;;  %6235 = vmatpush2.bf16.msra.mxu0 %v12920_v5  ;;  %v21008_v26 = vrot.slane %v16337_v17, 4 }
 0x210   : > { %v3397_v27 = vrot.slane %v3370_v3, 4  ;;  %2653 = vrot.lane.b32.xlu1 %v16078_v41, %s21314_s28 }
 0x211   : > { %2645 = vrot.lane.b32.xlu0 %v16081_v44, %s21314_s28 }
 0x212   : > { %v3416_v29 = vsel %vm21212_vm0, %v3397_v27, %v21008_v26  ;;  %v16348_v33 = vpop.permute.xlu1 %1384 }
 0x213   : > { %v3417_v30 = vsel %vm700_vm5, %v3370_v3, %v3416_v29  ;;  %21315 = vst [vmem:[#allocation64_spill] sm:$0xff] %v16348_v33  ;;  %v16350_v59 = vpop.permute.xlu0 %1376  ;;  %v21013_v5 = vrot.slane %v16348_v33, 4  ;;  %v21318_v3 = vrot.slane %v15466_v34, 4  ;;  %v21319_v29 = vrot.slane %v15446_v48, 4 }
 0x214   : > { %21316 = vst [vmem:[#allocation65_spill] sm:$0xff] %v16350_v59  ;;  %v21016_v13 = vrot.slane %v16350_v59, 4  ;;  %v12913_v22 = vcombine.low %v3410_v28, %v3417_v30  ;;  %v12914_v31 = vcombine.high %v3410_v28, %v3417_v30  ;;  %2371 = vrot.lane.b32.xlu1 %v16078_v41, %s21317_s13 }
 0x215   : > { %2363 = vrot.lane.b32.xlu0 %v16081_v44, %s21317_s13  ;;  %v1428_v27 = vsel %vm21212_vm0, %v21318_v3, %v21013_v5 }
 0x216   : > { %v1421_v26 = vsel %vm21212_vm0, %v21319_v29, %v21016_v13  ;;  %6236 = vmatprep.subr.bf16.mxu0 %v12914_v31  ;;  %v1429_v28 = vsel %vm1405_vm10, %v15466_v34, %v1428_v27  ;;  %v16372_v10 = vpop.permute.xlu1 %3239 }
 0x217   : > { %v1422_v30 = vsel %vm1405_vm10, %v15446_v48, %v1421_v26  ;;  %v3238_v51 = vpop.permute.xlu0 %3237  ;;  %6237 = vmatpush2.bf16.msra.mxu0 %v12913_v22  ;;  %v21017_v33 = vrot.slane %v16372_v10, 4 }
 0x218   : > { %v3261_v3 = vrot.slane %v3238_v51, 4  ;;  %v12712_v5 = vcombine.low %v1422_v30, %v1429_v28  ;;  %v12713_v59 = vcombine.high %v1422_v30, %v1429_v28  ;;  %2637 = vrot.lane.b32.xlu1 %v16123_v1, %s21314_s28 }
 0x219   : > { %2629 = vrot.lane.b32.xlu0 %v16126_v54, %s21314_s28 }
 0x21a   : > { %v3283_v48 = vsel %vm21212_vm0, %v3261_v3, %v21017_v33  ;;  %6356 = vmatprep.subr.bf16.mxu1 %v12713_v59  ;;  %v16383_v31 = vpop.permute.xlu1 %3247  ;;  %v16394_v59 = vld [vmem:[%s14867_s24 + $0x80] sm:$0xff] }
 0x21b   : > { %v3284_v34 = vsel %vm559_vm7, %v3238_v51, %v3283_v48  ;;  %v3246_v22 = vpop.permute.xlu0 %3245  ;;  %6357 = vmatpush2.bf16.msra.mxu1 %v12712_v5  ;;  %v21020_v26 = vrot.slane %v16383_v31, 4  ;;  %v16397_v51 = vld [vmem:[%s14867_s24 + $0x5c] sm:$0xff] }
 0x21c   : > { %v3265_v27 = vrot.slane %v3246_v22, 4  ;;  %2355 = vrot.lane.b32.xlu1 %v16123_v1, %s21317_s13 }
 0x21d   : > { %2347 = vrot.lane.b32.xlu0 %v16126_v54, %s21317_s13 }
 0x21e   : > { %v3290_v29 = vsel %vm21212_vm0, %v3265_v27, %v21020_v26  ;;  %v16400_v5 = vpop.permute.xlu1 %1368 }
 0x21f   : > { %v3291_v28 = vsel %vm559_vm7, %v3246_v22, %v3290_v29  ;;  %21320 = vst [vmem:[#allocation66_spill] sm:$0xff] %v16400_v5  ;;  %v16402_v30 = vpop.permute.xlu0 %1360  ;;  %v21025_v3 = vrot.slane %v16400_v5, 4  ;;  %v21323_v22 = vrot.slane %v15522_v18, 4  ;;  %v21324_v29 = vrot.slane %v15505_v20, 4 }
 0x220   : > { %21321 = vst [vmem:[#allocation67_spill] sm:$0xff] %v16402_v30  ;;  %v21029_v48 = vrot.slane %v16402_v30, 4  ;;  %v12906_v13 = vcombine.low %v3284_v34, %v3291_v28  ;;  %v12907_v33 = vcombine.high %v3284_v34, %v3291_v28  ;;  %3529 = vrot.lane.b32.xlu1 %v16394_v59, %s21322_s18 }
 0x221   : > { %3521 = vrot.lane.b32.xlu0 %v16397_v51, %s21322_s18  ;;  %v1414_v27 = vsel %vm21212_vm0, %v21323_v22, %v21025_v3 }
 0x222   : > { %v1407_v34 = vsel %vm21212_vm0, %v21324_v29, %v21029_v48  ;;  %6238 = vmatprep.subr.bf16.mxu0 %v12907_v33  ;;  %v1415_v28 = vsel %vm1405_vm10, %v15522_v18, %v1414_v27  ;;  %v16424_v5 = vpop.permute.xlu1 %3223  ;;  %v16438_v33 = vld [vmem:[%s14867_s24 + $0x14] sm:$0xff] }
 0x223   : > { %v1408_v26 = vsel %vm1405_vm10, %v15505_v20, %v1407_v34  ;;  %21325 = vst [vmem:[#allocation68_spill] sm:$0xff] %v16424_v5  ;;  %v3222_v63 = vpop.permute.xlu0 %3221  ;;  %6239 = vmatpush2.bf16.msra.mxu0 %v12906_v13  ;;  %v21030_v22 = vrot.slane %v16424_v5, 4  ;;  %v16435_v20 = vld [vmem:[%s14867_s24 + $0x38] sm:$0xff] }
 0x224   : > { %v3253_v3 = vrot.slane %v3222_v63, 4  ;;  %v12705_v30 = vcombine.low %v1408_v26, %v1415_v28  ;;  %v12706_v49 = vcombine.high %v1408_v26, %v1415_v28  ;;  %2230 = vrot.lane.b32.xlu1 %v16078_v41, %s21326_s12 }
 0x225   : > { %2222 = vrot.lane.b32.xlu0 %v16081_v44, %s21326_s12 }
 0x226   : > { %v3269_v18 = vsel %vm21212_vm0, %v3253_v3, %v21030_v22  ;;  %6358 = vmatprep.subr.bf16.mxu1 %v12706_v49  ;;  %v16441_v27 = vpop.permute.xlu1 %3231 }
 0x227   : > { %v3270_v13 = vsel %vm559_vm7, %v3222_v63, %v3269_v18  ;;  %21327 = vst [vmem:[#allocation69_spill] sm:$0xff] %v16441_v27  ;;  %v3230_v26 = vpop.permute.xlu0 %3229  ;;  %6359 = vmatpush2.bf16.msra.mxu1 %v12705_v30  ;;  %v21031_v29 = vrot.slane %v16441_v27, 4 }
 0x228   : > { %v3257_v34 = vrot.slane %v3230_v26, 4  ;;  %3513 = vrot.lane.b32.xlu1 %v16435_v20, %s21322_s18 }
 0x229   : > { %3505 = vrot.lane.b32.xlu0 %v16438_v33, %s21322_s18 }
 0x22a   : > { %v3276_v3 = vsel %vm21212_vm0, %v3257_v34, %v21031_v29  ;;  %v16452_v63 = vpop.permute.xlu1 %1243 }
 0x22b   : > { %v3277_v49 = vsel %vm559_vm7, %v3230_v26, %v3276_v3  ;;  %21328 = vst [vmem:[#allocation70_spill] sm:$0xff] %v16452_v63  ;;  %v16454_v28 = vpop.permute.xlu0 %1235  ;;  %v21036_v30 = vrot.slane %v16452_v63, 4  ;;  %v21330_v26 = vrot.slane %v15584_v36, 4  ;;  %v21331_v3 = vrot.slane %v15565_v8, 4 }
 0x22c   : > { %21329 = vst [vmem:[#allocation71_spill] sm:$0xff] %v16454_v28  ;;  %v21050_v18 = vrot.slane %v16454_v28, 4  ;;  %v12899_v48 = vcombine.low %v3270_v13, %v3277_v49  ;;  %v12900_v22 = vcombine.high %v3270_v13, %v3277_v49  ;;  %2214 = vrot.lane.b32.xlu1 %v16123_v1, %s21326_s12 }
 0x22d   : > { %2206 = vrot.lane.b32.xlu0 %v16126_v54, %s21326_s12  ;;  %v1287_v34 = vsel %vm21212_vm0, %v21330_v26, %v21036_v30 }
 0x22e   : > { %v1280_v29 = vsel %vm21212_vm0, %v21331_v3, %v21050_v18  ;;  %6240 = vmatprep.subr.bf16.mxu0 %v12900_v22  ;;  %v1288_v13 = vsel %vm1264_vm12, %v15584_v36, %v1287_v34  ;;  %v16476_v5 = vpop.permute.xlu1 %1227  ;;  %v21334_v22 = vcombine.high %v15939_v58, %v15942_v11  ;;  %v16664_v18 = vld [vmem:[%s14867_s24 + $0x60] sm:$0xff] }
 0x22f   : > { %v1281_v49 = vsel %vm1264_vm12, %v15565_v8, %v1280_v29  ;;  %21332 = vst [vmem:[#allocation72_spill] sm:$0xff] %v16476_v5  ;;  %v16478_v63 = vpop.permute.xlu0 %1219  ;;  %6241 = vmatpush2.bf16.msra.mxu0 %v12899_v48  ;;  %v21049_v26 = vrot.slane %v16476_v5, 4  ;;  %v21335_v8 = vrot.slane %v15638_v4, 4  ;;  %v21336_v48 = vrot.slane %v15627_v19, 4 }
 0x230   : > { %21333 = vst [vmem:[#allocation73_spill] sm:$0xff] %v16478_v63  ;;  %v21041_v30 = vrot.slane %v16478_v63, 4  ;;  %v12698_v28 = vcombine.low %v1281_v49, %v1288_v13  ;;  %v12699_v27 = vcombine.high %v1281_v49, %v1288_v13  ;;  %6242 = vmatprep.subr.bf16.mxu0 %v21334_v22  ;;  %3389 = vrot.lane.b32.xlu1 %v16394_v59, %s21266_s20 }
 0x231   : > { %3381 = vrot.lane.b32.xlu0 %v16397_v51, %s21266_s20  ;;  %v1273_v36 = vsel %vm21212_vm0, %v21335_v8, %v21049_v26  ;;  %v21339_v22 = vcombine.low %v15939_v58, %v15942_v11  ;;  %v21343_v11 = vrot.slane %v15671_v57, 4  ;;  %v16638_v26 = vld [vmem:[%s14867_s24 + $0x30] sm:$0xff] }
 0x232   : > { %v1266_v29 = vsel %vm21212_vm0, %v21336_v48, %v21041_v30  ;;  %6360 = vmatprep.subr.bf16.mxu1 %v12699_v27  ;;  %v1274_v34 = vsel %vm1264_vm12, %v15638_v4, %v1273_v36  ;;  %v16503_v13 = vpop.permute.xlu1 %1102  ;;  %v21340_v4 = vcombine.high %v15969_v42, %v15972_v53 }
 0x233   : > { %v1267_v3 = vsel %vm1264_vm12, %v15627_v19, %v1266_v29  ;;  %21337 = vst [vmem:[#allocation74_spill] sm:$0xff] %v16503_v13  ;;  %v16505_v49 = vpop.permute.xlu0 %1094  ;;  %6361 = vmatpush2.bf16.msra.mxu1 %v12698_v28  ;;  %6243 = vmatpush2.bf16.msra.mxu0 %v21339_v22  ;;  %v21048_v8 = vrot.slane %v16503_v13, 4  ;;  %v21342_v19 = vrot.slane %v15682_v55, 4 }
 0x234   : > { %21338 = vst [vmem:[#allocation75_spill] sm:$0xff] %v16505_v49  ;;  %v21047_v48 = vrot.slane %v16505_v49, 4  ;;  %v12691_v27 = vcombine.low %v1267_v3, %v1274_v34  ;;  %v12692_v30 = vcombine.high %v1267_v3, %v1274_v34  ;;  %6244 = vmatprep.subr.bf16.mxu0 %v21340_v4  ;;  %2089 = vrot.lane.b32.xlu1 %v16078_v41, %s21341_s10  ;;  %v13943_v41 = vld [vmem:[%s20753_s1 + $0x10] ss:$28 sps:$4 sm:$0xff]  }
 0x235   : > { %2081 = vrot.lane.b32.xlu0 %v16081_v44, %s21341_s10  ;;  %v1146_v58 = vsel %vm21212_vm0, %v21342_v19, %v21048_v8  ;;  %v21344_v3 = vcombine.low %v15969_v42, %v15972_v53  ;;  %v21346_v53 = vrot.slane %v15031_v15, 4 }
 0x236   : > { %v1139_v28 = vsel %vm21212_vm0, %v21343_v11, %v21047_v48  ;;  %6362 = vmatprep.subr.bf16.mxu1 %v12692_v30  ;;  %v1147_v44 = vsel %vm1123_vm14, %v15682_v55, %v1146_v58  ;;  %v16536_v29 = vpop.permute.xlu1 %1948  ;;  %v13948_v30 = vld [vmem:[%s20753_s1 + $0x4c] ss:$28 sps:$4 sm:$0xff]  }
 0x237   : > { %v1140_v36 = vsel %vm1123_vm14, %v15671_v57, %v1139_v28  ;;  %v16538_v34 = vpop.permute.xlu0 %1940  ;;  %6363 = vmatpush2.bf16.msra.mxu1 %v12691_v27  ;;  %6245 = vmatpush2.bf16.msra.mxu0 %v21344_v3  ;;  %v21060_v22 = vrot.slane %v16536_v29, 4  ;;  %v21345_v57 = vrot.slane %v15029_v14, 4 }
 0x238   : > { %v21059_v55 = vrot.slane %v16538_v34, 4  ;;  %v12684_v4 = vcombine.low %v1140_v36, %v1147_v44  ;;  %v12685_v19 = vcombine.high %v1140_v36, %v1147_v44  ;;  %3373 = vrot.lane.b32.xlu1 %v16435_v20, %s21266_s20 }
 0x239   : > { %3365 = vrot.lane.b32.xlu0 %v16438_v33, %s21266_s20  ;;  %v1992_v42 = vsel %vm21212_vm0, %v21345_v57, %v21060_v22 }
 0x23a   : > { %v1985_v27 = vsel %vm21212_vm0, %v21346_v53, %v21059_v55  ;;  %6364 = vmatprep.subr.bf16.mxu1 %v12685_v19  ;;  %6247 = vmatmul.mubr.bf16.vlgmr.msra.gmra.mxu0 %v13943_v41  ;;  %v1993_v58 = vsel %vm1969_vm1, %v15029_v14, %v1992_v42  ;;  %v16566_v28 = vpop.permute.xlu1 %1086  ;;  %v21349_v14 = vrot.slane %v15729_v43, 4 }
 0x23b   : > { %v1986_v11 = vsel %vm1969_vm1, %v15031_v15, %v1985_v27  ;;  %21347 = vst [vmem:[#allocation76_spill] sm:$0xff] %v16566_v28  ;;  %v16568_v44 = vpop.permute.xlu0 %1078  ;;  %6365 = vmatpush2.bf16.msra.mxu1 %v12684_v4  ;;  %6256 = vmatprep.mubr.bf16.mxu0 %v13948_v30  ;;  %v21046_v36 = vrot.slane %v16566_v28, 4  ;;  %v21350_v30 = vrot.slane %v15715_v45, 4  ;;  %v13951_v27 = vld [vmem:[%s20753_s1 + $0x84] ss:$28 sps:$4 sm:$0xff]  }
 0x23c   : > { %21348 = vst [vmem:[#allocation77_spill] sm:$0xff] %v16568_v44  ;;  %v21045_v3 = vrot.slane %v16568_v44, 4  ;;  %v12768_v19 = vcombine.low %v1986_v11, %v1993_v58  ;;  %v12769_v41 = vcombine.high %v1986_v11, %v1993_v58  ;;  %2073 = vrot.lane.b32.xlu1 %v16123_v1, %s21341_s10  ;;  %v13950_v1 = vld [vmem:[%s20753_s1 + $0x48] ss:$28 sps:$4 sm:$0xff]   ;;  %v16601_v58 = vld [vmem:[%s14867_s24 + $0x54] sm:$0xff] }
 0x23d   : > { %2065 = vrot.lane.b32.xlu0 %v16126_v54, %s21341_s10  ;;  %v1132_v15 = vsel %vm21212_vm0, %v21349_v14, %v21046_v36  ;;  %v16604_v11 = vld [vmem:[%s14867_s24 + $0x78] sm:$0xff] }
 0x23e   : > { %v1125_v4 = vsel %vm21212_vm0, %v21350_v30, %v21045_v3  ;;  %6403 = vmatprep.subr.bf16.mxu0 %v12769_v41  ;;  %v1133_v54 = vsel %vm1123_vm14, %v15729_v43, %v1132_v15  ;;  %v16593_v42 = vpop.permute.xlu1 %1932  ;;  %v21352_v30 = vrot.slane %v15058_v32, 4  ;;  %v17067_v44 = vld [vmem:[%s14867_s24 + $0x58] sm:$0xff] }
 0x23f   : > { %v1126_v57 = vsel %vm1123_vm14, %v15715_v45, %v1125_v4  ;;  %v16595_v53 = vpop.permute.xlu0 %1924  ;;  %6404 = vmatpush1.bf16.msra.mxu0 %v12768_v19  ;;  %v21053_v41 = vrot.slane %v16593_v42, 4 }
 0x240   : > { %v21051_v43 = vrot.slane %v16595_v53, 4  ;;  %v12677_v14 = vcombine.low %v1126_v57, %v1133_v54  ;;  %v12678_v45 = vcombine.high %v1126_v57, %v1133_v54  ;;  %3249 = vrot.lane.b32.xlu1 %v16394_v59, %s21351_s8  ;;  %v21353_v54 = vrot.slane %v15047_v24, 4 }
 0x241   : > { %3241 = vrot.lane.b32.xlu0 %v16397_v51, %s21351_s8  ;;  %v1978_v4 = vsel %vm21212_vm0, %v21352_v30, %v21053_v41  ;;  %v16635_v30 = vld [vmem:[%s14867_s24 + $0xc] sm:$0xff] }
 0x242   : > { %v1971_v57 = vsel %vm21212_vm0, %v21353_v54, %v21051_v43  ;;  %6366 = vmatprep.subr.bf16.mxu1 %v12678_v45  ;;  %6257 = vmatmul.mubr.bf16.gmra.mxu0 %v13950_v1  ;;  %v1979_v3 = vsel %vm1969_vm1, %v15058_v32, %v1978_v4  ;;  %v16630_v48 = vpop.permute.xlu1 %961 }
 0x243   : > { %v1972_v36 = vsel %vm1969_vm1, %v15047_v24, %v1971_v57  ;;  %21354 = vst [vmem:[#allocation78_spill] sm:$0xff] %v16630_v48  ;;  %v16632_v8 = vpop.permute.xlu0 %953  ;;  %6367 = vmatpush2.bf16.msra.mxu1 %v12677_v14  ;;  %6266 = vmatprep.mubr.bf16.mxu0 %v13951_v27  ;;  %v21052_v1 = vrot.slane %v16630_v48, 4  ;;  %v21356_v14 = vrot.slane %v15757_v50, 4  ;;  %v16661_v57 = vld [vmem:[%s14867_s24 + $0x84] sm:$0xff]  ;;  %v13953_v24 = vld [vmem:[%s20753_s1 + $0x80] ss:$28 sps:$4 sm:$0xff]  }
 0x244   : > { %21355 = vst [vmem:[#allocation79_spill] sm:$0xff] %v16632_v8  ;;  %v21054_v45 = vrot.slane %v16632_v8, 4  ;;  %v12761_v32 = vcombine.low %v1972_v36, %v1979_v3  ;;  %v12762_v4 = vcombine.high %v1972_v36, %v1979_v3  ;;  %3233 = vrot.lane.b32.xlu1 %v16435_v20, %s21351_s8  ;;  %v21357_v36 = vrot.slane %v15743_v62, 4 }
 0x245   : > { %3225 = vrot.lane.b32.xlu0 %v16438_v33, %s21351_s8  ;;  %v1005_v54 = vsel %vm21212_vm0, %v21356_v14, %v21052_v1 }
 0x246   : > { %v998_v3 = vsel %vm21212_vm0, %v21357_v36, %v21054_v45  ;;  %6405 = vmatprep.subr.bf16.mxu0 %v12762_v4  ;;  %v1006_v43 = vsel %vm982_vm15, %v15757_v50, %v1005_v54  ;;  %v16673_v1 = vpop.permute.xlu1 %1807 }
 0x247   : > { %v999_v14 = vsel %vm982_vm15, %v15743_v62, %v998_v3  ;;  %v16675_v41 = vpop.permute.xlu0 %1799  ;;  %6406 = vmatpush1.bf16.msra.mxu0 %v12761_v32  ;;  %v21056_v36 = vrot.slane %v16673_v1, 4  ;;  %v21358_v62 = vrot.slane %v15080_v46, 4  ;;  %v21359_v32 = vrot.slane %v15069_v38, 4 }
 0x248   : > { %v21055_v45 = vrot.slane %v16675_v41, 4  ;;  %v12670_v4 = vcombine.low %v999_v14, %v1006_v43  ;;  %v12671_v27 = vcombine.high %v999_v14, %v1006_v43  ;;  %1950 = vrot.lane.b32.xlu1 %v16661_v57, %s21281_s22 }
 0x249   : > { %1942 = vrot.lane.b32.xlu0 %v16664_v18, %s21281_s22  ;;  %v1851_v50 = vsel %vm21212_vm0, %v21358_v62, %v21056_v36  ;;  %v14597_v62 = vld [vmem:[%s20753_s1 + $0xc] ss:$28 sps:$4 sm:$0xff]   ;;  %v16721_v36 = vld [vmem:[%s14867_s24 + $0x3c] sm:$0xff] }
 0x24a   : > { %v1844_v54 = vsel %vm21212_vm0, %v21359_v32, %v21055_v45  ;;  %6368 = vmatprep.subr.bf16.mxu1 %v12671_v27  ;;  %6267 = vmatmul.mubr.bf16.gmra.mxu0 %v13953_v24  ;;  %v1852_v43 = vsel %vm1828_vm2, %v15080_v46, %v1851_v50  ;;  %v16697_v14 = vpop.permute.xlu1 %945 }
 0x24b   : > { %v1845_v3 = vsel %vm1828_vm2, %v15069_v38, %v1844_v54  ;;  %21360 = vst [vmem:[#allocation80_spill] sm:$0xff] %v16697_v14  ;;  %v16699_v19 = vpop.permute.xlu0 %937  ;;  %6369 = vmatpush2.bf16.msra.mxu1 %v12670_v4  ;;  %6435 = vmatprep.mubr.bf16.mxu0 %v14597_v62  ;;  %v21057_v24 = vrot.slane %v16697_v14, 4  ;;  %v21362_v38 = vld [vmem:[#allocation43_spill] sm:$0xff]  ;;  %v21364_v54 = vld [vmem:[#allocation42_spill] sm:$0xff] }
 0x24c   : > { %21361 = vst [vmem:[#allocation81_spill] sm:$0xff] %v16699_v19  ;;  %v21058_v27 = vrot.slane %v16699_v19, 4  ;;  %v12754_v32 = vcombine.low %v1845_v3, %v1852_v43  ;;  %v12755_v46 = vcombine.high %v1845_v3, %v1852_v43  ;;  %3669 = vrot.lane.b32.xlu1 %v16394_v59, %s21286_s23  ;;  %v21363_v4 = vrot.slane %v21362_v38, 4  ;;  %v16724_v43 = vld [vmem:[%s14867_s24 + $0x18] sm:$0xff] }
 0x24d   : > { %3661 = vrot.lane.b32.xlu0 %v16397_v51, %s21286_s23  ;;  %v21365_v62 = vrot.slane %v21364_v54, 4 }
 0x24e   : > { %v991_v50 = vsel %vm21212_vm0, %v21363_v4, %v21057_v24  ;;  %6407 = vmatprep.subr.bf16.mxu0 %v12755_v46  ;;  %v16730_v3 = vpop.permute.xlu1 %1791 }
 0x24f   : > { %v984_v45 = vsel %vm21212_vm0, %v21365_v62, %v21058_v27  ;;  %v992_v59 = vsel %vm982_vm15, %v21362_v38, %v991_v50  ;;  %v16732_v4 = vpop.permute.xlu0 %1783  ;;  %6408 = vmatpush1.bf16.msra.mxu0 %v12754_v32  ;;  %v21061_v24 = vrot.slane %v16730_v3, 4  ;;  %v21368_v32 = vld [vmem:[#allocation16_spill] sm:$0xff] }
 0x250   : > { %v985_v51 = vsel %vm982_vm15, %v21364_v54, %v984_v45  ;;  %v21069_v62 = vrot.slane %v16732_v4, 4  ;;  %1934 = vrot.lane.b32.xlu1 %v16721_v36, %s21281_s22  ;;  %v21366_v45 = vld [vmem:[#allocation17_spill] sm:$0xff]  ;;  %v21369_v50 = vrot.slane %v21368_v32, 4 }
 0x251   : > { %v12663_v27 = vcombine.low %v985_v51, %v992_v59  ;;  %v12664_v15 = vcombine.high %v985_v51, %v992_v59  ;;  %1926 = vrot.lane.b32.xlu0 %v16724_v43, %s21281_s22  ;;  %v21367_v46 = vrot.slane %v21366_v45, 4  ;;  %s14729_s22 = smov 99  }
 0x252   : > { %v1830_v54 = vsel %vm21212_vm0, %v21369_v50, %v21069_v62  ;;  %v16754_v55 = vpop.permute.xlu1 %3076 }
 0x253   : > { %v1837_v38 = vsel %vm21212_vm0, %v21367_v46, %v21061_v24  ;;  %6370 = vmatprep.subr.bf16.mxu1 %v12664_v15  ;;  %v1831_v51 = vsel %vm1828_vm2, %v21368_v32, %v1830_v54  ;;  %21370 = vst [vmem:[#allocation43_spill] sm:$0xff] %v16754_v55  ;;  %v16756_v22 = vpop.permute.xlu0 %3068  ;;  %v21067_v46 = vrot.slane %v16754_v55, 4  ;;  %v21372_v15 = vrot.slane %v15811_v25, 4 }
 0x254   : > { %v1838_v59 = vsel %vm1828_vm2, %v21366_v45, %v1837_v38  ;;  %21371 = vst [vmem:[#allocation42_spill] sm:$0xff] %v16756_v22  ;;  %6371 = vmatpush2.bf16.msra.mxu1 %v12663_v27  ;;  %v21066_v24 = vrot.slane %v16756_v22, 4  ;;  %3653 = vrot.lane.b32.xlu1 %v16435_v20, %s21286_s23  ;;  %v21373_v27 = vld [vmem:[#allocation44_spill] sm:$0xff]  ;;  %v14598_v20 = vld [vmem:[%s20753_s1] ss:$28 sps:$4 sm:$0xff]  }
 0x255   : > { %v12747_v19 = vcombine.low %v1831_v51, %v1838_v59  ;;  %v12748_v14 = vcombine.high %v1831_v51, %v1838_v59  ;;  %3645 = vrot.lane.b32.xlu0 %v16438_v33, %s21286_s23  ;;  %v3120_v45 = vsel %vm21212_vm0, %v21372_v15, %v21067_v46  ;;  %v21374_v38 = vrot.slane %v21373_v27, 4 }
 0x256   : > { %v3121_v33 = vsel %vm21105_vm13, %v15811_v25, %v3120_v45  ;;  %v16781_v54 = vpop.permute.xlu1 %1666  ;;  %v21375_v25 = vld [vmem:[#allocation19_spill] sm:$0xff] }
 0x257   : > { %v3113_v32 = vsel %vm21212_vm0, %v21374_v38, %v21066_v24  ;;  %6409 = vmatprep.subr.bf16.mxu0 %v12748_v14  ;;  %6373 = vmatmul.mubr.bf16.vlgmr.msra.gmra.mxu1 %v14598_v20  ;;  %v16783_v59 = vpop.permute.xlu0 %1658  ;;  %v14599_v14 = vld [vmem:[%s20753_s1 + $0x3c] ss:$28 sps:$4 sm:$0xff]   ;;  %v21068_v51 = vrot.slane %v16781_v54, 4 }
 0x258   : > { %v3114_v50 = vsel %vm21105_vm13, %v21373_v27, %v3113_v32  ;;  %6410 = vmatpush1.bf16.msra.mxu0 %v12747_v19  ;;  %6382 = vmatprep.mubr.bf16.mxu1 %v14599_v14  ;;  %v21074_v15 = vrot.slane %v16783_v59, 4  ;;  %v21376_v19 = vrot.slane %v21375_v25, 4  ;;  %v21377_v27 = vld [vmem:[#allocation18_spill] sm:$0xff] }
 0x259   : > { %v12880_v38 = vcombine.low %v3114_v50, %v3121_v33  ;;  %v12881_v20 = vcombine.high %v3114_v50, %v3121_v33  ;;  %1809 = vrot.lane.b32.xlu1 %v16661_v57, %s21289_s17  ;;  %1801 = vrot.lane.b32.xlu0 %v16664_v18, %s21289_s17  ;;  %v21378_v32 = vrot.slane %v21377_v27, 4 }
 0x25a   : > { %v1710_v45 = vsel %vm21212_vm0, %v21376_v19, %v21068_v51  ;;  %v16808_v24 = vpop.permute.xlu1 %3060 }
 0x25b   : > { %v1703_v14 = vsel %vm21212_vm0, %v21378_v32, %v21074_v15  ;;  %6466 = vmatprep.subr.bf16.mxu1 %v12881_v20  ;;  %v1711_v33 = vsel %vm1687_vm4, %v21375_v25, %v1710_v45  ;;  %21379 = vst [vmem:[#allocation17_spill] sm:$0xff] %v16808_v24  ;;  %v16810_v46 = vpop.permute.xlu0 %3052  ;;  %v21073_v19 = vrot.slane %v16808_v24, 4  ;;  %v21381_v20 = vrot.slane %v15853_v0, 4  ;;  %v14600_v32 = vld [vmem:[%s20753_s1 + $0x38] ss:$28 sps:$4 sm:$0xff]  }
 0x25c   : > { %v1704_v50 = vsel %vm1687_vm4, %v21377_v27, %v1703_v14  ;;  %21380 = vst [vmem:[#allocation16_spill] sm:$0xff] %v16810_v46  ;;  %6467 = vmatpush1.bf16.msra.mxu1 %v12880_v38  ;;  %v21072_v51 = vrot.slane %v16810_v46, 4  ;;  %v21382_v38 = vld [vmem:[#allocation45_spill] sm:$0xff] }
 0x25d   : > { %v12740_v62 = vcombine.low %v1704_v50, %v1711_v33  ;;  %v12741_v22 = vcombine.high %v1704_v50, %v1711_v33  ;;  %822 = vrot.lane.b32.xlu1 %v16661_v57, %s21322_s18  ;;  %814 = vrot.lane.b32.xlu0 %v16664_v18, %s21322_s18  ;;  %v3106_v25 = vsel %vm21212_vm0, %v21381_v20, %v21073_v19  ;;  %v21383_v45 = vrot.slane %v21382_v38, 4 }
 0x25e   : > { %v3107_v14 = vsel %vm21105_vm13, %v15853_v0, %v3106_v25  ;;  %v16835_v50 = vpop.permute.xlu1 %1650  ;;  %v21384_v0 = vld [vmem:[#allocation21_spill] sm:$0xff] }
 0x25f   : > { %v3099_v27 = vsel %vm21212_vm0, %v21383_v45, %v21072_v51  ;;  %6411 = vmatprep.subr.bf16.mxu0 %v12741_v22  ;;  %6383 = vmatmul.mubr.bf16.gmra.mxu1 %v14600_v32  ;;  %v16837_v20 = vpop.permute.xlu0 %1642  ;;  %v14601_v22 = vld [vmem:[%s20753_s1 + $0x74] ss:$28 sps:$4 sm:$0xff]   ;;  %v21077_v45 = vrot.slane %v16835_v50, 4 }
 0x260   : > { %v3100_v33 = vsel %vm21105_vm13, %v21382_v38, %v3099_v27  ;;  %6412 = vmatpush1.bf16.msra.mxu0 %v12740_v62  ;;  %6392 = vmatprep.mubr.bf16.mxu1 %v14601_v22  ;;  %v21084_v32 = vrot.slane %v16837_v20, 4  ;;  %v21385_v62 = vrot.slane %v21384_v0, 4  ;;  %v21386_v38 = vld [vmem:[#allocation20_spill] sm:$0xff] }
 0x261   : > { %v12873_v51 = vcombine.low %v3100_v33, %v3107_v14  ;;  %v12874_v19 = vcombine.high %v3100_v33, %v3107_v14  ;;  %1793 = vrot.lane.b32.xlu1 %v16721_v36, %s21289_s17  ;;  %1785 = vrot.lane.b32.xlu0 %v16724_v43, %s21289_s17  ;;  %v21387_v27 = vrot.slane %v21386_v38, 4  ;;  %s14727_s17 = smov 98  }
 0x262   : > { %v1696_v25 = vsel %vm21212_vm0, %v21385_v62, %v21077_v45  ;;  %v16862_v15 = vpop.permute.xlu1 %2935 }
 0x263   : > { %v1689_v22 = vsel %vm21212_vm0, %v21387_v27, %v21084_v32  ;;  %6468 = vmatprep.subr.bf16.mxu1 %v12874_v19  ;;  %v1697_v14 = vsel %vm1687_vm4, %v21384_v0, %v1696_v25  ;;  %21388 = vst [vmem:[#allocation44_spill] sm:$0xff] %v16862_v15  ;;  %v16864_v46 = vpop.permute.xlu0 %2927  ;;  %v21083_v62 = vrot.slane %v16862_v15, 4  ;;  %v21390_v19 = vrot.slane %v15897_v2, 4 }
 0x264   : > { %v1690_v33 = vsel %vm1687_vm4, %v21386_v38, %v1689_v22  ;;  %21389 = vst [vmem:[#allocation19_spill] sm:$0xff] %v16864_v46  ;;  %6469 = vmatpush1.bf16.msra.mxu1 %v12873_v51  ;;  %v21082_v45 = vrot.slane %v16864_v46, 4  ;;  %v21391_v51 = vrot.slane %v15886_v9, 4  ;;  %v14602_v38 = vld [vmem:[%s20753_s1 + $0x70] ss:$28 sps:$4 sm:$0xff]  }
 0x265   : > { %v12733_v24 = vcombine.low %v1690_v33, %v1697_v14  ;;  %v12734_v55 = vcombine.high %v1690_v33, %v1697_v14  ;;  %806 = vrot.lane.b32.xlu1 %v16721_v36, %s21322_s18  ;;  %798 = vrot.lane.b32.xlu0 %v16724_v43, %s21322_s18  ;;  %v2979_v0 = vsel %vm21212_vm0, %v21390_v19, %v21083_v62 }
 0x266   : > { %v2972_v25 = vsel %vm21212_vm0, %v21391_v51, %v21082_v45  ;;  %v2980_v27 = vsel %vm21104_vm11, %v15897_v2, %v2979_v0  ;;  %v16889_v14 = vpop.permute.xlu1 %1525  ;;  %v21394_v0 = vld [vmem:[#allocation22_spill] sm:$0xff] }
 0x267   : > { %6413 = vmatprep.subr.bf16.mxu0 %v12734_v55  ;;  %6393 = vmatmul.mubr.bf16.gmra.mxu1 %v14602_v38  ;;  %v2973_v22 = vsel %vm21104_vm11, %v15886_v9, %v2972_v25  ;;  %v16891_v33 = vpop.permute.xlu0 %1517  ;;  %v14603_v55 = vld [vmem:[%s20753_s1 + $0x14] ss:$28 sps:$4 sm:$0xff]   ;;  %v21085_v19 = vrot.slane %v16889_v14, 4  ;;  %v21392_v9 = vld [vmem:[#allocation23_spill] sm:$0xff]  ;;  %v21395_v25 = vrot.slane %v21394_v0, 4 }
 0x268   : > { %6414 = vmatpush1.bf16.msra.mxu0 %v12733_v24  ;;  %6498 = vmatprep.mubr.bf16.mxu1 %v14603_v55  ;;  %v21090_v51 = vrot.slane %v16891_v33, 4  ;;  %v12866_v38 = vcombine.low %v2973_v22, %v2980_v27  ;;  %v12867_v45 = vcombine.high %v2973_v22, %v2980_v27  ;;  %v21393_v2 = vrot.slane %v21392_v9, 4 }
 0x269   : > { %1668 = vrot.lane.b32.xlu1 %v16661_v57, %s21297_s16  ;;  %1660 = vrot.lane.b32.xlu0 %v16664_v18, %s21297_s16 }
 0x26a   : > { %v1569_v24 = vsel %vm21212_vm0, %v21393_v2, %v21085_v19  ;;  %v1562_v55 = vsel %vm21212_vm0, %v21395_v25, %v21090_v51  ;;  %6470 = vmatprep.subr.bf16.mxu1 %v12867_v45  ;;  %v16916_v62 = vpop.permute.xlu1 %2919  ;;  %v21398_v45 = vld [vmem:[#allocation51_spill] sm:$0xff] }
 0x26b   : > { %v1570_v27 = vsel %vm1546_vm6, %v21392_v9, %v1569_v24  ;;  %v1563_v22 = vsel %vm1546_vm6, %v21394_v0, %v1562_v55  ;;  %21396 = vst [vmem:[#allocation18_spill] sm:$0xff] %v16916_v62  ;;  %v16918_v32 = vpop.permute.xlu0 %2911  ;;  %6471 = vmatpush1.bf16.msra.mxu1 %v12866_v38  ;;  %v21091_v2 = vrot.slane %v16916_v62, 4  ;;  %v21399_v9 = vrot.slane %v21398_v45, 4  ;;  %v21400_v38 = vld [vmem:[#allocation50_spill] sm:$0xff] }
 0x26c   : > { %21397 = vst [vmem:[#allocation45_spill] sm:$0xff] %v16918_v32  ;;  %v21096_v19 = vrot.slane %v16918_v32, 4  ;;  %v12726_v46 = vcombine.low %v1563_v22, %v1570_v27  ;;  %v12727_v15 = vcombine.high %v1563_v22, %v1570_v27  ;;  %v21401_v0 = vrot.slane %v21400_v38, 4 }
 0x26d   : > { %681 = vrot.lane.b32.xlu1 %v16661_v57, %s21266_s20  ;;  %673 = vrot.lane.b32.xlu0 %v16664_v18, %s21266_s20  ;;  %v2965_v24 = vsel %vm21212_vm0, %v21399_v9, %v21091_v2 }
 0x26e   : > { %v2958_v25 = vsel %vm21212_vm0, %v21401_v0, %v21096_v19  ;;  %6415 = vmatprep.subr.bf16.mxu0 %v12727_v15  ;;  %v2966_v55 = vsel %vm21104_vm11, %v21398_v45, %v2965_v24  ;;  %v16940_v22 = vpop.permute.xlu1 %1509  ;;  %v21402_v15 = vld [vmem:[#allocation25_spill] sm:$0xff] }
 0x26f   : > { %v2959_v27 = vsel %vm21104_vm11, %v21400_v38, %v2958_v25  ;;  %v16942_v51 = vpop.permute.xlu0 %1501  ;;  %6416 = vmatpush1.bf16.msra.mxu0 %v12726_v46  ;;  %v21097_v9 = vrot.slane %v16940_v22, 4  ;;  %v21403_v45 = vrot.slane %v21402_v15, 4  ;;  %v21404_v46 = vld [vmem:[#allocation24_spill] sm:$0xff]  ;;  %vm21414_vm11 = vcmask 261120  }
 0x270   : > { %v21103_v2 = vrot.slane %v16942_v51, 4  ;;  %v12859_v32 = vcombine.low %v2959_v27, %v2966_v55  ;;  %v12860_v62 = vcombine.high %v2959_v27, %v2966_v55  ;;  %v21405_v38 = vrot.slane %v21404_v46, 4  ;;  %vm21415_vm13 = vmmov %vm21414_vm11 }
 0x271   : > { %1652 = vrot.lane.b32.xlu1 %v16721_v36, %s21297_s16  ;;  %1644 = vrot.lane.b32.xlu0 %v16724_v43, %s21297_s16  ;;  %v1555_v24 = vsel %vm21212_vm0, %v21403_v45, %v21097_v9  ;;  %s14725_s16 = smov 97  }
 0x272   : > { %v1548_v0 = vsel %vm21212_vm0, %v21405_v38, %v21103_v2  ;;  %6472 = vmatprep.subr.bf16.mxu1 %v12860_v62  ;;  %v1556_v25 = vsel %vm1546_vm6, %v21402_v15, %v1555_v24  ;;  %v16964_v27 = vpop.permute.xlu1 %2794  ;;  %v21408_v62 = vrot.slane %v16027_v37, 4 }
 0x273   : > { %v1549_v55 = vsel %vm1546_vm6, %v21404_v46, %v1548_v0  ;;  %21406 = vst [vmem:[#allocation21_spill] sm:$0xff] %v16964_v27  ;;  %v16966_v19 = vpop.permute.xlu0 %2786  ;;  %6473 = vmatpush1.bf16.msra.mxu1 %v12859_v32  ;;  %v21102_v45 = vrot.slane %v16964_v27, 4  ;;  %v21409_v32 = vrot.slane %v16016_v12, 4 }
 0x274   : > { %21407 = vst [vmem:[#allocation20_spill] sm:$0xff] %v16966_v19  ;;  %v21106_v9 = vrot.slane %v16966_v19, 4  ;;  %v12719_v8 = vcombine.low %v1549_v55, %v1556_v25  ;;  %v12720_v48 = vcombine.high %v1549_v55, %v1556_v25 }
 0x275   : > { %665 = vrot.lane.b32.xlu1 %v16721_v36, %s21266_s20  ;;  %657 = vrot.lane.b32.xlu0 %v16724_v43, %s21266_s20  ;;  %v2838_v15 = vsel %vm21212_vm0, %v21408_v62, %v21102_v45 }
 0x276   : > { %v2831_v24 = vsel %vm21212_vm0, %v21409_v32, %v21106_v9  ;;  %6417 = vmatprep.subr.bf16.mxu0 %v12720_v48  ;;  %v2839_v46 = vsel %vm2815_vm9, %v16027_v37, %v2838_v15  ;;  %v16988_v0 = vpop.permute.xlu1 %2512 }
 0x277   : > { %v2832_v38 = vsel %vm2815_vm9, %v16016_v12, %v2831_v24  ;;  %v16990_v25 = vpop.permute.xlu0 %2504  ;;  %6418 = vmatpush1.bf16.msra.mxu0 %v12719_v8  ;;  %v21107_v55 = vrot.slane %v16988_v0, 4  ;;  %v21410_v12 = vld [vmem:[#allocation27_spill] sm:$0xff]  ;;  %v21412_v8 = vld [vmem:[#allocation26_spill] sm:$0xff] }
 0x278   : > { %v21113_v62 = vrot.slane %v16990_v25, 4  ;;  %v12852_v45 = vcombine.low %v2832_v38, %v2839_v46  ;;  %v12853_v2 = vcombine.high %v2832_v38, %v2839_v46  ;;  %v21411_v37 = vrot.slane %v21410_v12, 4 }
 0x279   : > { %1527 = vrot.lane.b32.xlu1 %v16661_v57, %s21303_s14  ;;  %1519 = vrot.lane.b32.xlu0 %v16664_v18, %s21303_s14  ;;  %v21413_v15 = vrot.slane %v21412_v8, 4 }
 0x27a   : > { %v2556_v48 = vsel %vm21212_vm0, %v21411_v37, %v21107_v55  ;;  %6474 = vmatprep.subr.bf16.mxu1 %v12853_v2  ;;  %v17012_v38 = vpop.permute.xlu1 %2778  ;;  %v21418_v2 = vrot.slane %v16084_v56, 4 }
 0x27b   : > { %v2549_v32 = vsel %vm21212_vm0, %v21413_v15, %v21113_v62  ;;  %v2557_v24 = vsel %vm21414_vm11, %v21410_v12, %v2556_v48  ;;  %21416 = vst [vmem:[#allocation23_spill] sm:$0xff] %v17012_v38  ;;  %v17014_v9 = vpop.permute.xlu0 %2770  ;;  %6475 = vmatpush1.bf16.msra.mxu1 %v12852_v45  ;;  %v21112_v37 = vrot.slane %v17012_v38, 4  ;;  %v21419_v45 = vrot.slane %v16065_v35, 4 }
 0x27c   : > { %v2550_v46 = vsel %vm21415_vm13, %v21412_v8, %v2549_v32  ;;  %21417 = vst [vmem:[#allocation22_spill] sm:$0xff] %v17014_v9  ;;  %v21114_v55 = vrot.slane %v17014_v9, 4  ;;  %vm21424_vm13 = vmmov %vm21414_vm11 }
 0x27d   : > { %v12824_v19 = vcombine.low %v2550_v46, %v2557_v24  ;;  %v12825_v27 = vcombine.high %v2550_v46, %v2557_v24  ;;  %539 = vrot.lane.b32.xlu1 %v16661_v57, %s21351_s8  ;;  %531 = vrot.lane.b32.xlu0 %v16664_v18, %s21351_s8  ;;  %v2824_v12 = vsel %vm21212_vm0, %v21418_v2, %v21112_v37 }
 0x27e   : > { %v2817_v48 = vsel %vm21212_vm0, %v21419_v45, %v21114_v55  ;;  %v2825_v8 = vsel %vm2815_vm9, %v16084_v56, %v2824_v12  ;;  %v17036_v32 = vpop.permute.xlu1 %2496 }
 0x27f   : > { %6419 = vmatprep.subr.bf16.mxu0 %v12825_v27  ;;  %v2818_v15 = vsel %vm2815_vm9, %v16065_v35, %v2817_v48  ;;  %v17038_v24 = vpop.permute.xlu0 %2488  ;;  %v21115_v46 = vrot.slane %v17036_v32, 4  ;;  %v21420_v35 = vld [vmem:[#allocation29_spill] sm:$0xff]  ;;  %v21422_v27 = vld [vmem:[#allocation28_spill] sm:$0xff] }
 0x280   : > { %6420 = vmatpush2.bf16.msra.mxu0 %v12824_v19  ;;  %v21122_v2 = vrot.slane %v17038_v24, 4  ;;  %v12845_v37 = vcombine.low %v2818_v15, %v2825_v8  ;;  %v12846_v62 = vcombine.high %v2818_v15, %v2825_v8  ;;  %v21421_v56 = vrot.slane %v21420_v35, 4 }
 0x281   : > { %1511 = vrot.lane.b32.xlu1 %v16721_v36, %s21303_s14  ;;  %1503 = vrot.lane.b32.xlu0 %v16724_v43, %s21303_s14  ;;  %v21423_v12 = vrot.slane %v21422_v27, 4  ;;  %s14741_s14 = smov 82  }
 0x282   : > { %v2542_v19 = vsel %vm21212_vm0, %v21421_v56, %v21115_v46  ;;  %6476 = vmatprep.subr.bf16.mxu1 %v12846_v62  ;;  %v17060_v15 = vpop.permute.xlu1 %2653  ;;  %v17070_v62 = vld [vmem:[%s14867_s24 + $0x7c] sm:$0xff] }
 0x283   : > { %v2535_v45 = vsel %vm21212_vm0, %v21423_v12, %v21122_v2  ;;  %v2543_v48 = vsel %vm21414_vm11, %v21420_v35, %v2542_v19  ;;  %21425 = vst [vmem:[#allocation51_spill] sm:$0xff] %v17060_v15  ;;  %v17062_v55 = vpop.permute.xlu0 %2645  ;;  %6477 = vmatpush1.bf16.msra.mxu1 %v12845_v37  ;;  %v21123_v56 = vrot.slane %v17060_v15, 4  ;;  %v21427_v35 = vrot.slane %v16143_v61, 4 }
 0x284   : > { %v2536_v8 = vsel %vm21424_vm13, %v21422_v27, %v2535_v45  ;;  %21426 = vst [vmem:[#allocation50_spill] sm:$0xff] %v17062_v55  ;;  %v21124_v46 = vrot.slane %v17062_v55, 4  ;;  %v21428_v27 = vrot.slane %v16132_v7, 4  ;;  %v17104_v45 = vld [vmem:[%s14867_s24 + $0x34] sm:$0xff]  ;;  %vm21434_vm11 = vcmask 490496  }
 0x285   : > { %v12817_v9 = vcombine.low %v2536_v8, %v2543_v48  ;;  %v12818_v38 = vcombine.high %v2536_v8, %v2543_v48  ;;  %523 = vrot.lane.b32.xlu1 %v16721_v36, %s21351_s8  ;;  %515 = vrot.lane.b32.xlu0 %v16724_v43, %s21351_s8  ;;  %v2697_v19 = vsel %vm21212_vm0, %v21427_v35, %v21123_v56  ;;  %vm21435_vm13 = vmmov %vm21434_vm11 }
 0x286   : > { %v2690_v12 = vsel %vm21212_vm0, %v21428_v27, %v21124_v46  ;;  %v2698_v48 = vsel %vm2674_vm8, %v16143_v61, %v2697_v19  ;;  %v17094_v2 = vpop.permute.xlu1 %2371  ;;  %v17101_v46 = vld [vmem:[%s14867_s24 + $0x10] sm:$0xff]  ;;  %v21430_v61 = vld [vmem:[#allocation31_spill] sm:$0xff] }
 0x287   : > { %6421 = vmatprep.subr.bf16.mxu0 %v12818_v38  ;;  %v2691_v8 = vsel %vm2674_vm8, %v16132_v7, %v2690_v12  ;;  %v17096_v37 = vpop.permute.xlu0 %2363  ;;  %v21133_v35 = vrot.slane %v17094_v2, 4  ;;  %v21432_v12 = vld [vmem:[#allocation30_spill] sm:$0xff] }
 0x288   : > { %21429 = vst [vmem:[#allocation25_spill] sm:$0xff] %v17096_v37  ;;  %6422 = vmatpush2.bf16.msra.mxu0 %v12817_v9  ;;  %v21135_v56 = vrot.slane %v17096_v37, 4  ;;  %v12838_v27 = vcombine.low %v2691_v8, %v2698_v48  ;;  %v12839_v38 = vcombine.high %v2691_v8, %v2698_v48  ;;  %v21431_v9 = vrot.slane %v21430_v61, 4 }
 0x289   : > { %2514 = vrot.lane.b32.xlu1 %v16661_v57, %s21312_s25  ;;  %2506 = vrot.lane.b32.xlu0 %v16664_v18, %s21312_s25  ;;  %v21433_v48 = vrot.slane %v21432_v12, 4 }
 0x28a   : > { %v2415_v19 = vsel %vm21212_vm0, %v21431_v9, %v21133_v35  ;;  %6478 = vmatprep.subr.bf16.mxu1 %v12839_v38  ;;  %v17128_v28 = vpop.permute.xlu1 %2637 }
 0x28b   : > { %v2408_v8 = vsel %vm21212_vm0, %v21433_v48, %v21135_v56  ;;  %v2416_v15 = vsel %vm21434_vm11, %v21430_v61, %v2415_v19  ;;  %21436 = vst [vmem:[#allocation24_spill] sm:$0xff] %v17128_v28  ;;  %v17130_v49 = vpop.permute.xlu0 %2629  ;;  %6479 = vmatpush1.bf16.msra.mxu1 %v12838_v27  ;;  %v21134_v9 = vrot.slane %v17128_v28, 4  ;;  %v21438_v61 = vrot.slane %v16189_v16, 4  ;;  %v17158_v28 = vpop.f32.mrf.mxu0 }
 0x28c   : > { %v2409_v7 = vsel %vm21435_vm13, %v21432_v12, %v2408_v8  ;;  %21437 = vst [vmem:[#allocation27_spill] sm:$0xff] %v17130_v49  ;;  %v21140_v35 = vrot.slane %v17130_v49, 4  ;;  %v21439_v27 = vrot.slane %v16178_v47, 4  ;;  %vm21446_vm13 = vmmov %vm21434_vm11 }
 0x28d   : > { %v12810_v48 = vcombine.low %v2409_v7, %v2416_v15  ;;  %v12811_v38 = vcombine.high %v2409_v7, %v2416_v15  ;;  %2498 = vrot.lane.b32.xlu1 %v16721_v36, %s21312_s25  ;;  %2490 = vrot.lane.b32.xlu0 %v16724_v43, %s21312_s25  ;;  %v2683_v19 = vsel %vm21212_vm0, %v21438_v61, %v21134_v9  ;;  %s14740_s25 = smov 72  }
 0x28e   : > { %v2676_v12 = vsel %vm21212_vm0, %v21439_v27, %v21140_v35  ;;  %v2684_v15 = vsel %vm2674_vm8, %v16189_v16, %v2683_v19  ;;  %v17152_v8 = vpop.permute.xlu1 %2355  ;;  %v21442_v16 = vld [vmem:[#allocation33_spill] sm:$0xff]  ;;  %v21444_v19 = vld [vmem:[#allocation32_spill] sm:$0xff] }
 0x28f   : > { %6423 = vmatprep.subr.bf16.mxu0 %v12811_v38  ;;  %v2677_v7 = vsel %vm2674_vm8, %v16178_v47, %v2676_v12  ;;  %21440 = vst [vmem:[#allocation26_spill] sm:$0xff] %v17152_v8  ;;  %v17154_v55 = vpop.permute.xlu0 %2347  ;;  %v21143_v61 = vrot.slane %v17152_v8, 4  ;;  %v17164_v47 = vpop.f32.mrf.mxu1  ;;  %v21445_v27 = vrot.slane %v21444_v19, 4 }
 0x290   : > { %21441 = vst [vmem:[#allocation29_spill] sm:$0xff] %v17154_v55  ;;  %6424 = vmatpush2.bf16.msra.mxu0 %v12810_v48  ;;  %v21151_v9 = vrot.slane %v17154_v55, 4  ;;  %v12831_v56 = vcombine.low %v2677_v7, %v2684_v15  ;;  %v12832_v49 = vcombine.high %v2677_v7, %v2684_v15  ;;  %v21443_v48 = vrot.slane %v21442_v16, 4  ;;  %v17186_v55 = vpop.f32.mrf.mxu0 }
 0x291   : > { %2373 = vrot.lane.b32.xlu1 %v16661_v57, %s21317_s13  ;;  %2365 = vrot.lane.b32.xlu0 %v16664_v18, %s21317_s13 }
 0x292   : > { %v2401_v38 = vsel %vm21212_vm0, %v21443_v48, %v21143_v61  ;;  %v2394_v12 = vsel %vm21212_vm0, %v21445_v27, %v21151_v9  ;;  %6480 = vmatprep.subr.bf16.mxu1 %v12832_v49  ;;  %v17180_v35 = vpop.permute.xlu1 %3529  ;;  %v17188_v49 = vpop.f32.mrf.mxu1 }
 0x293   : > { %v2402_v15 = vsel %vm21434_vm11, %v21442_v16, %v2401_v38  ;;  %v2395_v7 = vsel %vm21446_vm13, %v21444_v19, %v2394_v12  ;;  %21447 = vst [vmem:[#allocation28_spill] sm:$0xff] %v17180_v35  ;;  %v17182_v13 = vpop.permute.xlu0 %3521  ;;  %6481 = vmatpush1.bf16.msra.mxu1 %v12831_v56  ;;  %v21150_v48 = vrot.slane %v17180_v35, 4  ;;  %v21449_v56 = vrot.slane %v16235_v6, 4  ;;  %v17214_v35 = vpop.f32.mrf.mxu0 }
 0x294   : > { %21448 = vst [vmem:[#allocation31_spill] sm:$0xff] %v17182_v13  ;;  %v21156_v61 = vrot.slane %v17182_v13, 4  ;;  %v12803_v63 = vcombine.low %v2395_v7, %v2402_v15  ;;  %v12804_v5 = vcombine.high %v2395_v7, %v2402_v15  ;;  %v21450_v38 = vrot.slane %v16224_v40, 4 }
 0x295   : > { %1386 = vrot.lane.b32.xlu1 %v16661_v57, %s21270_s21  ;;  %1378 = vrot.lane.b32.xlu0 %v16664_v18, %s21270_s21  ;;  %v3572_v16 = vsel %vm21212_vm0, %v21449_v56, %v21150_v48  ;;  %vm21457_vm11 = vcmask 498688   ;;  %v17242_v37 = vpop.f32.mrf.mxu0 }
 0x296   : > { %v3565_v19 = vsel %vm21212_vm0, %v21450_v38, %v21156_v61  ;;  %6425 = vmatprep.subr.bf16.mxu0 %v12804_v5  ;;  %v3573_v27 = vsel %vm841_vm3, %v16235_v6, %v3572_v16  ;;  %v17208_v15 = vpop.permute.xlu1 %2230  ;;  %v17216_v5 = vpop.f32.mrf.mxu1  ;;  %v21455_v16 = vld [vmem:[#allocation34_spill] sm:$0xff]  ;;  %vm21458_vm13 = vmmov %vm21457_vm11 }
 0x297   : > { %v3566_v12 = vsel %vm841_vm3, %v16224_v40, %v3565_v19  ;;  %21451 = vst [vmem:[#allocation30_spill] sm:$0xff] %v17208_v15  ;;  %v17210_v7 = vpop.permute.xlu0 %2222  ;;  %6426 = vmatpush2.bf16.msra.mxu0 %v12803_v63  ;;  %v21159_v56 = vrot.slane %v17208_v15, 4  ;;  %v21453_v40 = vld [vmem:[#allocation35_spill] sm:$0xff]  ;;  %v21456_v38 = vrot.slane %v21455_v16, 4  ;;  %21461 = vst [vmem:[#allocation34_spill] sm:$0xff] %v17242_v37  ;;  %v6132_v37 = vpop.f32.mrf.mxu0 }
 0x298   : > { %21452 = vst [vmem:[#allocation33_spill] sm:$0xff] %v17210_v7  ;;  %v21167_v48 = vrot.slane %v17210_v7, 4  ;;  %v12936_v9 = vcombine.low %v3566_v12, %v3573_v27  ;;  %v12937_v13 = vcombine.high %v3566_v12, %v3573_v27  ;;  %v21454_v6 = vrot.slane %v21453_v40, 4 }
 0x299   : > { %2357 = vrot.lane.b32.xlu1 %v16721_v36, %s21317_s13  ;;  %2349 = vrot.lane.b32.xlu0 %v16724_v43, %s21317_s13  ;;  %s14738_s13 = smov 71  }
 0x29a   : > { %v2274_v63 = vsel %vm21212_vm0, %v21454_v6, %v21159_v56  ;;  %v2267_v19 = vsel %vm21212_vm0, %v21456_v38, %v21167_v48  ;;  %6482 = vmatprep.subr.bf16.mxu1 %v12937_v13  ;;  %v17236_v61 = vpop.permute.xlu1 %3513  ;;  %v17244_v13 = vpop.f32.mrf.mxu1 }
 0x29b   : > { %v2275_v27 = vsel %vm21457_vm11, %v21453_v40, %v2274_v63  ;;  %v2268_v12 = vsel %vm21458_vm13, %v21455_v16, %v2267_v19  ;;  %21459 = vst [vmem:[#allocation32_spill] sm:$0xff] %v17236_v61  ;;  %v17238_v15 = vpop.permute.xlu0 %3505  ;;  %6483 = vmatpush2.bf16.msra.mxu1 %v12936_v9  ;;  %v21166_v6 = vrot.slane %v17236_v61, 4  ;;  %21462 = vst [vmem:[#allocation82_spill] sm:$0xff] %v17244_v13  ;;  %v21463_v9 = vrot.slane %v16281_v60, 4 }
 0x29c   : > { %21460 = vst [vmem:[#allocation35_spill] sm:$0xff] %v17238_v15  ;;  %v21168_v56 = vrot.slane %v17238_v15, 4  ;;  %v12796_v7 = vcombine.low %v2268_v12, %v2275_v27  ;;  %v12797_v8 = vcombine.high %v2268_v12, %v2275_v27  ;;  %v21464_v63 = vrot.slane %v16270_v21, 4  ;;  %vm21471_vm13 = vmmov %vm21457_vm11 }
 0x29d   : > { %1370 = vrot.lane.b32.xlu1 %v16721_v36, %s21270_s21  ;;  %1362 = vrot.lane.b32.xlu0 %v16724_v43, %s21270_s21  ;;  %v3558_v40 = vsel %vm21212_vm0, %v21463_v9, %v21166_v6  ;;  %s14742_s21 = smov 68  }
 0x29e   : > { %v3551_v16 = vsel %vm21212_vm0, %v21464_v63, %v21168_v56  ;;  %6427 = vmatprep.subr.bf16.mxu0 %v12797_v8  ;;  %v3559_v38 = vsel %vm841_vm3, %v16281_v60, %v3558_v40  ;;  %v17264_v27 = vpop.permute.xlu1 %2214  ;;  %v6195_v63 = vpop.f32.mrf.mxu1 }
 0x29f   : > { %v3552_v19 = vsel %vm841_vm3, %v16270_v21, %v3551_v16  ;;  %21465 = vst [vmem:[#allocation83_spill] sm:$0xff] %v17264_v27  ;;  %v17266_v12 = vpop.permute.xlu0 %2206  ;;  %6428 = vmatpush2.bf16.msra.mxu0 %v12796_v7  ;;  %v21171_v9 = vrot.slane %v17264_v27, 4  ;;  %v21467_v21 = vld [vmem:[#allocation37_spill] sm:$0xff]  ;;  %v21469_v7 = vld [vmem:[#allocation36_spill] sm:$0xff]  ;;  %v6134_v27 = vpop.f32.mrf.mxu0 }
 0x2a0   : > { %21466 = vst [vmem:[#allocation84_spill] sm:$0xff] %v17266_v12  ;;  %v21184_v6 = vrot.slane %v17266_v12, 4  ;;  %v12929_v48 = vcombine.low %v3552_v19, %v3559_v38  ;;  %v12930_v13 = vcombine.high %v3552_v19, %v3559_v38  ;;  %v21468_v60 = vrot.slane %v21467_v21, 4 }
 0x2a1   : > { %2232 = vrot.lane.b32.xlu1 %v16661_v57, %s21326_s12  ;;  %2224 = vrot.lane.b32.xlu0 %v16664_v18, %s21326_s12  ;;  %v21470_v40 = vrot.slane %v21469_v7, 4 }
 0x2a2   : > { %v2260_v8 = vsel %vm21212_vm0, %v21468_v60, %v21171_v9  ;;  %6484 = vmatprep.subr.bf16.mxu1 %v12930_v13  ;;  %v17288_v56 = vpop.permute.xlu1 %3389  ;;  %v17300_v13 = vadd.f32 %v17164_v47, %v17158_v28 }
 0x2a3   : > { %v2253_v16 = vsel %vm21212_vm0, %v21470_v40, %v21184_v6  ;;  %v2261_v38 = vsel %vm21457_vm11, %v21467_v21, %v2260_v8  ;;  %v17290_v15 = vpop.permute.xlu0 %3381  ;;  %6485 = vmatpush2.bf16.msra.mxu1 %v12929_v48  ;;  %v21179_v60 = vrot.slane %v17288_v56, 4  ;;  %v6197_v40 = vpop.f32.mrf.mxu1  ;;  %v17304_v48 = vadd.f32 %v17188_v49, %v17186_v55 }
 0x2a4   : > { %v2254_v19 = vsel %vm21471_vm13, %v21469_v7, %v2253_v16  ;;  %v21178_v9 = vrot.slane %v17290_v15, 4  ;;  %v21473_v21 = vrot.slane %v16312_v23, 4  ;;  %vm21479_vm11 = vcmask 506880  }
 0x2a5   : > { %v12789_v61 = vcombine.low %v2254_v19, %v2261_v38  ;;  %v12790_v12 = vcombine.high %v2254_v19, %v2261_v38  ;;  %1245 = vrot.lane.b32.xlu1 %v16661_v57, %s21275_s30  ;;  %1237 = vrot.lane.b32.xlu0 %v16664_v18, %s21275_s30  ;;  %21472 = vst [vmem:[#allocation37_spill] sm:$0xff] %v17304_v48  ;;  %v21474_v57 = vrot.slane %v16295_v52, 4  ;;  %vm21480_vm13 = vmmov %vm21479_vm11  ;;  %v17440_v48 = vld [vmem:[%s14867_s24 + $0x18] sm:$0xff] }
 0x2a6   : > { %v3432_v8 = vsel %vm21212_vm0, %v21473_v21, %v21179_v60  ;;  %v17320_v47 = vpop.permute.xlu1 %2089  ;;  %v6136_v21 = vpop.f32.mrf.mxu0 }
 0x2a7   : > { %v3425_v18 = vsel %vm21212_vm0, %v21474_v57, %v21178_v9  ;;  %6429 = vmatprep.subr.bf16.mxu0 %v12790_v12  ;;  %v3433_v28 = vsel %vm700_vm5, %v16312_v23, %v3432_v8  ;;  %v17322_v49 = vpop.permute.xlu0 %2081  ;;  %v21180_v7 = vrot.slane %v17320_v47, 4  ;;  %v6199_v57 = vpop.f32.mrf.mxu1  ;;  %v21475_v23 = vld [vmem:[#allocation39_spill] sm:$0xff]  ;;  %v21477_v8 = vld [vmem:[#allocation38_spill] sm:$0xff] }
 0x2a8   : > { %v3426_v55 = vsel %vm700_vm5, %v16295_v52, %v3425_v18  ;;  %6430 = vmatpush2.bf16.msra.mxu0 %v12789_v61  ;;  %v21181_v16 = vrot.slane %v17322_v49, 4  ;;  %v17332_v52 = vadd.f32 %v17216_v5, %v17214_v35  ;;  %v21476_v61 = vrot.slane %v21475_v23, 4 }
 0x2a9   : > { %v12922_v38 = vcombine.low %v3426_v55, %v3433_v28  ;;  %v12923_v19 = vcombine.high %v3426_v55, %v3433_v28  ;;  %2216 = vrot.lane.b32.xlu1 %v16721_v36, %s21326_s12  ;;  %2208 = vrot.lane.b32.xlu0 %v16724_v43, %s21326_s12  ;;  %v21478_v18 = vrot.slane %v21477_v8, 4  ;;  %s14732_s12 = smov 110  }
 0x2aa   : > { %v2133_v12 = vsel %vm21212_vm0, %v21476_v61, %v21180_v7  ;;  %v17348_v5 = vpop.permute.xlu1 %3373 }
 0x2ab   : > { %v2126_v28 = vsel %vm21212_vm0, %v21478_v18, %v21181_v16  ;;  %6486 = vmatprep.subr.bf16.mxu1 %v12923_v19  ;;  %v2134_v55 = vsel %vm21479_vm11, %v21475_v23, %v2133_v12  ;;  %v17350_v9 = vpop.permute.xlu0 %3365  ;;  %v21183_v61 = vrot.slane %v17348_v5, 4  ;;  %v17354_v19 = vpop.f32.mrf.mxu0  ;;  %v17362_v23 = vadd.f32 %v6195_v63, %v6132_v37 }
 0x2ac   : > { %v2127_v35 = vsel %vm21480_vm13, %v21477_v8, %v2126_v28  ;;  %21481 = vst [vmem:[#allocation36_spill] sm:$0xff] %v17350_v9  ;;  %6487 = vmatpush2.bf16.msra.mxu1 %v12922_v38  ;;  %v21182_v60 = vrot.slane %v17350_v9, 4  ;;  %21482 = vst [vmem:[#allocation39_spill] sm:$0xff] %v17354_v19  ;;  %v17356_v16 = vpop.f32.mrf.mxu1  ;;  %v17364_v12 = vadd.f32 %v6197_v40, %v6134_v27  ;;  %v21484_v38 = vrot.slane %v16337_v17, 4 }
 0x2ad   : > { %v12782_v7 = vcombine.low %v2127_v35, %v2134_v55  ;;  %v12783_v18 = vcombine.high %v2127_v35, %v2134_v55  ;;  %21483 = vst [vmem:[#allocation38_spill] sm:$0xff] %v17356_v16  ;;  %1229 = vrot.lane.b32.xlu1 %v16721_v36, %s21275_s30  ;;  %1221 = vrot.lane.b32.xlu0 %v16724_v43, %s21275_s30  ;;  %v21485_v28 = vrot.slane %v16326_v39, 4  ;;  %v17377_v36 = vld [vmem:[%s14867_s24 + $0x84] sm:$0xff]  ;;  %vm21490_vm13 = vmmov %vm21479_vm11  ;;  %s14724_s30 = smov 114  }
 0x2ae   : > { %v3418_v8 = vsel %vm21212_vm0, %v21484_v38, %v21183_v61  ;;  %v17380_v35 = vld [vmem:[%s14867_s24 + $0x60] sm:$0xff]  ;;  %v17386_v27 = vpop.permute.xlu1 %2073  ;;  %v6142_v61 = vpop.f32.mrf.mxu0 }
 0x2af   : > { %v3411_v55 = vsel %vm21212_vm0, %v21485_v28, %v21182_v60  ;;  %6431 = vmatprep.subr.bf16.mxu0 %v12783_v18  ;;  %v3419_v43 = vsel %vm700_vm5, %v16337_v17, %v3418_v8  ;;  %v17388_v63 = vpop.permute.xlu0 %2065  ;;  %v21185_v40 = vrot.slane %v17386_v27, 4  ;;  %v6205_v6 = vpop.f32.mrf.mxu1  ;;  %v21486_v17 = vld [vmem:[#allocation41_spill] sm:$0xff]  ;;  %v21488_v8 = vld [vmem:[#allocation40_spill] sm:$0xff] }
 0x2b0   : > { %v3412_v37 = vsel %vm700_vm5, %v16326_v39, %v3411_v55  ;;  %6432 = vmatpush2.bf16.msra.mxu0 %v12782_v7  ;;  %v21186_v38 = vrot.slane %v17388_v63, 4  ;;  %v17396_v39 = vadd.f32 %v6199_v57, %v6136_v21  ;;  %v21487_v7 = vrot.slane %v21486_v17, 4 }
 0x2b1   : > { %v12915_v28 = vcombine.low %v3412_v37, %v3419_v43  ;;  %v12916_v60 = vcombine.high %v3412_v37, %v3419_v43  ;;  %2091 = vrot.lane.b32.xlu1 %v17377_v36, %s21341_s10  ;;  %2083 = vrot.lane.b32.xlu0 %v17380_v35, %s21341_s10  ;;  %v21489_v55 = vrot.slane %v21488_v8, 4 }
 0x2b2   : > { %v2119_v18 = vsel %vm21212_vm0, %v21487_v7, %v21185_v40  ;;  %v17412_v57 = vpop.permute.xlu1 %3249 }
 0x2b3   : > { %v2112_v43 = vsel %vm21212_vm0, %v21489_v55, %v21186_v38  ;;  %6488 = vmatprep.subr.bf16.mxu1 %v12916_v60  ;;  %v2120_v37 = vsel %vm21479_vm11, %v21486_v17, %v2119_v18  ;;  %21491 = vst [vmem:[#allocation41_spill] sm:$0xff] %v17412_v57  ;;  %v17414_v16 = vpop.permute.xlu0 %3241  ;;  %v21188_v7 = vrot.slane %v17412_v57, 4  ;;  %v6144_v60 = vpop.f32.mrf.mxu0  ;;  %v17422_v17 = vadd.f32 %v6205_v6, %v6142_v61 }
 0x2b4   : > { %v2113_v21 = vsel %vm21490_vm13, %v21488_v8, %v2112_v43  ;;  %21492 = vst [vmem:[#allocation40_spill] sm:$0xff] %v17414_v16  ;;  %6489 = vmatpush2.bf16.msra.mxu1 %v12915_v28  ;;  %v21187_v40 = vrot.slane %v17414_v16, 4  ;;  %v6207_v38 = vpop.f32.mrf.mxu1  ;;  %v21493_v28 = vrot.slane %v16383_v31, 4  ;;  %v21494_v43 = vrot.slane %v16372_v10, 4 }
 0x2b5   : > { %v12775_v19 = vcombine.low %v2113_v21, %v2120_v37  ;;  %v12776_v55 = vcombine.high %v2113_v21, %v2120_v37  ;;  %1104 = vrot.lane.b32.xlu1 %v17377_v36, %s21280_s15  ;;  %1096 = vrot.lane.b32.xlu0 %v17380_v35, %s21280_s15  ;;  %v17424_v18 = vadd.f32 %v6207_v38, %v6144_v60  ;;  %v17437_v21 = vld [vmem:[%s14867_s24 + $0x3c] sm:$0xff]  ;;  %v6146_v16 = vpop.f32.mrf.mxu0 }
 0x2b6   : > { %v3292_v8 = vsel %vm21212_vm0, %v21493_v28, %v21188_v7  ;;  %v3285_v37 = vsel %vm21212_vm0, %v21494_v43, %v21187_v40  ;;  %v17446_v38 = vpop.permute.xlu1 %3233  ;;  %v6209_v57 = vpop.f32.mrf.mxu1 }
 0x2b7   : > { %6433 = vmatprep.subr.bf16.mxu0 %v12776_v55  ;;  %v3293_v6 = vsel %vm559_vm7, %v16383_v31, %v3292_v8  ;;  %v3286_v61 = vsel %vm559_vm7, %v16372_v10, %v3285_v37  ;;  %21495 = vst [vmem:[#allocation85_spill] sm:$0xff] %v17446_v38  ;;  %v17448_v60 = vpop.permute.xlu0 %3225  ;;  %v21195_v28 = vrot.slane %v17446_v38, 4  ;;  %v17456_v10 = vadd.f32 %v6209_v57, %v6146_v16  ;;  %v21497_v31 = vld [vmem:[#allocation69_spill] sm:$0xff]  ;;  %v21499_v8 = vld [vmem:[#allocation68_spill] sm:$0xff] }
 0x2b8   : > { %21496 = vst [vmem:[#allocation86_spill] sm:$0xff] %v17448_v60  ;;  %6434 = vmatpush2.bf16.msra.mxu0 %v12775_v19  ;;  %v21196_v43 = vrot.slane %v17448_v60, 4  ;;  %v12908_v40 = vcombine.low %v3286_v61, %v3293_v6  ;;  %v12909_v7 = vcombine.high %v3286_v61, %v3293_v6  ;;  %v21498_v19 = vrot.slane %v21497_v31, 4  ;;  %v14604_v61 = vld [vmem:[%s20753_s1 + $0x8] ss:$28 sps:$4 sm:$0xff]  }
 0x2b9   : > { %2075 = vrot.lane.b32.xlu1 %v17437_v21, %s21341_s10  ;;  %2067 = vrot.lane.b32.xlu0 %v17440_v48, %s21341_s10  ;;  %v21500_v37 = vrot.slane %v21499_v8, 4  ;;  %s14739_s10 = smov 70  }
 0x2ba   : > { %v3278_v55 = vsel %vm21212_vm0, %v21498_v19, %v21195_v28  ;;  %6490 = vmatprep.subr.bf16.mxu1 %v12909_v7  ;;  %v1951_v38 = vpop.permute.xlu1 %1950  ;;  %v14605_v28 = vld [vmem:[%s20753_s1 + $0x44] ss:$28 sps:$4 sm:$0xff]   ;;  %v21501_v7 = vrot.slane %v16536_v29, 4 }
 0x2bb   : > { %v3271_v6 = vsel %vm21212_vm0, %v21500_v37, %v21196_v43  ;;  %6436 = vmatmul.mubr.bf16.vlgmr.msra.gmra.mxu0 %v14604_v61  ;;  %v3279_v16 = vsel %vm559_vm7, %v21497_v31, %v3278_v55  ;;  %v1943_v19 = vpop.permute.xlu0 %1942  ;;  %6491 = vmatpush2.bf16.msra.mxu1 %v12908_v40  ;;  %v1967_v37 = vrot.slane %v1951_v38, 4  ;;  %v21502_v55 = vrot.slane %v16538_v34, 4 }
 0x2bc   : > { %v3272_v57 = vsel %vm559_vm7, %v21499_v8, %v3271_v6  ;;  %6445 = vmatprep.mubr.bf16.mxu0 %v14605_v28  ;;  %v1963_v43 = vrot.slane %v1943_v19, 4 }
 0x2bd   : > { %v12901_v60 = vcombine.low %v3272_v57, %v3279_v16  ;;  %v12902_v9 = vcombine.high %v3272_v57, %v3279_v16  ;;  %1088 = vrot.lane.b32.xlu1 %v17437_v21, %s21280_s15  ;;  %1080 = vrot.lane.b32.xlu0 %v17440_v48, %s21280_s15  ;;  %v1994_v31 = vsel %vm21212_vm0, %v21501_v7, %v1967_v37 }
 0x2be   : > { %v1996_v40 = vsel %vm1969_vm1, %v1951_v38, %v1967_v37  ;;  %v1987_v28 = vsel %vm21212_vm0, %v21502_v55, %v1963_v43  ;;  %v1989_v8 = vsel %vm1969_vm1, %v1943_v19, %v1963_v43  ;;  %v1995_v6 = vsel %vm1969_vm1, %v16536_v29, %v1994_v31  ;;  %v17494_v16 = vpop.permute.xlu1 %3669  ;;  %v21504_v29 = vld [vmem:[#allocation47_spill] sm:$0xff]  ;;  %v21506_v43 = vld [vmem:[#allocation46_spill] sm:$0xff] }
 0x2bf   : > { %6492 = vmatprep.subr.bf16.mxu1 %v12902_v9  ;;  %2028 = vst [vmem:[#allocation2 + $0x53c] sm:$0xf] %v1996_v40  ;;  %v1988_v61 = vsel %vm1969_vm1, %v16538_v34, %v1987_v28  ;;  %2024 = vst [vmem:[#allocation2 + $0x520] sm:$0xf] %v1989_v8  ;;  %v17496_v57 = vpop.permute.xlu0 %3661  ;;  %v21202_v38 = vrot.slane %v17494_v16, 4  ;;  %v21503_v9 = vcombine.high %v16601_v58, %v16604_v11  ;;  %v21505_v34 = vrot.slane %v21504_v29, 4 }
 0x2c0   : > { %6493 = vmatpush2.bf16.msra.mxu1 %v12901_v60  ;;  %v21201_v37 = vrot.slane %v17496_v57, 4  ;;  %v21507_v19 = vrot.slane %v21506_v43, 4  ;;  %v14606_v31 = vld [vmem:[%s20753_s1 + $0x40] ss:$28 sps:$4 sm:$0xff]  }
 0x2c1   : > { %6494 = vmatprep.subr.bf16.mxu1 %v21503_v9  ;;  %963 = vrot.lane.b32.xlu1 %v17377_v36, %s21286_s23  ;;  %v3712_v60 = vsel %vm21212_vm0, %v21505_v34, %v21202_v38  ;;  %v21508_v9 = vcombine.low %v16601_v58, %v16604_v11  ;;  %v14607_v34 = vld [vmem:[%s20753_s1 + $0x7c] ss:$28 sps:$4 sm:$0xff]   ;;  %v12771_v58 = vcombine.high %v1988_v61, %v1995_v6  ;;  %v21510_v11 = vrot.slane %v16593_v42, 4 }
 0x2c2   : > { %955 = vrot.lane.b32.xlu0 %v17380_v35, %s21286_s23  ;;  %v3705_v7 = vsel %vm21212_vm0, %v21507_v19, %v21201_v37  ;;  %v3713_v40 = vsel %vm982_vm15, %v21504_v29, %v3712_v60  ;;  %v1935_v28 = vpop.permute.xlu1 %1934 }
 0x2c3   : > { %6446 = vmatmul.mubr.bf16.gmra.mxu0 %v14606_v31  ;;  %v3706_v55 = vsel %vm982_vm15, %v21506_v43, %v3705_v7  ;;  %v1927_v8 = vpop.permute.xlu0 %1926  ;;  %v1959_v19 = vrot.slane %v1935_v28, 4  ;;  %v21509_v31 = vcombine.high %v16635_v30, %v16638_v26 }
 0x2c4   : > { %6495 = vmatpush2.bf16.msra.mxu1 %v21508_v9  ;;  %6455 = vmatprep.mubr.bf16.mxu0 %v14607_v34  ;;  %v1955_v37 = vrot.slane %v1927_v8, 4  ;;  %v12950_v29 = vcombine.low %v3706_v55, %v3713_v40  ;;  %v12951_v60 = vcombine.high %v3706_v55, %v3713_v40  ;;  %v21511_v9 = vrot.slane %v16595_v53, 4 }
 0x2c5   : > { %6496 = vmatprep.subr.bf16.mxu1 %v21509_v31  ;;  %947 = vrot.lane.b32.xlu1 %v17437_v21, %s21286_s23  ;;  %v1980_v43 = vsel %vm21212_vm0, %v21510_v11, %v1959_v19  ;;  %v1982_v7 = vsel %vm1969_vm1, %v1935_v28, %v1959_v19  ;;  %v21512_v28 = vcombine.low %v16635_v30, %v16638_v26  ;;  %v21515_v30 = vld [vmem:[#allocation48_spill] sm:$0xff] }
 0x2c6   : > { %939 = vrot.lane.b32.xlu0 %v17440_v48, %s21286_s23  ;;  %v1973_v34 = vsel %vm21212_vm0, %v21511_v9, %v1955_v37  ;;  %v1975_v31 = vsel %vm1969_vm1, %v1927_v8, %v1955_v37  ;;  %6541 = vmatprep.subr.bf16.mxu0 %v12951_v60  ;;  %v1981_v40 = vsel %vm1969_vm1, %v16593_v42, %v1980_v43  ;;  %v17549_v38 = vpop.permute.xlu1 %3653 }
 0x2c7   : > { %2020 = vst [vmem:[#allocation2 + $0x504] sm:$0xf] %v1982_v7  ;;  %v1974_v55 = vsel %vm1969_vm1, %v16595_v53, %v1973_v34  ;;  %2016 = vst [vmem:[#allocation2 + $0x4e8] sm:$0xf] %v1975_v31  ;;  %v17551_v11 = vpop.permute.xlu0 %3645  ;;  %6542 = vmatpush1.bf16.msra.mxu0 %v12950_v29  ;;  %v21204_v37 = vrot.slane %v17549_v38, 4  ;;  %v12770_v42 = vcombine.low %v1988_v61, %v1995_v6  ;;  %v21513_v53 = vld [vmem:[#allocation49_spill] sm:$0xff] }
 0x2c8   : > { %6497 = vmatpush2.bf16.msra.mxu1 %v21512_v28  ;;  %v21203_v8 = vrot.slane %v17551_v11, 4  ;;  %v21514_v19 = vrot.slane %v21513_v53, 4  ;;  %v21516_v29 = vrot.slane %v21515_v30, 4  ;;  %v14609_v6 = vld [vmem:[%s20753_s1 + $0x10] ss:$28 sps:$4 sm:$0xff]   ;;  %v12764_v61 = vcombine.high %v1974_v55, %v1981_v40 }
 0x2c9   : > { %6655 = vmatprep.subr.bf16.mxu1 %v12771_v58  ;;  %3078 = vrot.lane.b32.xlu1 %v17377_v36, %s21294_s0  ;;  %v14608_v58 = vld [vmem:[%s20753_s1 + $0x78] ss:$28 sps:$4 sm:$0xff]   ;;  %v21517_v31 = vmov 0   ;;  %vm21524_vm1 = vcmask 261120  }
 0x2ca   : > { %3070 = vrot.lane.b32.xlu0 %v17380_v35, %s21294_s0  ;;  %v3698_v26 = vsel %vm21212_vm0, %v21514_v19, %v21204_v37  ;;  %v3691_v60 = vsel %vm21212_vm0, %v21516_v29, %v21203_v8  ;;  %vm21538_vm11 = vmmov %vm21524_vm1 }
 0x2cb   : > { %6456 = vmatmul.mubr.bf16.gmra.mxu0 %v14608_v58  ;;  %6499 = vmatmul.mubr.bf16.vlgmr.msra.gmra.mxu1 %v14609_v6  ;;  %v3699_v43 = vsel %vm982_vm15, %v21513_v53, %v3698_v26  ;;  %v3692_v7 = vsel %vm982_vm15, %v21515_v30, %v3691_v60  ;;  %v1810_v9 = vpop.permute.xlu1 %1809  ;;  %v1802_v34 = vpop.permute.xlu0 %1801  ;;  %v14610_v6 = vld [vmem:[%s20753_s1 + $0x4c] ss:$28 sps:$4 sm:$0xff]   ;;  %v12763_v53 = vcombine.low %v1974_v55, %v1981_v40  ;;  %v21518_v26 = vrot.slane %v16673_v1, 4  ;;  %vm21561_vm13 = vmmov %vm21524_vm1 }
 0x2cc   : > { %6656 = vmatpush1.bf16.msra.mxu1 %v12770_v42  ;;  %6561 = vmatprep.mubr.bf16.mxu0 %v21517_v31  ;;  %v1826_v28 = vrot.slane %v1810_v9, 4  ;;  %v1822_v19 = vrot.slane %v1802_v34, 4  ;;  %v12943_v29 = vcombine.low %v3692_v7, %v3699_v43  ;;  %v12944_v58 = vcombine.high %v3692_v7, %v3699_v43  ;;  %v17591_v42 = vld [vmem:[%s14867_s24 + $0x88] sm:$0xff] }
 0x2cd   : > { %6657 = vmatprep.subr.bf16.mxu1 %v12764_v61  ;;  %6508 = vmatprep.mubr.bf16.mxu1 %v14610_v6  ;;  %v21519_v61 = vrot.slane %v16675_v41, 4  ;;  %v17602_v6 = vld [vmem:[%s14867_s24 + $0x64] sm:$0xff] }
 0x2ce   : > { %3062 = vrot.lane.b32.xlu1 %v17437_v21, %s21294_s0  ;;  %3054 = vrot.lane.b32.xlu0 %v17440_v48, %s21294_s0  ;;  %v1853_v30 = vsel %vm21212_vm0, %v21518_v26, %v1826_v28  ;;  %v1855_v60 = vsel %vm1828_vm2, %v1810_v9, %v1826_v28  ;;  %v1848_v7 = vsel %vm1828_vm2, %v1802_v34, %v1822_v19  ;;  %s14733_s0 = smov 111  }
 0x2cf   : > { %v1846_v43 = vsel %vm21212_vm0, %v21519_v61, %v1822_v19  ;;  %6543 = vmatprep.subr.bf16.mxu0 %v12944_v58  ;;  %v1854_v8 = vsel %vm1828_vm2, %v16673_v1, %v1853_v30  ;;  %1887 = vst [vmem:[#allocation2 + $0x4cc] sm:$0xf] %v1855_v60  ;;  %1883 = vst [vmem:[#allocation2 + $0x4b0] sm:$0xf] %v1848_v7  ;;  %v823_v55 = vpop.permute.xlu1 %822  ;;  %v815_v26 = vpop.permute.xlu0 %814  ;;  %v21520_v1 = vld [vmem:[#allocation52_spill] sm:$0xff]  ;;  %v21522_v58 = vld [vmem:[#allocation53_spill] sm:$0xff] }
 0x2d0   : > { %v1847_v40 = vsel %vm1828_vm2, %v16675_v41, %v1846_v43  ;;  %6544 = vmatpush1.bf16.msra.mxu0 %v12943_v29  ;;  %6658 = vmatpush1.bf16.msra.mxu1 %v12763_v53  ;;  %v839_v9 = vrot.slane %v823_v55, 4  ;;  %v835_v28 = vrot.slane %v815_v26, 4  ;;  %v21521_v34 = vrot.slane %v21520_v1, 4 }
 0x2d1   : > { %v12756_v61 = vcombine.low %v1847_v40, %v1854_v8  ;;  %v12757_v37 = vcombine.high %v1847_v40, %v1854_v8  ;;  %v21523_v30 = vrot.slane %v21522_v58, 4  ;;  %v14611_v8 = vld [vmem:[%s20753_s1 + $0x18] ss:$28 sps:$4 sm:$0xff]  }
 0x2d2   : > { %3671 = vrot.lane.b32.xlu1 %v17591_v42, %s21286_s23  ;;  %3663 = vrot.lane.b32.xlu0 %v17602_v6, %s21286_s23  ;;  %v866_v19 = vsel %vm21212_vm0, %v21521_v34, %v839_v9  ;;  %v868_v41 = vsel %vm841_vm3, %v823_v55, %v839_v9  ;;  %v861_v53 = vsel %vm841_vm3, %v815_v26, %v835_v28  ;;  %v14612_v55 = vld [vmem:[%s20753_s1 + $0x48] ss:$28 sps:$4 sm:$0xff]   ;;  %v21525_v34 = vrot.slane %v16730_v3, 4 }
 0x2d3   : > { %v859_v29 = vsel %vm21212_vm0, %v21523_v30, %v835_v28  ;;  %12958 = vmatmul.mubr.msk.bf16.vlgmr.msra.gmra.mxu0 %vm21524_vm1, %v14611_v8  ;;  %v867_v60 = vsel %vm841_vm3, %v21520_v1, %v866_v19  ;;  %900 = vst [vmem:[#allocation2 + $0x1bc] sm:$0xf] %v868_v41  ;;  %896 = vst [vmem:[#allocation2 + $0x1a0] sm:$0xf] %v861_v53  ;;  %v1794_v7 = vpop.permute.xlu1 %1793  ;;  %v1786_v40 = vpop.permute.xlu0 %1785  ;;  %6659 = vmatprep.subr.bf16.mxu1 %v12757_v37  ;;  %v17637_v37 = vld [vmem:[%s14867_s24 + $0x40] sm:$0xff] }
 0x2d4   : > { %v860_v43 = vsel %vm841_vm3, %v21522_v58, %v859_v29  ;;  %6509 = vmatmul.mubr.bf16.gmra.mxu1 %v14612_v55  ;;  %v1818_v26 = vrot.slane %v1794_v7, 4  ;;  %v1814_v9 = vrot.slane %v1786_v40, 4  ;;  %6571 = vmatprep.mubr.bf16.mxu0 %v21517_v31  ;;  %v17648_v29 = vld [vmem:[%s14867_s24 + $0x1c] sm:$0xff] }
 0x2d5   : > { %6660 = vmatpush1.bf16.msra.mxu1 %v12756_v61  ;;  %v12658_v28 = vcombine.low %v860_v43, %v867_v60  ;;  %v12659_v1 = vcombine.high %v860_v43, %v867_v60  ;;  %v21526_v61 = vrot.slane %v16732_v4, 4 }
 0x2d6   : > { %2937 = vrot.lane.b32.xlu1 %v17377_v36, %s21302_s27  ;;  %2929 = vrot.lane.b32.xlu0 %v17380_v35, %s21302_s27  ;;  %v1839_v19 = vsel %vm21212_vm0, %v21525_v34, %v1818_v26  ;;  %v1841_v41 = vsel %vm1828_vm2, %v1794_v7, %v1818_v26  ;;  %v1834_v30 = vsel %vm1828_vm2, %v1786_v40, %v1814_v9  ;;  %v14613_v7 = vld [vmem:[%s20753_s1 + $0x84] ss:$28 sps:$4 sm:$0xff]   ;;  %v21529_v34 = vld [vmem:[#allocation55_spill] sm:$0xff] }
 0x2d7   : > { %v1832_v58 = vsel %vm21212_vm0, %v21526_v61, %v1814_v9  ;;  %6592 = vmatprep.subr.bf16.mxu0 %v12659_v1  ;;  %v1840_v53 = vsel %vm1828_vm2, %v16730_v3, %v1839_v19  ;;  %1879 = vst [vmem:[#allocation2 + $0x494] sm:$0xf] %v1841_v41  ;;  %1875 = vst [vmem:[#allocation2 + $0x478] sm:$0xf] %v1834_v30  ;;  %v807_v60 = vpop.permute.xlu1 %806  ;;  %v799_v43 = vpop.permute.xlu0 %798  ;;  %6518 = vmatprep.mubr.bf16.mxu1 %v14613_v7  ;;  %v21527_v3 = vld [vmem:[#allocation54_spill] sm:$0xff]  ;;  %v21530_v19 = vrot.slane %v21529_v34, 4 }
 0x2d8   : > { %v1833_v8 = vsel %vm1828_vm2, %v16732_v4, %v1832_v58  ;;  %6593 = vmatpush1.bf16.msra.mxu0 %v12658_v28  ;;  %v831_v40 = vrot.slane %v807_v60, 4  ;;  %v827_v55 = vrot.slane %v799_v43, 4  ;;  %v21528_v4 = vrot.slane %v21527_v3, 4  ;;  %vm21531_vm2 = vmmov %vm21524_vm1 }
 0x2d9   : > { %v12749_v26 = vcombine.low %v1833_v8, %v1840_v53  ;;  %v12750_v9 = vcombine.high %v1833_v8, %v1840_v53 }
 0x2da   : > { %3655 = vrot.lane.b32.xlu1 %v17637_v37, %s21286_s23  ;;  %3647 = vrot.lane.b32.xlu0 %v17648_v29, %s21286_s23  ;;  %v852_v1 = vsel %vm21212_vm0, %v21528_v4, %v831_v40  ;;  %v854_v28 = vsel %vm841_vm3, %v807_v60, %v831_v40  ;;  %v845_v41 = vsel %vm21212_vm0, %v21530_v19, %v827_v55  ;;  %v14614_v60 = vld [vmem:[%s20753_s1 + $0x50] ss:$28 sps:$4 sm:$0xff]  }
 0x2db   : > { %v847_v61 = vsel %vm841_vm3, %v799_v43, %v827_v55  ;;  %6661 = vmatprep.subr.bf16.mxu1 %v12750_v9  ;;  %v853_v58 = vsel %vm841_vm3, %v21527_v3, %v852_v1  ;;  %892 = vst [vmem:[#allocation2 + $0x184] sm:$0xf] %v854_v28  ;;  %v846_v30 = vsel %vm841_vm3, %v21529_v34, %v845_v41  ;;  %v1669_v53 = vpop.permute.xlu1 %1668  ;;  %v1661_v8 = vpop.permute.xlu0 %1660  ;;  %v14615_v9 = vld [vmem:[%s20753_s1 + $0x80] ss:$28 sps:$4 sm:$0xff]   ;;  %v21533_v1 = vrot.slane %v16783_v59, 4 }
 0x2dc   : > { %888 = vst [vmem:[#allocation2 + $0x168] sm:$0xf] %v847_v61  ;;  %6662 = vmatpush1.bf16.msra.mxu1 %v12749_v26  ;;  %12959 = vmatmul.mubr.msk.bf16.gmra.mxu0 %vm21531_vm2, %v14614_v60  ;;  %v1685_v7 = vrot.slane %v1669_v53, 4  ;;  %v1681_v43 = vrot.slane %v1661_v8, 4  ;;  %v12651_v40 = vcombine.low %v846_v30, %v853_v58  ;;  %v12652_v55 = vcombine.high %v846_v30, %v853_v58  ;;  %v14616_v30 = vld [vmem:[%s20753_s1 + $0xc] ss:$28 sps:$4 sm:$0xff]   ;;  %vm21566_vm2 = vmmov %vm21524_vm1 }
 0x2dd   : > { %6519 = vmatmul.mubr.bf16.gmra.mxu1 %v14615_v9  ;;  %6581 = vmatprep.mubr.bf16.mxu0 %v21517_v31  ;;  %v21532_v26 = vrot.slane %v16781_v54, 4 }
 0x2de   : > { %2921 = vrot.lane.b32.xlu1 %v17437_v21, %s21302_s27  ;;  %2913 = vrot.lane.b32.xlu0 %v17440_v48, %s21302_s27  ;;  %v1714_v4 = vsel %vm1687_vm4, %v1669_v53, %v1685_v7  ;;  %v1705_v28 = vsel %vm21212_vm0, %v21533_v1, %v1681_v43  ;;  %v1707_v34 = vsel %vm1687_vm4, %v1661_v8, %v1681_v43  ;;  %s14728_s27 = smov 113  }
 0x2df   : > { %v1712_v3 = vsel %vm21212_vm0, %v21532_v26, %v1685_v7  ;;  %6594 = vmatprep.subr.bf16.mxu0 %v12652_v55  ;;  %1746 = vst [vmem:[#allocation2 + $0x45c] sm:$0xf] %v1714_v4  ;;  %v1706_v41 = vsel %vm1687_vm4, %v16783_v59, %v1705_v28  ;;  %1742 = vst [vmem:[#allocation2 + $0x440] sm:$0xf] %v1707_v34  ;;  %v682_v61 = vpop.permute.xlu1 %681  ;;  %v674_v58 = vpop.permute.xlu0 %673  ;;  %6687 = vmatprep.mubr.bf16.mxu1 %v14616_v30  ;;  %v21536_v55 = vld [vmem:[#allocation57_spill] sm:$0xff] }
 0x2e0   : > { %v1713_v19 = vsel %vm1687_vm4, %v16781_v54, %v1712_v3  ;;  %6595 = vmatpush1.bf16.msra.mxu0 %v12651_v40  ;;  %v698_v53 = vrot.slane %v682_v61, 4  ;;  %v694_v60 = vrot.slane %v674_v58, 4  ;;  %v21534_v54 = vld [vmem:[#allocation56_spill] sm:$0xff]  ;;  %v21537_v9 = vrot.slane %v21536_v55, 4 }
 0x2e1   : > { %v12742_v8 = vcombine.low %v1706_v41, %v1713_v19  ;;  %v12743_v7 = vcombine.high %v1706_v41, %v1713_v19  ;;  %v21535_v59 = vrot.slane %v21534_v54, 4  ;;  %v14617_v19 = vld [vmem:[%s20753_s1 + $0x88] ss:$28 sps:$4 sm:$0xff]  }
 0x2e2   : > { %2796 = vrot.lane.b32.xlu1 %v17377_v36, %s21309_s19  ;;  %2788 = vrot.lane.b32.xlu0 %v17380_v35, %s21309_s19  ;;  %v727_v40 = vsel %vm700_vm5, %v682_v61, %v698_v53  ;;  %v718_v26 = vsel %vm21212_vm0, %v21537_v9, %v694_v60  ;;  %v720_v3 = vsel %vm700_vm5, %v674_v58, %v694_v60  ;;  %v14618_v60 = vld [vmem:[%s20753_s1 + $0x4] ss:$28 sps:$4 sm:$0xff]  }
 0x2e3   : > { %v725_v43 = vsel %vm21212_vm0, %v21535_v59, %v698_v53  ;;  %6663 = vmatprep.subr.bf16.mxu1 %v12743_v7  ;;  %759 = vst [vmem:[#allocation2 + $0x14c] sm:$0xf] %v727_v40  ;;  %v719_v1 = vsel %vm700_vm5, %v21536_v55, %v718_v26  ;;  %755 = vst [vmem:[#allocation2 + $0x130] sm:$0xf] %v720_v3  ;;  %v1653_v28 = vpop.permute.xlu1 %1652  ;;  %v1645_v34 = vpop.permute.xlu0 %1644  ;;  %v21540_v59 = vrot.slane %v16837_v20, 4 }
 0x2e4   : > { %v726_v4 = vsel %vm700_vm5, %v21534_v54, %v725_v43  ;;  %6664 = vmatpush1.bf16.msra.mxu1 %v12742_v8  ;;  %12960 = vmatmul.mubr.msk.bf16.gmra.mxu0 %vm21538_vm11, %v14617_v19  ;;  %v1677_v41 = vrot.slane %v1653_v28, 4  ;;  %v1673_v61 = vrot.slane %v1645_v34, 4  ;;  %v17720_v53 = vpop.f32.mrf.mxu1  ;;  %v21539_v8 = vrot.slane %v16835_v50, 4  ;;  %v456_v55 = vld [vmem:[%s14867_s24 + $0x60] sm:$0xf]  ;;  %vm21568_vm11 = vmmov %vm21524_vm1 }
 0x2e5   : > { %v12644_v58 = vcombine.low %v719_v1, %v726_v4  ;;  %v12645_v30 = vcombine.high %v719_v1, %v726_v4  ;;  %6624 = vmatprep.mubr.bf16.mxu0 %v14618_v60  ;;  %v460_v9 = vld [vmem:[%s14867_s24 + $0x84] sm:$0xf]  ;;  %472 = vst [vmem:[#allocation2 + $0x50] sm:$0xf] %v456_v55  ;;  %v21543_v60 = vld [vmem:[#allocation59_spill] sm:$0xff] }
 0x2e6   : > { %2780 = vrot.lane.b32.xlu1 %v17437_v21, %s21309_s19  ;;  %2772 = vrot.lane.b32.xlu0 %v17440_v48, %s21309_s19  ;;  %v1698_v7 = vsel %vm21212_vm0, %v21539_v8, %v1677_v41  ;;  %v1700_v54 = vsel %vm1687_vm4, %v1653_v28, %v1677_v41  ;;  %v1691_v43 = vsel %vm21212_vm0, %v21540_v59, %v1673_v61  ;;  %v21544_v8 = vrot.slane %v21543_v60, 4  ;;  %v452_v55 = vld [vmem:[%s14867_s24 + $0x3c] sm:$0xf] }
 0x2e7   : > { %v1693_v40 = vsel %vm1687_vm4, %v1645_v34, %v1673_v61  ;;  %6596 = vmatprep.subr.bf16.mxu0 %v12645_v30  ;;  %v1699_v26 = vsel %vm1687_vm4, %v16835_v50, %v1698_v7  ;;  %1738 = vst [vmem:[#allocation2 + $0x424] sm:$0xf] %v1700_v54  ;;  %v1692_v3 = vsel %vm1687_vm4, %v16837_v20, %v1691_v43  ;;  %v666_v4 = vpop.permute.xlu1 %665  ;;  %v658_v1 = vpop.permute.xlu0 %657  ;;  %476 = vst [vmem:[#allocation2 + $0x6c] sm:$0xf] %v460_v9  ;;  %v21541_v50 = vld [vmem:[#allocation58_spill] sm:$0xff] }
 0x2e8   : > { %1734 = vst [vmem:[#allocation2 + $0x408] sm:$0xf] %v1693_v40  ;;  %6597 = vmatpush1.bf16.msra.mxu0 %v12644_v58  ;;  %v690_v28 = vrot.slane %v666_v4, 4  ;;  %v686_v19 = vrot.slane %v658_v1, 4  ;;  %v12735_v41 = vcombine.low %v1692_v3, %v1699_v26  ;;  %v12736_v34 = vcombine.high %v1692_v3, %v1699_v26  ;;  %v17743_v61 = vpop.f32.mrf.mxu1  ;;  %v448_v40 = vld [vmem:[%s14867_s24 + $0x18] sm:$0xf]  ;;  %vm21558_vm4 = vmmov %vm21524_vm1 }
 0x2e9   : > { %v21542_v20 = vrot.slane %v21541_v50, 4  ;;  %464 = vst [vmem:[#allocation2 + $0x18] sm:$0xf] %v448_v40  ;;  %468 = vst [vmem:[#allocation2 + $0x34] sm:$0xf] %v452_v55 }
 0x2ea   : > { %2655 = vrot.lane.b32.xlu1 %v17377_v36, %s21314_s28  ;;  %2647 = vrot.lane.b32.xlu0 %v17380_v35, %s21314_s28  ;;  %v713_v30 = vsel %vm700_vm5, %v666_v4, %v690_v28  ;;  %v704_v7 = vsel %vm21212_vm0, %v21544_v8, %v686_v19  ;;  %v706_v54 = vsel %vm700_vm5, %v658_v1, %v686_v19  ;;  %v21545_v1 = vrot.slane %v16889_v14, 4 }
 0x2eb   : > { %v711_v58 = vsel %vm21212_vm0, %v21542_v20, %v690_v28  ;;  %6665 = vmatprep.subr.bf16.mxu1 %v12736_v34  ;;  %751 = vst [vmem:[#allocation2 + $0x114] sm:$0xf] %v713_v30  ;;  %v705_v36 = vsel %vm700_vm5, %v21543_v60, %v704_v7  ;;  %747 = vst [vmem:[#allocation2 + $0xf8] sm:$0xf] %v706_v54  ;;  %v1528_v35 = vpop.permute.xlu1 %1527  ;;  %v1520_v43 = vpop.permute.xlu0 %1519  ;;  %v21546_v34 = vrot.slane %v16891_v33, 4 }
 0x2ec   : > { %v712_v59 = vsel %vm700_vm5, %v21541_v50, %v711_v58  ;;  %6666 = vmatpush1.bf16.msra.mxu1 %v12735_v41  ;;  %v1544_v9 = vrot.slane %v1528_v35, 4  ;;  %v1540_v26 = vrot.slane %v1520_v43, 4  ;;  %v17763_v28 = vpop.f32.mrf.mxu1 }
 0x2ed   : > { %v12637_v3 = vcombine.low %v705_v36, %v712_v59  ;;  %v12638_v4 = vcombine.high %v705_v36, %v712_v59 }
 0x2ee   : > { %2639 = vrot.lane.b32.xlu1 %v17437_v21, %s21314_s28  ;;  %2631 = vrot.lane.b32.xlu0 %v17440_v48, %s21314_s28  ;;  %v1571_v19 = vsel %vm21212_vm0, %v21545_v1, %v1544_v9  ;;  %v1573_v41 = vsel %vm1546_vm6, %v1528_v35, %v1544_v9  ;;  %v1564_v50 = vsel %vm21212_vm0, %v21546_v34, %v1540_v26  ;;  %v17781_v59 = vpop.f32.mrf.mxu1  ;;  %s14735_s28 = smov 84  }
 0x2ef   : > { %v1566_v20 = vsel %vm1546_vm6, %v1520_v43, %v1540_v26  ;;  %6598 = vmatprep.subr.bf16.mxu0 %v12638_v4  ;;  %v1572_v58 = vsel %vm1546_vm6, %v16889_v14, %v1571_v19  ;;  %1605 = vst [vmem:[#allocation2 + $0x3ec] sm:$0xf] %v1573_v41  ;;  %v1565_v48 = vsel %vm1546_vm6, %v16891_v33, %v1564_v50  ;;  %v540_v21 = vpop.permute.xlu1 %539  ;;  %v532_v30 = vpop.permute.xlu0 %531  ;;  %v21547_v14 = vld [vmem:[#allocation60_spill] sm:$0xff]  ;;  %v21549_v43 = vld [vmem:[#allocation61_spill] sm:$0xff] }
 0x2f0   : > { %1601 = vst [vmem:[#allocation2 + $0x3d0] sm:$0xf] %v1566_v20  ;;  %6599 = vmatpush1.bf16.msra.mxu0 %v12637_v3  ;;  %v556_v60 = vrot.slane %v540_v21, 4  ;;  %v552_v8 = vrot.slane %v532_v30, 4  ;;  %v12728_v7 = vcombine.low %v1565_v48, %v1572_v58  ;;  %v12729_v54 = vcombine.high %v1565_v48, %v1572_v58  ;;  %v17799_v20 = vpop.f32.mrf.mxu1 }
 0x2f1   : > { %v21548_v36 = vrot.slane %v21547_v14, 4  ;;  %v21550_v40 = vrot.slane %v21549_v43, 4  ;;  %v21551_v58 = vrot.slane %v16940_v22, 4 }
 0x2f2   : > { %3531 = vrot.lane.b32.xlu1 %v17591_v42, %s21322_s18  ;;  %3523 = vrot.lane.b32.xlu0 %v17602_v6, %s21322_s18  ;;  %v586_v35 = vsel %vm559_vm7, %v540_v21, %v556_v60  ;;  %v579_v9 = vsel %vm559_vm7, %v532_v30, %v552_v8  ;;  %v21552_v30 = vrot.slane %v16942_v51, 4 }
 0x2f3   : > { %v584_v33 = vsel %vm21212_vm0, %v21548_v36, %v556_v60  ;;  %v577_v55 = vsel %vm21212_vm0, %v21550_v40, %v552_v8  ;;  %6667 = vmatprep.subr.bf16.mxu1 %v12729_v54  ;;  %618 = vst [vmem:[#allocation2 + $0xdc] sm:$0xf] %v586_v35  ;;  %614 = vst [vmem:[#allocation2 + $0xc0] sm:$0xf] %v579_v9  ;;  %v1512_v4 = vpop.permute.xlu1 %1511  ;;  %v1504_v1 = vpop.permute.xlu0 %1503 }
 0x2f4   : > { %v585_v26 = vsel %vm559_vm7, %v21547_v14, %v584_v33  ;;  %v578_v3 = vsel %vm559_vm7, %v21549_v43, %v577_v55  ;;  %6668 = vmatpush1.bf16.msra.mxu1 %v12728_v7  ;;  %v1536_v19 = vrot.slane %v1512_v4, 4  ;;  %v1532_v41 = vrot.slane %v1504_v1, 4  ;;  %v17813_v7 = vpop.f32.mrf.mxu0  ;;  %v17819_v9 = vpop.f32.mrf.mxu1 }
 0x2f5   : > { %v12630_v34 = vcombine.low %v578_v3, %v585_v26  ;;  %v12631_v50 = vcombine.high %v578_v3, %v585_v26 }
 0x2f6   : > { %3515 = vrot.lane.b32.xlu1 %v17637_v37, %s21322_s18  ;;  %3507 = vrot.lane.b32.xlu0 %v17648_v29, %s21322_s18  ;;  %v1557_v48 = vsel %vm21212_vm0, %v21551_v58, %v1536_v19  ;;  %v1559_v21 = vsel %vm1546_vm6, %v1512_v4, %v1536_v19  ;;  %v1550_v60 = vsel %vm21212_vm0, %v21552_v30, %v1532_v41  ;;  %v21555_v4 = vld [vmem:[#allocation63_spill] sm:$0xff] }
 0x2f7   : > { %v1552_v8 = vsel %vm1546_vm6, %v1504_v1, %v1532_v41  ;;  %6600 = vmatprep.subr.bf16.mxu0 %v12631_v50  ;;  %v1558_v54 = vsel %vm1546_vm6, %v16940_v22, %v1557_v48  ;;  %1597 = vst [vmem:[#allocation2 + $0x3b4] sm:$0xf] %v1559_v21  ;;  %v1551_v14 = vsel %vm1546_vm6, %v16942_v51, %v1550_v60  ;;  %v524_v36 = vpop.permute.xlu1 %523  ;;  %v516_v33 = vpop.permute.xlu0 %515  ;;  %v21553_v22 = vld [vmem:[#allocation62_spill] sm:$0xff]  ;;  %v21556_v1 = vrot.slane %v21555_v4, 4  ;;  %vm21560_vm6 = vmmov %vm21524_vm1 }
 0x2f8   : > { %1593 = vst [vmem:[#allocation2 + $0x398] sm:$0xf] %v1552_v8  ;;  %6601 = vmatpush1.bf16.msra.mxu0 %v12630_v34  ;;  %v548_v35 = vrot.slane %v524_v36, 4  ;;  %v544_v43 = vrot.slane %v516_v33, 4  ;;  %v12721_v40 = vcombine.low %v1551_v14, %v1558_v54  ;;  %v12722_v55 = vcombine.high %v1551_v14, %v1558_v54 }
 0x2f9   : > { %v21554_v26 = vrot.slane %v21553_v22, 4 }
 0x2fa   : > { %3391 = vrot.lane.b32.xlu1 %v17591_v42, %s21266_s20  ;;  %3383 = vrot.lane.b32.xlu0 %v17602_v6, %s21266_s20  ;;  %v572_v3 = vsel %vm559_vm7, %v524_v36, %v548_v35  ;;  %v563_v19 = vsel %vm21212_vm0, %v21556_v1, %v544_v43  ;;  %v565_v41 = vsel %vm559_vm7, %v516_v33, %v544_v43  ;;  %v6248_v34 = vpop.f32.mrf.mxu0  ;;  %v17840_v33 = vpop.f32.mrf.mxu1 }
 0x2fb   : > { %v570_v51 = vsel %vm21212_vm0, %v21554_v26, %v548_v35  ;;  %6669 = vmatprep.subr.bf16.mxu1 %v12722_v55  ;;  %610 = vst [vmem:[#allocation2 + $0xa4] sm:$0xf] %v572_v3  ;;  %v564_v58 = vsel %vm559_vm7, %v21555_v4, %v563_v19  ;;  %606 = vst [vmem:[#allocation2 + $0x88] sm:$0xf] %v565_v41  ;;  %v2515_v48 = vpop.permute.xlu1 %2514  ;;  %v2507_v21 = vpop.permute.xlu0 %2506  ;;  %v6249_v30 = vadd.f32 %v6248_v34, %v17300_v13 }
 0x2fc   : > { %v571_v50 = vsel %vm559_vm7, %v21553_v22, %v570_v51  ;;  %6670 = vmatpush1.bf16.msra.mxu1 %v12721_v40  ;;  %v2531_v60 = vrot.slane %v2515_v48, 4  ;;  %v2527_v8 = vrot.slane %v2507_v21, 4  ;;  %v17838_v36 = vpop.f32.mrf.mxu0  ;;  %v21557_v35 = vrot.slane %v16988_v0, 4 }
 0x2fd   : > { %v12623_v54 = vcombine.low %v564_v58, %v571_v50  ;;  %v12624_v14 = vcombine.high %v564_v58, %v571_v50  ;;  %v21559_v40 = vrot.slane %v16990_v25, 4  ;;  %v17859_v19 = vadd.f32 %v17743_v61, %v6249_v30 }
 0x2fe   : > { %3375 = vrot.lane.b32.xlu1 %v17637_v37, %s21266_s20  ;;  %3367 = vrot.lane.b32.xlu0 %v17648_v29, %s21266_s20  ;;  %v2558_v43 = vsel %vm21212_vm0, %v21557_v35, %v2531_v60  ;;  %v2560_v13 = vsel %vm21558_vm4, %v2515_v48, %v2531_v60  ;;  %v2553_v22 = vsel %vm21560_vm6, %v2507_v21, %v2527_v8  ;;  %v6252_v26 = vpop.f32.mrf.mxu0  ;;  %v17870_v60 = vld [vmem:[%s14867_s24 + $0x5c] sm:$0xff]  ;;  %v21565_v30 = vrot.slane %v17036_v32, 4  ;;  %vm21569_vm4 = vmmov %vm21524_vm1 }
 0x2ff   : > { %v2551_v55 = vsel %vm21212_vm0, %v21559_v40, %v2527_v8  ;;  %6602 = vmatprep.subr.bf16.mxu0 %v12624_v14  ;;  %v2559_v51 = vsel %vm21561_vm13, %v16988_v0, %v2558_v43  ;;  %2592 = vst [vmem:[#allocation2 + $0x6fc] sm:$0xf] %v2560_v13  ;;  %2588 = vst [vmem:[#allocation2 + $0x6e0] sm:$0xf] %v2553_v22  ;;  %v2499_v4 = vpop.permute.xlu1 %2498  ;;  %v2491_v1 = vpop.permute.xlu0 %2490  ;;  %v6253_v41 = vadd.f32 %v6252_v26, %v17332_v52  ;;  %v17873_v8 = vld [vmem:[%s14867_s24 + $0x80] sm:$0xff]  ;;  %vm21574_vm13 = vcmask 490496  }
 0x300   : > { %v2552_v3 = vsel %vm21524_vm1, %v16990_v25, %v2551_v55  ;;  %6603 = vmatpush1.bf16.msra.mxu0 %v12623_v54  ;;  %21562 = vst [vmem:[#allocation69_spill] sm:$0xff] %v17859_v19  ;;  %v2523_v34 = vrot.slane %v2499_v4, 4  ;;  %v2519_v50 = vrot.slane %v2491_v1, 4  ;;  %v21563_v0 = vcombine.high %v17067_v44, %v17070_v62  ;;  %v17865_v21 = vpop.f32.mrf.mxu0  ;;  %v17867_v25 = vpop.f32.mrf.mxu1  ;;  %vm21570_vm6 = vmmov %vm21524_vm1 }
 0x301   : > { %v12826_v58 = vcombine.low %v2552_v3, %v2559_v51  ;;  %v12827_v48 = vcombine.high %v2552_v3, %v2559_v51  ;;  %v17880_v52 = vadd.f32 %v17781_v59, %v6253_v41  ;;  %v21567_v35 = vrot.slane %v17038_v24, 4  ;;  %vm21577_vm1 = vmmov %vm21574_vm13 }
 0x302   : > { %6604 = vmatprep.subr.bf16.mxu0 %v21563_v0  ;;  %3251 = vrot.lane.b32.xlu1 %v17591_v42, %s21351_s8  ;;  %v2544_v54 = vsel %vm21212_vm0, %v21565_v30, %v2523_v34  ;;  %v2546_v14 = vsel %vm21566_vm2, %v2499_v4, %v2523_v34  ;;  %v2539_v42 = vsel %vm21568_vm11, %v2491_v1, %v2519_v50  ;;  %v17904_v41 = vpop.f32.mrf.mxu1  ;;  %v17907_v34 = vld [vmem:[%s14867_s24 + $0x14] sm:$0xff]  ;;  %vm21578_vm2 = vmmov %vm21577_vm1  ;;  %v21216_v19 = vmov 0.0  }
 0x303   : > { %3243 = vrot.lane.b32.xlu0 %v17602_v6, %s21351_s8  ;;  %21564 = vst [vmem:[#allocation68_spill] sm:$0xff] %v17880_v52  ;;  %v2537_v43 = vsel %vm21212_vm0, %v21567_v35, %v2519_v50  ;;  %6671 = vmatprep.subr.bf16.mxu1 %v12827_v48  ;;  %v6258_v6 = vpop.f32.mrf.mxu0  ;;  %v2545_v59 = vsel %vm21569_vm4, %v17036_v32, %v2544_v54  ;;  %2584 = vst [vmem:[#allocation2 + $0x6c4] sm:$0xf] %v2546_v14  ;;  %v2374_v40 = vpop.permute.xlu1 %2373  ;;  %v17910_v50 = vld [vmem:[%s14867_s24 + $0x38] sm:$0xff] }
 0x304   : > { %v2538_v13 = vsel %vm21570_vm6, %v17038_v24, %v2537_v43  ;;  %2580 = vst [vmem:[#allocation2 + $0x6a8] sm:$0xf] %v2539_v42  ;;  %v2366_v55 = vpop.permute.xlu0 %2365  ;;  %6672 = vmatpush2.bf16.msra.mxu1 %v12826_v58  ;;  %v21571_v22 = vcombine.low %v17067_v44, %v17070_v62  ;;  %v2390_v51 = vrot.slane %v2374_v40, 4  ;;  %v21572_v1 = vcombine.high %v17101_v46, %v17104_v45  ;;  %v21575_v30 = vld [vmem:[#allocation25_spill] sm:$0xff]  ;;  %vm21579_vm11 = vmmov %vm21577_vm1 }
 0x305   : > { %v2386_v3 = vrot.slane %v2366_v55, 4  ;;  %v12819_v32 = vcombine.low %v2538_v13, %v2545_v59  ;;  %v12820_v4 = vcombine.high %v2538_v13, %v2545_v59  ;;  %v6260_v24 = vpop.f32.mrf.mxu0  ;;  %v6259_v44 = vadd.f32 %v6258_v6, %v17362_v23  ;;  %vm21591_vm4 = vmmov %vm21577_vm1 }
 0x306   : > { %6605 = vmatpush1.bf16.msra.mxu0 %v21571_v22  ;;  %3235 = vrot.lane.b32.xlu1 %v17637_v37, %s21351_s8  ;;  %v17918_v62 = vadd.f32 %v6260_v24, %v17364_v12  ;;  %v21573_v58 = vrot.slane %v17094_v2, 4  ;;  %v2419_v0 = vsel %vm21574_vm13, %v2374_v40, %v2390_v51  ;;  %v21576_v54 = vrot.slane %v21575_v30, 4  ;;  %v6331_v22 = vpop.f32.mrf.mxu1  ;;  %vm21594_vm6 = vmmov %vm21577_vm1 }
 0x307   : > { %6606 = vmatprep.subr.bf16.mxu0 %v21572_v1  ;;  %3227 = vrot.lane.b32.xlu0 %v17648_v29, %s21351_s8  ;;  %v2412_v37 = vsel %vm21577_vm1, %v2366_v55, %v2386_v3  ;;  %v6262_v35 = vpop.f32.mrf.mxu0  ;;  %2451 = vst [vmem:[#allocation2 + $0x68c] sm:$0xf] %v2419_v0  ;;  %v1387_v29 = vpop.permute.xlu1 %1386  ;;  %v21580_v42 = vcombine.low %v17101_v46, %v17104_v45  ;;  %v21584_v46 = vld [vmem:[#allocation65_spill] sm:$0xff]  ;;  %vm21595_vm13 = vmmov %vm21577_vm1 }
 0x308   : > { %v2417_v48 = vsel %vm21212_vm0, %v21573_v58, %v2390_v51  ;;  %v2410_v14 = vsel %vm21212_vm0, %v21576_v54, %v2386_v3  ;;  %6673 = vmatprep.subr.bf16.mxu1 %v12820_v4  ;;  %2447 = vst [vmem:[#allocation2 + $0x670] sm:$0xf] %v2412_v37  ;;  %v1379_v43 = vpop.permute.xlu0 %1378  ;;  %v1403_v6 = vrot.slane %v1387_v29, 4  ;;  %v6263_v51 = vadd.f32 %v6262_v35, %v17396_v39  ;;  %v21582_v3 = vld [vmem:[#allocation64_spill] sm:$0xff] }
 0x309   : > { %v2418_v23 = vsel %vm21578_vm2, %v17094_v2, %v2417_v48  ;;  %v2411_v12 = vsel %vm21579_vm11, %v21575_v30, %v2410_v14  ;;  %6674 = vmatpush2.bf16.msra.mxu1 %v12819_v32  ;;  %v1399_v59 = vrot.slane %v1379_v43, 4  ;;  %v17935_v55 = vpop.f32.mrf.mxu0  ;;  %v17938_v2 = vadd.f32 %v17819_v9, %v6259_v44 }
 0x30a   : > { %6607 = vmatpush1.bf16.msra.mxu0 %v21580_v42  ;;  %v12812_v13 = vcombine.low %v2411_v12, %v2418_v23  ;;  %v12813_v40 = vcombine.high %v2411_v12, %v2418_v23  ;;  %v21583_v4 = vrot.slane %v21582_v3, 4  ;;  %v1432_v1 = vsel %vm1405_vm10, %v1387_v29, %v1403_v6  ;;  %v17957_v29 = vpop.f32.mrf.mxu1 }
 0x30b   : > { %21581 = vst [vmem:[#allocation47_spill] sm:$0xff] %v17938_v2  ;;  %v21585_v45 = vrot.slane %v21584_v46, 4  ;;  %v1425_v58 = vsel %vm1405_vm10, %v1379_v43, %v1399_v59  ;;  %v6268_v48 = vpop.f32.mrf.mxu0  ;;  %1464 = vst [vmem:[#allocation2 + $0x37c] sm:$0xf] %v1432_v1  ;;  %v2358_v44 = vpop.permute.xlu1 %2357  ;;  %v17954_v30 = vadd.f32 %v17867_v25, %v6263_v51 }
 0x30c   : > { %v1430_v32 = vsel %vm21212_vm0, %v21583_v4, %v1403_v6  ;;  %6675 = vmatprep.subr.bf16.mxu1 %v12813_v40  ;;  %1460 = vst [vmem:[#allocation2 + $0x360] sm:$0xf] %v1425_v58  ;;  %v2350_v0 = vpop.permute.xlu0 %2349  ;;  %v6269_v54 = vadd.f32 %v6268_v48, %v17422_v17  ;;  %v2382_v14 = vrot.slane %v2358_v44, 4  ;;  %21587 = vst [vmem:[#allocation49_spill] sm:$0xff] %v17957_v29  ;;  %v21589_v6 = vld [vmem:[#allocation26_spill] sm:$0xff]  ;;  %v21592_v17 = vld [vmem:[#allocation29_spill] sm:$0xff] }
 0x30d   : > { %v1423_v24 = vsel %vm21212_vm0, %v21585_v45, %v1399_v59  ;;  %v1431_v9 = vsel %vm1405_vm10, %v21582_v3, %v1430_v32  ;;  %6676 = vmatpush2.bf16.msra.mxu1 %v12812_v13  ;;  %21586 = vst [vmem:[#allocation46_spill] sm:$0xff] %v17954_v30  ;;  %v2378_v37 = vrot.slane %v2350_v0, 4  ;;  %v6270_v12 = vpop.f32.mrf.mxu0  ;;  %v21590_v59 = vrot.slane %v21589_v6, 4 }
 0x30e   : > { %v1424_v39 = vsel %vm1405_vm10, %v21584_v46, %v1423_v24  ;;  %v17962_v42 = vadd.f32 %v6270_v12, %v17424_v18  ;;  %v2405_v13 = vsel %vm21591_vm4, %v2358_v44, %v2382_v14  ;;  %v21593_v40 = vrot.slane %v21592_v17, 4  ;;  %v6335_v44 = vpop.f32.mrf.mxu1 }
 0x30f   : > { %v12714_v35 = vcombine.low %v1424_v39, %v1431_v9  ;;  %v12715_v23 = vcombine.high %v1424_v39, %v1431_v9  ;;  %v2403_v25 = vsel %vm21212_vm0, %v21590_v59, %v2382_v14  ;;  %v2398_v3 = vsel %vm21594_vm6, %v2350_v0, %v2378_v37  ;;  %v6272_v4 = vpop.f32.mrf.mxu0  ;;  %2443 = vst [vmem:[#allocation2 + $0x654] sm:$0xf] %v2405_v13  ;;  %v1371_v1 = vpop.permute.xlu1 %1370 }
 0x310   : > { %21588 = vst [vmem:[#allocation48_spill] sm:$0xff] %v17962_v42  ;;  %v2396_v51 = vsel %vm21212_vm0, %v21593_v40, %v2378_v37  ;;  %v2404_v32 = vsel %vm21595_vm13, %v21589_v6, %v2403_v25  ;;  %2439 = vst [vmem:[#allocation2 + $0x638] sm:$0xf] %v2398_v3  ;;  %v1363_v46 = vpop.permute.xlu0 %1362  ;;  %v17976_v45 = vadd.f32 %v6331_v22, %v6269_v54  ;;  %v1395_v58 = vrot.slane %v1371_v1, 4  ;;  %v21598_v37 = vld [vmem:[#allocation66_spill] sm:$0xff]  ;;  %v21600_v22 = vld [vmem:[#allocation67_spill] sm:$0xff] }
 0x311   : > { %6608 = vmatprep.subr.bf16.mxu0 %v12715_v23  ;;  %v2397_v18 = vsel %vm21577_vm1, %v21592_v17, %v2396_v51  ;;  %v6273_v24 = vadd.f32 %v6272_v4, %v17456_v10  ;;  %v1391_v48 = vrot.slane %v1363_v46, 4  ;;  %v21599_v23 = vrot.slane %v21598_v37, 4  ;;  %v13965_v40 = vld [vmem:[#allocation2 + $0x168] ss:$28 sps:$4 sm:$0xff]  }
 0x312   : > { %6609 = vmatpush2.bf16.msra.mxu0 %v12714_v35  ;;  %21596 = vst [vmem:[#allocation52_spill] sm:$0xff] %v17976_v45  ;;  %v12805_v9 = vcombine.low %v2397_v18, %v2404_v32  ;;  %v12806_v39 = vcombine.high %v2397_v18, %v2404_v32  ;;  %v1418_v35 = vsel %vm1405_vm10, %v1371_v1, %v1395_v58  ;;  %v21601_v54 = vrot.slane %v21600_v22, 4  ;;  %v13969_v18 = vld [vmem:[#allocation2 + $0xf8] ss:$28 sps:$4 sm:$0xff]  }
 0x313   : > { %v17979_v0 = vadd.f32 %v6335_v44, %v6273_v24  ;;  %v1416_v12 = vsel %vm21212_vm0, %v21599_v23, %v1395_v58  ;;  %v1411_v6 = vsel %vm1405_vm10, %v1363_v46, %v1391_v48  ;;  %1456 = vst [vmem:[#allocation2 + $0x344] sm:$0xf] %v1418_v35  ;;  %v2233_v13 = vpop.permute.xlu1 %2232  ;;  %v21602_v46 = vld [vmem:[#allocation30_spill] sm:$0xff] }
 0x314   : > { %v1409_v10 = vsel %vm21212_vm0, %v21601_v54, %v1391_v48  ;;  %6677 = vmatprep.subr.bf16.mxu1 %v12806_v39  ;;  %v1417_v59 = vsel %vm1405_vm10, %v21598_v37, %v1416_v12  ;;  %1452 = vst [vmem:[#allocation2 + $0x328] sm:$0xf] %v1411_v6  ;;  %v2225_v17 = vpop.permute.xlu0 %2224  ;;  %v2249_v51 = vrot.slane %v2233_v13, 4  ;;  %v21603_v24 = vrot.slane %v21602_v46, 4 }
 0x315   : > { %21597 = vst [vmem:[#allocation53_spill] sm:$0xff] %v17979_v0  ;;  %v1410_v25 = vsel %vm1405_vm10, %v21600_v22, %v1409_v10  ;;  %6678 = vmatpush2.bf16.msra.mxu1 %v12805_v9  ;;  %v2245_v3 = vrot.slane %v2225_v17, 4  ;;  %vm21604_vm10 = vcmask 498688   ;;  %v21605_v9 = vld [vmem:[#allocation33_spill] sm:$0xff] }
 0x316   : > { %v12707_v4 = vcombine.low %v1410_v25, %v1417_v59  ;;  %v12708_v32 = vcombine.high %v1410_v25, %v1417_v59  ;;  %v2276_v58 = vsel %vm21212_vm0, %v21603_v24, %v2249_v51  ;;  %v2278_v48 = vsel %vm21604_vm10, %v2233_v13, %v2249_v51  ;;  %vm21607_vm2 = vmmov %vm21604_vm10  ;;  %v3168_v25 = vld [vmem:[%s14867_s24 + $0x64] sm:$0xf]  ;;  %v3172_v13 = vld [vmem:[%s14867_s24 + $0x88] sm:$0xf] }
 0x317   : > { %v21606_v39 = vrot.slane %v21605_v9, 4  ;;  %v2271_v37 = vsel %vm21607_vm2, %v2225_v17, %v2245_v3  ;;  %vm21608_vm11 = vmmov %vm21607_vm2  ;;  %2310 = vst [vmem:[#allocation2 + $0x61c] sm:$0xf] %v2278_v48  ;;  %v1246_v35 = vpop.permute.xlu1 %1245  ;;  %v21610_v51 = vld [vmem:[#allocation70_spill] sm:$0xff] }
 0x318   : > { %6610 = vmatprep.subr.bf16.mxu0 %v12708_v32  ;;  %v2277_v23 = vsel %vm21608_vm11, %v21602_v46, %v2276_v58  ;;  %vm21609_vm4 = vmmov %vm21607_vm2  ;;  %2306 = vst [vmem:[#allocation2 + $0x600] sm:$0xf] %v2271_v37  ;;  %v1238_v22 = vpop.permute.xlu0 %1237  ;;  %v1262_v54 = vrot.slane %v1246_v35, 4  ;;  %v21611_v17 = vrot.slane %v21610_v51, 4  ;;  %v21612_v46 = vld [vmem:[#allocation71_spill] sm:$0xff] }
 0x319   : > { %v2269_v44 = vsel %vm21212_vm0, %v21606_v39, %v2245_v3  ;;  %6611 = vmatpush2.bf16.msra.mxu0 %v12707_v4  ;;  %v1258_v10 = vrot.slane %v1238_v22, 4  ;;  %v21613_v24 = vrot.slane %v21612_v46, 4  ;;  %3184 = vst [vmem:[#allocation2 + $0x910] sm:$0xf] %v3168_v25  ;;  %3188 = vst [vmem:[#allocation2 + $0x92c] sm:$0xf] %v3172_v13 }
 0x31a   : > { %v2270_v12 = vsel %vm21609_vm4, %v21605_v9, %v2269_v44  ;;  %v1289_v3 = vsel %vm21212_vm0, %v21611_v17, %v1262_v54  ;;  %v1291_v32 = vsel %vm1264_vm12, %v1246_v35, %v1262_v54  ;;  %v3164_v54 = vld [vmem:[%s14867_s24 + $0x40] sm:$0xf]  ;;  %vm21616_vm6 = vmmov %vm21607_vm2 }
 0x31b   : > { %v12798_v6 = vcombine.low %v2270_v12, %v2277_v23  ;;  %v12799_v59 = vcombine.high %v2270_v12, %v2277_v23  ;;  %v1282_v58 = vsel %vm21212_vm0, %v21613_v24, %v1258_v10  ;;  %v1284_v48 = vsel %vm1264_vm12, %v1238_v22, %v1258_v10  ;;  %1323 = vst [vmem:[#allocation2 + $0x30c] sm:$0xf] %v1291_v32  ;;  %v2217_v39 = vpop.permute.xlu1 %2216  ;;  %v3160_v22 = vld [vmem:[%s14867_s24 + $0x1c] sm:$0xf]  ;;  %v21614_v10 = vld [vmem:[#allocation83_spill] sm:$0xff]  ;;  %vm21619_vm13 = vmmov %vm21607_vm2 }
 0x31c   : > { %v1290_v4 = vsel %vm1264_vm12, %v21610_v51, %v1289_v3  ;;  %v1283_v9 = vsel %vm1264_vm12, %v21612_v46, %v1282_v58  ;;  %1319 = vst [vmem:[#allocation2 + $0x2f0] sm:$0xf] %v1284_v48  ;;  %v2209_v44 = vpop.permute.xlu0 %2208  ;;  %v2241_v37 = vrot.slane %v2217_v39, 4  ;;  %v21617_v51 = vld [vmem:[#allocation84_spill] sm:$0xff]  ;;  %3176 = vst [vmem:[#allocation2 + $0x8d8] sm:$0xf] %v3160_v22 }
 0x31d   : > { %6679 = vmatprep.subr.bf16.mxu1 %v12799_v59  ;;  %v2237_v23 = vrot.slane %v2209_v44, 4  ;;  %v12700_v12 = vcombine.low %v1283_v9, %v1290_v4  ;;  %v12701_v35 = vcombine.high %v1283_v9, %v1290_v4  ;;  %v21615_v59 = vrot.slane %v21614_v10, 4  ;;  %3180 = vst [vmem:[#allocation2 + $0x8f4] sm:$0xf] %v3164_v54  ;;  %vm21620_vm1 = vmmov %vm21607_vm2  ;;  %v21624_v22 = vld [vmem:[#allocation73_spill] sm:$0xff] }
 0x31e   : > { %6680 = vmatpush2.bf16.msra.mxu1 %v12798_v6  ;;  %v2264_v13 = vsel %vm21616_vm6, %v2217_v39, %v2241_v37  ;;  %v21618_v17 = vrot.slane %v21617_v51, 4  ;;  %vm21621_vm10 = vmmov %vm21620_vm1  ;;  %v21625_v54 = vrot.slane %v21624_v22, 4  ;;  %vm21627_vm2 = vcmask 506880  }
 0x31f   : > { %v2262_v25 = vsel %vm21212_vm0, %v21615_v59, %v2241_v37  ;;  %v2257_v32 = vsel %vm21619_vm13, %v2209_v44, %v2237_v23  ;;  %6612 = vmatprep.subr.bf16.mxu0 %v12701_v35  ;;  %2302 = vst [vmem:[#allocation2 + $0x5e4] sm:$0xf] %v2264_v13  ;;  %v1230_v24 = vpop.permute.xlu1 %1229  ;;  %v21622_v37 = vld [vmem:[#allocation72_spill] sm:$0xff]  ;;  %vm21629_vm11 = vmmov %vm21627_vm2 }
 0x320   : > { %v2255_v3 = vsel %vm21212_vm0, %v21618_v17, %v2237_v23  ;;  %v2263_v6 = vsel %vm21620_vm1, %v21614_v10, %v2262_v25  ;;  %2298 = vst [vmem:[#allocation2 + $0x5c8] sm:$0xf] %v2257_v32  ;;  %v1222_v58 = vpop.permute.xlu0 %1221  ;;  %6613 = vmatpush2.bf16.msra.mxu0 %v12700_v12  ;;  %v1254_v48 = vrot.slane %v1230_v24, 4  ;;  %v21623_v44 = vrot.slane %v21622_v37, 4  ;;  %vm21631_vm4 = vmmov %vm21627_vm2 }
 0x321   : > { %v2256_v46 = vsel %vm21621_vm10, %v21617_v51, %v2255_v3  ;;  %v1250_v4 = vrot.slane %v1222_v58, 4  ;;  %vm21637_vm6 = vmmov %vm21627_vm2 }
 0x322   : > { %v12791_v9 = vcombine.low %v2256_v46, %v2263_v6  ;;  %v12792_v39 = vcombine.high %v2256_v46, %v2263_v6  ;;  %v1275_v23 = vsel %vm21212_vm0, %v21623_v44, %v1254_v48  ;;  %v1277_v35 = vsel %vm1264_vm12, %v1230_v24, %v1254_v48  ;;  %vm21639_vm13 = vmmov %vm21627_vm2 }
 0x323   : > { %v1268_v10 = vsel %vm21212_vm0, %v21625_v54, %v1250_v4  ;;  %v1270_v59 = vsel %vm1264_vm12, %v1222_v58, %v1250_v4  ;;  %v1276_v12 = vsel %vm1264_vm12, %v21622_v37, %v1275_v23  ;;  %1315 = vst [vmem:[#allocation2 + $0x2d4] sm:$0xf] %v1277_v35  ;;  %v2092_v13 = vpop.permute.xlu1 %2091  ;;  %v21626_v46 = vrot.slane %v17320_v47, 4  ;;  %vm21640_vm1 = vmmov %vm21627_vm2 }
 0x324   : > { %6681 = vmatprep.subr.bf16.mxu1 %v12792_v39  ;;  %v1269_v25 = vsel %vm1264_vm12, %v21624_v22, %v1268_v10  ;;  %1311 = vst [vmem:[#allocation2 + $0x2b8] sm:$0xf] %v1270_v59  ;;  %v2084_v51 = vpop.permute.xlu0 %2083  ;;  %v2108_v17 = vrot.slane %v2092_v13, 4  ;;  %v21628_v48 = vrot.slane %v17322_v49, 4  ;;  %vm21630_vm12 = vmmov %vm21627_vm2  ;;  %v21632_v59 = vld [vmem:[#allocation74_spill] sm:$0xff] }
 0x325   : > { %6682 = vmatpush2.bf16.msra.mxu1 %v12791_v9  ;;  %v2104_v3 = vrot.slane %v2084_v51, 4  ;;  %v12693_v32 = vcombine.low %v1269_v25, %v1276_v12  ;;  %v12694_v6 = vcombine.high %v1269_v25, %v1276_v12  ;;  %v21633_v12 = vrot.slane %v21632_v59, 4  ;;  %vm21641_vm10 = vmmov %vm21640_vm1 }
 0x326   : > { %v2135_v24 = vsel %vm21212_vm0, %v21626_v46, %v2108_v17  ;;  %v2137_v58 = vsel %vm21627_vm2, %v2092_v13, %v2108_v17  ;;  %vm21656_vm2 = vcmask 228352  }
 0x327   : > { %v2128_v4 = vsel %vm21212_vm0, %v21628_v48, %v2104_v3  ;;  %v2130_v39 = vsel %vm21629_vm11, %v2084_v51, %v2104_v3  ;;  %6614 = vmatprep.subr.bf16.mxu0 %v12694_v6  ;;  %v2136_v9 = vsel %vm21630_vm12, %v17320_v47, %v2135_v24  ;;  %2169 = vst [vmem:[#allocation2 + $0x5ac] sm:$0xf] %v2137_v58  ;;  %v1105_v44 = vpop.permute.xlu1 %1104  ;;  %v21634_v51 = vld [vmem:[#allocation75_spill] sm:$0xff]  ;;  %vm21659_vm11 = vmmov %vm21656_vm2 }
 0x328   : > { %v2129_v37 = vsel %vm21631_vm4, %v17322_v49, %v2128_v4  ;;  %2165 = vst [vmem:[#allocation2 + $0x590] sm:$0xf] %v2130_v39  ;;  %v1097_v23 = vpop.permute.xlu0 %1096  ;;  %6615 = vmatpush2.bf16.msra.mxu0 %v12693_v32  ;;  %v1121_v35 = vrot.slane %v1105_v44, 4  ;;  %v21635_v47 = vrot.slane %v21634_v51, 4  ;;  %v21636_v39 = vrot.slane %v17386_v27, 4  ;;  %vm21660_vm12 = vmmov %vm21656_vm2 }
 0x329   : > { %v1117_v22 = vrot.slane %v1097_v23, 4  ;;  %v12784_v54 = vcombine.low %v2129_v37, %v2136_v9  ;;  %v12785_v10 = vcombine.high %v2129_v37, %v2136_v9  ;;  %vm21661_vm4 = vmmov %vm21656_vm2 }
 0x32a   : > { %v1148_v25 = vsel %vm21212_vm0, %v21633_v12, %v1121_v35  ;;  %v1150_v13 = vsel %vm1123_vm14, %v1105_v44, %v1121_v35  ;;  %v21638_v44 = vrot.slane %v17388_v63, 4 }
 0x32b   : > { %v1141_v17 = vsel %vm21212_vm0, %v21635_v47, %v1117_v22  ;;  %v1143_v49 = vsel %vm1123_vm14, %v1097_v23, %v1117_v22  ;;  %6683 = vmatprep.subr.bf16.mxu1 %v12785_v10  ;;  %v1149_v3 = vsel %vm1123_vm14, %v21632_v59, %v1148_v25  ;;  %1182 = vst [vmem:[#allocation2 + $0x29c] sm:$0xf] %v1150_v13  ;;  %v2076_v6 = vpop.permute.xlu1 %2075  ;;  %v21642_v47 = vld [vmem:[#allocation76_spill] sm:$0xff] }
 0x32c   : > { %v1142_v32 = vsel %vm1123_vm14, %v21634_v51, %v1141_v17  ;;  %1178 = vst [vmem:[#allocation2 + $0x280] sm:$0xf] %v1143_v49  ;;  %v2068_v46 = vpop.permute.xlu0 %2067  ;;  %6684 = vmatpush2.bf16.msra.mxu1 %v12784_v54  ;;  %v2100_v24 = vrot.slane %v2076_v6, 4  ;;  %v21643_v17 = vrot.slane %v21642_v47, 4 }
 0x32d   : > { %v2096_v58 = vrot.slane %v2068_v46, 4  ;;  %v12686_v48 = vcombine.low %v1142_v32, %v1149_v3  ;;  %v12687_v4 = vcombine.high %v1142_v32, %v1149_v3  ;;  %v21644_v32 = vld [vmem:[#allocation77_spill] sm:$0xff] }
 0x32e   : > { %v2121_v9 = vsel %vm21212_vm0, %v21636_v39, %v2100_v24  ;;  %v2123_v37 = vsel %vm21637_vm6, %v2076_v6, %v2100_v24  ;;  %vm21664_vm6 = vmmov %vm21656_vm2 }
 0x32f   : > { %v2114_v23 = vsel %vm21212_vm0, %v21638_v44, %v2096_v58  ;;  %v2116_v35 = vsel %vm21639_vm13, %v2068_v46, %v2096_v58  ;;  %6616 = vmatprep.subr.bf16.mxu0 %v12687_v4  ;;  %v2122_v22 = vsel %vm21640_vm1, %v17386_v27, %v2121_v9  ;;  %2161 = vst [vmem:[#allocation2 + $0x574] sm:$0xf] %v2123_v37  ;;  %v1089_v10 = vpop.permute.xlu1 %1088  ;;  %v21645_v27 = vrot.slane %v21644_v32, 4  ;;  %v21646_v44 = vld [vmem:[#allocation78_spill] sm:$0xff]  ;;  %vm21667_vm13 = vmmov %vm21656_vm2 }
 0x330   : > { %v2115_v54 = vsel %vm21641_vm10, %v17388_v63, %v2114_v23  ;;  %2157 = vst [vmem:[#allocation2 + $0x558] sm:$0xf] %v2116_v35  ;;  %v1081_v59 = vpop.permute.xlu0 %1080  ;;  %6617 = vmatpush2.bf16.msra.mxu0 %v12686_v48  ;;  %v1113_v12 = vrot.slane %v1089_v10, 4  ;;  %v21647_v23 = vrot.slane %v21646_v44, 4  ;;  %vm21668_vm1 = vmmov %vm21656_vm2 }
 0x331   : > { %v1109_v25 = vrot.slane %v1081_v59, 4  ;;  %v12777_v13 = vcombine.low %v2115_v54, %v2122_v22  ;;  %v12778_v51 = vcombine.high %v2115_v54, %v2122_v22  ;;  %v21648_v54 = vld [vmem:[#allocation79_spill] sm:$0xff]  ;;  %vm21669_vm10 = vmmov %vm21668_vm1 }
 0x332   : > { %v1134_v49 = vsel %vm21212_vm0, %v21643_v17, %v1113_v12  ;;  %v1136_v3 = vsel %vm1123_vm14, %v1089_v10, %v1113_v12  ;;  %v21649_v10 = vrot.slane %v21648_v54, 4  ;;  %v18116_v17 = vld [vmem:[%s20753_s1 + $0x8] ss:$28 sps:$4 sm:$0xff]  }
 0x333   : > { %v1127_v6 = vsel %vm21212_vm0, %v21645_v27, %v1109_v25  ;;  %v1129_v63 = vsel %vm1123_vm14, %v1081_v59, %v1109_v25  ;;  %6685 = vmatprep.subr.bf16.mxu1 %v12778_v51  ;;  %v1135_v46 = vsel %vm1123_vm14, %v21642_v47, %v1134_v49  ;;  %1174 = vst [vmem:[#allocation2 + $0x264] sm:$0xf] %v1136_v3  ;;  %v964_v58 = vpop.permute.xlu1 %963 }
 0x334   : > { %v1128_v24 = vsel %vm1123_vm14, %v21644_v32, %v1127_v6  ;;  %1170 = vst [vmem:[#allocation2 + $0x248] sm:$0xf] %v1129_v63  ;;  %v956_v48 = vpop.permute.xlu0 %955  ;;  %6686 = vmatpush2.bf16.msra.mxu1 %v12777_v13  ;;  %v980_v4 = vrot.slane %v964_v58, 4  ;;  %v18122_v6 = vld [vmem:[%s20753_s1 + $0x44] ss:$28 sps:$4 sm:$0xff]   ;;  %v21650_v63 = vld [vmem:[#allocation80_spill] sm:$0xff] }
 0x335   : > { %v976_v39 = vrot.slane %v956_v48, 4  ;;  %v12679_v9 = vcombine.low %v1128_v24, %v1135_v46  ;;  %v12680_v37 = vcombine.high %v1128_v24, %v1135_v46  ;;  %v21651_v46 = vrot.slane %v21650_v63, 4 }
 0x336   : > { %v1007_v35 = vsel %vm21212_vm0, %v21647_v23, %v980_v4  ;;  %v1009_v22 = vsel %vm982_vm15, %v964_v58, %v980_v4 }
 0x337   : > { %v1000_v59 = vsel %vm21212_vm0, %v21649_v10, %v976_v39  ;;  %v1002_v12 = vsel %vm982_vm15, %v956_v48, %v976_v39  ;;  %6618 = vmatprep.subr.bf16.mxu0 %v12680_v37  ;;  %v1008_v25 = vsel %vm982_vm15, %v21646_v44, %v1007_v35  ;;  %1041 = vst [vmem:[#allocation2 + $0x22c] sm:$0xf] %v1009_v22  ;;  %v948_v51 = vpop.permute.xlu1 %947  ;;  %v21652_v48 = vld [vmem:[#allocation81_spill] sm:$0xff] }
 0x338   : > { %v1001_v13 = vsel %vm982_vm15, %v21648_v54, %v1000_v59  ;;  %1037 = vst [vmem:[#allocation2 + $0x210] sm:$0xf] %v1002_v12  ;;  %v940_v47 = vpop.permute.xlu0 %939  ;;  %6619 = vmatpush2.bf16.msra.mxu0 %v12679_v9  ;;  %6688 = vmatmul.mubr.bf16.vlgmr.msra.gmra.mxu1 %v18116_v17  ;;  %v972_v49 = vrot.slane %v948_v51, 4  ;;  %v21653_v4 = vrot.slane %v21652_v48, 4  ;;  %v21654_v12 = vld [vmem:[#allocation43_spill] sm:$0xff] }
 0x339   : > { %v968_v3 = vrot.slane %v940_v47, 4  ;;  %v12672_v32 = vcombine.low %v1001_v13, %v1008_v25  ;;  %v12673_v27 = vcombine.high %v1001_v13, %v1008_v25  ;;  %6697 = vmatprep.mubr.bf16.mxu1 %v18122_v6  ;;  %v21655_v25 = vrot.slane %v21654_v12, 4 }
 0x33a   : > { %v993_v24 = vsel %vm21212_vm0, %v21651_v46, %v972_v49  ;;  %v995_v58 = vsel %vm982_vm15, %v948_v51, %v972_v49 }
 0x33b   : > { %v986_v39 = vsel %vm21212_vm0, %v21653_v4, %v968_v3  ;;  %v988_v9 = vsel %vm982_vm15, %v940_v47, %v968_v3  ;;  %6620 = vmatprep.subr.bf16.mxu0 %v12673_v27  ;;  %v994_v37 = vsel %vm982_vm15, %v21650_v63, %v993_v24  ;;  %1033 = vst [vmem:[#allocation2 + $0x1f4] sm:$0xf] %v995_v58  ;;  %v3079_v23 = vpop.permute.xlu1 %3078  ;;  %v21657_v47 = vld [vmem:[#allocation42_spill] sm:$0xff] }
 0x33c   : > { %v987_v44 = vsel %vm982_vm15, %v21652_v48, %v986_v39  ;;  %1029 = vst [vmem:[#allocation2 + $0x1d8] sm:$0xf] %v988_v9  ;;  %v3071_v35 = vpop.permute.xlu0 %3070  ;;  %6621 = vmatpush2.bf16.msra.mxu0 %v12672_v32  ;;  %v3095_v22 = vrot.slane %v3079_v23, 4  ;;  %v21658_v49 = vrot.slane %v21657_v47, 4  ;;  %v18152_v58 = vld [vmem:[%s20753_s1 + $0x40] ss:$28 sps:$4 sm:$0xff]  }
 0x33d   : > { %v3091_v54 = vrot.slane %v3071_v35, 4  ;;  %v12665_v10 = vcombine.low %v987_v44, %v994_v37  ;;  %v12666_v59 = vcombine.high %v987_v44, %v994_v37  ;;  %v18158_v37 = vld [vmem:[%s20753_s1 + $0x7c] ss:$28 sps:$4 sm:$0xff]  }
 0x33e   : > { %v3122_v13 = vsel %vm21212_vm0, %v21655_v25, %v3095_v22  ;;  %v3124_v51 = vsel %vm21656_vm2, %v3079_v23, %v3095_v22  ;;  %v21662_v44 = vld [vmem:[#allocation17_spill] sm:$0xff]  ;;  %vm21674_vm2 = vcmask 236544  }
 0x33f   : > { %v3115_v3 = vsel %vm21212_vm0, %v21658_v49, %v3091_v54  ;;  %v3117_v27 = vsel %vm21659_vm11, %v3071_v35, %v3091_v54  ;;  %6622 = vmatprep.subr.bf16.mxu0 %v12666_v59  ;;  %v3123_v32 = vsel %vm21660_vm12, %v21654_v12, %v3122_v13  ;;  %3156 = vst [vmem:[#allocation2 + $0x8bc] sm:$0xf] %v3124_v51  ;;  %v21663_v23 = vrot.slane %v21662_v44, 4  ;;  %v21665_v54 = vld [vmem:[#allocation16_spill] sm:$0xff]  ;;  %v18176_v49 = vld [vmem:[%s20753_s1] ss:$28 sps:$4 sm:$0xff]   ;;  %vm21677_vm11 = vmmov %vm21674_vm2 }
 0x340   : > { %v3116_v63 = vsel %vm21661_vm4, %v21657_v47, %v3115_v3  ;;  %3152 = vst [vmem:[#allocation2 + $0x8a0] sm:$0xf] %v3117_v27  ;;  %v3063_v46 = vpop.permute.xlu1 %3062  ;;  %v3055_v24 = vpop.permute.xlu0 %3054  ;;  %6623 = vmatpush2.bf16.msra.mxu0 %v12665_v10  ;;  %6698 = vmatmul.mubr.bf16.gmra.mxu1 %v18152_v58  ;;  %v21666_v10 = vrot.slane %v21665_v54, 4  ;;  %vm21678_vm12 = vmmov %vm21674_vm2 }
 0x341   : > { %v3087_v48 = vrot.slane %v3063_v46, 4  ;;  %v3083_v4 = vrot.slane %v3055_v24, 4  ;;  %v12882_v39 = vcombine.low %v3116_v63, %v3123_v32  ;;  %v12883_v9 = vcombine.high %v3116_v63, %v3123_v32  ;;  %6707 = vmatprep.mubr.bf16.mxu1 %v18158_v37  ;;  %vm21679_vm4 = vmmov %vm21674_vm2 }
 0x343   : > { %v3108_v35 = vsel %vm21212_vm0, %v21663_v23, %v3087_v48  ;;  %v3110_v22 = vsel %vm21664_vm6, %v3063_v46, %v3087_v48  ;;  %v3101_v59 = vsel %vm21212_vm0, %v21666_v10, %v3083_v4  ;;  %v3103_v12 = vsel %vm21667_vm13, %v3055_v24, %v3083_v4  ;;  %6718 = vmatprep.subr.bf16.mxu0 %v12883_v9  ;;  %v18182_v46 = vld [vmem:[%s20753_s1 + $0x3c] ss:$28 sps:$4 sm:$0xff]   ;;  %vm21684_vm6 = vmmov %vm21674_vm2 }
 0x344   : > { %v3109_v25 = vsel %vm21668_vm1, %v21662_v44, %v3108_v35  ;;  %3148 = vst [vmem:[#allocation2 + $0x884] sm:$0xf] %v3110_v22  ;;  %v3102_v13 = vsel %vm21669_vm10, %v21665_v54, %v3101_v59  ;;  %3144 = vst [vmem:[#allocation2 + $0x868] sm:$0xf] %v3103_v12  ;;  %v3672_v51 = vpop.permute.xlu1 %3671  ;;  %v3664_v47 = vpop.permute.xlu0 %3663  ;;  %6625 = vmatmul.mubr.bf16.vlgmr.msra.gmra.mxu0 %v18176_v49  ;;  %v21670_v24 = vrot.slane %v17494_v16, 4  ;;  %v21671_v9 = vrot.slane %v17496_v57, 4 }
 0x345   : > { %v3688_v3 = vrot.slane %v3672_v51, 4  ;;  %v3684_v27 = vrot.slane %v3664_v47, 4  ;;  %6719 = vmatpush1.bf16.msra.mxu0 %v12882_v39  ;;  %v12875_v32 = vcombine.low %v3102_v13, %v3109_v25  ;;  %v12876_v63 = vcombine.high %v3102_v13, %v3109_v25  ;;  %6634 = vmatprep.mubr.bf16.mxu0 %v18182_v46  ;;  %v18200_v10 = vld [vmem:[%s20753_s1 + $0x78] ss:$28 sps:$4 sm:$0xff]   ;;  %vm21687_vm13 = vmmov %vm21674_vm2 }
 0x346   : > { %vm21688_vm1 = vmmov %vm21674_vm2 }
 0x347   : > { %v3714_v48 = vsel %vm21212_vm0, %v21670_v24, %v3688_v3  ;;  %v3716_v4 = vsel %vm982_vm15, %v3672_v51, %v3688_v3  ;;  %v3707_v44 = vsel %vm21212_vm0, %v21671_v9, %v3684_v27  ;;  %v3709_v39 = vsel %vm982_vm15, %v3664_v47, %v3684_v27  ;;  %6720 = vmatprep.subr.bf16.mxu0 %v12876_v63  ;;  %v21675_v3 = vld [vmem:[#allocation19_spill] sm:$0xff]  ;;  %vm21689_vm10 = vmmov %vm21688_vm1 }
 0x348   : > { %v3715_v23 = vsel %vm982_vm15, %v17494_v16, %v3714_v48  ;;  %3748 = vst [vmem:[#allocation2 + $0xaec] sm:$0xf] %v3716_v4  ;;  %v3708_v35 = vsel %vm982_vm15, %v17496_v57, %v3707_v44  ;;  %3744 = vst [vmem:[#allocation2 + $0xad0] sm:$0xf] %v3709_v39  ;;  %v2938_v22 = vpop.permute.xlu1 %2937  ;;  %v2930_v54 = vpop.permute.xlu0 %2929  ;;  %6708 = vmatmul.mubr.bf16.gmra.mxu1 %v18200_v10  ;;  %v21672_v16 = vld [vmem:[#allocation44_spill] sm:$0xff]  ;;  %v21676_v27 = vrot.slane %v21675_v3, 4 }
 0x349   : > { %v2954_v59 = vrot.slane %v2938_v22, 4  ;;  %v2950_v12 = vrot.slane %v2930_v54, 4  ;;  %6721 = vmatpush1.bf16.msra.mxu0 %v12875_v32  ;;  %v12952_v25 = vcombine.low %v3708_v35, %v3715_v23  ;;  %v12953_v13 = vcombine.high %v3708_v35, %v3715_v23  ;;  %6813 = vmatprep.mubr.bf16.mxu1 %v21517_v31  ;;  %v18219_v44 = vld [vmem:[%s20753_s1 + $0x38] ss:$28 sps:$4 sm:$0xff]  }
 0x34a   : > { %v21673_v51 = vrot.slane %v21672_v16, 4 }
 0x34b   : > { %v2983_v47 = vsel %vm21674_vm2, %v2938_v22, %v2954_v59  ;;  %v2974_v63 = vsel %vm21212_vm0, %v21676_v27, %v2950_v12  ;;  %v2976_v24 = vsel %vm21677_vm11, %v2930_v54, %v2950_v12  ;;  %6793 = vmatprep.subr.bf16.mxu1 %v12953_v13  ;;  %v18225_v54 = vld [vmem:[%s20753_s1 + $0x74] ss:$28 sps:$4 sm:$0xff]   ;;  %vm21694_vm2 = vcmask 261120  }
 0x34c   : > { %v2981_v57 = vsel %vm21212_vm0, %v21673_v51, %v2954_v59  ;;  %3015 = vst [vmem:[#allocation2 + $0x84c] sm:$0xf] %v2983_v47  ;;  %v2975_v48 = vsel %vm21679_vm4, %v21675_v3, %v2974_v63  ;;  %3011 = vst [vmem:[#allocation2 + $0x830] sm:$0xf] %v2976_v24  ;;  %v3656_v4 = vpop.permute.xlu1 %3655  ;;  %v3648_v9 = vpop.permute.xlu0 %3647  ;;  %6635 = vmatmul.mubr.bf16.gmra.mxu0 %v18219_v44  ;;  %6794 = vmatpush1.bf16.msra.mxu1 %v12952_v25  ;;  %v21680_v59 = vrot.slane %v17549_v38, 4  ;;  %vm21213_vm11 = vmmov 0  }
 0x34d   : > { %v2982_v32 = vsel %vm21678_vm12, %v21672_v16, %v2981_v57  ;;  %v3680_v39 = vrot.slane %v3656_v4, 4  ;;  %v3676_v23 = vrot.slane %v3648_v9, 4  ;;  %6644 = vmatprep.mubr.bf16.mxu0 %v18225_v54  ;;  %v21681_v16 = vrot.slane %v17551_v11, 4  ;;  %vm21738_vm12 = vmmov %vm21694_vm2 }
 0x34e   : > { %v12868_v35 = vcombine.low %v2975_v48, %v2982_v32  ;;  %v12869_v22 = vcombine.high %v2975_v48, %v2982_v32  ;;  %vm21740_vm4 = vmmov %vm21694_vm2 }
 0x34f   : > { %v3700_v12 = vsel %vm21212_vm0, %v21680_v59, %v3680_v39  ;;  %v3702_v13 = vsel %vm982_vm15, %v3656_v4, %v3680_v39  ;;  %v3693_v25 = vsel %vm21212_vm0, %v21681_v16, %v3676_v23  ;;  %v3695_v51 = vsel %vm982_vm15, %v3648_v9, %v3676_v23  ;;  %v21682_v4 = vld [vmem:[#allocation18_spill] sm:$0xff] }
 0x350   : > { %6722 = vmatprep.subr.bf16.mxu0 %v12869_v22  ;;  %v3701_v57 = vsel %vm982_vm15, %v17549_v38, %v3700_v12  ;;  %3740 = vst [vmem:[#allocation2 + $0xab4] sm:$0xf] %v3702_v13  ;;  %v3694_v47 = vsel %vm982_vm15, %v17551_v11, %v3693_v25  ;;  %3736 = vst [vmem:[#allocation2 + $0xa98] sm:$0xf] %v3695_v51  ;;  %v2922_v3 = vpop.permute.xlu1 %2921  ;;  %v2914_v27 = vpop.permute.xlu0 %2913  ;;  %v21683_v39 = vrot.slane %v21682_v4, 4  ;;  %v21685_v22 = vld [vmem:[#allocation45_spill] sm:$0xff] }
 0x351   : > { %6723 = vmatpush1.bf16.msra.mxu0 %v12868_v35  ;;  %v2946_v63 = vrot.slane %v2922_v3, 4  ;;  %v2942_v24 = vrot.slane %v2914_v27, 4  ;;  %v12945_v32 = vcombine.low %v3694_v47, %v3701_v57  ;;  %v12946_v48 = vcombine.high %v3694_v47, %v3701_v57  ;;  %v13962_v12 = vld [vmem:[#allocation2 + $0x360] ss:$28 sps:$4 sm:$0xff]   ;;  %v18255_v51 = vld [vmem:[%s20753_s1 + $0x70] ss:$28 sps:$4 sm:$0xff]  }
 0x352   : > { %v21686_v38 = vrot.slane %v21685_v22, 4 }
 0x353   : > { %v2967_v9 = vsel %vm21212_vm0, %v21683_v39, %v2946_v63  ;;  %v2969_v23 = vsel %vm21684_vm6, %v2922_v3, %v2946_v63  ;;  %v2962_v11 = vsel %vm21687_vm13, %v2914_v27, %v2942_v24  ;;  %6795 = vmatprep.subr.bf16.mxu1 %v12946_v48  ;;  %v18261_v63 = vld [vmem:[%s20753_s1 + $0x14] ss:$28 sps:$4 sm:$0xff]   ;;  %vm21741_vm6 = vmmov %vm21694_vm2  ;;  %vm8090_vm13 = vcmask 97284  }
 0x354   : > { %v2960_v59 = vsel %vm21212_vm0, %v21686_v38, %v2942_v24  ;;  %v2968_v35 = vsel %vm21688_vm1, %v21682_v4, %v2967_v9  ;;  %3007 = vst [vmem:[#allocation2 + $0x814] sm:$0xf] %v2969_v23  ;;  %3003 = vst [vmem:[#allocation2 + $0x7f8] sm:$0xf] %v2962_v11  ;;  %v2797_v16 = vpop.permute.xlu1 %2796  ;;  %v2789_v25 = vpop.permute.xlu0 %2788  ;;  %6645 = vmatmul.mubr.bf16.gmra.mxu0 %v18255_v51  ;;  %6796 = vmatpush1.bf16.msra.mxu1 %v12945_v32  ;;  %v21690_v24 = vld [vmem:[#allocation21_spill] sm:$0xff]  ;;  %v21692_v9 = vld [vmem:[#allocation20_spill] sm:$0xff] }
 0x355   : > { %v2961_v13 = vsel %vm21689_vm10, %v21685_v22, %v2960_v59  ;;  %v2813_v57 = vrot.slane %v2797_v16, 4  ;;  %v2809_v47 = vrot.slane %v2789_v25, 4  ;;  %13477 = vmatprep.subr.bf16.mxu1 %v13962_v12  ;;  %6750 = vmatprep.mubr.bf16.mxu0 %v18261_v63  ;;  %v21691_v48 = vrot.slane %v21690_v24, 4  ;;  %v13963_v38 = vld [vmem:[#allocation2 + $0x1a0] ss:$28 sps:$4 sm:$0xff]   ;;  %vm19119_vm1 = vmor %vm8090_vm13, %vm21212_vm0 }
 0x356   : > { %v12861_v3 = vcombine.low %v2961_v13, %v2968_v35  ;;  %v12862_v27 = vcombine.high %v2961_v13, %v2968_v35  ;;  %v21693_v32 = vrot.slane %v21692_v9, 4  ;;  %v18279_v13 = vld [vmem:[%s20753_s1 + $0x18] ss:$28 sps:$4 sm:$0xff]   ;;  %vm8260_vm10 = vcmask 932864  }
 0x357   : > { %v2840_v4 = vsel %vm21212_vm0, %v21691_v48, %v2813_v57  ;;  %v2842_v39 = vsel %vm2815_vm9, %v2797_v16, %v2813_v57  ;;  %v2835_v22 = vsel %vm2815_vm9, %v2789_v25, %v2809_v47  ;;  %12961 = vmatmul.mubr.msk.bf16.vlgmr.msra.gmra.mxu1 %vm21694_vm2, %v18279_v13  ;;  %v13964_v16 = vld [vmem:[#allocation2 + $0x328] ss:$28 sps:$4 sm:$0xff]   ;;  %v18283_v25 = vpop.f32.mrf.mxu1  ;;  %vm8629_vm13 = vcmask 703488  }
 0x358   : > { %v2833_v23 = vsel %vm21212_vm0, %v21693_v32, %v2809_v47  ;;  %6724 = vmatprep.subr.bf16.mxu0 %v12862_v27  ;;  %v2841_v59 = vsel %vm2815_vm9, %v21690_v24, %v2840_v4  ;;  %2874 = vst [vmem:[#allocation2 + $0x7dc] sm:$0xf] %v2842_v39  ;;  %2870 = vst [vmem:[#allocation2 + $0x7c0] sm:$0xf] %v2835_v22  ;;  %v2781_v12 = vpop.permute.xlu1 %2780  ;;  %v2773_v35 = vpop.permute.xlu0 %2772  ;;  %13478 = vmatpush3.bf16.msra.mxu1 %v13963_v38 }
 0x359   : > { %v2834_v11 = vsel %vm2815_vm9, %v21692_v9, %v2833_v23  ;;  %6725 = vmatpush1.bf16.msra.mxu0 %v12861_v3  ;;  %21695 = vst [vmem:[#allocation54_spill] sm:$0xff] %v18283_v25  ;;  %v2805_v57 = vrot.slane %v2781_v12, 4  ;;  %v2801_v47 = vrot.slane %v2773_v35, 4  ;;  %6823 = vmatprep.mubr.bf16.mxu1 %v21517_v31  ;;  %v21696_v3 = vld [vmem:[#allocation23_spill] sm:$0xff]  ;;  %v21698_v9 = vld [vmem:[#allocation22_spill] sm:$0xff]  ;;  %v18294_v38 = vpop.f32.mrf.mxu1 }
 0x35a   : > { %v12854_v27 = vcombine.low %v2834_v11, %v2841_v59  ;;  %v12855_v24 = vcombine.high %v2834_v11, %v2841_v59  ;;  %13479 = vmatprep.subr.bf16.mxu1 %v13964_v16  ;;  %v21697_v48 = vrot.slane %v21696_v3, 4  ;;  %v21699_v32 = vrot.slane %v21698_v9, 4 }
 0x35b   : > { %v2828_v39 = vsel %vm2815_vm9, %v2781_v12, %v2805_v57  ;;  %v2821_v22 = vsel %vm2815_vm9, %v2773_v35, %v2801_v47 }
 0x35c   : > { %v2826_v4 = vsel %vm21212_vm0, %v21697_v48, %v2805_v57  ;;  %v2819_v23 = vsel %vm21212_vm0, %v21699_v32, %v2801_v47  ;;  %6726 = vmatprep.subr.bf16.mxu0 %v12855_v24  ;;  %2866 = vst [vmem:[#allocation2 + $0x7a4] sm:$0xf] %v2828_v39  ;;  %2862 = vst [vmem:[#allocation2 + $0x788] sm:$0xf] %v2821_v22  ;;  %v2656_v16 = vpop.permute.xlu1 %2655  ;;  %v2648_v12 = vpop.permute.xlu0 %2647  ;;  %v13966_v57 = vld [vmem:[#allocation2 + $0x2f0] ss:$28 sps:$4 sm:$0xff]   ;;  %13480 = vmatpush3.bf16.msra.mxu1 %v13965_v40 }
 0x35d   : > { %v2827_v59 = vsel %vm2815_vm9, %v21696_v3, %v2826_v4  ;;  %v2820_v11 = vsel %vm2815_vm9, %v21698_v9, %v2819_v23  ;;  %6727 = vmatpush1.bf16.msra.mxu0 %v12854_v27  ;;  %v2672_v48 = vrot.slane %v2656_v16, 4  ;;  %v2668_v32 = vrot.slane %v2648_v12, 4  ;;  %13481 = vmatprep.subr.bf16.mxu1 %v13966_v57  ;;  %v21700_v24 = vld [vmem:[#allocation51_spill] sm:$0xff]  ;;  %v21702_v4 = vld [vmem:[#allocation50_spill] sm:$0xff]  ;;  %v18308_v22 = vpop.f32.mrf.mxu1  ;;  %vm21704_vm9 = vmmov %vm21694_vm2 }
 0x35e   : > { %v12847_v35 = vcombine.low %v2820_v11, %v2827_v59  ;;  %v12848_v47 = vcombine.high %v2820_v11, %v2827_v59  ;;  %v21701_v43 = vrot.slane %v21700_v24, 4  ;;  %v21703_v39 = vrot.slane %v21702_v4, 4  ;;  %v13967_v27 = vld [vmem:[#allocation2 + $0x130] ss:$28 sps:$4 sm:$0xff]  }
 0x35f   : > { %v2701_v3 = vsel %vm2674_vm8, %v2656_v16, %v2672_v48  ;;  %v2694_v23 = vsel %vm2674_vm8, %v2648_v12, %v2668_v32  ;;  %v13968_v16 = vld [vmem:[#allocation2 + $0x2b8] ss:$28 sps:$4 sm:$0xff]   ;;  %v18317_v12 = vld [vmem:[%s20753_s1 + $0x50] ss:$28 sps:$4 sm:$0xff]  }
 0x360   : > { %v2699_v26 = vsel %vm21212_vm0, %v21701_v43, %v2672_v48  ;;  %v2692_v9 = vsel %vm21212_vm0, %v21703_v39, %v2668_v32  ;;  %6728 = vmatprep.subr.bf16.mxu0 %v12848_v47  ;;  %2733 = vst [vmem:[#allocation2 + $0x76c] sm:$0xf] %v2701_v3  ;;  %2729 = vst [vmem:[#allocation2 + $0x750] sm:$0xf] %v2694_v23  ;;  %v2640_v43 = vpop.permute.xlu1 %2639  ;;  %v2632_v11 = vpop.permute.xlu0 %2631  ;;  %12962 = vmatmul.mubr.msk.bf16.gmra.mxu1 %vm21704_vm9, %v18317_v12  ;;  %v21705_v47 = vld [vmem:[#allocation24_spill] sm:$0xff]  ;;  %vm8334_vm9 = vcmask 916480  }
 0x361   : > { %v2700_v40 = vsel %vm2674_vm8, %v21700_v24, %v2699_v26  ;;  %v2693_v59 = vsel %vm2674_vm8, %v21702_v4, %v2692_v9  ;;  %6729 = vmatpush1.bf16.msra.mxu0 %v12847_v35  ;;  %v2664_v57 = vrot.slane %v2640_v43, 4  ;;  %v2660_v48 = vrot.slane %v2632_v11, 4  ;;  %13482 = vmatpush3.bf16.msra.mxu1 %v13967_v27  ;;  %v21707_v4 = vld [vmem:[#allocation27_spill] sm:$0xff]  ;;  %v18330_v27 = vpop.f32.mrf.mxu1 }
 0x362   : > { %v12840_v26 = vcombine.low %v2693_v59, %v2700_v40  ;;  %v12841_v32 = vcombine.high %v2693_v59, %v2700_v40  ;;  %6833 = vmatprep.mubr.bf16.mxu1 %v21517_v31  ;;  %13483 = vmatprep.subr.bf16.mxu1 %v13968_v16  ;;  %v21706_v24 = vrot.slane %v21705_v47, 4  ;;  %v21708_v39 = vrot.slane %v21707_v4, 4 }
 0x363   : > { %v2687_v3 = vsel %vm2674_vm8, %v2640_v43, %v2664_v57  ;;  %v2680_v23 = vsel %vm2674_vm8, %v2632_v11, %v2660_v48  ;;  %v21718_v31 = vrot.slane %v17288_v56, 4 }
 0x364   : > { %v2685_v35 = vsel %vm21212_vm0, %v21706_v24, %v2664_v57  ;;  %v2678_v9 = vsel %vm21212_vm0, %v21708_v39, %v2660_v48  ;;  %6730 = vmatprep.subr.bf16.mxu0 %v12841_v32  ;;  %2725 = vst [vmem:[#allocation2 + $0x734] sm:$0xf] %v2687_v3  ;;  %2721 = vst [vmem:[#allocation2 + $0x718] sm:$0xf] %v2680_v23  ;;  %v3532_v16 = vpop.permute.xlu1 %3531  ;;  %v3524_v43 = vpop.permute.xlu0 %3523  ;;  %v13970_v57 = vld [vmem:[#allocation2 + $0x280] ss:$28 sps:$4 sm:$0xff]  }
 0x365   : > { %v2686_v40 = vsel %vm2674_vm8, %v21705_v47, %v2685_v35  ;;  %v2679_v59 = vsel %vm2674_vm8, %v21707_v4, %v2678_v9  ;;  %6731 = vmatpush1.bf16.msra.mxu0 %v12840_v26  ;;  %v3548_v24 = vrot.slane %v3532_v16, 4  ;;  %v3544_v39 = vrot.slane %v3524_v43, 4  ;;  %13484 = vmatpush3.bf16.msra.mxu1 %v13969_v18  ;;  %v21709_v32 = vld [vmem:[#allocation28_spill] sm:$0xff]  ;;  %v21711_v35 = vld [vmem:[#allocation31_spill] sm:$0xff]  ;;  %v13971_v26 = vld [vmem:[#allocation2 + $0xc0] ss:$28 sps:$4 sm:$0xff]   ;;  %v18344_v23 = vpop.f32.mrf.mxu1 }
 0x366   : > { %v12833_v11 = vcombine.low %v2679_v59, %v2686_v40  ;;  %v12834_v48 = vcombine.high %v2679_v59, %v2686_v40  ;;  %13485 = vmatprep.subr.bf16.mxu1 %v13970_v57  ;;  %v21710_v1 = vrot.slane %v21709_v32, 4  ;;  %v21712_v3 = vrot.slane %v21711_v35, 4  ;;  %vm21713_vm8 = vmmov %vm21694_vm2 }
 0x367   : > { %v3576_v47 = vsel %vm841_vm3, %v3532_v16, %v3548_v24  ;;  %v3569_v9 = vsel %vm841_vm3, %v3524_v43, %v3544_v39  ;;  %v13972_v16 = vld [vmem:[#allocation2 + $0x248] ss:$28 sps:$4 sm:$0xff]   ;;  %vm8556_vm2 = vcmask 793600  }
 0x368   : > { %v3574_v14 = vsel %vm21212_vm0, %v21710_v1, %v3548_v24  ;;  %v3567_v4 = vsel %vm21212_vm0, %v21712_v3, %v3544_v39  ;;  %6732 = vmatprep.subr.bf16.mxu0 %v12834_v48  ;;  %3608 = vst [vmem:[#allocation2 + $0xa7c] sm:$0xf] %v3576_v47  ;;  %3604 = vst [vmem:[#allocation2 + $0xa60] sm:$0xf] %v3569_v9  ;;  %v3516_v1 = vpop.permute.xlu1 %3515  ;;  %v3508_v59 = vpop.permute.xlu0 %3507  ;;  %v18353_v43 = vld [vmem:[%s20753_s1 + $0x88] ss:$28 sps:$4 sm:$0xff]  }
 0x369   : > { %v3575_v18 = vsel %vm841_vm3, %v21709_v32, %v3574_v14  ;;  %v3568_v40 = vsel %vm841_vm3, %v21711_v35, %v3567_v4  ;;  %6733 = vmatpush1.bf16.msra.mxu0 %v12833_v11  ;;  %12963 = vmatmul.mubr.msk.bf16.gmra.mxu1 %vm21713_vm8, %v18353_v43  ;;  %v3540_v57 = vrot.slane %v3516_v1, 4  ;;  %v3536_v24 = vrot.slane %v3508_v59, 4  ;;  %v14633_v48 = vld [vmem:[%s20753_s1 + $0x4] ss:$28 sps:$4 sm:$0xff]   ;;  %v21714_v11 = vld [vmem:[#allocation32_spill] sm:$0xff]  ;;  %v21716_v3 = vld [vmem:[#allocation35_spill] sm:$0xff] }
 0x36a   : > { %13486 = vmatpush3.bf16.msra.mxu1 %v13971_v26  ;;  %v12938_v14 = vcombine.low %v3568_v40, %v3575_v18  ;;  %v12939_v39 = vcombine.high %v3568_v40, %v3575_v18  ;;  %6876 = vmatprep.mubr.bf16.mxu1 %v14633_v48  ;;  %v21715_v32 = vrot.slane %v21714_v11, 4  ;;  %v21717_v4 = vrot.slane %v21716_v3, 4  ;;  %v13973_v18 = vld [vmem:[#allocation2 + $0x88] ss:$28 sps:$4 sm:$0xff]   ;;  %v18368_v40 = vpop.f32.mrf.mxu1 }
 0x36b   : > { %13487 = vmatprep.subr.bf16.mxu1 %v13972_v16  ;;  %v3562_v35 = vsel %vm841_vm3, %v3516_v1, %v3540_v57  ;;  %v3555_v26 = vsel %vm841_vm3, %v3508_v59, %v3536_v24  ;;  %vm8519_vm8 = vcmask 801792  }
 0x36c   : > { %v3560_v47 = vsel %vm21212_vm0, %v21715_v32, %v3540_v57  ;;  %v3553_v9 = vsel %vm21212_vm0, %v21717_v4, %v3536_v24  ;;  %6734 = vmatprep.subr.bf16.mxu0 %v12939_v39  ;;  %3600 = vst [vmem:[#allocation2 + $0xa44] sm:$0xf] %v3562_v35  ;;  %3596 = vst [vmem:[#allocation2 + $0xa28] sm:$0xf] %v3555_v26  ;;  %v3392_v32 = vpop.permute.xlu1 %3391  ;;  %v3384_v1 = vpop.permute.xlu0 %3383  ;;  %v13974_v57 = vld [vmem:[#allocation2 + $0x210] ss:$28 sps:$4 sm:$0xff]  }
 0x36d   : > { %v3561_v48 = vsel %vm841_vm3, %v21714_v11, %v3560_v47  ;;  %v3554_v16 = vsel %vm841_vm3, %v21716_v3, %v3553_v9  ;;  %6735 = vmatpush2.bf16.msra.mxu0 %v12938_v14  ;;  %v3408_v61 = vrot.slane %v3392_v32, 4  ;;  %v3404_v4 = vrot.slane %v3384_v1, 4  ;;  %v13975_v39 = vld [vmem:[#allocation2 + $0x50] ss:$28 sps:$4 sm:$0xff]   ;;  %v18382_v9 = vpop.f32.mrf.mxu1 }
 0x36e   : > { %13488 = vmatpush3.bf16.msra.mxu1 %v13973_v18  ;;  %v12931_v59 = vcombine.low %v3554_v16, %v3561_v48  ;;  %v12932_v24 = vcombine.high %v3554_v16, %v3561_v48  ;;  %v21719_v35 = vrot.slane %v17290_v15, 4 }
 0x36f   : > { %13489 = vmatprep.subr.bf16.mxu1 %v13974_v57  ;;  %v3434_v11 = vsel %vm21212_vm0, %v21718_v31, %v3408_v61  ;;  %v3436_v47 = vsel %vm700_vm5, %v3392_v32, %v3408_v61  ;;  %v3429_v14 = vsel %vm700_vm5, %v3384_v1, %v3404_v4  ;;  %v13976_v61 = vld [vmem:[#allocation2 + $0x1d8] ss:$28 sps:$4 sm:$0xff]  }
 0x370   : > { %v3427_v3 = vsel %vm21212_vm0, %v21719_v35, %v3404_v4  ;;  %6736 = vmatprep.subr.bf16.mxu0 %v12932_v24  ;;  %v3435_v26 = vsel %vm700_vm5, %v17288_v56, %v3434_v11  ;;  %3468 = vst [vmem:[#allocation2 + $0xa0c] sm:$0xf] %v3436_v47  ;;  %3464 = vst [vmem:[#allocation2 + $0x9f0] sm:$0xf] %v3429_v14  ;;  %v3376_v31 = vpop.permute.xlu1 %3375  ;;  %v3368_v48 = vpop.permute.xlu0 %3367  ;;  %v13977_v4 = vld [vmem:[#allocation2 + $0x18] ss:$28 sps:$4 sm:$0xff]  }
 0x371   : > { %v3428_v18 = vsel %vm700_vm5, %v17290_v15, %v3427_v3  ;;  %6737 = vmatpush2.bf16.msra.mxu0 %v12931_v59  ;;  %v3400_v16 = vrot.slane %v3376_v31, 4  ;;  %v3396_v32 = vrot.slane %v3368_v48, 4  ;;  %v21720_v24 = vrot.slane %v17348_v5, 4  ;;  %v21721_v47 = vld [vmem:[#allocation36_spill] sm:$0xff]  ;;  %v18396_v3 = vpop.f32.mrf.mxu1 }
 0x372   : > { %13490 = vmatpush3.bf16.msra.mxu1 %v13975_v39  ;;  %v12924_v57 = vcombine.low %v3428_v18, %v3435_v26  ;;  %v12925_v1 = vcombine.high %v3428_v18, %v3435_v26  ;;  %v21722_v15 = vrot.slane %v21721_v47, 4 }
 0x373   : > { %13491 = vmatprep.subr.bf16.mxu1 %v13976_v61  ;;  %v3420_v56 = vsel %vm21212_vm0, %v21720_v24, %v3400_v16  ;;  %v3422_v11 = vsel %vm700_vm5, %v3376_v31, %v3400_v16  ;;  %v3415_v59 = vsel %vm700_vm5, %v3368_v48, %v3396_v32  ;;  %v13978_v31 = vld [vmem:[#allocation2 + $0x6e0] ss:$28 sps:$4 sm:$0xff]  }
 0x374   : > { %v3413_v35 = vsel %vm21212_vm0, %v21722_v15, %v3396_v32  ;;  %6738 = vmatprep.subr.bf16.mxu0 %v12925_v1  ;;  %v3421_v39 = vsel %vm700_vm5, %v17348_v5, %v3420_v56  ;;  %3460 = vst [vmem:[#allocation2 + $0x9d4] sm:$0xf] %v3422_v11  ;;  %3456 = vst [vmem:[#allocation2 + $0x9b8] sm:$0xf] %v3415_v59  ;;  %v3252_v26 = vpop.permute.xlu1 %3251  ;;  %v21723_v32 = vld [vmem:[#allocation41_spill] sm:$0xff]  ;;  %v21725_v56 = vld [vmem:[#allocation40_spill] sm:$0xff]  ;;  %v18410_v59 = vpop.f32.mrf.mxu1 }
 0x375   : > { %v3414_v14 = vsel %vm700_vm5, %v21721_v47, %v3413_v35  ;;  %v3244_v18 = vpop.permute.xlu0 %3243  ;;  %6739 = vmatpush2.bf16.msra.mxu0 %v12924_v57  ;;  %v3268_v61 = vrot.slane %v3252_v26, 4  ;;  %v21724_v1 = vrot.slane %v21723_v32, 4  ;;  %v21726_v11 = vrot.slane %v21725_v56, 4  ;;  %v13979_v57 = vld [vmem:[#allocation2 + $0x520] ss:$28 sps:$4 sm:$0xff]  }
 0x376   : > { %v3264_v16 = vrot.slane %v3244_v18, 4  ;;  %13492 = vmatpush3.bf16.msra.mxu1 %v13977_v4  ;;  %v12917_v24 = vcombine.low %v3414_v14, %v3421_v39  ;;  %v12918_v48 = vcombine.high %v3414_v14, %v3421_v39 }
 0x377   : > { %13511 = vmatprep.subr.bf16.mxu1 %v13978_v31  ;;  %v3294_v15 = vsel %vm21212_vm0, %v21724_v1, %v3268_v61  ;;  %v3296_v5 = vsel %vm559_vm7, %v3252_v26, %v3268_v61  ;;  %v13980_v31 = vld [vmem:[#allocation2 + $0x6a8] ss:$28 sps:$4 sm:$0xff]   ;;  %v18417_v61 = vpop.f32.mrf.mxu0 }
 0x378   : > { %v3287_v47 = vsel %vm21212_vm0, %v21726_v11, %v3264_v16  ;;  %v3289_v35 = vsel %vm559_vm7, %v3244_v18, %v3264_v16  ;;  %6740 = vmatprep.subr.bf16.mxu0 %v12918_v48  ;;  %v3295_v4 = vsel %vm559_vm7, %v21723_v32, %v3294_v15  ;;  %3328 = vst [vmem:[#allocation2 + $0x99c] sm:$0xf] %v3296_v5  ;;  %v3236_v14 = vpop.permute.xlu1 %3235  ;;  %v21727_v32 = vld [vmem:[#allocation85_spill] sm:$0xff] }
 0x379   : > { %v3288_v39 = vsel %vm559_vm7, %v21725_v56, %v3287_v47  ;;  %3324 = vst [vmem:[#allocation2 + $0x980] sm:$0xf] %v3289_v35  ;;  %v3228_v26 = vpop.permute.xlu0 %3227  ;;  %6741 = vmatpush2.bf16.msra.mxu0 %v12917_v24  ;;  %6877 = vmatmul.mubr.bf16.vlgmr.msra.gmra.mxu1 %v18176_v49  ;;  %v3260_v18 = vrot.slane %v3236_v14, 4  ;;  %v21728_v15 = vrot.slane %v21727_v32, 4  ;;  %v21729_v24 = vld [vmem:[#allocation86_spill] sm:$0xff] }
 0x37a   : > { %v3256_v16 = vrot.slane %v3228_v26, 4  ;;  %13512 = vmatpush3.bf16.msra.mxu1 %v13979_v57  ;;  %v12910_v48 = vcombine.low %v3288_v39, %v3295_v4  ;;  %v12911_v1 = vcombine.high %v3288_v39, %v3295_v4  ;;  %6884 = vmatprep.mubr.bf16.mxu1 %v18182_v46  ;;  %v21730_v11 = vrot.slane %v21729_v24, 4  ;;  %v13981_v57 = vld [vmem:[#allocation2 + $0x4e8] ss:$28 sps:$4 sm:$0xff]   ;;  %v18430_v4 = vpop.f32.mrf.mxu1 }
 0x37b   : > { %13513 = vmatprep.subr.bf16.mxu1 %v13980_v31  ;;  %v3280_v5 = vsel %vm21212_vm0, %v21728_v15, %v3260_v18  ;;  %v3282_v56 = vsel %vm559_vm7, %v3236_v14, %v3260_v18  ;;  %v18428_v35 = vpop.f32.mrf.mxu0  ;;  %v13982_v14 = vld [vmem:[#allocation2 + $0x670] ss:$28 sps:$4 sm:$0xff]   ;;  %v14004_v30 = vld [vmem:[#allocation2 + $0x9b8] ss:$28 sps:$4 sm:$0xff]  }
 0x37c   : > { %v3273_v49 = vsel %vm21212_vm0, %v21730_v11, %v3256_v16  ;;  %v3275_v47 = vsel %vm559_vm7, %v3228_v26, %v3256_v16  ;;  %6742 = vmatprep.subr.bf16.mxu0 %v12911_v1  ;;  %v3281_v46 = vsel %vm559_vm7, %v21727_v32, %v3280_v5  ;;  %3320 = vst [vmem:[#allocation2 + $0x964] sm:$0xf] %v3282_v56  ;;  %v13983_v1 = vld [vmem:[#allocation2 + $0x4b0] ss:$28 sps:$4 sm:$0xff]   ;;  %v18440_v15 = vpop.f32.mrf.mxu1  ;;  %v13984_v32 = vld [vmem:[#allocation2 + $0x638] ss:$28 sps:$4 sm:$0xff]  }
 0x37d   : > { %v3274_v39 = vsel %vm559_vm7, %v21729_v24, %v3273_v49  ;;  %3316 = vst [vmem:[#allocation2 + $0x948] sm:$0xf] %v3275_v47  ;;  %6743 = vmatpush2.bf16.msra.mxu0 %v12910_v48  ;;  %v18436_v31 = vpop.f32.mrf.mxu0  ;;  %v21731_v48 = vcombine.high %v17870_v60, %v17873_v8  ;;  %v13987_v24 = vld [vmem:[#allocation2 + $0x478] ss:$28 sps:$4 sm:$0xff]   ;;  %v21732_v49 = vcombine.low %v17870_v60, %v17873_v8  ;;  %v13992_v60 = vld [vmem:[#allocation2 + $0x5c8] ss:$28 sps:$4 sm:$0xff]  }
 0x37e   : > { %13514 = vmatpush3.bf16.msra.mxu1 %v13981_v57  ;;  %v12903_v26 = vcombine.low %v3274_v39, %v3281_v46  ;;  %v12904_v18 = vcombine.high %v3274_v39, %v3281_v46  ;;  %v18451_v11 = vpop.f32.mrf.mxu1  ;;  %v21733_v57 = vcombine.high %v17907_v34, %v17910_v50  ;;  %vm8408_vm0 = vcmask 900096  }
 0x37f   : > { %13515 = vmatprep.subr.bf16.mxu1 %v13982_v14  ;;  %v18438_v16 = vpop.f32.mrf.mxu0  ;;  %v13993_v14 = vld [vmem:[#allocation2 + $0xa60] ss:$28 sps:$4 sm:$0xff]  }
 0x380   : > { %6744 = vmatprep.subr.bf16.mxu0 %v12904_v18  ;;  %v18463_v39 = vpop.f32.mrf.mxu1  ;;  %v13995_v18 = vld [vmem:[#allocation2 + $0x8a0] ss:$28 sps:$4 sm:$0xff]  }
 0x381   : > { %6745 = vmatpush2.bf16.msra.mxu0 %v12903_v26  ;;  %6885 = vmatmul.mubr.bf16.gmra.mxu1 %v18219_v44  ;;  %v18443_v5 = vpop.f32.mrf.mxu0  ;;  %v13988_v44 = vld [vmem:[#allocation2 + $0x600] ss:$28 sps:$4 sm:$0xff]   ;;  %v21734_v26 = vcombine.low %v17907_v34, %v17910_v50  ;;  %v18479_v34 = vld [vmem:[%s20753_s1 + $0x10] ss:$28 sps:$4 sm:$0xff]   ;;  %v13994_v50 = vld [vmem:[#allocation2 + $0x408] ss:$28 sps:$4 sm:$0xff]  }
 0x382   : > { %13516 = vmatpush3.bf16.msra.mxu1 %v13983_v1  ;;  %6746 = vmatprep.subr.bf16.mxu0 %v21731_v48  ;;  %v14634_v1 = vld [vmem:[%s20753_s1 + $0xc] ss:$28 sps:$4 sm:$0xff]   ;;  %v14007_v52 = vld [vmem:[#allocation2 + $0x980] ss:$28 sps:$4 sm:$0xff]  }
 0x383   : > { %13517 = vmatprep.subr.bf16.mxu1 %v13984_v32  ;;  %6892 = vmatprep.mubr.bf16.mxu1 %v18225_v54  ;;  %v18449_v56 = vpop.f32.mrf.mxu0  ;;  %v13991_v54 = vld [vmem:[#allocation2 + $0x440] ss:$28 sps:$4 sm:$0xff]  }
 0x385   : > { %6747 = vmatpush2.bf16.msra.mxu0 %v21732_v49  ;;  %v18456_v47 = vpop.f32.mrf.mxu0  ;;  %v18485_v49 = vld [vmem:[%s20753_s1 + $0x4c] ss:$28 sps:$4 sm:$0xff]  }
 0x386   : > { %13518 = vmatpush3.bf16.msra.mxu1 %v13987_v24  ;;  %6748 = vmatprep.subr.bf16.mxu0 %v21733_v57  ;;  %v13996_v24 = vld [vmem:[#allocation2 + $0x590] ss:$28 sps:$4 sm:$0xff]  }
 0x387   : > { %13519 = vmatprep.subr.bf16.mxu1 %v13988_v44  ;;  %v18461_v46 = vpop.f32.mrf.mxu0 }
 0x389   : > { %6749 = vmatpush2.bf16.msra.mxu0 %v21734_v26  ;;  %6893 = vmatmul.mubr.bf16.gmra.mxu1 %v18255_v51  ;;  %v18469_v8 = vpop.f32.mrf.mxu0  ;;  %v13997_v51 = vld [vmem:[#allocation2 + $0xa28] ss:$28 sps:$4 sm:$0xff]  }
 0x38a   : > { %13520 = vmatpush3.bf16.msra.mxu1 %v13991_v54  ;;  %13545 = vmatprep.subr.bf16.mxu0 %v13993_v14  ;;  %v13999_v54 = vld [vmem:[#allocation2 + $0x868] ss:$28 sps:$4 sm:$0xff]  }
 0x38b   : > { %13521 = vmatprep.subr.bf16.mxu1 %v13992_v60  ;;  %6933 = vmatprep.mubr.bf16.mxu1 %v14634_v1  ;;  %v18474_v32 = vpop.f32.mrf.mxu0  ;;  %v6500_v48 = vpop.f32.mrf.mxu1  ;;  %v13998_v60 = vld [vmem:[#allocation2 + $0x3d0] ss:$28 sps:$4 sm:$0xff]   ;;  %v14000_v1 = vld [vmem:[#allocation2 + $0x558] ss:$28 sps:$4 sm:$0xff]  }
 0x38c   : > { %6751 = vmatmul.mubr.bf16.vlgmr.msra.gmra.mxu0 %v18479_v34 }
 0x38d   : > { %13546 = vmatpush3.bf16.msra.mxu0 %v13995_v18  ;;  %6760 = vmatprep.mubr.bf16.mxu0 %v18485_v49  ;;  %v18488_v44 = vpop.f32.mrf.mxu0  ;;  %v18490_v57 = vpop.f32.mrf.mxu1  ;;  %v14001_v18 = vld [vmem:[#allocation2 + $0x9f0] ss:$28 sps:$4 sm:$0xff]  }
 0x38e   : > { %13522 = vmatpush3.bf16.msra.mxu1 %v13994_v50  ;;  %13547 = vmatprep.subr.bf16.mxu0 %v13997_v51  ;;  %v14003_v50 = vld [vmem:[#allocation2 + $0x830] ss:$28 sps:$4 sm:$0xff]   ;;  %v18501_v51 = vld [vmem:[%s20753_s1 + $0x48] ss:$28 sps:$4 sm:$0xff]  }
 0x38f   : > { %13523 = vmatprep.subr.bf16.mxu1 %v13996_v24  ;;  %v18492_v14 = vpop.f32.mrf.mxu0  ;;  %v6504_v26 = vpop.f32.mrf.mxu1  ;;  %v14002_v24 = vld [vmem:[#allocation2 + $0x398] ss:$28 sps:$4 sm:$0xff]  }
 0x391   : > { %13548 = vmatpush3.bf16.msra.mxu0 %v13999_v54  ;;  %v18494_v45 = vpop.f32.mrf.mxu0  ;;  %v18496_v0 = vpop.f32.mrf.mxu1  ;;  %v6438_v54 = vadd.f32 %v18428_v35, %v18294_v38  ;;  %v14005_v38 = vld [vmem:[#allocation2 + $0x7f8] ss:$28 sps:$4 sm:$0xff]   ;;  %v6448_v35 = vadd.f32 %v18449_v56, %v18368_v40 }
 0x392   : > { %13524 = vmatpush3.bf16.msra.mxu1 %v13998_v60  ;;  %21735 = vst [vmem:[#allocation55_spill] sm:$0xff] %v18494_v45  ;;  %13549 = vmatprep.subr.bf16.mxu0 %v14001_v18  ;;  %v6442_v60 = vadd.f32 %v18438_v16, %v18330_v27  ;;  %v18511_v18 = vld [vmem:[%s20753_s1 + $0x84] ss:$28 sps:$4 sm:$0xff]  }
 0x393   : > { %13525 = vmatprep.subr.bf16.mxu1 %v14000_v1  ;;  %v6563_v2 = vpop.f32.mrf.mxu0  ;;  %v6501_v29 = vadd.f32 %v6500_v48, %v6438_v54  ;;  %v6452_v48 = vadd.f32 %v18461_v46, %v18396_v3  ;;  %v14010_v3 = vld [vmem:[#allocation2 + $0x948] ss:$28 sps:$4 sm:$0xff]   ;;  %v14012_v46 = vld [vmem:[#allocation2 + $0x910] ss:$28 sps:$4 sm:$0xff]  }
 0x394   : > { %6761 = vmatmul.mubr.bf16.gmra.mxu0 %v18501_v51  ;;  %v6510_v1 = vpop.f32.mrf.mxu1  ;;  %v6505_v42 = vadd.f32 %v6504_v26, %v6442_v60 }
 0x395   : > { %13550 = vmatpush3.bf16.msra.mxu0 %v14003_v50  ;;  %6770 = vmatprep.mubr.bf16.mxu0 %v18511_v18  ;;  %v18514_v25 = vpop.f32.mrf.mxu0  ;;  %v14006_v50 = vld [vmem:[#allocation2 + $0xad0] ss:$28 sps:$4 sm:$0xff]   ;;  %v18521_v45 = vadd.f32 %v6563_v2, %v6501_v29  ;;  %v14008_v2 = vld [vmem:[#allocation2 + $0x7c0] ss:$28 sps:$4 sm:$0xff]   ;;  %v6511_v56 = vadd.f32 %v6510_v1, %v6448_v35 }
 0x396   : > { %13526 = vmatpush3.bf16.msra.mxu1 %v14002_v24  ;;  %13551 = vmatprep.subr.bf16.mxu0 %v14004_v30  ;;  %v18517_v27 = vpop.f32.mrf.mxu1  ;;  %v14021_v29 = vld [vmem:[%s20755_s3 + $0x174] ss:$8 sps:$4 sm:$0xff]  }
 0x397   : > { %13648 = vmatprep.subr.bf16.mxu1 %v21216_v19  ;;  %v6567_v16 = vpop.f32.mrf.mxu0  ;;  %v7208_v1 = vld [vmem:[%s20754_s2 + $0x18] sm:$0xff] }
 0x398   : > { %v18523_v24 = vadd.f32 %v6567_v16, %v6505_v42  ;;  %v6514_v30 = vpop.f32.mrf.mxu1  ;;  %7228 = vperm.xlu1 %13911, %v7208_v1   ;;  %v14024_v1 = vld [vmem:[%s20755_s3 + $0x64] ss:$8 sps:$4 sm:$0xff]  }
 0x399   : > { %6934 = vmatmul.mubr.bf16.vlgmr.msra.gmra.mxu1 %v18116_v17  ;;  %13552 = vmatpush3.bf16.msra.mxu0 %v14005_v38  ;;  %v18530_v40 = vpop.f32.mrf.mxu0  ;;  %v14009_v17 = vld [vmem:[#allocation2 + $0xa98] ss:$28 sps:$4 sm:$0xff]   ;;  %v6515_v54 = vadd.f32 %v6514_v30, %v6452_v48  ;;  %v14011_v38 = vld [vmem:[#allocation2 + $0x788] ss:$28 sps:$4 sm:$0xff]   ;;  %v6462_v30 = vadd.f32 %v18492_v14, %v18451_v11 }
 0x39a   : > { %13649 = vmatpush3.bf16.msra.mxu1 %v14006_v50  ;;  %13553 = vmatprep.subr.bf16.mxu0 %v14007_v52  ;;  %v18537_v42 = vpop.f32.mrf.mxu1  ;;  %v18542_v52 = vld [vmem:[%s20753_s1 + $0x80] ss:$28 sps:$4 sm:$0xff]   ;;  %v6458_v50 = vadd.f32 %v18474_v32, %v18430_v4  ;;  %v14014_v48 = vld [vmem:[#allocation2 + $0x8d8] ss:$28 sps:$4 sm:$0xff]   ;;  %v14013_v32 = vld [vmem:[#allocation2 + $0x750] ss:$28 sps:$4 sm:$0xff]  }
 0x39b   : > { %13650 = vmatprep.subr.bf16.mxu1 %v21216_v19  ;;  %6941 = vmatprep.mubr.bf16.mxu1 %v18122_v6  ;;  %v7205_v11 = vld [vmem:[%s20754_s2] sm:$0xff] }
 0x39c   : > { %6771 = vmatmul.mubr.bf16.gmra.mxu0 %v18542_v52  ;;  %v6573_v6 = vpop.f32.mrf.mxu0  ;;  %7213 = vperm.xlu1 %13911, %v7205_v11   ;;  %v14027_v11 = vld [vmem:[%s20755_s3 + $0x164] ss:$8 sps:$4 sm:$0xff]  }
 0x39d   : > { %13554 = vmatpush3.bf16.msra.mxu0 %v14008_v2  ;;  %6990 = vmatprep.mubr.bf16.mxu0 %v18261_v63  ;;  %v6520_v60 = vpop.f32.mrf.mxu1  ;;  %v18550_v26 = vadd.f32 %v6573_v6, %v6511_v56  ;;  %v14015_v6 = vld [vmem:[#allocation2 + $0x718] ss:$28 sps:$4 sm:$0xff]  }
 0x39e   : > { %13651 = vmatpush3.bf16.msra.mxu1 %v14009_v17  ;;  %13555 = vmatprep.subr.bf16.mxu0 %v14010_v3  ;;  %v18546_v16 = vpop.f32.mrf.mxu0  ;;  %v6521_v17 = vadd.f32 %v6520_v60, %v6458_v50  ;;  %v14018_v3 = vld [vmem:[%s20755_s3 + $0x74] ss:$8 sps:$4 sm:$0xff]  }
 0x39f   : > { %7864 = vmatprep.subr.bf16.mxu1 %v14021_v29  ;;  %v18556_v35 = vpop.f32.mrf.mxu1 }
 0x3a0   : > { %v6577_v63 = vpop.f32.mrf.mxu0 }
 0x3a1   : > { %6942 = vmatmul.mubr.bf16.gmra.mxu1 %v18152_v58  ;;  %13556 = vmatpush3.bf16.msra.mxu0 %v14011_v38  ;;  %v18561_v4 = vadd.f32 %v6577_v63, %v6515_v54  ;;  %v7207_v58 = vld [vmem:[%s20754_s2 + $0x10] sm:$0xff]  ;;  %v6524_v14 = vpop.f32.mrf.mxu1  ;;  %v7206_v54 = vld [vmem:[%s20754_s2 + $0x8] sm:$0xff] }
 0x3a2   : > { %13557 = vmatprep.subr.bf16.mxu0 %v14012_v46  ;;  %6949 = vmatprep.mubr.bf16.mxu1 %v18158_v37  ;;  %v18563_v2 = vpop.f32.mrf.mxu0  ;;  %v6525_v56 = vadd.f32 %v6524_v14, %v6462_v30  ;;  %v14016_v38 = vld [vmem:[%s20755_s3 + $0x70] ss:$8 sps:$4 sm:$0xff]   ;;  %v14022_v30 = vld [vmem:[%s20755_s3 + $0x60] ss:$8 sps:$4 sm:$0xff]   ;;  %v14036_v14 = vld [vmem:[%s20755_s3 + $0x44] ss:$8 sps:$4 sm:$0xff]  }
 0x3a3   : > { %v7081_v29 = vpack.c.bf16 %v18561_v4, %v18550_v26  ;;  %7223 = vperm.xlu0 %13910, %v7207_v58   ;;  %v21737_v58 = vld [vmem:[#allocation82_spill] sm:$0xff]  ;;  %v21755_v4 = vld [vmem:[#allocation53_spill] sm:$0xff] }
 0x3a4   : > { %v6583_v37 = vpop.f32.mrf.mxu0  ;;  %v14169_v26 = vld [vmem:[%s20755_s3 + $0x340] ss:$8 sps:$4 sm:$0xff]  }
 0x3a5   : > { %13558 = vmatpush3.bf16.msra.mxu0 %v14013_v32  ;;  %v18581_v60 = vadd.f32 %v6583_v37, %v6521_v17  ;;  %v14030_v32 = vld [vmem:[%s20755_s3 + $0x54] ss:$8 sps:$4 sm:$0xff]   ;;  %v14025_v37 = vld [vmem:[%s20755_s3 + $0x160] ss:$8 sps:$4 sm:$0xff]  }
 0x3a6   : > { %13559 = vmatprep.subr.bf16.mxu0 %v14014_v48  ;;  %v18576_v46 = vpop.f32.mrf.mxu0  ;;  %v14019_v48 = vld [vmem:[%s20755_s3 + $0x170] ss:$8 sps:$4 sm:$0xff]  }
 0x3a7   : > { %7218 = vperm.xlu0 %13910, %v7206_v54   ;;  %v14034_v54 = vld [vmem:[%s20755_s3 + $0x40] ss:$8 sps:$4 sm:$0xff]  }
 0x3a8   : > { %v6587_v50 = vpop.f32.mrf.mxu0 }
 0x3a9   : > { %6950 = vmatmul.mubr.bf16.gmra.mxu1 %v18200_v10  ;;  %13560 = vmatpush3.bf16.msra.mxu0 %v14015_v6  ;;  %v18592_v63 = vadd.f32 %v6587_v50, %v6525_v56  ;;  %v14033_v6 = vld [vmem:[%s20755_s3 + $0x154] ss:$8 sps:$4 sm:$0xff]   ;;  %v14039_v50 = vld [vmem:[%s20755_s3 + $0x144] ss:$8 sps:$4 sm:$0xff]  }
 0x3aa   : > { %7801 = vmatprep.subr.bf16.mxu0 %v14018_v3  ;;  %13652 = vmatprep.mubr.msk.bf16.mxu1 %vm21213_vm11, %v21216_v19  ;;  %v21739_v3 = vld [vmem:[#allocation37_spill] sm:$0xff] }
 0x3ab   : > { %v7088_v10 = vpack.c.bf16 %v18592_v63, %v18581_v60  ;;  %v6251_v56 = vadd.f32 %v17838_v36, %v21739_v3  ;;  %v14031_v36 = vld [vmem:[%s20755_s3 + $0x150] ss:$8 sps:$4 sm:$0xff]   ;;  %v14063_v3 = vld [vmem:[%s20755_s3 + $0x104] ss:$8 sps:$4 sm:$0xff]   ;;  %v14175_v60 = vld [vmem:[%s20755_s3 + $0x320] ss:$8 sps:$4 sm:$0xff]  }
 0x3ac   : > { %6991 = vmatmul.mubr.bf16.vlgmr.msra.gmra.mxu0 %v18479_v34  ;;  %v21736_v34 = vld [vmem:[#allocation34_spill] sm:$0xff]  ;;  %v14180_v63 = vld [vmem:[%s20755_s3 + $0x314] ss:$8 sps:$4 sm:$0xff]  }
 0x3ad   : > { %7802 = vmatpush1.bf16.msra.mxu0 %v14016_v38  ;;  %6998 = vmatprep.mubr.bf16.mxu0 %v18485_v49  ;;  %v6192_v17 = vadd.f32 %v21737_v58, %v21736_v34  ;;  %v14028_v49 = vld [vmem:[%s20755_s3 + $0x50] ss:$8 sps:$4 sm:$0xff]   ;;  %v6314_v38 = vadd.f32 %v17763_v28, %v6251_v56  ;;  %v6440_v28 = vadd.f32 %v18436_v31, %v18308_v22  ;;  %v14045_v22 = vld [vmem:[%s20755_s3 + $0x134] ss:$8 sps:$4 sm:$0xff]   ;;  %v7210_v58 = vld [vmem:[%s20754_s2 + $0x28] sm:$0xff] }
 0x3ae   : > { %7803 = vmatprep.subr.bf16.mxu0 %v14024_v1  ;;  %v14040_v1 = vld [vmem:[%s20755_s3 + $0x30] ss:$8 sps:$4 sm:$0xff]   ;;  %7238 = vperm.xlu0 %13910, %v7210_v58  }
 0x3af   : > { %v14064_v56 = vld [vmem:[%s20755_s3 + $0xf0] ss:$8 sps:$4 sm:$0xff]  }
 0x3b0   : > { %v14100_v58 = vld [vmem:[%s20755_s3 + $0x90] ss:$8 sps:$4 sm:$0xff]  }
 0x3b1   : > { %13653 = vmatmul.mubr.msk.bf16.vlgmr.msra.gmra.mxu1 %vm21738_vm12, %v18279_v13  ;;  %7804 = vmatpush1.bf16.msra.mxu0 %v14022_v30  ;;  %v6255_v13 = vadd.f32 %v17865_v21, %v6192_v17  ;;  %v14042_v21 = vld [vmem:[%s20755_s3 + $0x34] ss:$8 sps:$4 sm:$0xff]   ;;  %v14037_v30 = vld [vmem:[%s20755_s3 + $0x140] ss:$8 sps:$4 sm:$0xff]   ;;  %vm8297_vm12 = vcmask 924672  }
 0x3b2   : > { %7865 = vmatpush1.bf16.msra.mxu1 %v14019_v48  ;;  %7805 = vmatprep.subr.bf16.mxu0 %v14030_v32  ;;  %v14046_v48 = vld [vmem:[%s20755_s3 + $0x20] ss:$8 sps:$4 sm:$0xff]  }
 0x3b3   : > { %7866 = vmatprep.subr.bf16.mxu1 %v14027_v11  ;;  %13656 = vmatprep.mubr.msk.bf16.mxu1 %vm21213_vm11, %v21216_v19  ;;  %v14049_v17 = vld [vmem:[%s20755_s3 + $0x120] ss:$8 sps:$4 sm:$0xff]   ;;  %v14060_v11 = vld [vmem:[%s20755_s3 + $0x4] ss:$8 sps:$4 sm:$0xff]  }
 0x3b4   : > { %6999 = vmatmul.mubr.bf16.gmra.mxu0 %v18501_v51  ;;  %v6318_v51 = vadd.f32 %v17799_v20, %v6255_v13  ;;  %v14061_v13 = vld [vmem:[%s20755_s3 + $0x100] ss:$8 sps:$4 sm:$0xff]  }
 0x3b5   : > { %7806 = vmatpush1.bf16.msra.mxu0 %v14028_v49  ;;  %7006 = vmatprep.mubr.bf16.mxu0 %v18511_v18  ;;  %v6444_v18 = vadd.f32 %v18443_v5, %v18344_v23  ;;  %v7209_v5 = vld [vmem:[%s20754_s2 + $0x20] sm:$0xff] }
 0x3b6   : > { %7867 = vmatpush1.bf16.msra.mxu1 %v14025_v37  ;;  %7807 = vmatprep.subr.bf16.mxu0 %v14036_v14  ;;  %v7073_v23 = vpack.c.bf16 %v6318_v51, %v6314_v38  ;;  %v14058_v49 = vld [vmem:[%s20755_s3] ss:$8 sps:$4 sm:$0xff]   ;;  %v14055_v37 = vld [vmem:[%s20755_s3 + $0x110] ss:$8 sps:$4 sm:$0xff]   ;;  %v14066_v14 = vld [vmem:[%s20755_s3 + $0xf4] ss:$8 sps:$4 sm:$0xff]  }
 0x3b7   : > { %7868 = vmatprep.subr.bf16.mxu1 %v14033_v6  ;;  %v6507_v20 = vadd.f32 %v18496_v0, %v6444_v18  ;;  %v6503_v0 = vadd.f32 %v18490_v57, %v6440_v28  ;;  %v14043_v57 = vld [vmem:[%s20755_s3 + $0x130] ss:$8 sps:$4 sm:$0xff]   ;;  %7233 = vperm.xlu1 %13911, %v7209_v5   ;;  %v14072_v6 = vld [vmem:[%s20755_s3 + $0xe4] ss:$8 sps:$4 sm:$0xff]   ;;  %v14078_v38 = vld [vmem:[%s20755_s3 + $0xd4] ss:$8 sps:$4 sm:$0xff]  }
 0x3b8   : > { %v14075_v51 = vld [vmem:[%s20755_s3 + $0x1e4] ss:$8 sps:$4 sm:$0xff]   ;;  %v14073_v18 = vld [vmem:[%s20755_s3 + $0x1e0] ss:$8 sps:$4 sm:$0xff]   ;;  %v14081_v28 = vld [vmem:[%s20755_s3 + $0x1d4] ss:$8 sps:$4 sm:$0xff]  }
 0x3b9   : > { %13657 = vmatmul.mubr.msk.bf16.gmra.mxu1 %vm21740_vm4, %v18317_v12  ;;  %7808 = vmatpush1.bf16.msra.mxu0 %v14034_v54  ;;  %v14048_v12 = vld [vmem:[%s20755_s3 + $0x24] ss:$8 sps:$4 sm:$0xff]   ;;  %v6570_v31 = vadd.f32 %v18530_v40, %v6507_v20  ;;  %v6566_v32 = vadd.f32 %v18514_v25, %v6503_v0  ;;  %v14052_v25 = vld [vmem:[%s20755_s3 + $0x10] ss:$8 sps:$4 sm:$0xff]   ;;  %v14069_v54 = vld [vmem:[%s20755_s3 + $0x1f4] ss:$8 sps:$4 sm:$0xff]  }
 0x3ba   : > { %7869 = vmatpush1.bf16.msra.mxu1 %v14031_v36  ;;  %7809 = vmatprep.subr.bf16.mxu0 %v14042_v21  ;;  %v14051_v40 = vld [vmem:[%s20755_s3 + $0x124] ss:$8 sps:$4 sm:$0xff]   ;;  %v14070_v36 = vld [vmem:[%s20755_s3 + $0xe0] ss:$8 sps:$4 sm:$0xff]   ;;  %v14067_v21 = vld [vmem:[%s20755_s3 + $0x1f0] ss:$8 sps:$4 sm:$0xff]  }
 0x3bb   : > { %7870 = vmatprep.subr.bf16.mxu1 %v14039_v50  ;;  %13660 = vmatprep.mubr.msk.bf16.mxu1 %vm21213_vm11, %v21216_v19  ;;  %v7075_v34 = vpack.c.bf16 %v6570_v31, %v6566_v32  ;;  %v14076_v50 = vld [vmem:[%s20755_s3 + $0xd0] ss:$8 sps:$4 sm:$0xff]   ;;  %v14082_v20 = vld [vmem:[%s20755_s3 + $0xc0] ss:$8 sps:$4 sm:$0xff]   ;;  %v14096_v31 = vld [vmem:[%s20755_s3 + $0xa4] ss:$8 sps:$4 sm:$0xff]  }
 0x3bc   : > { %7007 = vmatmul.mubr.bf16.gmra.mxu0 %v18542_v52  ;;  %v14054_v52 = vld [vmem:[%s20755_s3 + $0x14] ss:$8 sps:$4 sm:$0xff]   ;;  %v14085_v0 = vld [vmem:[%s20755_s3 + $0x1c0] ss:$8 sps:$4 sm:$0xff]   ;;  %v14091_v32 = vld [vmem:[%s20755_s3 + $0x1b0] ss:$8 sps:$4 sm:$0xff]  }
 0x3bd   : > { %7810 = vmatpush1.bf16.msra.mxu0 %v14040_v1  ;;  %7833 = vmatprep.mubr.bf16.mxu0 %v7073_v23  ;;  %v14084_v1 = vld [vmem:[%s20755_s3 + $0xc4] ss:$8 sps:$4 sm:$0xff]   ;;  %v14093_v5 = vld [vmem:[%s20755_s3 + $0x1b4] ss:$8 sps:$4 sm:$0xff]   ;;  %vm8482_vm4 = vcmask 809984   ;;  %vm21215_vm11 = vcmask 678912  }
 0x3be   : > { %7871 = vmatpush1.bf16.msra.mxu1 %v14037_v30  ;;  %7811 = vmatprep.subr.bf16.mxu0 %v14048_v12  ;;  %v14079_v30 = vld [vmem:[%s20755_s3 + $0x1d0] ss:$8 sps:$4 sm:$0xff]   ;;  %v14090_v12 = vld [vmem:[%s20755_s3 + $0xb4] ss:$8 sps:$4 sm:$0xff]   ;;  %v14087_v23 = vld [vmem:[%s20755_s3 + $0x1c4] ss:$8 sps:$4 sm:$0xff]  }
 0x3bf   : > { %7872 = vmatprep.subr.bf16.mxu1 %v14045_v22  ;;  %v14088_v22 = vld [vmem:[%s20755_s3 + $0xb0] ss:$8 sps:$4 sm:$0xff]  }
 0x3c1   : > { %13661 = vmatmul.mubr.msk.bf16.gmra.mxu1 %vm21741_vm6, %v18353_v43  ;;  %7812 = vmatpush1.bf16.msra.mxu0 %v14046_v48  ;;  %v14057_v43 = vld [vmem:[%s20755_s3 + $0x114] ss:$8 sps:$4 sm:$0xff]   ;;  %v14094_v48 = vld [vmem:[%s20755_s3 + $0xa0] ss:$8 sps:$4 sm:$0xff]   ;;  %vm8445_vm6 = vcmask 818176  }
 0x3c2   : > { %7873 = vmatpush1.bf16.msra.mxu1 %v14043_v57  ;;  %7896 = vmatprep.mubr.bf16.mxu1 %v7075_v34  ;;  %v14102_v57 = vld [vmem:[%s20755_s3 + $0x94] ss:$8 sps:$4 sm:$0xff]  }
 0x3c3   : > { %7874 = vmatprep.subr.bf16.mxu1 %v14051_v40  ;;  %7813 = vmatprep.subr.bf16.mxu0 %v14054_v52  ;;  %v21742_v40 = vld [vmem:[#allocation39_spill] sm:$0xff]  ;;  %v21743_v52 = vld [vmem:[#allocation38_spill] sm:$0xff] }
 0x3c4   : > { %v6202_v34 = vadd.f32 %v21743_v52, %v21742_v40  ;;  %v21753_v40 = vld [vmem:[#allocation47_spill] sm:$0xff] }
 0x3c5   : > { %7814 = vmatpush1.bf16.msra.mxu0 %v14052_v25  ;;  %v14099_v25 = vld [vmem:[%s20755_s3 + $0x1a4] ss:$8 sps:$4 sm:$0xff]  }
 0x3c6   : > { %7875 = vmatpush1.bf16.msra.mxu1 %v14049_v17  ;;  %7815 = vmatprep.subr.bf16.mxu0 %v14060_v11  ;;  %v14097_v17 = vld [vmem:[%s20755_s3 + $0x1a0] ss:$8 sps:$4 sm:$0xff]   ;;  %v14108_v11 = vld [vmem:[%s20755_s3 + $0x84] ss:$8 sps:$4 sm:$0xff]  }
 0x3c7   : > { %7876 = vmatprep.subr.bf16.mxu1 %v14057_v43  ;;  %v6265_v43 = vadd.f32 %v17935_v55, %v6202_v34  ;;  %v14103_v55 = vld [vmem:[%s20755_s3 + $0x190] ss:$8 sps:$4 sm:$0xff]   ;;  %v14168_v34 = vld [vmem:[%s20755_s3 + $0x354] ss:$8 sps:$4 sm:$0xff]  }
 0x3c9   : > { %7816 = vmatpush1.bf16.msra.mxu0 %v14058_v49  ;;  %v14105_v49 = vld [vmem:[%s20755_s3 + $0x194] ss:$8 sps:$4 sm:$0xff]  }
 0x3ca   : > { %7877 = vmatpush1.bf16.msra.mxu1 %v14055_v37  ;;  %7817 = vmatprep.subr.bf16.mxu0 %v14066_v14  ;;  %v6450_v37 = vadd.f32 %v18456_v47, %v18382_v9  ;;  %v6454_v14 = vadd.f32 %v18469_v8, %v18410_v59  ;;  %v6212_v9 = vadd.f32 %v17720_v53, %v17813_v7  ;;  %v14111_v8 = vld [vmem:[%s20755_s3 + $0x184] ss:$8 sps:$4 sm:$0xff]   ;;  %v14109_v53 = vld [vmem:[%s20755_s3 + $0x180] ss:$8 sps:$4 sm:$0xff]  }
 0x3cb   : > { %7878 = vmatprep.subr.bf16.mxu1 %v14063_v3  ;;  %v14106_v3 = vld [vmem:[%s20755_s3 + $0x80] ss:$8 sps:$4 sm:$0xff]   ;;  %v6324_v59 = vadd.f32 %v17840_v33, %v17918_v62  ;;  %v6328_v47 = vadd.f32 %v17904_v41, %v6265_v43  ;;  %v14117_v7 = vld [vmem:[%s20755_s3 + $0x264] ss:$8 sps:$4 sm:$0xff]   ;;  %v14162_v62 = vld [vmem:[%s20755_s3 + $0x374] ss:$8 sps:$4 sm:$0xff]  }
 0x3cc   : > { %v6275_v41 = vadd.f32 %v18417_v61, %v6212_v9  ;;  %v6526_v61 = vpop.f32.mrf.mxu1  ;;  %v14127_v9 = vld [vmem:[%s20755_s3 + $0x220] ss:$8 sps:$4 sm:$0xff]  }
 0x3cd   : > { %7818 = vmatpush2.bf16.msra.mxu0 %v14064_v56  ;;  %v14114_v56 = vld [vmem:[%s20755_s3 + $0x274] ss:$8 sps:$4 sm:$0xff]   ;;  %v7080_v33 = vpack.c.bf16 %v6328_v47, %v6324_v59 }
 0x3ce   : > { %7879 = vmatpush1.bf16.msra.mxu1 %v14061_v13  ;;  %7819 = vmatprep.subr.bf16.mxu0 %v14072_v6  ;;  %v6513_v13 = vadd.f32 %v18517_v27, %v6450_v37  ;;  %v6517_v6 = vadd.f32 %v18537_v42, %v6454_v14  ;;  %v6460_v27 = vadd.f32 %v18488_v44, %v18440_v15  ;;  %v21744_v42 = vld [vmem:[#allocation55_spill] sm:$0xff]  ;;  %v14120_v15 = vld [vmem:[%s20755_s3 + $0x254] ss:$8 sps:$4 sm:$0xff]  }
 0x3cf   : > { %7880 = vmatprep.subr.bf16.mxu1 %v14069_v54  ;;  %v14112_v54 = vld [vmem:[%s20755_s3 + $0x270] ss:$8 sps:$4 sm:$0xff]   ;;  %v14129_v37 = vld [vmem:[%s20755_s3 + $0x224] ss:$8 sps:$4 sm:$0xff]   ;;  %v14132_v59 = vld [vmem:[%s20755_s3 + $0x214] ss:$8 sps:$4 sm:$0xff]  }
 0x3d0   : > { %v21749_v44 = vld [vmem:[#allocation49_spill] sm:$0xff] }
 0x3d1   : > { %7820 = vmatpush2.bf16.msra.mxu0 %v14070_v36  ;;  %v6464_v36 = vadd.f32 %v21744_v42, %v18463_v39  ;;  %v21748_v39 = vld [vmem:[#allocation48_spill] sm:$0xff] }
 0x3d2   : > { %7881 = vmatpush2.bf16.msra.mxu1 %v14067_v21  ;;  %7821 = vmatprep.subr.bf16.mxu0 %v14078_v38  ;;  %v6576_v21 = vadd.f32 %v18546_v16, %v6513_v13  ;;  %v6580_v38 = vadd.f32 %v18563_v2, %v6517_v6  ;;  %v6334_v16 = vadd.f32 %v21749_v44, %v21748_v39  ;;  %v21750_v2 = vld [vmem:[#allocation54_spill] sm:$0xff]  ;;  %v14178_v42 = vld [vmem:[%s20755_s3 + $0x310] ss:$8 sps:$4 sm:$0xff]  }
 0x3d3   : > { %7882 = vmatprep.subr.bf16.mxu1 %v14075_v51  ;;  %v21745_v51 = vld [vmem:[#allocation68_spill] sm:$0xff]  ;;  %v14177_v13 = vld [vmem:[%s20755_s3 + $0x324] ss:$8 sps:$4 sm:$0xff]  }
 0x3d4   : > { %v14147_v39 = vld [vmem:[%s20755_s3 + $0x2c4] ss:$8 sps:$4 sm:$0xff]  }
 0x3d5   : > { %7822 = vmatpush2.bf16.msra.mxu0 %v14076_v50  ;;  %v21746_v50 = vld [vmem:[#allocation69_spill] sm:$0xff] }
 0x3d6   : > { %7883 = vmatpush2.bf16.msra.mxu1 %v14073_v18  ;;  %7823 = vmatprep.subr.bf16.mxu0 %v14084_v1  ;;  %v21747_v18 = vpack.c.bf16 %v21745_v51, %v21746_v50  ;;  %v14115_v1 = vld [vmem:[%s20755_s3 + $0x260] ss:$8 sps:$4 sm:$0xff]  }
 0x3d7   : > { %7884 = vmatprep.subr.bf16.mxu1 %v14081_v28  ;;  %v6338_v28 = vadd.f32 %v21750_v2, %v6275_v41  ;;  %v14133_v41 = vld [vmem:[%s20755_s3 + $0x200] ss:$8 sps:$4 sm:$0xff]   ;;  %v14150_v2 = vld [vmem:[%s20755_s3 + $0x2b4] ss:$8 sps:$4 sm:$0xff]  }
 0x3d8   : > { %v14181_v50 = vld [vmem:[%s20755_s3 + $0x300] ss:$8 sps:$4 sm:$0xff]  }
 0x3d9   : > { %7824 = vmatpush2.bf16.msra.mxu0 %v14082_v20  ;;  %v14160_v20 = vld [vmem:[%s20755_s3 + $0x370] ss:$8 sps:$4 sm:$0xff]  }
 0x3da   : > { %7885 = vmatpush2.bf16.msra.mxu1 %v14079_v30  ;;  %7825 = vmatprep.subr.bf16.mxu0 %v14090_v12  ;;  %v7082_v30 = vpack.c.bf16 %v6580_v38, %v6576_v21  ;;  %v6523_v12 = vadd.f32 %v18556_v35, %v6460_v27  ;;  %v14123_v35 = vld [vmem:[%s20755_s3 + $0x244] ss:$8 sps:$4 sm:$0xff]   ;;  %v14136_v21 = vld [vmem:[%s20755_s3 + $0x2f0] ss:$8 sps:$4 sm:$0xff]  }
 0x3db   : > { %7886 = vmatprep.subr.bf16.mxu1 %v14087_v23  ;;  %v6527_v23 = vadd.f32 %v6526_v61, %v6464_v36  ;;  %v14183_v36 = vld [vmem:[%s20755_s3 + $0x304] ss:$8 sps:$4 sm:$0xff]   ;;  %v14144_v61 = vld [vmem:[%s20755_s3 + $0x2d4] ss:$8 sps:$4 sm:$0xff]  }
 0x3dc   : > { %v14141_v38 = vld [vmem:[%s20755_s3 + $0x2e4] ss:$8 sps:$4 sm:$0xff]  }
 0x3dd   : > { %7826 = vmatpush2.bf16.msra.mxu0 %v14088_v22  ;;  %v14165_v22 = vld [vmem:[%s20755_s3 + $0x364] ss:$8 sps:$4 sm:$0xff]  }
 0x3de   : > { %7887 = vmatpush2.bf16.msra.mxu1 %v14085_v0  ;;  %7827 = vmatprep.subr.bf16.mxu0 %v14096_v31  ;;  %v6589_v0 = vpop.f32.mrf.mxu0  ;;  %v21751_v31 = vpack.c.bf16 %v18523_v24, %v18521_v45  ;;  %v6586_v45 = vadd.f32 %v18576_v46, %v6523_v12  ;;  %v14126_v46 = vld [vmem:[%s20755_s3 + $0x234] ss:$8 sps:$4 sm:$0xff]   ;;  %v14153_v12 = vld [vmem:[%s20755_s3 + $0x2a4] ss:$8 sps:$4 sm:$0xff]  }
 0x3df   : > { %7888 = vmatprep.subr.bf16.mxu1 %v14093_v5  ;;  %v14118_v5 = vld [vmem:[%s20755_s3 + $0x250] ss:$8 sps:$4 sm:$0xff]   ;;  %v6590_v24 = vadd.f32 %v6589_v0, %v6527_v23  ;;  %v14151_v0 = vld [vmem:[%s20755_s3 + $0x2a0] ss:$8 sps:$4 sm:$0xff]  }
 0x3e1   : > { %7828 = vmatpush2.bf16.msra.mxu0 %v14094_v48  ;;  %v7087_v48 = vpack.c.bf16 %v6338_v28, %v6334_v16  ;;  %v14145_v16 = vld [vmem:[%s20755_s3 + $0x2c0] ss:$8 sps:$4 sm:$0xff]  }
 0x3e2   : > { %7889 = vmatpush2.bf16.msra.mxu1 %v14091_v32  ;;  %7829 = vmatprep.subr.bf16.mxu0 %v14102_v57  ;;  %v14163_v32 = vld [vmem:[%s20755_s3 + $0x360] ss:$8 sps:$4 sm:$0xff]  }
 0x3e3   : > { %7890 = vmatprep.subr.bf16.mxu1 %v14099_v25  ;;  %v21752_v57 = vld [vmem:[#allocation46_spill] sm:$0xff] }
 0x3e4   : > { %v21754_v52 = vpack.c.bf16 %v21752_v57, %v21753_v40  ;;  %v14121_v25 = vld [vmem:[%s20755_s3 + $0x240] ss:$8 sps:$4 sm:$0xff]  }
 0x3e5   : > { %7830 = vmatpush2.bf16.msra.mxu0 %v14100_v58  ;;  %v14166_v58 = vld [vmem:[%s20755_s3 + $0x350] ss:$8 sps:$4 sm:$0xff]  }
 0x3e6   : > { %7891 = vmatpush2.bf16.msra.mxu1 %v14097_v17  ;;  %7831 = vmatprep.subr.bf16.mxu0 %v14108_v11  ;;  %v7089_v17 = vpack.c.bf16 %v6590_v24, %v6586_v45  ;;  %v14171_v11 = vld [vmem:[%s20755_s3 + $0x344] ss:$8 sps:$4 sm:$0xff]  }
 0x3e7   : > { %7892 = vmatprep.subr.bf16.mxu1 %v14105_v49  ;;  %v14124_v49 = vld [vmem:[%s20755_s3 + $0x230] ss:$8 sps:$4 sm:$0xff]   ;;  %v14159_v24 = vld [vmem:[%s20755_s3 + $0x284] ss:$8 sps:$4 sm:$0xff]  }
 0x3e9   : > { %7832 = vmatpush2.bf16.msra.mxu0 %v14106_v3 }
 0x3ea   : > { %7893 = vmatpush2.bf16.msra.mxu1 %v14103_v55  ;;  %7927 = vmatprep.subr.bf16.mxu0 %v14114_v56  ;;  %v14174_v55 = vld [vmem:[%s20755_s3 + $0x334] ss:$8 sps:$4 sm:$0xff]  }
 0x3eb   : > { %7894 = vmatprep.subr.bf16.mxu1 %v14111_v8  ;;  %v14172_v8 = vld [vmem:[%s20755_s3 + $0x330] ss:$8 sps:$4 sm:$0xff]  }
 0x3ec   : > { %7834 = vmatmul.mubr.bf16.vlgmr.msra.gmra.mxu0 %v21747_v18  ;;  %v14139_v18 = vld [vmem:[%s20755_s3 + $0x2e0] ss:$8 sps:$4 sm:$0xff]  }
 0x3ed   : > { %7843 = vmatprep.mubr.bf16.mxu0 %v7080_v33  ;;  %7928 = vmatpush1.bf16.msra.mxu0 %v14112_v54  ;;  %v14130_v54 = vld [vmem:[%s20755_s3 + $0x210] ss:$8 sps:$4 sm:$0xff]  }
 0x3ee   : > { %7895 = vmatpush2.bf16.msra.mxu1 %v14109_v53  ;;  %7929 = vmatprep.subr.bf16.mxu0 %v14117_v7  ;;  %v14135_v53 = vld [vmem:[%s20755_s3 + $0x204] ss:$8 sps:$4 sm:$0xff]   ;;  %v21758_v7 = vmov 0  }
 0x3ef   : > { %7990 = vmatprep.subr.bf16.mxu1 %v14162_v62  ;;  %v14138_v62 = vld [vmem:[%s20755_s3 + $0x2f4] ss:$8 sps:$4 sm:$0xff]  }
 0x3f1   : > { %7897 = vmatmul.mubr.bf16.vlgmr.msra.gmra.mxu1 %v21751_v31  ;;  %7930 = vmatpush1.bf16.msra.mxu0 %v14115_v1 }
 0x3f2   : > { %7906 = vmatprep.mubr.bf16.mxu1 %v7082_v30  ;;  %7931 = vmatprep.subr.bf16.mxu0 %v14120_v15  ;;  %v14142_v15 = vld [vmem:[%s20755_s3 + $0x2d0] ss:$8 sps:$4 sm:$0xff]  }
 0x3f3   : > { %7991 = vmatpush1.bf16.msra.mxu1 %v14160_v20  ;;  %v14148_v30 = vld [vmem:[%s20755_s3 + $0x2b0] ss:$8 sps:$4 sm:$0xff]  }
 0x3f4   : > { %7844 = vmatmul.mubr.bf16.gmra.mxu0 %v21754_v52  ;;  %7992 = vmatprep.subr.bf16.mxu1 %v14165_v22  ;;  %v14157_v52 = vld [vmem:[%s20755_s3 + $0x280] ss:$8 sps:$4 sm:$0xff]  }
 0x3f5   : > { %7853 = vmatprep.mubr.bf16.mxu0 %v7087_v48  ;;  %7932 = vmatpush1.bf16.msra.mxu0 %v14118_v5  ;;  %v14156_v5 = vld [vmem:[%s20755_s3 + $0x294] ss:$8 sps:$4 sm:$0xff]  }
 0x3f6   : > { %7933 = vmatprep.subr.bf16.mxu0 %v14123_v35 }
 0x3f7   : > { %7993 = vmatpush1.bf16.msra.mxu1 %v14163_v32  ;;  %v14154_v32 = vld [vmem:[%s20755_s3 + $0x290] ss:$8 sps:$4 sm:$0xff]  }
 0x3f8   : > { %7994 = vmatprep.subr.bf16.mxu1 %v14168_v34  ;;  %v18898_v43 = vpop.f32.mrf.mxu1 }
 0x3f9   : > { %7907 = vmatmul.mubr.bf16.gmra.mxu1 %v7081_v29  ;;  %7934 = vmatpush1.bf16.msra.mxu0 %v14121_v25  ;;  %v21756_v29 = vld [vmem:[#allocation52_spill] sm:$0xff] }
 0x3fa   : > { %7916 = vmatprep.mubr.bf16.mxu1 %v7089_v17  ;;  %7935 = vmatprep.subr.bf16.mxu0 %v14126_v46  ;;  %v18906_v14 = vpop.f32.mrf.mxu1  ;;  %v21757_v3 = vpack.c.bf16 %v21755_v4, %v21756_v29 }
 0x3fb   : > { %7995 = vmatpush1.bf16.msra.mxu1 %v14166_v58 }
 0x3fc   : > { %7854 = vmatmul.mubr.bf16.gmra.mxu0 %v21757_v3  ;;  %7996 = vmatprep.subr.bf16.mxu1 %v14171_v11  ;;  %v18917_v56 = vpop.f32.mrf.mxu1 }
 0x3fd   : > { %7936 = vmatpush1.bf16.msra.mxu0 %v14124_v49 }
 0x3fe   : > { %7937 = vmatprep.subr.bf16.mxu0 %v14129_v37  ;;  %v18925_v47 = vpop.f32.mrf.mxu1 }
 0x3ff   : > { %7997 = vmatpush1.bf16.msra.mxu1 %v14169_v26 }
 0x400   : > { %7998 = vmatprep.subr.bf16.mxu1 %v14174_v55  ;;  %v18936_v6 = vpop.f32.mrf.mxu1 }
 0x401   : > { %7917 = vmatmul.mubr.bf16.gmra.mxu1 %v7088_v10  ;;  %7938 = vmatpush1.bf16.msra.mxu0 %v14127_v9 }
 0x402   : > { %7939 = vmatprep.subr.bf16.mxu0 %v14132_v59  ;;  %8022 = vmatprep.mubr.bf16.mxu1 %v21758_v7  ;;  %v18945_v33 = vpop.f32.mrf.mxu1 }
 0x403   : > { %7999 = vmatpush1.bf16.msra.mxu1 %v14172_v8 }
 0x404   : > { %8000 = vmatprep.subr.bf16.mxu1 %v14177_v13  ;;  %v18953_v10 = vpop.f32.mrf.mxu1  ;;  %v6626_v31 = vpop.f32.mrf.mxu0 }
 0x405   : > { %7940 = vmatpush1.bf16.msra.mxu0 %v14130_v54 }
 0x406   : > { %7941 = vmatprep.subr.bf16.mxu0 %v14135_v53  ;;  %v18961_v27 = vpop.f32.mrf.mxu1  ;;  %v6628_v45 = vpop.f32.mrf.mxu0 }
 0x407   : > { %8001 = vmatpush1.bf16.msra.mxu1 %v14175_v60 }
 0x408   : > { %8002 = vmatprep.subr.bf16.mxu1 %v14180_v63  ;;  %v18975_v51 = vpop.f32.mrf.mxu1  ;;  %v6630_v34 = vpop.f32.mrf.mxu0 }
 0x409   : > { %7942 = vmatpush1.bf16.msra.mxu0 %v14133_v41 }
 0x40a   : > { %7943 = vmatprep.subr.bf16.mxu0 %v14138_v62  ;;  %v18986_v1 = vpop.f32.mrf.mxu1  ;;  %v6632_v46 = vpop.f32.mrf.mxu0 }
 0x40b   : > { %8003 = vmatpush1.bf16.msra.mxu1 %v14178_v42 }
 0x40c   : > { %8004 = vmatprep.subr.bf16.mxu1 %v14183_v36  ;;  %v18994_v44 = vpop.f32.mrf.mxu1  ;;  %v6636_v17 = vpop.f32.mrf.mxu0 }
 0x40d   : > { %7944 = vmatpush2.bf16.msra.mxu0 %v14136_v21 }
 0x40e   : > { %7945 = vmatprep.subr.bf16.mxu0 %v14141_v38  ;;  %v19002_v28 = vpop.f32.mrf.mxu1  ;;  %v6638_v49 = vpop.f32.mrf.mxu0  ;;  %v6692_v38 = vadd.f32 %v18906_v14, %v6628_v45 }
 0x40f   : > { %8005 = vmatpush1.bf16.msra.mxu1 %v14181_v50  ;;  %v6694_v50 = vadd.f32 %v18917_v56, %v6630_v34  ;;  %v6702_v34 = vadd.f32 %v18945_v33, %v6638_v49 }
 0x410   : > { %v6640_v26 = vpop.f32.mrf.mxu0 }
 0x411   : > { %7946 = vmatpush2.bf16.msra.mxu0 %v14139_v18 }
 0x412   : > { %7947 = vmatprep.subr.bf16.mxu0 %v14144_v61  ;;  %v6642_v3 = vpop.f32.mrf.mxu0  ;;  %v6690_v61 = vadd.f32 %v18898_v43, %v6626_v31  ;;  %v6704_v43 = vadd.f32 %v18953_v10, %v6640_v26 }
 0x414   : > { %v6646_v59 = vpop.f32.mrf.mxu0 }
 0x415   : > { %7948 = vmatpush2.bf16.msra.mxu0 %v14142_v15 }
 0x416   : > { %7949 = vmatprep.subr.bf16.mxu0 %v14147_v39  ;;  %v6648_v54 = vpop.f32.mrf.mxu0  ;;  %v6696_v39 = vadd.f32 %v18925_v47, %v6632_v46  ;;  %v6700_v46 = vadd.f32 %v18936_v6, %v6636_v17 }
 0x417   : > { %v19004_v20 = vpop.f32.mrf.mxu1 }
 0x418   : > { %v6650_v63 = vpop.f32.mrf.mxu0 }
 0x419   : > { %7950 = vmatpush2.bf16.msra.mxu0 %v14145_v16  ;;  %v6817_v23 = vpop.f32.mrf.mxu1 }
 0x41a   : > { %7951 = vmatprep.subr.bf16.mxu0 %v14150_v2  ;;  %v6652_v62 = vpop.f32.mrf.mxu0 }
 0x41b   : > { %v6819_v22 = vpop.f32.mrf.mxu1 }
 0x41d   : > { %7952 = vmatpush2.bf16.msra.mxu0 %v14148_v30  ;;  %v6821_v35 = vpop.f32.mrf.mxu1 }
 0x41e   : > { %7953 = vmatprep.subr.bf16.mxu0 %v14153_v12 }
 0x420   : > { %v19018_v48 = vpop.f32.mrf.mxu1 }
 0x421   : > { %7954 = vmatpush2.bf16.msra.mxu0 %v14151_v0 }
 0x422   : > { %7955 = vmatprep.subr.bf16.mxu0 %v14156_v5  ;;  %v19026_v57 = vpop.f32.mrf.mxu1 }
 0x424   : > { %v19028_v40 = vpop.f32.mrf.mxu1 }
 0x425   : > { %7956 = vmatpush2.bf16.msra.mxu0 %v14154_v32 }
 0x426   : > { %7957 = vmatprep.subr.bf16.mxu0 %v14159_v24  ;;  %v19033_v25 = vpop.f32.mrf.mxu1 }
 0x429   : > { %7958 = vmatpush2.bf16.msra.mxu0 %v14157_v52  ;;  %v19035_v58 = vpop.f32.mrf.mxu1 }
 0x42b   : > { %v19037_v11 = vpop.f32.mrf.mxu1 }
 0x42d   : > { %v19039_v37 = vpop.f32.mrf.mxu1 }
 0x42f   : > { %v19041_v4 = vpop.f32.mrf.mxu1 }
 0x439   : > { %v19043_v29 = vpop.f32.mrf.mxu1 }
 0x43b   : > { %v19045_v55 = vpop.f32.mrf.mxu1 }
 0x43d   : > { %v19047_v9 = vpop.f32.mrf.mxu1 }
 0x43f   : > { %v19049_v8 = vpop.f32.mrf.mxu1 }
 0x441   : > { %v19051_v13 = vpop.f32.mrf.mxu1 }
 0x443   : > { %v19053_v53 = vpop.f32.mrf.mxu1 }
 0x445   : > { %v19055_v60 = vpop.f32.mrf.mxu1 }
 0x447   : > { %v19057_v41 = vpop.f32.mrf.mxu1 }
 0x449   : > { %v19059_v42 = vpop.f32.mrf.mxu1 }
 0x44b   : > { %v19063_v18 = vpop.f32.mrf.mxu1 }
 0x44c   : > { %v6752_v36 = vpop.f32.mrf.mxu0 }
 0x44d   : > { %v6753_v30 = vadd.f32 %v6752_v36, %v6690_v61  ;;  %v19067_v5 = vpop.f32.mrf.mxu1 }
 0x44e   : > { %v6754_v21 = vpop.f32.mrf.mxu0 }
 0x44f   : > { %v6755_v16 = vadd.f32 %v6754_v21, %v6692_v38  ;;  %v6816_v56 = vadd.f32 %v19004_v20, %v6753_v30  ;;  %v19072_v31 = vpop.f32.mrf.mxu1  ;;  %v6706_v38 = vadd.f32 %v18961_v27, %v6642_v3  ;;  %v6712_v3 = vadd.f32 %v18986_v1, %v6648_v54 }
 0x450   : > { %v6756_v15 = vpop.f32.mrf.mxu0  ;;  %v6710_v30 = vadd.f32 %v18975_v51, %v6646_v59 }
 0x451   : > { %v6757_v2 = vadd.f32 %v6756_v15, %v6694_v50  ;;  %v6818_v52 = vadd.f32 %v6817_v23, %v6755_v16 }
 0x452   : > { %v6758_v12 = vpop.f32.mrf.mxu0 }
 0x453   : > { %v6759_v0 = vadd.f32 %v6758_v12, %v6696_v39  ;;  %v6820_v32 = vadd.f32 %v6819_v22, %v6757_v2  ;;  %v6714_v39 = vadd.f32 %v18994_v44, %v6650_v63 }
 0x454   : > { %v6762_v24 = vpop.f32.mrf.mxu0 }
 0x455   : > { %v6822_v14 = vadd.f32 %v6821_v35, %v6759_v0  ;;  %v7076_v36 = vpack.c.bf16 %v6820_v32, %v6816_v56  ;;  %v6763_v35 = vadd.f32 %v6762_v24, %v6700_v46 }
 0x456   : > { %v6764_v45 = vpop.f32.mrf.mxu0 }
 0x457   : > { %v7077_v47 = vpack.c.bf16 %v6822_v14, %v6818_v52  ;;  %v6765_v22 = vadd.f32 %v6764_v45, %v6702_v34  ;;  %v6826_v15 = vadd.f32 %v19018_v48, %v6763_v35 }
 0x458   : > { %v6766_v21 = vpop.f32.mrf.mxu0 }
 0x459   : > { %v6767_v50 = vadd.f32 %v6766_v21, %v6704_v43  ;;  %v13527_v23 = vpop.f32.mrf.mxu1  ;;  %7959 = vmatprep.mubr.bf16.mxu0 %v7077_v47  ;;  %v6828_v26 = vadd.f32 %v19026_v57, %v6765_v22 }
 0x45a   : > { %v6768_v20 = vpop.f32.mrf.mxu0  ;;  %7960 = vmatmul.mubr.bf16.vlgmr.msra.gmra.mxu0 %v7076_v36 }
 0x45b   : > { %v6769_v61 = vadd.f32 %v6768_v20, %v6706_v38  ;;  %v13528_v33 = vpop.f32.mrf.mxu1  ;;  %v6830_v10 = vadd.f32 %v19028_v40, %v6767_v50  ;;  %v6716_v40 = vadd.f32 %v19002_v28, %v6652_v62 }
 0x45c   : > { %v6772_v49 = vpop.f32.mrf.mxu0  ;;  %v13529_v43 = vadd.f32 %v13528_v33, %v13527_v23 }
 0x45d   : > { %v6832_v6 = vadd.f32 %v19033_v25, %v6769_v61  ;;  %v13530_v17 = vpop.f32.mrf.mxu1  ;;  %v7083_v0 = vpack.c.bf16 %v6830_v10, %v6826_v15  ;;  %v6773_v25 = vadd.f32 %v6772_v49, %v6710_v30 }
 0x45e   : > { %v6774_v27 = vpop.f32.mrf.mxu0 }
 0x45f   : > { %v13531_v16 = vpop.f32.mrf.mxu1  ;;  %v7084_v2 = vpack.c.bf16 %v6832_v6, %v6828_v26  ;;  %v6775_v32 = vadd.f32 %v6774_v27, %v6712_v3  ;;  %v6836_v59 = vadd.f32 %v19035_v58, %v6773_v25  ;;  %v13498_v58 = vadd.f32 %v19049_v8, %v19047_v9 }
 0x460   : > { %v6776_v12 = vpop.f32.mrf.mxu0  ;;  %v13504_v3 = vadd.f32 %v19057_v41, %v19055_v60  ;;  %v13507_v25 = vadd.f32 %v19063_v18, %v19059_v42 }
 0x461   : > { %v6777_v57 = vadd.f32 %v6776_v12, %v6714_v39  ;;  %v13533_v24 = vpop.f32.mrf.mxu1  ;;  %7969 = vmatprep.mubr.bf16.mxu0 %v7084_v2  ;;  %v6838_v44 = vadd.f32 %v19037_v11, %v6775_v32  ;;  %v13532_v11 = vadd.f32 %v13531_v16, %v13530_v17 }
 0x462   : > { %v6778_v52 = vpop.f32.mrf.mxu0  ;;  %7970 = vmatmul.mubr.bf16.gmra.mxu0 %v7083_v0 }
 0x463   : > { %v6779_v48 = vadd.f32 %v6778_v52, %v6716_v40  ;;  %v13534_v14 = vpop.f32.mrf.mxu1  ;;  %v6840_v1 = vadd.f32 %v19039_v37, %v6777_v57  ;;  %v13495_v37 = vadd.f32 %v19045_v55, %v19043_v29  ;;  %v6939_v35 = vadd.f32 %v13532_v11, %v13498_v58 }
 0x464   : > { %v13535_v33 = vadd.f32 %v13534_v14, %v13533_v24  ;;  %v13501_v29 = vadd.f32 %v19053_v53, %v19051_v13 }
 0x465   : > { %v6842_v54 = vadd.f32 %v19041_v4, %v6779_v48  ;;  %v13536_v51 = vpop.f32.mrf.mxu1  ;;  %v7090_v62 = vpack.c.bf16 %v6840_v1, %v6836_v59  ;;  %v6936_v38 = vadd.f32 %v13529_v43, %v13495_v37 }
 0x466   : > { %v6944_v39 = vadd.f32 %v13535_v33, %v13501_v29 }
 0x467   : > { %v13537_v63 = vpop.f32.mrf.mxu1  ;;  %v7091_v28 = vpack.c.bf16 %v6842_v54, %v6838_v44  ;;  %v13510_v54 = vadd.f32 %v19072_v31, %v19067_v5 }
 0x468   : > { %v13538_v6 = vadd.f32 %v13537_v63, %v13536_v51 }
 0x469   : > { %v13539_v56 = vpop.f32.mrf.mxu1  ;;  %7979 = vmatprep.mubr.bf16.mxu0 %v7091_v28 }
 0x46a   : > { %7980 = vmatmul.mubr.bf16.gmra.mxu0 %v7090_v62  ;;  %v6947_v12 = vadd.f32 %v13538_v6, %v13504_v3  ;;  %v7224_v3 = vpop.permute.xlu0 %7223 }
 0x46b   : > { %v13540_v45 = vpop.f32.mrf.mxu1 }
 0x46c   : > { %v13561_v34 = vpop.f32.mrf.mxu0  ;;  %v13541_v53 = vadd.f32 %v13540_v45, %v13539_v56 }
 0x46d   : > { %v13542_v47 = vpop.f32.mrf.mxu1 }
 0x46e   : > { %v13562_v46 = vpop.f32.mrf.mxu0  ;;  %v6952_v51 = vadd.f32 %v13541_v53, %v13507_v25 }
 0x46f   : > { %v13543_v36 = vpop.f32.mrf.mxu1  ;;  %v13563_v4 = vadd.f32 %v13562_v46, %v13561_v34 }
 0x470   : > { %v13564_v21 = vpop.f32.mrf.mxu0  ;;  %v13544_v60 = vadd.f32 %v13543_v36, %v13542_v47 }
 0x471   : > { %v7049_v22 = vpop.f32.mrf.mxu1  ;;  %v6993_v61 = vadd.f32 %v13563_v4, %v6936_v38 }
 0x472   : > { %v13565_v50 = vpop.f32.mrf.mxu0  ;;  %v6955_v62 = vadd.f32 %v13544_v60, %v13510_v54 }
 0x473   : > { %v13566_v20 = vadd.f32 %v13565_v50, %v13564_v21  ;;  %v13654_v10 = vpop.f32.mrf.mxu1  ;;  %v7050_v17 = vadd.f32 %v7049_v22, %v6993_v61 }
 0x474   : > { %v13567_v23 = vpop.f32.mrf.mxu0 }
 0x475   : > { %v6996_v49 = vadd.f32 %v13566_v20, %v6939_v35  ;;  %v7052_v26 = vpop.f32.mrf.mxu1 }
 0x476   : > { %v13568_v55 = vpop.f32.mrf.mxu0 }
 0x477   : > { %v13569_v15 = vadd.f32 %v13568_v55, %v13567_v23  ;;  %v7053_v27 = vadd.f32 %v7052_v26, %v6996_v49  ;;  %v13655_v9 = vpop.f32.mrf.mxu1 }
 0x478   : > { %v13570_v8 = vpop.f32.mrf.mxu0 }
 0x479   : > { %v7078_v16 = vpack.c.bf16 %v7053_v27, %v7050_v17  ;;  %v7057_v2 = vpop.f32.mrf.mxu1  ;;  %v7001_v40 = vadd.f32 %v13569_v15, %v6944_v39  ;;  %v7229_v27 = vpop.permute.xlu1 %7228 }
 0x47a   : > { %v13571_v30 = vpop.f32.mrf.mxu0 }
 0x47b   : > { %v13572_v0 = vadd.f32 %v13571_v30, %v13570_v8  ;;  %8023 = vmatmul.mubr.bf16.vlgmr.msra.gmra.mxu1 %v7078_v16  ;;  %v13658_v32 = vpop.f32.mrf.mxu1  ;;  %v7058_v41 = vadd.f32 %v7057_v2, %v7001_v40 }
 0x47c   : > { %v13573_v13 = vpop.f32.mrf.mxu0  ;;  %8032 = vmatprep.mubr.bf16.mxu1 %v21758_v7  ;;  %v7219_v32 = vpop.permute.xlu0 %7218 }
 0x47d   : > { %v7004_v57 = vadd.f32 %v13572_v0, %v6947_v12  ;;  %v7060_v24 = vpop.f32.mrf.mxu1  ;;  %v7214_v2 = vpop.permute.xlu1 %7213 }
 0x47e   : > { %v13574_v52 = vpop.f32.mrf.mxu0 }
 0x47f   : > { %v13575_v48 = vadd.f32 %v13574_v52, %v13573_v13  ;;  %v7061_v14 = vadd.f32 %v7060_v24, %v7004_v57  ;;  %v13659_v1 = vpop.f32.mrf.mxu1 }
 0x480   : > { %v13576_v44 = vpop.f32.mrf.mxu0 }
 0x481   : > { %v7085_v59 = vpack.c.bf16 %v7061_v14, %v7058_v41  ;;  %v7065_v63 = vpop.f32.mrf.mxu1  ;;  %v7009_v45 = vadd.f32 %v13575_v48, %v6952_v51 }
 0x482   : > { %v13577_v28 = vpop.f32.mrf.mxu0 }
 0x483   : > { %v13578_v56 = vadd.f32 %v13577_v28, %v13576_v44  ;;  %8033 = vmatmul.mubr.bf16.gmra.mxu1 %v7085_v59  ;;  %v13662_v34 = vpop.f32.mrf.mxu1  ;;  %v7066_v43 = vadd.f32 %v7065_v63, %v7009_v45 }
 0x484   : > { %8042 = vmatprep.mubr.bf16.mxu1 %v21758_v7 }
 0x485   : > { %v7012_v42 = vadd.f32 %v13578_v56, %v6955_v62  ;;  %v7068_v18 = vpop.f32.mrf.mxu1  ;;  %v14478_v56 = vld [vmem:[%s20756_s4 + $0x18] ss:$40 sps:$4 sm:$0xff]  }
 0x487   : > { %v7069_v47 = vadd.f32 %v7068_v18, %v7012_v42  ;;  %v13663_v46 = vpop.f32.mrf.mxu1 }
 0x489   : > { %v7092_v37 = vpack.c.bf16 %v7069_v47, %v7066_v43 }
 0x48b   : > { %8043 = vmatmul.mubr.bf16.gmra.mxu1 %v7092_v37 }
 0x4ac   : > { %v7835_v11 = vpop.f32.mrf.mxu0 }
 0x4ad   : > { %v7836_v0 = vadd.f32 %v7835_v11, %v7214_v2 }
 0x4ae   : > { %v7837_v5 = vpop.f32.mrf.mxu0 }
 0x4af   : > { %v7838_v40 = vadd.f32 %v7837_v5, %v7214_v2  ;;  %v7234_v5 = vpop.permute.xlu1 %7233 }
 0x4b0   : > { %v7839_v31 = vpop.f32.mrf.mxu0 }
 0x4b1   : > { %v7898_v38 = vpop.f32.mrf.mxu1  ;;  %v7840_v13 = vadd.f32 %v7839_v31, %v7219_v32 }
 0x4b2   : > { %v7841_v36 = vpop.f32.mrf.mxu0  ;;  %v7899_v24 = vadd.f32 %v7898_v38, %v7836_v0 }
 0x4b3   : > { %v7900_v50 = vpop.f32.mrf.mxu1  ;;  %v7842_v52 = vadd.f32 %v7841_v36, %v7219_v32 }
 0x4b4   : > { %v7845_v4 = vpop.f32.mrf.mxu0  ;;  %v7901_v25 = vadd.f32 %v7900_v50, %v7838_v40 }
 0x4b5   : > { %v7902_v20 = vpop.f32.mrf.mxu1  ;;  %v7846_v1 = vadd.f32 %v7845_v4, %v7224_v3 }
 0x4b6   : > { %v7847_v21 = vpop.f32.mrf.mxu0  ;;  %v7903_v14 = vadd.f32 %v7902_v20, %v7840_v13 }
 0x4b7   : > { %v7904_v10 = vpop.f32.mrf.mxu1  ;;  %v7848_v59 = vadd.f32 %v7847_v21, %v7224_v3 }
 0x4b8   : > { %v7849_v58 = vpop.f32.mrf.mxu0  ;;  %v7905_v51 = vadd.f32 %v7904_v10, %v7842_v52 }
 0x4b9   : > { %v7908_v33 = vpop.f32.mrf.mxu1  ;;  %v7850_v43 = vadd.f32 %v7849_v58, %v7229_v27 }
 0x4ba   : > { %v7851_v22 = vpop.f32.mrf.mxu0  ;;  %v7909_v18 = vadd.f32 %v7908_v33, %v7846_v1 }
 0x4bb   : > { %v7910_v26 = vpop.f32.mrf.mxu1  ;;  %v7852_v11 = vadd.f32 %v7851_v22, %v7229_v27 }
 0x4bc   : > { %v19102_v35 = vpop.f32.mrf.mxu0  ;;  %v7911_v37 = vadd.f32 %v7910_v26, %v7848_v59 }
 0x4bd   : > { %v7912_v55 = vpop.f32.mrf.mxu1  ;;  %v7856_v20 = vadd.f32 %v19102_v35, %v7234_v5 }
 0x4be   : > { %v19104_v61 = vpop.f32.mrf.mxu0  ;;  %v7913_v58 = vadd.f32 %v7912_v55, %v7850_v43 }
 0x4bf   : > { %v7914_v17 = vpop.f32.mrf.mxu1  ;;  %v7858_v22 = vadd.f32 %v19104_v61, %v7234_v5 }
 0x4c0   : > { %v19106_v23 = vpop.f32.mrf.mxu0  ;;  %v7915_v26 = vadd.f32 %v7914_v17, %v7852_v11 }
 0x4c1   : > { %v19110_v9 = vpop.f32.mrf.mxu1 }
 0x4c2   : > { %v19108_v49 = vpop.f32.mrf.mxu0  ;;  %v7919_v17 = vadd.f32 %v19110_v9, %v7856_v20 }
 0x4c3   : > { %v19112_v39 = vpop.f32.mrf.mxu1 }
 0x4c5   : > { %v19114_v30 = vpop.f32.mrf.mxu1 }
 0x4c7   : > { %v19116_v53 = vpop.f32.mrf.mxu1 }
 0x51a   : > { %v7961_v29 = vpop.f32.mrf.mxu0 }
 0x51b   : > { %v7962_v41 = vadd.f32 %v7961_v29, %v7899_v24  ;;  %v7239_v29 = vpop.permute.xlu0 %7238 }
 0x51c   : > { %v7963_v6 = vpop.f32.mrf.mxu0  ;;  %v7862_v3 = vadd.f32 %v19108_v49, %v7239_v29 }
 0x51d   : > { %v7964_v48 = vadd.f32 %v7963_v6, %v7901_v25 }
 0x51e   : > { %v7965_v15 = vpop.f32.mrf.mxu0  ;;  %v7925_v24 = vadd.f32 %v19116_v53, %v7862_v3 }
 0x51f   : > { %v7966_v45 = vadd.f32 %v7965_v15, %v7903_v14 }
 0x520   : > { %v7967_v8 = vpop.f32.mrf.mxu0 }
 0x521   : > { %v7968_v34 = vadd.f32 %v7967_v8, %v7905_v51  ;;  %v7860_v8 = vadd.f32 %v19106_v23, %v7239_v29 }
 0x522   : > { %v7971_v16 = vpop.f32.mrf.mxu0 }
 0x523   : > { %v7972_v21 = vadd.f32 %v7971_v16, %v7909_v18 }
 0x524   : > { %v7973_v12 = vpop.f32.mrf.mxu0 }
 0x525   : > { %v7974_v38 = vadd.f32 %v7973_v12, %v7911_v37  ;;  %v7921_v12 = vadd.f32 %v19112_v39, %v7858_v22  ;;  %v7923_v39 = vadd.f32 %v19114_v30, %v7860_v8 }
 0x526   : > { %v7975_v57 = vpop.f32.mrf.mxu0 }
 0x527   : > { %v7976_v35 = vadd.f32 %v7975_v57, %v7913_v58 }
 0x528   : > { %v7977_v44 = vpop.f32.mrf.mxu0 }
 0x529   : > { %v7978_v27 = vadd.f32 %v7977_v44, %v7915_v26 }
 0x52a   : > { %v7981_v47 = vpop.f32.mrf.mxu0 }
 0x52b   : > { %v7982_v9 = vadd.f32 %v7981_v47, %v7919_v17 }
 0x52c   : > { %v7983_v10 = vpop.f32.mrf.mxu0 }
 0x52d   : > { %v7984_v49 = vadd.f32 %v7983_v10, %v7921_v12 }
 0x52e   : > { %v7985_v16 = vpop.f32.mrf.mxu0 }
 0x530   : > { %v7987_v13 = vpop.f32.mrf.mxu0 }
 0x53b   : > { %v8024_v60 = vpop.f32.mrf.mxu1 }
 0x53c   : > { %v8025_v63 = vadd.f32 %v8024_v60, %v7962_v41  ;;  %v7986_v41 = vadd.f32 %v7985_v16, %v7923_v39 }
 0x53d   : > { %v8026_v54 = vpop.f32.mrf.mxu1 }
 0x53e   : > { %v8027_v28 = vadd.f32 %v8026_v54, %v7964_v48  ;;  %v7988_v48 = vadd.f32 %v7987_v13, %v7925_v24 }
 0x53f   : > { %v8028_v62 = vpop.f32.mrf.mxu1 }
 0x540   : > { %v19123_v42 = vpack.c.bf16 %v8027_v28, %v8025_v63  ;;  %v8029_v31 = vadd.f32 %v8028_v62, %v7966_v45 }
 0x541   : > { %v8030_v46 = vpop.f32.mrf.mxu1 }
 0x542   : > { %v8031_v36 = vadd.f32 %v8030_v46, %v7968_v34  ;;  %8134 = vrot.lane.b32.xlu1 %v19123_v42, %s21266_s20  ;;  %8092 = vst.msk [vmem:[#allocation3] sm:$0xff] %vm19119_vm1, %v19123_v42 }
 0x543   : > { %v8034_v4 = vpop.f32.mrf.mxu1 }
 0x544   : > { %v19130_v50 = vpack.c.bf16 %v8031_v36, %v8029_v31  ;;  %v8035_v6 = vadd.f32 %v8034_v4, %v7972_v21 }
 0x545   : > { %v8036_v33 = vpop.f32.mrf.mxu1 }
 0x546   : > { %v8037_v15 = vadd.f32 %v8036_v33, %v7974_v38  ;;  %8136 = vrot.lane.b32.xlu0 %v19130_v50, %s21266_s20  ;;  %8098 = vrot.lane.b32.xlu1 %v19123_v42, %s21351_s8  ;;  %8093 = vst.msk [vmem:[#allocation3 + $0x8] sm:$0xff] %vm19119_vm1, %v19130_v50 }
 0x547   : > { %v8038_v55 = vpop.f32.mrf.mxu1 }
 0x548   : > { %v19141_v61 = vpack.c.bf16 %v8037_v15, %v8035_v6  ;;  %v8039_v0 = vadd.f32 %v8038_v55, %v7976_v35 }
 0x549   : > { %v8040_v2 = vpop.f32.mrf.mxu1 }
 0x54a   : > { %v8041_v40 = vadd.f32 %v8040_v2, %v7978_v27  ;;  %8100 = vrot.lane.b32.xlu0 %v19130_v50, %s21351_s8  ;;  %8242 = vrot.lane.b32.xlu1 %v19123_v42, %s14724_s30  ;;  %8094 = vst.msk [vmem:[#allocation3 + $0x10] sm:$0xff] %vm19119_vm1, %v19141_v61 }
 0x54b   : > { %v8044_v23 = vpop.f32.mrf.mxu1 }
 0x54c   : > { %v19154_v32 = vpack.c.bf16 %v8041_v40, %v8039_v0  ;;  %v8045_v25 = vadd.f32 %v8044_v23, %v7982_v9 }
 0x54d   : > { %v8046_v57 = vpop.f32.mrf.mxu1 }
 0x54e   : > { %v8047_v52 = vadd.f32 %v8046_v57, %v7984_v49  ;;  %8244 = vrot.lane.b32.xlu0 %v19130_v50, %s14724_s30  ;;  %8206 = vrot.lane.b32.xlu1 %v19123_v42, %s21286_s23  ;;  %8095 = vst.msk [vmem:[#allocation3 + $0x18] sm:$0xff] %vm19119_vm1, %v19154_v32 }
 0x54f   : > { %v8048_v60 = vpop.f32.mrf.mxu1 }
 0x550   : > { %v19165_v30 = vpack.c.bf16 %v8047_v52, %v8045_v25  ;;  %v8049_v1 = vadd.f32 %v8048_v60, %v7986_v41 }
 0x551   : > { %v8050_v14 = vpop.f32.mrf.mxu1 }
 0x552   : > { %v8051_v53 = vadd.f32 %v8050_v14, %v7988_v48  ;;  %8208 = vrot.lane.b32.xlu0 %v19130_v50, %s21286_s23  ;;  %8170 = vrot.lane.b32.xlu1 %v19123_v42, %s21322_s18  ;;  %8096 = vst.msk [vmem:[#allocation3 + $0x20] sm:$0xff] %vm19119_vm1, %v19165_v30 }
 0x554   : > { %v19174_v44 = vpack.c.bf16 %v8051_v53, %v8049_v1 }
 0x556   : > { %8172 = vrot.lane.b32.xlu0 %v19130_v50, %s21322_s18  ;;  %8538 = vrot.lane.b32.xlu1 %v19123_v42, %s14725_s16  ;;  %8097 = vst.msk [vmem:[#allocation3 + $0x28] sm:$0xff] %vm19119_vm1, %v19174_v44 }
 0x55a   : > { %8540 = vrot.lane.b32.xlu0 %v19130_v50, %s14725_s16  ;;  %8316 = vrot.lane.b32.xlu1 %v19123_v42, %s14726_s11 }
 0x55e   : > { %8318 = vrot.lane.b32.xlu0 %v19130_v50, %s14726_s11  ;;  %8501 = vrot.lane.b32.xlu1 %v19123_v42, %s14727_s17 }
 0x562   : > { %8503 = vrot.lane.b32.xlu0 %v19130_v50, %s14727_s17  ;;  %8279 = vrot.lane.b32.xlu1 %v19123_v42, %s14728_s27 }
 0x566   : > { %8281 = vrot.lane.b32.xlu0 %v19130_v50, %s14728_s27  ;;  %8464 = vrot.lane.b32.xlu1 %v19123_v42, %s14729_s22 }
 0x56a   : > { %8466 = vrot.lane.b32.xlu0 %v19130_v50, %s14729_s22  ;;  %8427 = vrot.lane.b32.xlu1 %v19123_v42, %s14730_s26 }
 0x56e   : > { %8429 = vrot.lane.b32.xlu0 %v19130_v50, %s14730_s26  ;;  %8611 = vrot.lane.b32.xlu1 %v19123_v42, %s14731_s29 }
 0x572   : > { %8613 = vrot.lane.b32.xlu0 %v19130_v50, %s14731_s29  ;;  %8390 = vrot.lane.b32.xlu1 %v19123_v42, %s14732_s12 }
 0x576   : > { %8392 = vrot.lane.b32.xlu0 %v19130_v50, %s14732_s12  ;;  %8138 = vrot.lane.b32.xlu1 %v19141_v61, %s21266_s20 }
 0x57a   : > { %8140 = vrot.lane.b32.xlu0 %v19154_v32, %s21266_s20  ;;  %8102 = vrot.lane.b32.xlu1 %v19141_v61, %s21351_s8 }
 0x57e   : > { %8104 = vrot.lane.b32.xlu0 %v19154_v32, %s21351_s8  ;;  %8210 = vrot.lane.b32.xlu1 %v19141_v61, %s21286_s23 }
 0x582   : > { %8212 = vrot.lane.b32.xlu0 %v19154_v32, %s21286_s23  ;;  %8174 = vrot.lane.b32.xlu1 %v19141_v61, %s21322_s18 }
 0x586   : > { %8176 = vrot.lane.b32.xlu0 %v19154_v32, %s21322_s18  ;;  %8320 = vrot.lane.b32.xlu1 %v19141_v61, %s14726_s11 }
 0x58a   : > { %8322 = vrot.lane.b32.xlu0 %v19154_v32, %s14726_s11  ;;  %8505 = vrot.lane.b32.xlu1 %v19141_v61, %s14727_s17 }
 0x58e   : > { %8507 = vrot.lane.b32.xlu0 %v19154_v32, %s14727_s17  ;;  %8283 = vrot.lane.b32.xlu1 %v19141_v61, %s14728_s27 }
 0x592   : > { %8285 = vrot.lane.b32.xlu0 %v19154_v32, %s14728_s27  ;;  %8468 = vrot.lane.b32.xlu1 %v19141_v61, %s14729_s22 }
 0x596   : > { %8470 = vrot.lane.b32.xlu0 %v19154_v32, %s14729_s22  ;;  %8246 = vrot.lane.b32.xlu1 %v19141_v61, %s14724_s30 }
 0x59a   : > { %8248 = vrot.lane.b32.xlu0 %v19154_v32, %s14724_s30  ;;  %8431 = vrot.lane.b32.xlu1 %v19141_v61, %s14730_s26 }
 0x59e   : > { %8433 = vrot.lane.b32.xlu0 %v19154_v32, %s14730_s26  ;;  %8615 = vrot.lane.b32.xlu1 %v19141_v61, %s14731_s29 }
 0x5a2   : > { %8617 = vrot.lane.b32.xlu0 %v19154_v32, %s14731_s29  ;;  %8394 = vrot.lane.b32.xlu1 %v19141_v61, %s14732_s12 }
 0x5a6   : > { %8396 = vrot.lane.b32.xlu0 %v19154_v32, %s14732_s12  ;;  %8579 = vrot.lane.b32.xlu1 %v19141_v61, %s21280_s15 }
 0x5aa   : > { %8581 = vrot.lane.b32.xlu0 %v19154_v32, %s21280_s15  ;;  %8106 = vrot.lane.b32.xlu1 %v19165_v30, %s21351_s8 }
 0x5ae   : > { %8108 = vrot.lane.b32.xlu0 %v19174_v44, %s21351_s8  ;;  %8575 = vrot.lane.b32.xlu1 %v19123_v42, %s21280_s15  ;;  %s14734_s8 = smov 83  }
 0x5b2   : > { %8577 = vrot.lane.b32.xlu0 %v19130_v50, %s21280_s15  ;;  %8214 = vrot.lane.b32.xlu1 %v19165_v30, %s21286_s23 }
 0x5b4   : > { %v8135_v54 = vpop.permute.xlu1 %8134 }
 0x5b5   : > { %v8146_v51 = vrot.slane %v8135_v54, 4 }
 0x5b6   : > { %8359 = vrot.lane.b32.xlu0 %v19154_v32, %s14733_s0  ;;  %8178 = vrot.lane.b32.xlu1 %v19165_v30, %s21322_s18 }
 0x5b7   : > { %v8152_v59 = vsel %vm700_vm5, %v8135_v54, %v8146_v51 }
 0x5b8   : > { %8164 = vst.msk [vmem:[#allocation3 + $0x60] sm:$0xff] %vm19119_vm1, %v8152_v59  ;;  %v8137_v63 = vpop.permute.xlu0 %8136  ;;  %v8099_v28 = vpop.permute.xlu1 %8098 }
 0x5b9   : > { %v8147_v62 = vrot.slane %v8137_v63, 4  ;;  %v8110_v45 = vrot.slane %v8099_v28, 4 }
 0x5ba   : > { %8355 = vrot.lane.b32.xlu0 %v19130_v50, %s14733_s0  ;;  %8142 = vrot.lane.b32.xlu1 %v19165_v30, %s21266_s20 }
 0x5bb   : > { %v8153_v34 = vsel %vm700_vm5, %v8137_v63, %v8147_v62  ;;  %v8116_v18 = vsel %vm559_vm7, %v8099_v28, %v8110_v45 }
 0x5bc   : > { %8165 = vst.msk [vmem:[#allocation3 + $0x68] sm:$0xff] %vm19119_vm1, %v8153_v34  ;;  %8128 = vst.msk [vmem:[#allocation3 + $0x30] sm:$0xff] %vm19119_vm1, %v8116_v18  ;;  %v8101_v43 = vpop.permute.xlu0 %8100  ;;  %v8243_v47 = vpop.permute.xlu1 %8242 }
 0x5bd   : > { %v8111_v46 = vrot.slane %v8101_v43, 4  ;;  %v8254_v37 = vrot.slane %v8243_v47, 4 }
 0x5be   : > { %8544 = vrot.lane.b32.xlu0 %v19154_v32, %s14725_s16  ;;  %8324 = vrot.lane.b32.xlu1 %v19165_v30, %s14726_s11 }
 0x5bf   : > { %v8117_v11 = vsel %vm559_vm7, %v8101_v43, %v8111_v46  ;;  %v8261_v5 = vsel %vm8260_vm10, %v8243_v47, %v8254_v37 }
 0x5c0   : > { %8129 = vst.msk [vmem:[#allocation3 + $0x38] sm:$0xff] %vm19119_vm1, %v8117_v11  ;;  %8273 = vst.msk [vmem:[#allocation3 + $0xf0] sm:$0xff] %vm19119_vm1, %v8261_v5  ;;  %v8245_v31 = vpop.permute.xlu0 %8244  ;;  %v8207_v36 = vpop.permute.xlu1 %8206 }
 0x5c1   : > { %v8255_v4 = vrot.slane %v8245_v31, 4  ;;  %v8218_v21 = vrot.slane %v8207_v36, 4 }
 0x5c2   : > { %8728 = vrot.lane.b32.xlu0 %v19154_v32, %s14734_s8  ;;  %8509 = vrot.lane.b32.xlu1 %v19165_v30, %s14727_s17 }
 0x5c3   : > { %v8262_v38 = vsel %vm8260_vm10, %v8245_v31, %v8255_v4  ;;  %v8224_v58 = vsel %vm982_vm15, %v8207_v36, %v8218_v21  ;;  %v14246_v36 = vld [vmem:[%s20756_s4 + $0x4] ss:$40 sps:$4 sm:$0xff]  }
 0x5c4   : > { %8274 = vst.msk [vmem:[#allocation3 + $0xf8] sm:$0xff] %vm19119_vm1, %v8262_v38  ;;  %8236 = vst.msk [vmem:[#allocation3 + $0xc0] sm:$0xff] %vm19119_vm1, %v8224_v58  ;;  %v8209_v20 = vpop.permute.xlu0 %8208  ;;  %v8171_v22 = vpop.permute.xlu1 %8170  ;;  %10410 = vmatprep.mubr.bf16.mxu1 %v14246_v36 }
 0x5c5   : > { %v8219_v10 = vrot.slane %v8209_v20, 4  ;;  %v8182_v33 = vrot.slane %v8171_v22, 4 }
 0x5c6   : > { %8724 = vrot.lane.b32.xlu0 %v19130_v50, %s14734_s8  ;;  %8287 = vrot.lane.b32.xlu1 %v19165_v30, %s14728_s27 }
 0x5c7   : > { %v8225_v26 = vsel %vm982_vm15, %v8209_v20, %v8219_v10  ;;  %v8188_v29 = vsel %vm841_vm3, %v8171_v22, %v8182_v33 }
 0x5c8   : > { %8237 = vst.msk [vmem:[#allocation3 + $0xc8] sm:$0xff] %vm19119_vm1, %v8225_v26  ;;  %8200 = vst.msk [vmem:[#allocation3 + $0x90] sm:$0xff] %vm19119_vm1, %v8188_v29  ;;  %v8173_v6 = vpop.permute.xlu0 %8172  ;;  %v8539_v15 = vpop.permute.xlu1 %8538 }
 0x5c9   : > { %v8183_v55 = vrot.slane %v8173_v6, 4  ;;  %v8550_v35 = vrot.slane %v8539_v15, 4 }
 0x5ca   : > { %8216 = vrot.lane.b32.xlu0 %v19174_v44, %s21286_s23  ;;  %8472 = vrot.lane.b32.xlu1 %v19165_v30, %s14729_s22  ;;  %s14737_s23 = smov 69  }
 0x5cb   : > { %v8189_v27 = vsel %vm841_vm3, %v8173_v6, %v8183_v55  ;;  %v8557_v17 = vsel %vm8556_vm2, %v8539_v15, %v8550_v35 }
 0x5cc   : > { %8201 = vst.msk [vmem:[#allocation3 + $0x98] sm:$0xff] %vm19119_vm1, %v8189_v27  ;;  %8569 = vst.msk [vmem:[#allocation3 + $0x270] sm:$0xff] %vm19119_vm1, %v8557_v17  ;;  %v8541_v8 = vpop.permute.xlu0 %8540  ;;  %v8317_v3 = vpop.permute.xlu1 %8316 }
 0x5cd   : > { %v8551_v16 = vrot.slane %v8541_v8, 4  ;;  %v8328_v2 = vrot.slane %v8317_v3, 4 }
 0x5ce   : > { %8691 = vrot.lane.b32.xlu0 %v19154_v32, %s14735_s28  ;;  %8250 = vrot.lane.b32.xlu1 %v19165_v30, %s14724_s30 }
 0x5cf   : > { %v8558_v12 = vsel %vm8556_vm2, %v8541_v8, %v8551_v16  ;;  %v8335_v0 = vsel %vm8334_vm9, %v8317_v3, %v8328_v2 }
 0x5d0   : > { %8570 = vst.msk [vmem:[#allocation3 + $0x278] sm:$0xff] %vm19119_vm1, %v8558_v12  ;;  %8347 = vst.msk [vmem:[#allocation3 + $0x150] sm:$0xff] %vm19119_vm1, %v8335_v0  ;;  %v8319_v40 = vpop.permute.xlu0 %8318  ;;  %v8502_v23 = vpop.permute.xlu1 %8501 }
 0x5d1   : > { %v8329_v9 = vrot.slane %v8319_v40, 4  ;;  %v8513_v49 = vrot.slane %v8502_v23, 4 }
 0x5d2   : > { %8687 = vrot.lane.b32.xlu0 %v19130_v50, %s14735_s28  ;;  %8435 = vrot.lane.b32.xlu1 %v19165_v30, %s14730_s26 }
 0x5d3   : > { %v8336_v39 = vsel %vm8334_vm9, %v8319_v40, %v8329_v9  ;;  %v8520_v13 = vsel %vm8519_vm8, %v8502_v23, %v8513_v49 }
 0x5d4   : > { %8348 = vst.msk [vmem:[#allocation3 + $0x158] sm:$0xff] %vm19119_vm1, %v8336_v39  ;;  %8532 = vst.msk [vmem:[#allocation3 + $0x240] sm:$0xff] %vm19119_vm1, %v8520_v13  ;;  %v8504_v57 = vpop.permute.xlu0 %8503  ;;  %v8280_v24 = vpop.permute.xlu1 %8279 }
 0x5d5   : > { %v8514_v25 = vrot.slane %v8504_v57, 4  ;;  %v8291_v52 = vrot.slane %v8280_v24, 4 }
 0x5d6   : > { %8180 = vrot.lane.b32.xlu0 %v19174_v44, %s21322_s18  ;;  %8619 = vrot.lane.b32.xlu1 %v19165_v30, %s14731_s29  ;;  %s21805_s18 = sld [smem:[#allocation90_spill]] }
 0x5d7   : > { %v8521_v60 = vsel %vm8519_vm8, %v8504_v57, %v8514_v25  ;;  %v8298_v41 = vsel %vm8297_vm12, %v8280_v24, %v8291_v52 }
 0x5d8   : > { %8533 = vst.msk [vmem:[#allocation3 + $0x248] sm:$0xff] %vm19119_vm1, %v8521_v60  ;;  %8310 = vst.msk [vmem:[#allocation3 + $0x120] sm:$0xff] %vm19119_vm1, %v8298_v41  ;;  %v8282_v48 = vpop.permute.xlu0 %8281  ;;  %v8465_v14 = vpop.permute.xlu1 %8464 }
 0x5d9   : > { %v8292_v1 = vrot.slane %v8282_v48, 4  ;;  %v8476_v53 = vrot.slane %v8465_v14, 4 }
 0x5da   : > { %8144 = vrot.lane.b32.xlu0 %v19174_v44, %s21266_s20  ;;  %8398 = vrot.lane.b32.xlu1 %v19165_v30, %s14732_s12  ;;  %s21810_s20 = sld [smem:[#allocation91_spill]] }
 0x5db   : > { %v8299_v54 = vsel %vm8297_vm12, %v8282_v48, %v8292_v1  ;;  %v8483_v51 = vsel %vm8482_vm4, %v8465_v14, %v8476_v53  ;;  %v14189_v48 = vld [vmem:[#allocation3 + $0x64] ss:$8 sps:$4 sm:$0xff]  }
 0x5dc   : > { %8311 = vst.msk [vmem:[#allocation3 + $0x128] sm:$0xff] %vm19119_vm1, %v8299_v54  ;;  %8495 = vst.msk [vmem:[#allocation3 + $0x210] sm:$0xff] %vm19119_vm1, %v8483_v51  ;;  %v8467_v59 = vpop.permute.xlu0 %8466  ;;  %v8428_v63 = vpop.permute.xlu1 %8427 }
 0x5dd   : > { %v8477_v28 = vrot.slane %v8467_v59, 4  ;;  %v8439_v62 = vrot.slane %v8428_v63, 4 }
 0x5de   : > { %8326 = vrot.lane.b32.xlu0 %v19174_v44, %s14726_s11  ;;  %8583 = vrot.lane.b32.xlu1 %v19165_v30, %s21280_s15  ;;  %s21808_s11 = sld [smem:[#allocation11_spill]] }
 0x5df   : > { %v8484_v45 = vsel %vm8482_vm4, %v8467_v59, %v8477_v28  ;;  %v8446_v34 = vsel %vm8445_vm6, %v8428_v63, %v8439_v62  ;;  %v14187_v59 = vld [vmem:[#allocation3 + $0x60] ss:$8 sps:$4 sm:$0xff]  }
 0x5e0   : > { %8496 = vst.msk [vmem:[#allocation3 + $0x218] sm:$0xff] %vm19119_vm1, %v8484_v45  ;;  %8458 = vst.msk [vmem:[#allocation3 + $0x1e0] sm:$0xff] %vm19119_vm1, %v8446_v34  ;;  %v8430_v18 = vpop.permute.xlu0 %8429  ;;  %v8612_v43 = vpop.permute.xlu1 %8611 }
 0x5e1   : > { %v8440_v47 = vrot.slane %v8430_v18, 4  ;;  %v8623_v46 = vrot.slane %v8612_v43, 4 }
 0x5e2   : > { %8511 = vrot.lane.b32.xlu0 %v19174_v44, %s14727_s17  ;;  %8361 = vrot.lane.b32.xlu1 %v19165_v30, %s14733_s0 }
 0x5e3   : > { %v8447_v37 = vsel %vm8445_vm6, %v8430_v18, %v8440_v47  ;;  %v8630_v11 = vsel %vm8629_vm13, %v8612_v43, %v8623_v46 }
 0x5e4   : > { %8459 = vst.msk [vmem:[#allocation3 + $0x1e8] sm:$0xff] %vm19119_vm1, %v8447_v37  ;;  %8642 = vst.msk [vmem:[#allocation3 + $0x2d0] sm:$0xff] %vm19119_vm1, %v8630_v11  ;;  %v8614_v5 = vpop.permute.xlu0 %8613  ;;  %v8391_v31 = vpop.permute.xlu1 %8390 }
 0x5e5   : > { %v8624_v4 = vrot.slane %v8614_v5, 4  ;;  %v8402_v21 = vrot.slane %v8391_v31, 4 }
 0x5e6   : > { %8289 = vrot.lane.b32.xlu0 %v19174_v44, %s14728_s27  ;;  %8357 = vrot.lane.b32.xlu1 %v19141_v61, %s14733_s0 }
 0x5e7   : > { %v8631_v38 = vsel %vm8629_vm13, %v8614_v5, %v8624_v4  ;;  %v8409_v58 = vsel %vm8408_vm0, %v8391_v31, %v8402_v21 }
 0x5e8   : > { %8643 = vst.msk [vmem:[#allocation3 + $0x2d8] sm:$0xff] %vm19119_vm1, %v8631_v38  ;;  %8421 = vst.msk [vmem:[#allocation3 + $0x1b0] sm:$0xff] %vm19119_vm1, %v8409_v58  ;;  %v8393_v20 = vpop.permute.xlu0 %8392  ;;  %v8139_v22 = vpop.permute.xlu1 %8138 }
 0x5e9   : > { %v8403_v10 = vrot.slane %v8393_v20, 4  ;;  %v8148_v33 = vrot.slane %v8139_v22, 4 }
 0x5ea   : > { %8474 = vrot.lane.b32.xlu0 %v19174_v44, %s14729_s22  ;;  %8546 = vrot.lane.b32.xlu1 %v19165_v30, %s14725_s16 }
 0x5eb   : > { %v8410_v26 = vsel %vm8408_vm0, %v8393_v20, %v8403_v10  ;;  %v8154_v29 = vsel %vm700_vm5, %v8139_v22, %v8148_v33 }
 0x5ec   : > { %8422 = vst.msk [vmem:[#allocation3 + $0x1b8] sm:$0xff] %vm19119_vm1, %v8410_v26  ;;  %8166 = vst.msk [vmem:[#allocation3 + $0x70] sm:$0xff] %vm19119_vm1, %v8154_v29  ;;  %v8141_v6 = vpop.permute.xlu0 %8140  ;;  %v8103_v15 = vpop.permute.xlu1 %8102 }
 0x5ed   : > { %v8149_v55 = vrot.slane %v8141_v6, 4  ;;  %v8112_v35 = vrot.slane %v8103_v15, 4 }
 0x5ee   : > { %8252 = vrot.lane.b32.xlu0 %v19174_v44, %s14724_s30  ;;  %8353 = vrot.lane.b32.xlu1 %v19123_v42, %s14733_s0 }
 0x5ef   : > { %v8155_v27 = vsel %vm700_vm5, %v8141_v6, %v8149_v55  ;;  %v8118_v17 = vsel %vm559_vm7, %v8103_v15, %v8112_v35 }
 0x5f0   : > { %8167 = vst.msk [vmem:[#allocation3 + $0x78] sm:$0xff] %vm19119_vm1, %v8155_v27  ;;  %8130 = vst.msk [vmem:[#allocation3 + $0x40] sm:$0xff] %vm19119_vm1, %v8118_v17  ;;  %v8105_v8 = vpop.permute.xlu0 %8104  ;;  %v8211_v3 = vpop.permute.xlu1 %8210 }
 0x5f1   : > { %v8113_v16 = vrot.slane %v8105_v8, 4  ;;  %v8220_v2 = vrot.slane %v8211_v3, 4 }
 0x5f2   : > { %8437 = vrot.lane.b32.xlu0 %v19174_v44, %s14730_s26  ;;  %8542 = vrot.lane.b32.xlu1 %v19141_v61, %s14725_s16 }
 0x5f3   : > { %v8119_v12 = vsel %vm559_vm7, %v8105_v8, %v8113_v16  ;;  %v8226_v0 = vsel %vm982_vm15, %v8211_v3, %v8220_v2 }
 0x5f4   : > { %8131 = vst.msk [vmem:[#allocation3 + $0x48] sm:$0xff] %vm19119_vm1, %v8119_v12  ;;  %8238 = vst.msk [vmem:[#allocation3 + $0xd0] sm:$0xff] %vm19119_vm1, %v8226_v0  ;;  %v8213_v40 = vpop.permute.xlu0 %8212  ;;  %v8175_v23 = vpop.permute.xlu1 %8174 }
 0x5f5   : > { %v8221_v9 = vrot.slane %v8213_v40, 4  ;;  %v8184_v49 = vrot.slane %v8175_v23, 4 }
 0x5f6   : > { %8621 = vrot.lane.b32.xlu0 %v19174_v44, %s14731_s29  ;;  %8726 = vrot.lane.b32.xlu1 %v19141_v61, %s14734_s8  ;;  %s21809_s29 = sld [smem:[#allocation89_spill]] }
 0x5f7   : > { %v8227_v39 = vsel %vm982_vm15, %v8213_v40, %v8221_v9  ;;  %v8190_v13 = vsel %vm841_vm3, %v8175_v23, %v8184_v49  ;;  %v14184_v57 = vld [vmem:[#allocation3 + $0x70] ss:$8 sps:$4 sm:$0xff]   ;;  %v14186_v24 = vld [vmem:[#allocation3 + $0x74] ss:$8 sps:$4 sm:$0xff]  }
 0x5f8   : > { %8239 = vst.msk [vmem:[#allocation3 + $0xd8] sm:$0xff] %vm19119_vm1, %v8227_v39  ;;  %8202 = vst.msk [vmem:[#allocation3 + $0xa0] sm:$0xff] %vm19119_vm1, %v8190_v13  ;;  %v8177_v25 = vpop.permute.xlu0 %8176  ;;  %v8321_v52 = vpop.permute.xlu1 %8320  ;;  %10378 = vmatprep.subr.bf16.mxu1 %v14186_v24 }
 0x5f9   : > { %v8185_v60 = vrot.slane %v8177_v25, 4  ;;  %v8330_v41 = vrot.slane %v8321_v52, 4  ;;  %10379 = vmatpush1.bf16.msra.mxu1 %v14184_v57 }
 0x5fa   : > { %8400 = vrot.lane.b32.xlu0 %v19174_v44, %s14732_s12  ;;  %8722 = vrot.lane.b32.xlu1 %v19123_v42, %s14734_s8 }
 0x5fb   : > { %v8191_v14 = vsel %vm841_vm3, %v8177_v25, %v8185_v60  ;;  %v8337_v1 = vsel %vm8334_vm9, %v8321_v52, %v8330_v41  ;;  %10380 = vmatprep.subr.bf16.mxu1 %v14189_v48  ;;  %v14354_v41 = vld [vmem:[%s20756_s4 + $0xc] ss:$40 sps:$4 sm:$0xff]  }
 0x5fc   : > { %8203 = vst.msk [vmem:[#allocation3 + $0xa8] sm:$0xff] %vm19119_vm1, %v8191_v14  ;;  %8349 = vst.msk [vmem:[#allocation3 + $0x160] sm:$0xff] %vm19119_vm1, %v8337_v1  ;;  %v8323_v53 = vpop.permute.xlu0 %8322  ;;  %v8506_v54 = vpop.permute.xlu1 %8505  ;;  %10523 = vmatprep.mubr.bf16.mxu0 %v14354_v41 }
 0x5fd   : > { %v8331_v51 = vrot.slane %v8323_v53, 4  ;;  %v8515_v63 = vrot.slane %v8506_v54, 4  ;;  %10381 = vmatpush1.bf16.msra.mxu1 %v14187_v59 }
 0x5fe   : > { %8585 = vrot.lane.b32.xlu0 %v19174_v44, %s21280_s15  ;;  %8693 = vrot.lane.b32.xlu1 %v19165_v30, %s14735_s28  ;;  %s14736_s15 = smov 85  }
 0x5ff   : > { %v8338_v28 = vsel %vm8334_vm9, %v8323_v53, %v8331_v51  ;;  %v8522_v62 = vsel %vm8519_vm8, %v8506_v54, %v8515_v63 }
 0x600   : > { %8350 = vst.msk [vmem:[#allocation3 + $0x168] sm:$0xff] %vm19119_vm1, %v8338_v28  ;;  %8534 = vst.msk [vmem:[#allocation3 + $0x250] sm:$0xff] %vm19119_vm1, %v8522_v62  ;;  %v8508_v45 = vpop.permute.xlu0 %8507  ;;  %v8284_v34 = vpop.permute.xlu1 %8283 }
 0x601   : > { %v8516_v18 = vrot.slane %v8508_v45, 4  ;;  %v8293_v43 = vrot.slane %v8284_v34, 4 }
 0x602   : > { %8363 = vrot.lane.b32.xlu0 %v19174_v44, %s14733_s0  ;;  %8689 = vrot.lane.b32.xlu1 %v19141_v61, %s14735_s28 }
 0x603   : > { %v8523_v47 = vsel %vm8519_vm8, %v8508_v45, %v8516_v18  ;;  %v8300_v46 = vsel %vm8297_vm12, %v8284_v34, %v8293_v43 }
 0x604   : > { %8535 = vst.msk [vmem:[#allocation3 + $0x258] sm:$0xff] %vm19119_vm1, %v8523_v47  ;;  %8312 = vst.msk [vmem:[#allocation3 + $0x130] sm:$0xff] %vm19119_vm1, %v8300_v46  ;;  %v8286_v37 = vpop.permute.xlu0 %8285  ;;  %v8469_v11 = vpop.permute.xlu1 %8468 }
 0x605   : > { %v8294_v5 = vrot.slane %v8286_v37, 4  ;;  %v8478_v31 = vrot.slane %v8469_v11, 4 }
 0x606   : > { %8548 = vrot.lane.b32.xlu0 %v19174_v44, %s14725_s16  ;;  %8685 = vrot.lane.b32.xlu1 %v19123_v42, %s14735_s28 }
 0x607   : > { %v8301_v36 = vsel %vm8297_vm12, %v8286_v37, %v8294_v5  ;;  %v8485_v4 = vsel %vm8482_vm4, %v8469_v11, %v8478_v31 }
 0x608   : > { %8313 = vst.msk [vmem:[#allocation3 + $0x138] sm:$0xff] %vm19119_vm1, %v8301_v36  ;;  %8497 = vst.msk [vmem:[#allocation3 + $0x220] sm:$0xff] %vm19119_vm1, %v8485_v4  ;;  %v8471_v21 = vpop.permute.xlu0 %8470  ;;  %v8247_v38 = vpop.permute.xlu1 %8246 }
 0x609   : > { %v8479_v58 = vrot.slane %v8471_v21, 4  ;;  %v8256_v20 = vrot.slane %v8247_v38, 4 }
 0x60a   : > { %8695 = vrot.lane.b32.xlu0 %v19174_v44, %s14735_s28  ;;  %8656 = vrot.lane.b32.xlu1 %v19165_v30, %s14736_s15 }
 0x60b   : > { %v8486_v22 = vsel %vm8482_vm4, %v8471_v21, %v8479_v58  ;;  %v8263_v10 = vsel %vm8260_vm10, %v8247_v38, %v8256_v20 }
 0x60c   : > { %8498 = vst.msk [vmem:[#allocation3 + $0x228] sm:$0xff] %vm19119_vm1, %v8486_v22  ;;  %8275 = vst.msk [vmem:[#allocation3 + $0x100] sm:$0xff] %vm19119_vm1, %v8263_v10  ;;  %v8249_v33 = vpop.permute.xlu0 %8248  ;;  %v8432_v26 = vpop.permute.xlu1 %8431 }
 0x60d   : > { %v8257_v29 = vrot.slane %v8249_v33, 4  ;;  %v8441_v6 = vrot.slane %v8432_v26, 4 }
 0x60e   : > { %8658 = vrot.lane.b32.xlu0 %v19174_v44, %s14736_s15  ;;  %8915 = vrot.lane.b32.xlu1 %v19165_v30, %s14737_s23 }
 0x60f   : > { %v8264_v15 = vsel %vm8260_vm10, %v8249_v33, %v8257_v29  ;;  %v8448_v55 = vsel %vm8445_vm6, %v8432_v26, %v8441_v6  ;;  %v14195_v33 = vld [vmem:[#allocation3 + $0x44] ss:$8 sps:$4 sm:$0xff]  }
 0x610   : > { %8276 = vst.msk [vmem:[#allocation3 + $0x108] sm:$0xff] %vm19119_vm1, %v8264_v15  ;;  %8460 = vst.msk [vmem:[#allocation3 + $0x1f0] sm:$0xff] %vm19119_vm1, %v8448_v55  ;;  %v8434_v35 = vpop.permute.xlu0 %8433  ;;  %v8616_v27 = vpop.permute.xlu1 %8615 }
 0x611   : > { %v8442_v17 = vrot.slane %v8434_v35, 4  ;;  %v8625_v8 = vrot.slane %v8616_v27, 4 }
 0x612   : > { %8917 = vrot.lane.b32.xlu0 %v19174_v44, %s14737_s23  ;;  %8652 = vrot.lane.b32.xlu1 %v19141_v61, %s14736_s15 }
 0x613   : > { %v8449_v3 = vsel %vm8445_vm6, %v8434_v35, %v8442_v17  ;;  %v8632_v16 = vsel %vm8629_vm13, %v8616_v27, %v8625_v8  ;;  %v14193_v35 = vld [vmem:[#allocation3 + $0x40] ss:$8 sps:$4 sm:$0xff]   ;;  %v14198_v17 = vld [vmem:[#allocation3 + $0x34] ss:$8 sps:$4 sm:$0xff]  }
 0x614   : > { %8461 = vst.msk [vmem:[#allocation3 + $0x1f8] sm:$0xff] %vm19119_vm1, %v8449_v3  ;;  %8644 = vst.msk [vmem:[#allocation3 + $0x2e0] sm:$0xff] %vm19119_vm1, %v8632_v16  ;;  %v8618_v2 = vpop.permute.xlu0 %8617  ;;  %v8395_v12 = vpop.permute.xlu1 %8394 }
 0x615   : > { %v8626_v0 = vrot.slane %v8618_v2, 4  ;;  %v8404_v40 = vrot.slane %v8395_v12, 4 }
 0x616   : > { %8654 = vrot.lane.b32.xlu0 %v19154_v32, %s14736_s15  ;;  %8911 = vrot.lane.b32.xlu1 %v19141_v61, %s14737_s23 }
 0x617   : > { %v8633_v23 = vsel %vm8629_vm13, %v8618_v2, %v8626_v0  ;;  %v8411_v9 = vsel %vm8408_vm0, %v8395_v12, %v8404_v40  ;;  %v14196_v0 = vld [vmem:[#allocation3 + $0x30] ss:$8 sps:$4 sm:$0xff]  }
 0x618   : > { %8645 = vst.msk [vmem:[#allocation3 + $0x2e8] sm:$0xff] %vm19119_vm1, %v8633_v23  ;;  %8423 = vst.msk [vmem:[#allocation3 + $0x1c0] sm:$0xff] %vm19119_vm1, %v8411_v9  ;;  %v8397_v49 = vpop.permute.xlu0 %8396  ;;  %v8580_v39 = vpop.permute.xlu1 %8579  ;;  %v14201_v23 = vld [vmem:[#allocation3 + $0x24] ss:$8 sps:$4 sm:$0xff]  }
 0x619   : > { %v8405_v13 = vrot.slane %v8397_v49, 4  ;;  %v8589_v57 = vrot.slane %v8580_v39, 4 }
 0x61a   : > { %8913 = vrot.lane.b32.xlu0 %v19154_v32, %s14737_s23  ;;  %8648 = vrot.lane.b32.xlu1 %v19123_v42, %s14736_s15 }
 0x61b   : > { %v8412_v24 = vsel %vm8408_vm0, %v8397_v49, %v8405_v13  ;;  %v8595_v25 = vsel %vm1123_vm14, %v8580_v39, %v8589_v57 }
 0x61c   : > { %8424 = vst.msk [vmem:[#allocation3 + $0x1c8] sm:$0xff] %vm19119_vm1, %v8412_v24  ;;  %8607 = vst.msk [vmem:[#allocation3 + $0x2b0] sm:$0xff] %vm19119_vm1, %v8595_v25  ;;  %v8582_v52 = vpop.permute.xlu0 %8581  ;;  %v8107_v60 = vpop.permute.xlu1 %8106  ;;  %v14199_v25 = vld [vmem:[#allocation3 + $0x20] ss:$8 sps:$4 sm:$0xff]  }
 0x61d   : > { %v8590_v48 = vrot.slane %v8582_v52, 4  ;;  %v8114_v14 = vrot.slane %v8107_v60, 4 }
 0x61e   : > { %8650 = vrot.lane.b32.xlu0 %v19130_v50, %s14736_s15  ;;  %8907 = vrot.lane.b32.xlu1 %v19123_v42, %s14737_s23 }
 0x61f   : > { %v8596_v1 = vsel %vm1123_vm14, %v8582_v52, %v8590_v48  ;;  %v8120_v53 = vsel %vm559_vm7, %v8107_v60, %v8114_v14  ;;  %v14204_v52 = vld [vmem:[#allocation3 + $0x14] ss:$8 sps:$4 sm:$0xff]  }
 0x620   : > { %8608 = vst.msk [vmem:[#allocation3 + $0x2b8] sm:$0xff] %vm19119_vm1, %v8596_v1  ;;  %8132 = vst.msk [vmem:[#allocation3 + $0x50] sm:$0xff] %vm19119_vm1, %v8120_v53  ;;  %v8109_v54 = vpop.permute.xlu0 %8108  ;;  %v8576_v51 = vpop.permute.xlu1 %8575 }
 0x621   : > { %v8115_v59 = vrot.slane %v8109_v54, 4  ;;  %v8587_v63 = vrot.slane %v8576_v51, 4 }
 0x622   : > { %8909 = vrot.lane.b32.xlu0 %v19130_v50, %s14737_s23  ;;  %8833 = vrot.lane.b32.xlu1 %v19123_v42, %s14738_s13  ;;  %s13468_s23 = sshll.u32 %s21808_s11, 7  ;;  %s14744_s11 = smov [#allocation4]  }
 0x623   : > { %v8121_v28 = vsel %vm559_vm7, %v8109_v54, %v8115_v59  ;;  %v8593_v62 = vsel %vm1123_vm14, %v8576_v51, %v8587_v63  ;;  %vm8371_vm7 = vcmask 908288   ;;  %v14202_v54 = vld [vmem:[#allocation3 + $0x10] ss:$8 sps:$4 sm:$0xff]   ;;  %v14207_v51 = vld [vmem:[#allocation3 + $0x4] ss:$8 sps:$4 sm:$0xff]   ;;  %s14644_s17 = sshll.u32 %s14744_s11, 4  ;;  %s14645_s17 = int_to_ptr.vmem [resolvable:$false] %s14644_s17 }
 0x624   : > { %8133 = vst.msk [vmem:[#allocation3 + $0x58] sm:$0xff] %vm19119_vm1, %v8121_v28  ;;  %8605 = vst.msk [vmem:[#allocation3 + $0x2a0] sm:$0xff] %vm19119_vm1, %v8593_v62  ;;  %v8578_v45 = vpop.permute.xlu0 %8577  ;;  %v8215_v34 = vpop.permute.xlu1 %8214  ;;  %s14646_s27 = scalar_lea.vmem %s14645_s17, 256 }
 0x625   : > { %v8588_v18 = vrot.slane %v8578_v45, 4  ;;  %v8222_v43 = vrot.slane %v8215_v34, 4 }
 0x626   : > { %8835 = vrot.lane.b32.xlu0 %v19130_v50, %s14738_s13  ;;  %8878 = vrot.lane.b32.xlu1 %v19165_v30, %s14739_s10 }
 0x627   : > { %v8594_v47 = vsel %vm1123_vm14, %v8578_v45, %v8588_v18  ;;  %v8228_v46 = vsel %vm982_vm15, %v8215_v34, %v8222_v43  ;;  %v14205_v18 = vld [vmem:[#allocation3] ss:$8 sps:$4 sm:$0xff]   ;;  %v14210_v43 = vld [vmem:[#allocation3 + $0xf4] ss:$8 sps:$4 sm:$0xff]  }
 0x628   : > { %8606 = vst.msk [vmem:[#allocation3 + $0x2a8] sm:$0xff] %vm19119_vm1, %v8594_v47  ;;  %8240 = vst.msk [vmem:[#allocation3 + $0xe0] sm:$0xff] %vm19119_vm1, %v8228_v46  ;;  %v8360_v37 = vpop.permute.xlu0 %8359  ;;  %v8179_v11 = vpop.permute.xlu1 %8178 }
 0x629   : > { %v8368_v5 = vrot.slane %v8360_v37, 4  ;;  %v8186_v31 = vrot.slane %v8179_v11, 4 }
 0x62a   : > { %8880 = vrot.lane.b32.xlu0 %v19174_v44, %s14739_s10  ;;  %8804 = vrot.lane.b32.xlu1 %v19165_v30, %s14740_s25 }
 0x62b   : > { %v8375_v36 = vsel %vm8371_vm7, %v8360_v37, %v8368_v5  ;;  %v8192_v4 = vsel %vm841_vm3, %v8179_v11, %v8186_v31  ;;  %v14190_v21 = vld [vmem:[#allocation3 + $0x50] ss:$8 sps:$4 sm:$0xff]   ;;  %v14192_v38 = vld [vmem:[#allocation3 + $0x54] ss:$8 sps:$4 sm:$0xff]  }
 0x62c   : > { %8387 = vst.msk [vmem:[#allocation3 + $0x198] sm:$0xff] %vm19119_vm1, %v8375_v36  ;;  %8204 = vst.msk [vmem:[#allocation3 + $0xb0] sm:$0xff] %vm19119_vm1, %v8192_v4  ;;  %v8356_v58 = vpop.permute.xlu0 %8355  ;;  %v8143_v20 = vpop.permute.xlu1 %8142  ;;  %10382 = vmatprep.subr.bf16.mxu1 %v14192_v38  ;;  %v14208_v36 = vld [vmem:[#allocation3 + $0xf0] ss:$8 sps:$4 sm:$0xff]  }
 0x62d   : > { %v8366_v22 = vrot.slane %v8356_v58, 4  ;;  %v8150_v10 = vrot.slane %v8143_v20, 4  ;;  %10383 = vmatpush1.bf16.msra.mxu1 %v14190_v21 }
 0x62e   : > { %8806 = vrot.lane.b32.xlu0 %v19174_v44, %s14740_s25  ;;  %8874 = vrot.lane.b32.xlu1 %v19141_v61, %s14739_s10 }
 0x62f   : > { %v8373_v26 = vsel %vm8371_vm7, %v8356_v58, %v8366_v22  ;;  %v8156_v29 = vsel %vm700_vm5, %v8143_v20, %v8150_v10  ;;  %10384 = vmatprep.subr.bf16.mxu1 %v14195_v33 }
 0x630   : > { %8385 = vst.msk [vmem:[#allocation3 + $0x188] sm:$0xff] %vm19119_vm1, %v8373_v26  ;;  %8168 = vst.msk [vmem:[#allocation3 + $0x80] sm:$0xff] %vm19119_vm1, %v8156_v29  ;;  %v8545_v6 = vpop.permute.xlu0 %8544  ;;  %v8325_v15 = vpop.permute.xlu1 %8324  ;;  %v14216_v26 = vld [vmem:[#allocation3 + $0xd4] ss:$8 sps:$4 sm:$0xff]  }
 0x631   : > { %v8553_v55 = vrot.slane %v8545_v6, 4  ;;  %v8332_v27 = vrot.slane %v8325_v15, 4  ;;  %10385 = vmatpush1.bf16.msra.mxu1 %v14193_v35 }
 0x632   : > { %8876 = vrot.lane.b32.xlu0 %v19154_v32, %s14739_s10  ;;  %8800 = vrot.lane.b32.xlu1 %v19141_v61, %s14740_s25 }
 0x633   : > { %v8560_v8 = vsel %vm8556_vm2, %v8545_v6, %v8553_v55  ;;  %v8339_v3 = vsel %vm8334_vm9, %v8325_v15, %v8332_v27  ;;  %10386 = vmatprep.subr.bf16.mxu1 %v14198_v17  ;;  %v14214_v17 = vld [vmem:[#allocation3 + $0xd0] ss:$8 sps:$4 sm:$0xff]  }
 0x634   : > { %8572 = vst.msk [vmem:[#allocation3 + $0x288] sm:$0xff] %vm19119_vm1, %v8560_v8  ;;  %8351 = vst.msk [vmem:[#allocation3 + $0x170] sm:$0xff] %vm19119_vm1, %v8339_v3  ;;  %v8729_v16 = vpop.permute.xlu0 %8728  ;;  %v8510_v2 = vpop.permute.xlu1 %8509  ;;  %v14219_v8 = vld [vmem:[#allocation3 + $0xc4] ss:$8 sps:$4 sm:$0xff]  }
 0x635   : > { %v8737_v12 = vrot.slane %v8729_v16, 4  ;;  %v8517_v40 = vrot.slane %v8510_v2, 4  ;;  %10387 = vmatpush1.bf16.msra.mxu1 %v14196_v0 }
 0x636   : > { %8802 = vrot.lane.b32.xlu0 %v19154_v32, %s14740_s25  ;;  %8870 = vrot.lane.b32.xlu1 %v19123_v42, %s14739_s10 }
 0x637   : > { %v8744_v9 = vsel %vm21215_vm11, %v8729_v16, %v8737_v12  ;;  %v8524_v49 = vsel %vm8519_vm8, %v8510_v2, %v8517_v40  ;;  %10388 = vmatprep.subr.bf16.mxu1 %v14201_v23  ;;  %v14217_v23 = vld [vmem:[#allocation3 + $0xc0] ss:$8 sps:$4 sm:$0xff]  }
 0x638   : > { %8756 = vst.msk [vmem:[#allocation3 + $0x378] sm:$0xff] %vm19119_vm1, %v8744_v9  ;;  %8536 = vst.msk [vmem:[#allocation3 + $0x260] sm:$0xff] %vm19119_vm1, %v8524_v49  ;;  %v8725_v39 = vpop.permute.xlu0 %8724  ;;  %v8288_v13 = vpop.permute.xlu1 %8287 }
 0x639   : > { %v8735_v57 = vrot.slane %v8725_v39, 4  ;;  %v8295_v24 = vrot.slane %v8288_v13, 4  ;;  %10389 = vmatpush1.bf16.msra.mxu1 %v14199_v25 }
 0x63a   : > { %8872 = vrot.lane.b32.xlu0 %v19130_v50, %s14739_s10  ;;  %8796 = vrot.lane.b32.xlu1 %v19123_v42, %s14740_s25 }
 0x63b   : > { %v8742_v60 = vsel %vm21215_vm11, %v8725_v39, %v8735_v57  ;;  %v8302_v41 = vsel %vm8297_vm12, %v8288_v13, %v8295_v24  ;;  %10390 = vmatprep.subr.bf16.mxu1 %v14204_v52  ;;  %vm8703_vm11 = vcmask 687104  }
 0x63c   : > { %8754 = vst.msk [vmem:[#allocation3 + $0x368] sm:$0xff] %vm19119_vm1, %v8742_v60  ;;  %8314 = vst.msk [vmem:[#allocation3 + $0x140] sm:$0xff] %vm19119_vm1, %v8302_v41  ;;  %v8217_v48 = vpop.permute.xlu0 %8216  ;;  %v8473_v14 = vpop.permute.xlu1 %8472  ;;  %v14225_v60 = vld [vmem:[#allocation3 + $0xa4] ss:$8 sps:$4 sm:$0xff]  }
 0x63d   : > { %v8223_v1 = vrot.slane %v8217_v48, 4  ;;  %v8480_v53 = vrot.slane %v8473_v14, 4  ;;  %10391 = vmatpush1.bf16.msra.mxu1 %v14202_v54 }
 0x63e   : > { %8798 = vrot.lane.b32.xlu0 %v19130_v50, %s14740_s25  ;;  %8841 = vrot.lane.b32.xlu1 %v19165_v30, %s14738_s13  ;;  %s21812_s25 = sld [smem:[#allocation92_spill]] }
 0x63f   : > { %v8229_v59 = vsel %vm982_vm15, %v8217_v48, %v8223_v1  ;;  %v8487_v63 = vsel %vm8482_vm4, %v8473_v14, %v8480_v53  ;;  %10392 = vmatprep.subr.bf16.mxu1 %v14207_v51  ;;  %v14223_v51 = vld [vmem:[#allocation3 + $0xa0] ss:$8 sps:$4 sm:$0xff]   ;;  %vm8851_vm15 = vcmask 580608  }
 0x640   : > { %8241 = vst.msk [vmem:[#allocation3 + $0xe8] sm:$0xff] %vm19119_vm1, %v8229_v59  ;;  %8499 = vst.msk [vmem:[#allocation3 + $0x230] sm:$0xff] %vm19119_vm1, %v8487_v63  ;;  %v8692_v28 = vpop.permute.xlu0 %8691  ;;  %v8251_v62 = vpop.permute.xlu1 %8250 }
 0x641   : > { %v8700_v45 = vrot.slane %v8692_v28, 4  ;;  %v8258_v34 = vrot.slane %v8251_v62, 4  ;;  %10393 = vmatpush1.bf16.msra.mxu1 %v14205_v18 }
 0x642   : > { %8843 = vrot.lane.b32.xlu0 %v19174_v44, %s14738_s13  ;;  %8767 = vrot.lane.b32.xlu1 %v19165_v30, %s14741_s14 }
 0x643   : > { %v8707_v47 = vsel %vm8703_vm11, %v8692_v28, %v8700_v45  ;;  %v8265_v46 = vsel %vm8260_vm10, %v8251_v62, %v8258_v34  ;;  %10394 = vmatprep.subr.bf16.mxu1 %v14210_v43  ;;  %v14234_v43 = vld [vmem:[#allocation3 + $0x164] ss:$8 sps:$4 sm:$0xff]  }
 0x644   : > { %8719 = vst.msk [vmem:[#allocation3 + $0x348] sm:$0xff] %vm19119_vm1, %v8707_v47  ;;  %8277 = vst.msk [vmem:[#allocation3 + $0x110] sm:$0xff] %vm19119_vm1, %v8265_v46  ;;  %v8688_v37 = vpop.permute.xlu0 %8687  ;;  %v8436_v11 = vpop.permute.xlu1 %8435  ;;  %s20711_s30 = scalar_lea.hbm %s21812_s25, %s13468_s23 }
 0x645   : > { %v8698_v5 = vrot.slane %v8688_v37, 4  ;;  %v8443_v31 = vrot.slane %v8436_v11, 4  ;;  %10395 = vmatpush2.bf16.msra.mxu1 %v14208_v36 }
 0x646   : > { %8769 = vrot.lane.b32.xlu0 %v19174_v44, %s14741_s14  ;;  %8837 = vrot.lane.b32.xlu1 %v19141_v61, %s14738_s13 }
 0x647   : > { %v8705_v4 = vsel %vm8703_vm11, %v8688_v37, %v8698_v5  ;;  %v8450_v21 = vsel %vm8445_vm6, %v8436_v11, %v8443_v31  ;;  %v14211_v38 = vld [vmem:[#allocation3 + $0xe0] ss:$8 sps:$4 sm:$0xff]   ;;  %v14213_v58 = vld [vmem:[#allocation3 + $0xe4] ss:$8 sps:$4 sm:$0xff]   ;;  %v10978_v11 = vld [vmem:[%s20757_s5 + $0x8] sm:$0xff] }
 0x648   : > { %8717 = vst.msk [vmem:[#allocation3 + $0x338] sm:$0xff] %vm19119_vm1, %v8705_v4  ;;  %8462 = vst.msk [vmem:[#allocation3 + $0x200] sm:$0xff] %vm19119_vm1, %v8450_v21  ;;  %v8181_v20 = vpop.permute.xlu0 %8180  ;;  %v8620_v22 = vpop.permute.xlu1 %8619  ;;  %10396 = vmatprep.subr.bf16.mxu1 %v14213_v58  ;;  %v14232_v31 = vld [vmem:[#allocation3 + $0x160] ss:$8 sps:$4 sm:$0xff]   ;;  %v14240_v21 = vld [vmem:[#allocation3 + $0x154] ss:$8 sps:$4 sm:$0xff]  }
 0x649   : > { %v8187_v10 = vrot.slane %v8181_v20, 4  ;;  %v8627_v33 = vrot.slane %v8620_v22, 4  ;;  %10397 = vmatpush2.bf16.msra.mxu1 %v14211_v38  ;;  %v14243_v38 = vld [vmem:[#allocation3 + $0x274] ss:$8 sps:$4 sm:$0xff]   ;;  %v14244_v58 = vld [vmem:[%s20756_s4] ss:$40 sps:$4 sm:$0xff]  }
 0x64a   : > { %8839 = vrot.lane.b32.xlu0 %v19154_v32, %s14738_s13  ;;  %8763 = vrot.lane.b32.xlu1 %v19141_v61, %s14741_s14 }
 0x64b   : > { %v8193_v29 = vsel %vm841_vm3, %v8181_v20, %v8187_v10  ;;  %v8634_v6 = vsel %vm8629_vm13, %v8620_v22, %v8627_v33  ;;  %10398 = vmatprep.subr.bf16.mxu1 %v14216_v26  ;;  %v10977_v10 = vld [vmem:[%s20757_s5] sm:$0xff]  ;;  %vm21761_vm3 = vcmask 678912  }
 0x64c   : > { %8205 = vst.msk [vmem:[#allocation3 + $0xb8] sm:$0xff] %vm19119_vm1, %v8193_v29  ;;  %8646 = vst.msk [vmem:[#allocation3 + $0x2f0] sm:$0xff] %vm19119_vm1, %v8634_v6  ;;  %v8145_v15 = vpop.permute.xlu0 %8144  ;;  %v8399_v55 = vpop.permute.xlu1 %8398  ;;  %v14238_v6 = vld [vmem:[#allocation3 + $0x150] ss:$8 sps:$4 sm:$0xff]  }
 0x64d   : > { %v8151_v35 = vrot.slane %v8145_v15, 4  ;;  %v8406_v27 = vrot.slane %v8399_v55, 4  ;;  %10399 = vmatpush2.bf16.msra.mxu1 %v14214_v17  ;;  %v10980_v17 = vld [vmem:[%s20757_s5 + $0x18] sm:$0xff] }
 0x64e   : > { %8765 = vrot.lane.b32.xlu0 %v19154_v32, %s14741_s14  ;;  %8952 = vrot.lane.b32.xlu1 %v19165_v30, %s14742_s21 }
 0x64f   : > { %v8157_v3 = vsel %vm700_vm5, %v8145_v15, %v8151_v35  ;;  %v8413_v16 = vsel %vm8408_vm0, %v8399_v55, %v8406_v27  ;;  %10400 = vmatprep.subr.bf16.mxu1 %v14219_v8  ;;  %v14261_v55 = vld [vmem:[%s20756_s4 + $0x54] ss:$40 sps:$4 sm:$0xff]   ;;  %v14241_v35 = vld [vmem:[#allocation3 + $0x270] ss:$8 sps:$4 sm:$0xff]   ;;  %vm21762_vm5 = vmmov %vm21761_vm3 }
 0x650   : > { %8169 = vst.msk [vmem:[#allocation3 + $0x88] sm:$0xff] %vm19119_vm1, %v8157_v3  ;;  %8425 = vst.msk [vmem:[#allocation3 + $0x1d0] sm:$0xff] %vm19119_vm1, %v8413_v16  ;;  %v8327_v2 = vpop.permute.xlu0 %8326  ;;  %v8584_v12 = vpop.permute.xlu1 %8583 }
 0x651   : > { %v8333_v0 = vrot.slane %v8327_v2, 4  ;;  %v8591_v40 = vrot.slane %v8584_v12, 4  ;;  %10401 = vmatpush2.bf16.msra.mxu1 %v14217_v23 }
 0x652   : > { %8954 = vrot.lane.b32.xlu0 %v19174_v44, %s14742_s21  ;;  %8759 = vrot.lane.b32.xlu1 %v19123_v42, %s14741_s14 }
 0x653   : > { %v8340_v9 = vsel %vm8334_vm9, %v8327_v2, %v8333_v0  ;;  %v8597_v49 = vsel %vm1123_vm14, %v8584_v12, %v8591_v40  ;;  %v14220_v39 = vld [vmem:[#allocation3 + $0xb0] ss:$8 sps:$4 sm:$0xff]   ;;  %v14222_v13 = vld [vmem:[#allocation3 + $0xb4] ss:$8 sps:$4 sm:$0xff]   ;;  %vm8777_vm9 = vcmask 670720  }
 0x654   : > { %8352 = vst.msk [vmem:[#allocation3 + $0x178] sm:$0xff] %vm19119_vm1, %v8340_v9  ;;  %8609 = vst.msk [vmem:[#allocation3 + $0x2c0] sm:$0xff] %vm19119_vm1, %v8597_v49  ;;  %v8512_v57 = vpop.permute.xlu0 %8511  ;;  %v8362_v24 = vpop.permute.xlu1 %8361  ;;  %10402 = vmatprep.subr.bf16.mxu1 %v14222_v13  ;;  %v10981_v2 = vld [vmem:[%s20757_s5 + $0x20] sm:$0xff]  ;;  %v14259_v49 = vld [vmem:[%s20756_s4 + $0x50] ss:$40 sps:$4 sm:$0xff]  }
 0x655   : > { %v8518_v25 = vrot.slane %v8512_v57, 4  ;;  %v8369_v52 = vrot.slane %v8362_v24, 4  ;;  %10403 = vmatpush2.bf16.msra.mxu1 %v14220_v39  ;;  %v14255_v13 = vld [vmem:[#allocation3 + $0x134] ss:$8 sps:$4 sm:$0xff]  }
 0x656   : > { %8761 = vrot.lane.b32.xlu0 %v19130_v50, %s14741_s14  ;;  %8948 = vrot.lane.b32.xlu1 %v19141_v61, %s14742_s21  ;;  %v14228_v61 = vld [vmem:[#allocation3 + $0x94] ss:$8 sps:$4 sm:$0xff]   ;;  %s21806_s14 = sld [smem:[#allocation88_spill]] }
 0x657   : > { %v8525_v41 = vsel %vm8519_vm8, %v8512_v57, %v8518_v25  ;;  %v8376_v48 = vsel %vm8371_vm7, %v8362_v24, %v8369_v52  ;;  %10404 = vmatprep.subr.bf16.mxu1 %v14225_v60  ;;  %v14237_v47 = vld [vmem:[#allocation3 + $0x84] ss:$8 sps:$4 sm:$0xff]   ;;  %v14235_v4 = vld [vmem:[#allocation3 + $0x80] ss:$8 sps:$4 sm:$0xff]   ;;  %v10982_v57 = vld [vmem:[%s20757_s5 + $0x28] sm:$0xff]  ;;  %vm8962_vm8 = vcmask 556032  }
 0x658   : > { %8537 = vst.msk [vmem:[#allocation3 + $0x268] sm:$0xff] %vm19119_vm1, %v8525_v41  ;;  %8388 = vst.msk [vmem:[#allocation3 + $0x1a0] sm:$0xff] %vm19119_vm1, %v8376_v48  ;;  %v8290_v14 = vpop.permute.xlu0 %8289  ;;  %v8358_v1 = vpop.permute.xlu1 %8357  ;;  %v14258_v52 = vld [vmem:[#allocation3 + $0x254] ss:$8 sps:$4 sm:$0xff]   ;;  %v10983_v60 = vld [vmem:[%s20757_s5 + $0x30] sm:$0xff] }
 0x659   : > { %v8296_v53 = vrot.slane %v8290_v14, 4  ;;  %v8367_v54 = vrot.slane %v8358_v1, 4  ;;  %10405 = vmatpush2.bf16.msra.mxu1 %v14223_v51  ;;  %v14256_v51 = vld [vmem:[#allocation3 + $0x250] ss:$8 sps:$4 sm:$0xff]  }
 0x65a   : > { %8950 = vrot.lane.b32.xlu0 %v19154_v32, %s14742_s21  ;;  %8730 = vrot.lane.b32.xlu1 %v19165_v30, %s14734_s8  ;;  %v14226_v30 = vld [vmem:[#allocation3 + $0x90] ss:$8 sps:$4 sm:$0xff]  }
 0x65b   : > { %v8303_v59 = vsel %vm8297_vm12, %v8290_v14, %v8296_v53  ;;  %v8374_v63 = vsel %vm8371_vm7, %v8358_v1, %v8367_v54  ;;  %v14229_v28 = vld [vmem:[#allocation3 + $0x170] ss:$8 sps:$4 sm:$0xff]   ;;  %v14231_v62 = vld [vmem:[#allocation3 + $0x174] ss:$8 sps:$4 sm:$0xff]   ;;  %10406 = vmatprep.subr.bf16.mxu1 %v14228_v61  ;;  %v14264_v61 = vld [vmem:[#allocation3 + $0x124] ss:$8 sps:$4 sm:$0xff]  }
 0x65c   : > { %8315 = vst.msk [vmem:[#allocation3 + $0x148] sm:$0xff] %vm19119_vm1, %v8303_v59  ;;  %8386 = vst.msk [vmem:[#allocation3 + $0x190] sm:$0xff] %vm19119_vm1, %v8374_v63  ;;  %v8475_v45 = vpop.permute.xlu0 %8474  ;;  %v8547_v34 = vpop.permute.xlu1 %8546  ;;  %10491 = vmatprep.subr.bf16.mxu0 %v14231_v62  ;;  %v14253_v1 = vld [vmem:[#allocation3 + $0x130] ss:$8 sps:$4 sm:$0xff]   ;;  %v14276_v54 = vld [vmem:[%s20756_s4 + $0xa4] ss:$40 sps:$4 sm:$0xff]  }
 0x65d   : > { %v8481_v32 = vrot.slane %v8475_v45, 4  ;;  %v8554_v18 = vrot.slane %v8547_v34, 4  ;;  %10407 = vmatpush2.bf16.msra.mxu1 %v14226_v30  ;;  %10492 = vmatpush1.bf16.msra.mxu0 %v14229_v28  ;;  %v14267_v59 = vld [vmem:[#allocation3 + $0x244] ss:$8 sps:$4 sm:$0xff]   ;;  %v14262_v30 = vld [vmem:[#allocation3 + $0x120] ss:$8 sps:$4 sm:$0xff]   ;;  %vm21763_vm12 = vmmov %vm21761_vm3 }
 0x65e   : > { %8732 = vrot.lane.b32.xlu0 %v19174_v44, %s14734_s8  ;;  %8944 = vrot.lane.b32.xlu1 %v19123_v42, %s14742_s21  ;;  %v10984_v62 = vld [vmem:[%s20757_s5 + $0x38] sm:$0xff] }
 0x65f   : > { %v8488_v46 = vsel %vm8482_vm4, %v8475_v45, %v8481_v32  ;;  %v8561_v37 = vsel %vm8556_vm2, %v8547_v34, %v8554_v18  ;;  %10493 = vmatprep.subr.bf16.mxu0 %v14234_v43  ;;  %10408 = vmatprep.subr.bf16.mxu1 %v14237_v47  ;;  %v14252_v16 = vld [vmem:[#allocation3 + $0x264] ss:$8 sps:$4 sm:$0xff]   ;;  %v14250_v39 = vld [vmem:[#allocation3 + $0x260] ss:$8 sps:$4 sm:$0xff]   ;;  %v10985_v45 = vld [vmem:[%s20757_s5 + $0x40] sm:$0xff] }
 0x660   : > { %8500 = vst.msk [vmem:[#allocation3 + $0x238] sm:$0xff] %vm19119_vm1, %v8488_v46  ;;  %8573 = vst.msk [vmem:[#allocation3 + $0x290] sm:$0xff] %vm19119_vm1, %v8561_v37  ;;  %v8253_v44 = vpop.permute.xlu0 %8252  ;;  %v8354_v42 = vpop.permute.xlu1 %8353  ;;  %v14265_v47 = vld [vmem:[#allocation3 + $0x240] ss:$8 sps:$4 sm:$0xff]   ;;  %v14274_v37 = vld [vmem:[%s20756_s4 + $0xa0] ss:$40 sps:$4 sm:$0xff]  }
 0x661   : > { %v8259_v5 = vrot.slane %v8253_v44, 4  ;;  %v8365_v36 = vrot.slane %v8354_v42, 4  ;;  %10409 = vmatpush2.bf16.msra.mxu1 %v14235_v4  ;;  %10494 = vmatpush1.bf16.msra.mxu0 %v14232_v31  ;;  %v10987_v31 = vld [vmem:[%s20757_s5 + $0x50] sm:$0xff]  ;;  %vm21764_vm4 = vmmov %vm21761_vm3 }
 0x662   : > { %8946 = vrot.lane.b32.xlu0 %v19130_v50, %s14742_s21  ;;  %11000 = vperm.xlu1 %13911, %v10978_v11   ;;  %v10979_v50 = vld [vmem:[%s20757_s5 + $0x10] sm:$0xff]  ;;  %v10986_v11 = vld [vmem:[%s20757_s5 + $0x48] sm:$0xff]  ;;  %s21807_s21 = sld [smem:[#allocation8_spill]] }
 0x663   : > { %v8266_v20 = vsel %vm8260_vm10, %v8253_v44, %v8259_v5  ;;  %v8372_v22 = vsel %vm8371_vm7, %v8354_v42, %v8365_v36  ;;  %10495 = vmatprep.subr.bf16.mxu0 %v14240_v21  ;;  %10604 = vmatprep.subr.bf16.mxu1 %v14243_v38  ;;  %v14249_v27 = vld [vmem:[#allocation3 + $0x144] ss:$8 sps:$4 sm:$0xff]   ;;  %v14247_v23 = vld [vmem:[#allocation3 + $0x140] ss:$8 sps:$4 sm:$0xff]   ;;  %vm8888_vm10 = vcmask 572416  }
 0x664   : > { %8278 = vst.msk [vmem:[#allocation3 + $0x118] sm:$0xff] %vm19119_vm1, %v8266_v20  ;;  %8384 = vst.msk [vmem:[#allocation3 + $0x180] sm:$0xff] %vm19119_vm1, %v8372_v22  ;;  %v8438_v33 = vpop.permute.xlu0 %8437  ;;  %v8543_v26 = vpop.permute.xlu1 %8542  ;;  %10411 = vmatmul.mubr.bf16.vlgmr.msra.gmra.mxu1 %v14244_v58  ;;  %v14291_v20 = vld [vmem:[%s20756_s4 + $0xf4] ss:$40 sps:$4 sm:$0xff]  }
 0x665   : > { %v8444_v29 = vrot.slane %v8438_v33, 4  ;;  %v8552_v15 = vrot.slane %v8543_v26, 4  ;;  %10496 = vmatpush1.bf16.msra.mxu0 %v14238_v6  ;;  %10605 = vmatpush1.bf16.msra.mxu1 %v14241_v35  ;;  %v10989_v6 = vld [vmem:[%s20757_s5 + $0x60] sm:$0xff] }
 0x666   : > { %10995 = vperm.xlu0 %13910, %v10977_v10   ;;  %11005 = vperm.xlu1 %13911, %v10979_v50   ;;  %v14279_v10 = vld [vmem:[#allocation3 + $0x104] ss:$8 sps:$4 sm:$0xff]  }
 0x667   : > { %v8451_v8 = vsel %vm8445_vm6, %v8438_v33, %v8444_v29  ;;  %v8559_v3 = vsel %vm8556_vm2, %v8543_v26, %v8552_v15  ;;  %10497 = vmatprep.subr.bf16.mxu0 %v14249_v27  ;;  %10606 = vmatprep.subr.bf16.mxu1 %v14252_v16  ;;  %v14273_v5 = vld [vmem:[#allocation3 + $0x234] ss:$8 sps:$4 sm:$0xff]   ;;  %v14271_v22 = vld [vmem:[#allocation3 + $0x230] ss:$8 sps:$4 sm:$0xff]   ;;  %v10988_v50 = vld [vmem:[%s20757_s5 + $0x58] sm:$0xff]  ;;  %vm21765_vm6 = vmmov 0  }
 0x668   : > { %8463 = vst.msk [vmem:[#allocation3 + $0x208] sm:$0xff] %vm19119_vm1, %v8451_v8  ;;  %8571 = vst.msk [vmem:[#allocation3 + $0x280] sm:$0xff] %vm19119_vm1, %v8559_v3  ;;  %v8622_v12 = vpop.permute.xlu0 %8621  ;;  %v8727_v0 = vpop.permute.xlu1 %8726  ;;  %10420 = vmatprep.mubr.bf16.mxu1 %v14261_v55  ;;  %v14282_v29 = vld [vmem:[#allocation3 + $0x224] ss:$8 sps:$4 sm:$0xff]   ;;  %v14277_v27 = vld [vmem:[#allocation3 + $0x100] ss:$8 sps:$4 sm:$0xff]  }
 0x669   : > { %v8628_v40 = vrot.slane %v8622_v12, 4  ;;  %v8736_v9 = vrot.slane %v8727_v0, 4  ;;  %10498 = vmatpush1.bf16.msra.mxu0 %v14247_v23  ;;  %10607 = vmatpush1.bf16.msra.mxu1 %v14250_v39  ;;  %v14288_v8 = vld [vmem:[#allocation3 + $0x214] ss:$8 sps:$4 sm:$0xff]   ;;  %v14280_v3 = vld [vmem:[#allocation3 + $0x220] ss:$8 sps:$4 sm:$0xff]  }
 0x66a   : > { %11010 = vperm.xlu0 %13910, %v10980_v17   ;;  %11015 = vperm.xlu1 %13911, %v10981_v2   ;;  %v14285_v16 = vld [vmem:[#allocation3 + $0x1f4] ss:$8 sps:$4 sm:$0xff]   ;;  %v14289_v2 = vld [vmem:[%s20756_s4 + $0xf0] ss:$40 sps:$4 sm:$0xff]   ;;  %s434_s12 = sand.u32 1, %s21807_s21  }
 0x66b   : > { %v8635_v24 = vsel %vm8629_vm13, %v8622_v12, %v8628_v40  ;;  %v8743_v25 = vsel %vm21761_vm3, %v8727_v0, %v8736_v9  ;;  %10499 = vmatprep.subr.bf16.mxu0 %v14255_v13  ;;  %10608 = vmatprep.subr.bf16.mxu1 %v14258_v52  ;;  %v14270_v46 = vld [vmem:[#allocation3 + $0x114] ss:$8 sps:$4 sm:$0xff]   ;;  %v14268_v38 = vld [vmem:[#allocation3 + $0x110] ss:$8 sps:$4 sm:$0xff]   ;;  %v10991_v23 = vld [vmem:[%s20757_s5 + $0x70] sm:$0xff]  ;;  %vm11151_vm13 = vcmask 1045504  }
 0x66c   : > { %8647 = vst.msk [vmem:[#allocation3 + $0x2f8] sm:$0xff] %vm19119_vm1, %v8635_v24  ;;  %8755 = vst.msk [vmem:[#allocation3 + $0x370] sm:$0xff] %vm19119_vm1, %v8743_v25  ;;  %v8401_v41 = vpop.permute.xlu0 %8400  ;;  %v8723_v48 = vpop.permute.xlu1 %8722  ;;  %10421 = vmatmul.mubr.bf16.gmra.mxu1 %v14259_v49  ;;  %v10990_v40 = vld [vmem:[%s20757_s5 + $0x68] sm:$0xff]  ;;  %v14294_v52 = vld [vmem:[#allocation3 + $0x1e4] ss:$8 sps:$4 sm:$0xff]   ;;  %vm21770_vm3 = vcmask 1043456  }
 0x66d   : > { %v8407_v14 = vrot.slane %v8401_v41, 4  ;;  %v8734_v53 = vrot.slane %v8723_v48, 4  ;;  %10500 = vmatpush1.bf16.msra.mxu0 %v14253_v1  ;;  %10609 = vmatpush1.bf16.msra.mxu1 %v14256_v51  ;;  %v14283_v13 = vld [vmem:[#allocation3 + $0x1f0] ss:$8 sps:$4 sm:$0xff]   ;;  %v14306_v24 = vld [vmem:[%s20756_s4 + $0x144] ss:$40 sps:$4 sm:$0xff]  }
 0x66e   : > { %11020 = vperm.xlu0 %13910, %v10982_v57   ;;  %11025 = vperm.xlu1 %13911, %v10983_v60   ;;  %v14286_v25 = vld [vmem:[#allocation3 + $0x210] ss:$8 sps:$4 sm:$0xff]   ;;  %v14292_v51 = vld [vmem:[#allocation3 + $0x1e0] ss:$8 sps:$4 sm:$0xff]   ;;  %s12581_s0 = sshll.u32 %s434_s12, 3  ;;  %s12505_s21 = scalar_lea.sflag [#allocation5], %s434_s12 }
 0x66f   : > { %v8414_v63 = vsel %vm8408_vm0, %v8401_v41, %v8407_v14  ;;  %v8741_v28 = vsel %vm21762_vm5, %v8723_v48, %v8734_v53  ;;  %10501 = vmatprep.subr.bf16.mxu0 %v14264_v61  ;;  %10610 = vmatprep.subr.bf16.mxu1 %v14267_v59  ;;  %vm8666_vm0 = vcmask 695296   ;;  %v14297_v48 = vld [vmem:[#allocation3 + $0x204] ss:$8 sps:$4 sm:$0xff]   ;;  %v14295_v59 = vld [vmem:[#allocation3 + $0x200] ss:$8 sps:$4 sm:$0xff]   ;;  %vm11126_vm5 = vcmask 97280  }
 0x670   : > { %8426 = vst.msk [vmem:[#allocation3 + $0x1d8] sm:$0xff] %vm19119_vm1, %v8414_v63  ;;  %8753 = vst.msk [vmem:[#allocation3 + $0x360] sm:$0xff] %vm19119_vm1, %v8741_v28  ;;  %v8586_v34 = vpop.permute.xlu0 %8585  ;;  %v8694_v32 = vpop.permute.xlu1 %8693  ;;  %10430 = vmatprep.mubr.bf16.mxu1 %v14276_v54  ;;  %v10992_v14 = vld [vmem:[%s20757_s5 + $0x78] sm:$0xff]  ;;  %s436_s19 = scalar_lea.vmem [#allocation4], %s12581_s0 }
 0x671   : > { %v8592_v18 = vrot.slane %v8586_v34, 4  ;;  %v8701_v43 = vrot.slane %v8694_v32, 4  ;;  %10502 = vmatpush1.bf16.msra.mxu0 %v14262_v30  ;;  %10611 = vmatpush1.bf16.msra.mxu1 %v14265_v47  ;;  %s12518_s24 = sshll.u32 %s436_s19, 4  ;;  %s20713_s24 = int_to_ptr.vmem [resolvable:$true] %s12518_s24 }
 0x672   : > { %11030 = vperm.xlu0 %13910, %v10984_v62   ;;  %11035 = vperm.xlu1 %13911, %v10985_v45   ;;  %s14640_s16 = scalar_lea.vmem %s20713_s24, 128  ;;  %p14647_p0 = scmp.lt.s32.totalorder %s20713_s24, %s14645_s17 }
 0x673   : > { %v8598_v44 = vsel %vm1123_vm14, %v8586_v34, %v8592_v18  ;;  %v8708_v42 = vsel %vm8703_vm11, %v8694_v32, %v8701_v43  ;;  %10503 = vmatprep.subr.bf16.mxu0 %v14270_v46  ;;  %10612 = vmatprep.subr.bf16.mxu1 %v14273_v5  ;;  %vm8925_vm14 = vcmask 564224   ;;  %v14303_v45 = vld [vmem:[#allocation3 + $0x2f4] ss:$8 sps:$4 sm:$0xff]   ;;  %v14304_v34 = vld [vmem:[%s20756_s4 + $0x140] ss:$40 sps:$4 sm:$0xff]   ;;  %p14641_p11 = scmp.ne.s32.totalorder %s20713_s24, %s14640_s16  ;;  %p14648_p1 = scmp.lt.s32.totalorder %s14646_s27, %s14640_s16 }
 0x674   : > { %8610 = vst.msk [vmem:[#allocation3 + $0x2c8] sm:$0xff] %vm19119_vm1, %v8598_v44  ;;  %8720 = vst.msk [vmem:[#allocation3 + $0x350] sm:$0xff] %vm19119_vm1, %v8708_v42  ;;  %v8364_v36 = vpop.permute.xlu0 %8363  ;;  %v8690_v4 = vpop.permute.xlu1 %8689  ;;  %10431 = vmatmul.mubr.bf16.gmra.mxu1 %v14274_v37  ;;  %v14321_v46 = vld [vmem:[%s20756_s4 + $0x194] ss:$40 sps:$4 sm:$0xff]   ;;  %v14301_v37 = vld [vmem:[#allocation3 + $0x2f0] ss:$8 sps:$4 sm:$0xff]  }
 0x675   : > { %v8370_v21 = vrot.slane %v8364_v36, 4  ;;  %v8699_v58 = vrot.slane %v8690_v4, 4  ;;  %10504 = vmatpush1.bf16.msra.mxu0 %v14268_v38  ;;  %10613 = vmatpush1.bf16.msra.mxu1 %v14271_v22  ;;  %v14312_v5 = vld [vmem:[#allocation3 + $0x2e4] ss:$8 sps:$4 sm:$0xff]   ;;  %v14318_v22 = vld [vmem:[#allocation3 + $0x2d4] ss:$8 sps:$4 sm:$0xff]   ;;  %p14642_p12 = pnand %p14641_p11, %p14853_p5  ;;  %p14649_p2 = por %p14648_p1, %p14647_p0 }
 0x676   : > { %11040 = vperm.xlu0 %13910, %v10986_v11   ;;  %11045 = vperm.xlu1 %13911, %v10987_v31   ;;  %v14309_v11 = vld [vmem:[#allocation3 + $0x1c4] ss:$8 sps:$4 sm:$0xff]  }
 0x677   : > { %v8377_v33 = vsel %vm8371_vm7, %v8364_v36, %v8370_v21  ;;  %v8706_v26 = vsel %vm8703_vm11, %v8690_v4, %v8699_v58  ;;  %10505 = vmatprep.subr.bf16.mxu0 %v14279_v10  ;;  %10614 = vmatprep.subr.bf16.mxu1 %v14282_v29  ;;  %v14300_v63 = vld [vmem:[#allocation3 + $0x1d4] ss:$8 sps:$4 sm:$0xff]   ;;  %v14298_v43 = vld [vmem:[#allocation3 + $0x1d0] ss:$8 sps:$4 sm:$0xff]   ;;  %v14307_v21 = vld [vmem:[#allocation3 + $0x1c0] ss:$8 sps:$4 sm:$0xff]   ;;  %p14643_p13 = pneg %p14642_p12 }
 0x678   : > { %8389 = vst.msk [vmem:[#allocation3 + $0x1a8] sm:$0xff] %vm19119_vm1, %v8377_v33  ;;  %8718 = vst.msk [vmem:[#allocation3 + $0x340] sm:$0xff] %vm19119_vm1, %v8706_v26  ;;  %v8549_v15 = vpop.permute.xlu0 %8548  ;;  %v8686_v55 = vpop.permute.xlu1 %8685  ;;  %10440 = vmatprep.mubr.bf16.mxu1 %v14291_v20  ;;  %v14310_v58 = vld [vmem:[#allocation3 + $0x2e0] ss:$8 sps:$4 sm:$0xff]   ;;  %v14315_v20 = vld [vmem:[#allocation3 + $0x1b4] ss:$8 sps:$4 sm:$0xff]  }
 0x679   : > { %v8555_v35 = vrot.slane %v8549_v15, 4  ;;  %v8697_v17 = vrot.slane %v8686_v55, 4  ;;  %10506 = vmatpush1.bf16.msra.mxu0 %v14277_v27  ;;  %10615 = vmatpush1.bf16.msra.mxu1 %v14280_v3  ;;  %v14319_v33 = vld [vmem:[%s20756_s4 + $0x190] ss:$40 sps:$4 sm:$0xff]   ;;  %v14316_v27 = vld [vmem:[#allocation3 + $0x2d0] ss:$8 sps:$4 sm:$0xff]   ;;  %p14650_p3 = pnand %p14649_p2, %p14643_p13 }
 0x67a   : > { %11050 = vperm.xlu0 %13910, %v10988_v50   ;;  %11055 = vperm.xlu1 %13911, %v10989_v6   ;;  %vm11278_vm7 = vcmask 1044480  }
 0x67b   : > { %v8562_v12 = vsel %vm8556_vm2, %v8549_v15, %v8555_v35  ;;  %v8704_v0 = vsel %vm8703_vm11, %v8686_v55, %v8697_v17  ;;  %10507 = vmatprep.subr.bf16.mxu0 %v14285_v16  ;;  %10616 = vmatprep.subr.bf16.mxu1 %v14288_v8  ;;  %v14313_v15 = vld [vmem:[#allocation3 + $0x1b0] ss:$8 sps:$4 sm:$0xff]   ;;  %v14336_v35 = vld [vmem:[%s20756_s4 + $0x1e4] ss:$40 sps:$4 sm:$0xff]   ;;  %v14327_v16 = vld [vmem:[#allocation3 + $0x2c4] ss:$8 sps:$4 sm:$0xff]  }
 0x67c   : > { %8574 = vst.msk [vmem:[#allocation3 + $0x298] sm:$0xff] %vm19119_vm1, %v8562_v12  ;;  %8716 = vst.msk [vmem:[#allocation3 + $0x330] sm:$0xff] %vm19119_vm1, %v8704_v0  ;;  %v8696_v9 = vpop.permute.xlu0 %8695  ;;  %v8657_v49 = vpop.permute.xlu1 %8656  ;;  %10441 = vmatmul.mubr.bf16.gmra.mxu1 %v14289_v2  ;;  %vm8814_vm2 = vcmask 588800  }
 0x67d   : > { %v8702_v39 = vrot.slane %v8696_v9, 4  ;;  %v8664_v57 = vrot.slane %v8657_v49, 4  ;;  %10508 = vmatpush2.bf16.msra.mxu0 %v14283_v13  ;;  %10617 = vmatpush1.bf16.msra.mxu1 %v14286_v25 }
 0x67e   : > { %11060 = vperm.xlu0 %13910, %v10990_v40   ;;  %11065 = vperm.xlu1 %13911, %v10991_v23  }
 0x67f   : > { %v8709_v60 = vsel %vm8703_vm11, %v8696_v9, %v8702_v39  ;;  %v8671_v41 = vsel %vm8666_vm0, %v8657_v49, %v8664_v57  ;;  %10509 = vmatprep.subr.bf16.mxu0 %v14294_v52  ;;  %10618 = vmatprep.subr.bf16.mxu1 %v14297_v48  ;;  %v14324_v17 = vld [vmem:[#allocation3 + $0x1a4] ss:$8 sps:$4 sm:$0xff]   ;;  %v14322_v40 = vld [vmem:[#allocation3 + $0x1a0] ss:$8 sps:$4 sm:$0xff]   ;;  %v14330_v49 = vld [vmem:[#allocation3 + $0x194] ss:$8 sps:$4 sm:$0xff]  }
 0x680   : > { %8721 = vst.msk [vmem:[#allocation3 + $0x358] sm:$0xff] %vm19119_vm1, %v8709_v60  ;;  %8683 = vst.msk [vmem:[#allocation3 + $0x320] sm:$0xff] %vm19119_vm1, %v8671_v41  ;;  %v8659_v1 = vpop.permute.xlu0 %8658  ;;  %v8916_v53 = vpop.permute.xlu1 %8915  ;;  %10450 = vmatprep.mubr.bf16.mxu1 %v14306_v24  ;;  %v14325_v9 = vld [vmem:[#allocation3 + $0x2c0] ss:$8 sps:$4 sm:$0xff]   ;;  %v14334_v39 = vld [vmem:[%s20756_s4 + $0x1e0] ss:$40 sps:$4 sm:$0xff]  }
 0x681   : > { %v8665_v54 = vrot.slane %v8659_v1, 4  ;;  %v8923_v61 = vrot.slane %v8916_v53, 4  ;;  %10510 = vmatpush2.bf16.msra.mxu0 %v14292_v51  ;;  %10619 = vmatpush1.bf16.msra.mxu1 %v14295_v59  ;;  %v14333_v24 = vld [vmem:[#allocation3 + $0x2b4] ss:$8 sps:$4 sm:$0xff]   ;;  %v14328_v41 = vld [vmem:[#allocation3 + $0x190] ss:$8 sps:$4 sm:$0xff]  }
 0x682   : > { %11070 = vperm.xlu0 %13910, %v10992_v14   ;;  %10511 = vmatprep.subr.bf16.mxu0 %v14300_v63  ;;  %v14351_v14 = vld [vmem:[%s20756_s4 + $0x234] ss:$40 sps:$4 sm:$0xff]  }
 0x683   : > { %v8672_v28 = vsel %vm8666_vm0, %v8659_v1, %v8665_v54  ;;  %v8930_v62 = vsel %vm8925_vm14, %v8916_v53, %v8923_v61  ;;  %10620 = vmatprep.subr.bf16.mxu1 %v14303_v45  ;;  %v14331_v1 = vld [vmem:[#allocation3 + $0x2b0] ss:$8 sps:$4 sm:$0xff]   ;;  %v14339_v53 = vld [vmem:[#allocation3 + $0x184] ss:$8 sps:$4 sm:$0xff]  }
 0x684   : > { %8684 = vst.msk [vmem:[#allocation3 + $0x328] sm:$0xff] %vm19119_vm1, %v8672_v28  ;;  %8942 = vst.msk [vmem:[#allocation3 + $0x470] sm:$0xff] %vm19119_vm1, %v8930_v62  ;;  %v8918_v32 = vpop.permute.xlu0 %8917  ;;  %v8653_v18 = vpop.permute.xlu1 %8652  ;;  %10451 = vmatmul.mubr.bf16.gmra.mxu1 %v14304_v34  ;;  %v14342_v61 = vld [vmem:[#allocation3 + $0x2a4] ss:$8 sps:$4 sm:$0xff]   ;;  %v14337_v62 = vld [vmem:[#allocation3 + $0x180] ss:$8 sps:$4 sm:$0xff]  }
 0x685   : > { %v8924_v30 = vrot.slane %v8918_v32, 4  ;;  %v8662_v47 = vrot.slane %v8653_v18, 4  ;;  %10512 = vmatpush2.bf16.msra.mxu0 %v14298_v43  ;;  %10621 = vmatpush2.bf16.msra.mxu1 %v14301_v37  ;;  %v14349_v34 = vld [vmem:[%s20756_s4 + $0x230] ss:$40 sps:$4 sm:$0xff]  }
 0x686   : > { %10513 = vmatprep.subr.bf16.mxu0 %v14309_v11  ;;  %10622 = vmatprep.subr.bf16.mxu1 %v14312_v5 }
 0x687   : > { %v8931_v44 = vsel %vm8925_vm14, %v8918_v32, %v8924_v30  ;;  %v8669_v42 = vsel %vm8666_vm0, %v8653_v18, %v8662_v47  ;;  %10460 = vmatprep.mubr.bf16.mxu1 %v14321_v46  ;;  %v14340_v32 = vld [vmem:[#allocation3 + $0x2a0] ss:$8 sps:$4 sm:$0xff]   ;;  %v14345_v18 = vld [vmem:[#allocation3 + $0x374] ss:$8 sps:$4 sm:$0xff]  }
 0x688   : > { %8943 = vst.msk [vmem:[#allocation3 + $0x478] sm:$0xff] %vm19119_vm1, %v8931_v44  ;;  %8681 = vst.msk [vmem:[#allocation3 + $0x310] sm:$0xff] %vm19119_vm1, %v8669_v42  ;;  %v8655_v31 = vpop.permute.xlu0 %8654  ;;  %v8912_v36 = vpop.permute.xlu1 %8911  ;;  %v14352_v30 = vld [vmem:[%s20756_s4 + $0x8] ss:$40 sps:$4 sm:$0xff]   ;;  %v14348_v46 = vld [vmem:[#allocation3 + $0x294] ss:$8 sps:$4 sm:$0xff]  }
 0x689   : > { %v8663_v4 = vrot.slane %v8655_v31, 4  ;;  %v8921_v38 = vrot.slane %v8912_v36, 4  ;;  %10514 = vmatpush2.bf16.msra.mxu0 %v14307_v21  ;;  %10623 = vmatpush2.bf16.msra.mxu1 %v14310_v58  ;;  %v14343_v42 = vld [vmem:[#allocation3 + $0x370] ss:$8 sps:$4 sm:$0xff]   ;;  %v14372_v21 = vld [vmem:[%s20756_s4 + $0x14] ss:$40 sps:$4 sm:$0xff]  }
 0x68a   : > { %10515 = vmatprep.subr.bf16.mxu0 %v14315_v20  ;;  %10624 = vmatprep.subr.bf16.mxu1 %v14318_v22  ;;  %v14360_v20 = vld [vmem:[#allocation3 + $0x284] ss:$8 sps:$4 sm:$0xff]  }
 0x68b   : > { %v8670_v10 = vsel %vm8666_vm0, %v8655_v31, %v8663_v4  ;;  %v8928_v50 = vsel %vm8925_vm14, %v8912_v36, %v8921_v38  ;;  %v14369_v31 = vld [vmem:[%s20756_s4 + $0x5c] ss:$40 sps:$4 sm:$0xff]   ;;  %v14346_v36 = vld [vmem:[#allocation3 + $0x290] ss:$8 sps:$4 sm:$0xff]  }
 0x68c   : > { %8682 = vst.msk [vmem:[#allocation3 + $0x318] sm:$0xff] %vm19119_vm1, %v8670_v10  ;;  %8940 = vst.msk [vmem:[#allocation3 + $0x460] sm:$0xff] %vm19119_vm1, %v8928_v50  ;;  %v8914_v26 = vpop.permute.xlu0 %8913  ;;  %v8649_v29 = vpop.permute.xlu1 %8648  ;;  %10461 = vmatmul.mubr.bf16.gmra.mxu1 %v14319_v33  ;;  %v14357_v4 = vld [vmem:[#allocation3 + $0x364] ss:$8 sps:$4 sm:$0xff]   ;;  %v14355_v33 = vld [vmem:[#allocation3 + $0x360] ss:$8 sps:$4 sm:$0xff]  }
 0x68d   : > { %v8922_v6 = vrot.slane %v8914_v26, 4  ;;  %v8660_v55 = vrot.slane %v8649_v29, 4  ;;  %10516 = vmatpush2.bf16.msra.mxu0 %v14313_v15  ;;  %10625 = vmatpush2.bf16.msra.mxu1 %v14316_v27  ;;  %v14363_v15 = vld [vmem:[#allocation3 + $0x354] ss:$8 sps:$4 sm:$0xff]  }
 0x68e   : > { %10517 = vmatprep.subr.bf16.mxu0 %v14324_v17  ;;  %10626 = vmatprep.subr.bf16.mxu1 %v14327_v16 }
 0x68f   : > { %v8929_v8 = vsel %vm8925_vm14, %v8914_v26, %v8922_v6  ;;  %v8667_v3 = vsel %vm8666_vm0, %v8649_v29, %v8660_v55  ;;  %10470 = vmatprep.mubr.bf16.mxu1 %v14336_v35  ;;  %v14367_v29 = vld [vmem:[%s20756_s4 + $0x58] ss:$40 sps:$4 sm:$0xff]   ;;  %v14366_v17 = vld [vmem:[#allocation3 + $0x474] ss:$8 sps:$4 sm:$0xff]  }
 0x690   : > { %8941 = vst.msk [vmem:[#allocation3 + $0x468] sm:$0xff] %vm19119_vm1, %v8929_v8  ;;  %8679 = vst.msk [vmem:[#allocation3 + $0x300] sm:$0xff] %vm19119_vm1, %v8667_v3  ;;  %v8651_v2 = vpop.permute.xlu0 %8650  ;;  %v8908_v12 = vpop.permute.xlu1 %8907  ;;  %v14358_v6 = vld [vmem:[#allocation3 + $0x280] ss:$8 sps:$4 sm:$0xff]  }
 0x691   : > { %v8661_v0 = vrot.slane %v8651_v2, 4  ;;  %v8919_v23 = vrot.slane %v8908_v12, 4  ;;  %10518 = vmatpush2.bf16.msra.mxu0 %v14322_v40  ;;  %10627 = vmatpush2.bf16.msra.mxu1 %v14325_v9  ;;  %v14370_v55 = vld [vmem:[%s20756_s4 + $0x10] ss:$40 sps:$4 sm:$0xff]   ;;  %v14364_v40 = vld [vmem:[#allocation3 + $0x470] ss:$8 sps:$4 sm:$0xff]  }
 0x692   : > { %10519 = vmatprep.subr.bf16.mxu0 %v14330_v49  ;;  %10628 = vmatprep.subr.bf16.mxu1 %v14333_v24  ;;  %v14390_v9 = vld [vmem:[%s20756_s4 + $0x64] ss:$40 sps:$4 sm:$0xff]  }
 0x693   : > { %v8668_v13 = vsel %vm8666_vm0, %v8651_v2, %v8661_v0  ;;  %v8926_v57 = vsel %vm8925_vm14, %v8908_v12, %v8919_v23  ;;  %v14361_v2 = vld [vmem:[#allocation3 + $0x350] ss:$8 sps:$4 sm:$0xff]   ;;  %v14387_v0 = vld [vmem:[%s20756_s4 + $0xac] ss:$40 sps:$4 sm:$0xff]   ;;  %vm11274_vm0 = vcmask 203776  }
 0x694   : > { %8680 = vst.msk [vmem:[#allocation3 + $0x308] sm:$0xff] %vm19119_vm1, %v8668_v13  ;;  %8938 = vst.msk [vmem:[#allocation3 + $0x450] sm:$0xff] %vm19119_vm1, %v8926_v57  ;;  %v8910_v25 = vpop.permute.xlu0 %8909  ;;  %v8834_v52 = vpop.permute.xlu1 %8833  ;;  %10471 = vmatmul.mubr.bf16.gmra.mxu1 %v14334_v39  ;;  %v14375_v23 = vld [vmem:[#allocation3 + $0x344] ss:$8 sps:$4 sm:$0xff]  }
 0x695   : > { %v8920_v60 = vrot.slane %v8910_v25, 4  ;;  %v8845_v48 = vrot.slane %v8834_v52, 4  ;;  %10520 = vmatpush2.bf16.msra.mxu0 %v14328_v41  ;;  %10629 = vmatpush2.bf16.msra.mxu1 %v14331_v1  ;;  %v14385_v41 = vld [vmem:[%s20756_s4 + $0xa8] ss:$40 sps:$4 sm:$0xff]  }
 0x696   : > { %10521 = vmatprep.subr.bf16.mxu0 %v14339_v53  ;;  %10630 = vmatprep.subr.bf16.mxu1 %v14342_v61  ;;  %v14388_v1 = vld [vmem:[%s20756_s4 + $0x60] ss:$40 sps:$4 sm:$0xff]  }
 0x697   : > { %v8927_v54 = vsel %vm8925_vm14, %v8910_v25, %v8920_v60  ;;  %v8852_v51 = vsel %vm8851_vm15, %v8834_v52, %v8845_v48  ;;  %10480 = vmatprep.mubr.bf16.mxu1 %v14351_v14  ;;  %v14378_v13 = vld [vmem:[#allocation3 + $0x464] ss:$8 sps:$4 sm:$0xff]   ;;  %v14373_v52 = vld [vmem:[#allocation3 + $0x340] ss:$8 sps:$4 sm:$0xff]   ;;  %v14381_v14 = vld [vmem:[#allocation3 + $0x334] ss:$8 sps:$4 sm:$0xff]  }
 0x698   : > { %8939 = vst.msk [vmem:[#allocation3 + $0x458] sm:$0xff] %vm19119_vm1, %v8927_v54  ;;  %8864 = vst.msk [vmem:[#allocation3 + $0x3f0] sm:$0xff] %vm19119_vm1, %v8852_v51  ;;  %v8836_v59 = vpop.permute.xlu0 %8835  ;;  %v8879_v63 = vpop.permute.xlu1 %8878  ;;  %v14376_v48 = vld [vmem:[#allocation3 + $0x460] ss:$8 sps:$4 sm:$0xff]  }
 0x699   : > { %v8846_v28 = vrot.slane %v8836_v59, 4  ;;  %v8886_v45 = vrot.slane %v8879_v63, 4  ;;  %10522 = vmatpush2.bf16.msra.mxu0 %v14337_v62  ;;  %10631 = vmatpush2.bf16.msra.mxu1 %v14340_v32  ;;  %v14393_v32 = vld [vmem:[#allocation3 + $0x324] ss:$8 sps:$4 sm:$0xff]   ;;  %vm21804_vm14 = vmmov %vm21770_vm3 }
 0x69a   : > { %10717 = vmatprep.subr.bf16.mxu0 %v14345_v18  ;;  %10632 = vmatprep.subr.bf16.mxu1 %v14348_v46  ;;  %v14408_v18 = vld [vmem:[%s20756_s4 + $0xb4] ss:$40 sps:$4 sm:$0xff]  }
 0x69b   : > { %v8853_v43 = vsel %vm8851_vm15, %v8836_v59, %v8846_v28  ;;  %v8893_v47 = vsel %vm8888_vm10, %v8879_v63, %v8886_v45  ;;  %v14379_v28 = vld [vmem:[#allocation3 + $0x330] ss:$8 sps:$4 sm:$0xff]   ;;  %v14405_v45 = vld [vmem:[%s20756_s4 + $0xfc] ss:$40 sps:$4 sm:$0xff]  }
 0x69c   : > { %8865 = vst.msk [vmem:[#allocation3 + $0x3f8] sm:$0xff] %vm19119_vm1, %v8853_v43  ;;  %8905 = vst.msk [vmem:[#allocation3 + $0x440] sm:$0xff] %vm19119_vm1, %v8893_v47  ;;  %v8881_v37 = vpop.permute.xlu0 %8880  ;;  %v8805_v11 = vpop.permute.xlu1 %8804  ;;  %10524 = vmatmul.mubr.bf16.vlgmr.msra.gmra.mxu0 %v14352_v30  ;;  %10481 = vmatmul.mubr.bf16.gmra.mxu1 %v14349_v34 }
 0x69d   : > { %v8887_v44 = vrot.slane %v8881_v37, 4  ;;  %v8812_v5 = vrot.slane %v8805_v11, 4  ;;  %10718 = vmatpush1.bf16.msra.mxu0 %v14343_v42  ;;  %10633 = vmatpush2.bf16.msra.mxu1 %v14346_v36  ;;  %v14399_v36 = vld [vmem:[#allocation3 + $0x314] ss:$8 sps:$4 sm:$0xff]  }
 0x69e   : > { %10719 = vmatprep.subr.bf16.mxu0 %v14357_v4  ;;  %10634 = vmatprep.subr.bf16.mxu1 %v14360_v20  ;;  %v14406_v4 = vld [vmem:[%s20756_s4 + $0xb0] ss:$40 sps:$4 sm:$0xff]  }
 0x69f   : > { %v8894_v38 = vsel %vm8888_vm10, %v8881_v37, %v8887_v44  ;;  %v8819_v58 = vsel %vm8814_vm2, %v8805_v11, %v8812_v5  ;;  %10533 = vmatprep.mubr.bf16.mxu0 %v14369_v31  ;;  %10636 = vmatprep.mubr.bf16.mxu1 %v14372_v21  ;;  %v14384_v51 = vld [vmem:[#allocation3 + $0x454] ss:$8 sps:$4 sm:$0xff]   ;;  %v14382_v34 = vld [vmem:[#allocation3 + $0x450] ss:$8 sps:$4 sm:$0xff]   ;;  %v14391_v44 = vld [vmem:[#allocation3 + $0x320] ss:$8 sps:$4 sm:$0xff]  }
 0x6a0   : > { %8906 = vst.msk [vmem:[#allocation3 + $0x448] sm:$0xff] %vm19119_vm1, %v8894_v38  ;;  %8831 = vst.msk [vmem:[#allocation3 + $0x3e0] sm:$0xff] %vm19119_vm1, %v8819_v58  ;;  %v8807_v22 = vpop.permute.xlu0 %8806  ;;  %v8875_v10 = vpop.permute.xlu1 %8874  ;;  %v14403_v5 = vld [vmem:[%s20756_s4 + $0xf8] ss:$40 sps:$4 sm:$0xff]  }
 0x6a1   : > { %v8813_v50 = vrot.slane %v8807_v22, 4  ;;  %v8884_v26 = vrot.slane %v8875_v10, 4  ;;  %10720 = vmatpush1.bf16.msra.mxu0 %v14355_v33  ;;  %10635 = vmatpush2.bf16.msra.mxu1 %v14358_v6  ;;  %v14411_v6 = vld [vmem:[#allocation3 + $0x304] ss:$8 sps:$4 sm:$0xff]  }
 0x6a2   : > { %10721 = vmatprep.subr.bf16.mxu0 %v14363_v15  ;;  %10830 = vmatprep.subr.bf16.mxu1 %v14366_v17  ;;  %v14423_v15 = vld [vmem:[%s20756_s4 + $0x104] ss:$40 sps:$4 sm:$0xff]  }
 0x6a3   : > { %v8820_v35 = vsel %vm8814_vm2, %v8807_v22, %v8813_v50  ;;  %v8891_v27 = vsel %vm8888_vm10, %v8875_v10, %v8884_v26  ;;  %v14397_v50 = vld [vmem:[#allocation3 + $0x310] ss:$8 sps:$4 sm:$0xff]   ;;  %v14420_v26 = vld [vmem:[%s20756_s4 + $0x14c] ss:$40 sps:$4 sm:$0xff]  }
 0x6a4   : > { %8832 = vst.msk [vmem:[#allocation3 + $0x3e8] sm:$0xff] %vm19119_vm1, %v8820_v35  ;;  %8903 = vst.msk [vmem:[#allocation3 + $0x430] sm:$0xff] %vm19119_vm1, %v8891_v27  ;;  %v8877_v8 = vpop.permute.xlu0 %8876  ;;  %v8801_v3 = vpop.permute.xlu1 %8800  ;;  %10534 = vmatmul.mubr.bf16.gmra.mxu0 %v14367_v29  ;;  %10637 = vmatmul.mubr.bf16.vlgmr.msra.gmra.mxu1 %v14370_v55 }
 0x6a5   : > { %v8885_v16 = vrot.slane %v8877_v8, 4  ;;  %v8810_v12 = vrot.slane %v8801_v3, 4  ;;  %10722 = vmatpush1.bf16.msra.mxu0 %v14361_v2  ;;  %10831 = vmatpush1.bf16.msra.mxu1 %v14364_v40  ;;  %v14409_v2 = vld [vmem:[#allocation3 + $0x300] ss:$8 sps:$4 sm:$0xff]  }
 0x6a6   : > { %10723 = vmatprep.subr.bf16.mxu0 %v14375_v23  ;;  %10832 = vmatprep.subr.bf16.mxu1 %v14378_v13  ;;  %v14418_v40 = vld [vmem:[%s20756_s4 + $0x148] ss:$40 sps:$4 sm:$0xff]  }
 0x6a7   : > { %v8892_v49 = vsel %vm8888_vm10, %v8877_v8, %v8885_v16  ;;  %v8817_v39 = vsel %vm8814_vm2, %v8801_v3, %v8810_v12  ;;  %10543 = vmatprep.mubr.bf16.mxu0 %v14387_v0  ;;  %10646 = vmatprep.mubr.bf16.mxu1 %v14390_v9  ;;  %v14396_v47 = vld [vmem:[#allocation3 + $0x444] ss:$8 sps:$4 sm:$0xff]   ;;  %v14394_v31 = vld [vmem:[#allocation3 + $0x440] ss:$8 sps:$4 sm:$0xff]   ;;  %v14417_v0 = vld [vmem:[#allocation3 + $0x3f4] ss:$8 sps:$4 sm:$0xff]  }
 0x6a8   : > { %8904 = vst.msk [vmem:[#allocation3 + $0x438] sm:$0xff] %vm19119_vm1, %v8892_v49  ;;  %8829 = vst.msk [vmem:[#allocation3 + $0x3d0] sm:$0xff] %vm19119_vm1, %v8817_v39  ;;  %v8803_v57 = vpop.permute.xlu0 %8802  ;;  %v8871_v24 = vpop.permute.xlu1 %8870  ;;  %v14421_v49 = vld [vmem:[%s20756_s4 + $0x100] ss:$40 sps:$4 sm:$0xff]  }
 0x6a9   : > { %v8811_v25 = vrot.slane %v8803_v57, 4  ;;  %v8882_v60 = vrot.slane %v8871_v24, 4  ;;  %10724 = vmatpush1.bf16.msra.mxu0 %v14373_v52  ;;  %10833 = vmatpush1.bf16.msra.mxu1 %v14376_v48 }
 0x6aa   : > { %10725 = vmatprep.subr.bf16.mxu0 %v14381_v14  ;;  %10834 = vmatprep.subr.bf16.mxu1 %v14384_v51 }
 0x6ab   : > { %v8818_v53 = vsel %vm8814_vm2, %v8803_v57, %v8811_v25  ;;  %v8889_v54 = vsel %vm8888_vm10, %v8871_v24, %v8882_v60  ;;  %v14435_v57 = vld [vmem:[%s20756_s4 + $0x19c] ss:$40 sps:$4 sm:$0xff]   ;;  %v14415_v25 = vld [vmem:[#allocation3 + $0x3f0] ss:$8 sps:$4 sm:$0xff]  }
 0x6ac   : > { %8830 = vst.msk [vmem:[#allocation3 + $0x3d8] sm:$0xff] %vm19119_vm1, %v8818_v53  ;;  %8901 = vst.msk [vmem:[#allocation3 + $0x420] sm:$0xff] %vm19119_vm1, %v8889_v54  ;;  %v8873_v61 = vpop.permute.xlu0 %8872  ;;  %v8797_v59 = vpop.permute.xlu1 %8796  ;;  %10544 = vmatmul.mubr.bf16.gmra.mxu0 %v14385_v41  ;;  %10647 = vmatmul.mubr.bf16.gmra.mxu1 %v14388_v1  ;;  %v14438_v60 = vld [vmem:[%s20756_s4 + $0x154] ss:$40 sps:$4 sm:$0xff]  }
 0x6ad   : > { %v8883_v63 = vrot.slane %v8873_v61, 4  ;;  %v8808_v62 = vrot.slane %v8797_v59, 4  ;;  %10726 = vmatpush1.bf16.msra.mxu0 %v14379_v28  ;;  %10835 = vmatpush1.bf16.msra.mxu1 %v14382_v34  ;;  %v14426_v41 = vld [vmem:[#allocation3 + $0x3e4] ss:$8 sps:$4 sm:$0xff]  }
 0x6ae   : > { %10727 = vmatprep.subr.bf16.mxu0 %v14393_v32  ;;  %10836 = vmatprep.subr.bf16.mxu1 %v14396_v47  ;;  %v14436_v32 = vld [vmem:[%s20756_s4 + $0x150] ss:$40 sps:$4 sm:$0xff]  }
 0x6af   : > { %v8890_v30 = vsel %vm8888_vm10, %v8873_v61, %v8883_v63  ;;  %v8815_v43 = vsel %vm8814_vm2, %v8797_v59, %v8808_v62  ;;  %10553 = vmatprep.mubr.bf16.mxu0 %v14405_v45  ;;  %10656 = vmatprep.mubr.bf16.mxu1 %v14408_v18  ;;  %v14402_v58 = vld [vmem:[#allocation3 + $0x434] ss:$8 sps:$4 sm:$0xff]   ;;  %v14400_v29 = vld [vmem:[#allocation3 + $0x430] ss:$8 sps:$4 sm:$0xff]   ;;  %v14424_v59 = vld [vmem:[#allocation3 + $0x3e0] ss:$8 sps:$4 sm:$0xff]  }
 0x6b0   : > { %8902 = vst.msk [vmem:[#allocation3 + $0x428] sm:$0xff] %vm19119_vm1, %v8890_v30  ;;  %8827 = vst.msk [vmem:[#allocation3 + $0x3c0] sm:$0xff] %vm19119_vm1, %v8815_v43  ;;  %v8799_v46 = vpop.permute.xlu0 %8798  ;;  %v8842_v37 = vpop.permute.xlu1 %8841  ;;  %v14433_v62 = vld [vmem:[%s20756_s4 + $0x198] ss:$40 sps:$4 sm:$0xff]   ;;  %v14450_v43 = vld [vmem:[%s20756_s4 + $0x1ec] ss:$40 sps:$4 sm:$0xff]  }
 0x6b1   : > { %v8809_v11 = vrot.slane %v8799_v46, 4  ;;  %v8849_v42 = vrot.slane %v8842_v37, 4  ;;  %10728 = vmatpush1.bf16.msra.mxu0 %v14391_v44  ;;  %10837 = vmatpush1.bf16.msra.mxu1 %v14394_v31  ;;  %vm12354_vm10 = vcmask 982016  }
 0x6b2   : > { %10729 = vmatprep.subr.bf16.mxu0 %v14399_v36  ;;  %10838 = vmatprep.subr.bf16.mxu1 %v14402_v58 }
 0x6b3   : > { %v8816_v21 = vsel %vm8814_vm2, %v8799_v46, %v8809_v11  ;;  %v8856_v38 = vsel %vm8851_vm15, %v8842_v37, %v8849_v42  ;;  %v14432_v28 = vld [vmem:[#allocation3 + $0x3d4] ss:$8 sps:$4 sm:$0xff]   ;;  %v14430_v46 = vld [vmem:[#allocation3 + $0x3d0] ss:$8 sps:$4 sm:$0xff]   ;;  %vm12502_vm2 = vcmask 80896  }
 0x6b4   : > { %8828 = vst.msk [vmem:[#allocation3 + $0x3c8] sm:$0xff] %vm19119_vm1, %v8816_v21  ;;  %8868 = vst.msk [vmem:[#allocation3 + $0x410] sm:$0xff] %vm19119_vm1, %v8856_v38  ;;  %v8844_v20 = vpop.permute.xlu0 %8843  ;;  %v8768_v22 = vpop.permute.xlu1 %8767  ;;  %10554 = vmatmul.mubr.bf16.gmra.mxu0 %v14403_v5  ;;  %10657 = vmatmul.mubr.bf16.gmra.mxu1 %v14406_v4  ;;  %v14453_v11 = vld [vmem:[%s20756_s4 + $0x1a4] ss:$40 sps:$4 sm:$0xff]  }
 0x6b5   : > { %v8850_v10 = vrot.slane %v8844_v20, 4  ;;  %v8775_v33 = vrot.slane %v8768_v22, 4  ;;  %10730 = vmatpush1.bf16.msra.mxu0 %v14397_v50  ;;  %10839 = vmatpush1.bf16.msra.mxu1 %v14400_v29 }
 0x6b6   : > { %10731 = vmatprep.subr.bf16.mxu0 %v14411_v6  ;;  %10563 = vmatprep.mubr.bf16.mxu0 %v14420_v26  ;;  %v14451_v26 = vld [vmem:[%s20756_s4 + $0x1a0] ss:$40 sps:$4 sm:$0xff]  }
 0x6b7   : > { %v8857_v55 = vsel %vm8851_vm15, %v8844_v20, %v8850_v10  ;;  %v8782_v35 = vsel %vm8777_vm9, %v8768_v22, %v8775_v33  ;;  %v14414_v27 = vld [vmem:[#allocation3 + $0x424] ss:$8 sps:$4 sm:$0xff]   ;;  %v14412_v3 = vld [vmem:[#allocation3 + $0x420] ss:$8 sps:$4 sm:$0xff]   ;;  %10666 = vmatprep.mubr.bf16.mxu1 %v14423_v15 }
 0x6b8   : > { %8869 = vst.msk [vmem:[#allocation3 + $0x418] sm:$0xff] %vm19119_vm1, %v8857_v55  ;;  %8794 = vst.msk [vmem:[#allocation3 + $0x3b0] sm:$0xff] %vm19119_vm1, %v8782_v35  ;;  %v8770_v17 = vpop.permute.xlu0 %8769  ;;  %v8838_v8 = vpop.permute.xlu1 %8837  ;;  %10840 = vmatprep.subr.bf16.mxu1 %v14414_v27  ;;  %v14448_v10 = vld [vmem:[%s20756_s4 + $0x1e8] ss:$40 sps:$4 sm:$0xff]   ;;  %v14462_v15 = vld [vmem:[%s20756_s4 + $0x23c] ss:$40 sps:$4 sm:$0xff]  }
 0x6b9   : > { %v8776_v16 = vrot.slane %v8770_v17, 4  ;;  %v8847_v12 = vrot.slane %v8838_v8, 4  ;;  %10732 = vmatpush1.bf16.msra.mxu0 %v14409_v2  ;;  %10841 = vmatpush1.bf16.msra.mxu1 %v14412_v3 }
 0x6ba   : > { %10733 = vmatprep.subr.bf16.mxu0 %v14417_v0 }
 0x6bb   : > { %v8783_v23 = vsel %vm8777_vm9, %v8770_v17, %v8776_v16  ;;  %v8854_v9 = vsel %vm8851_vm15, %v8838_v8, %v8847_v12  ;;  %v14441_v44 = vld [vmem:[#allocation3 + $0x3c4] ss:$8 sps:$4 sm:$0xff]   ;;  %v14439_v58 = vld [vmem:[#allocation3 + $0x3c0] ss:$8 sps:$4 sm:$0xff]  }
 0x6bc   : > { %8795 = vst.msk [vmem:[#allocation3 + $0x3b8] sm:$0xff] %vm19119_vm1, %v8783_v23  ;;  %8866 = vst.msk [vmem:[#allocation3 + $0x400] sm:$0xff] %vm19119_vm1, %v8854_v9  ;;  %v8840_v39 = vpop.permute.xlu0 %8839  ;;  %v8764_v13 = vpop.permute.xlu1 %8763  ;;  %10564 = vmatmul.mubr.bf16.gmra.mxu0 %v14418_v40  ;;  %10667 = vmatmul.mubr.bf16.gmra.mxu1 %v14421_v49  ;;  %v14465_v17 = vld [vmem:[%s20756_s4 + $0x1f4] ss:$40 sps:$4 sm:$0xff]  }
 0x6bd   : > { %v8848_v24 = vrot.slane %v8840_v39, 4  ;;  %v8773_v52 = vrot.slane %v8764_v13, 4  ;;  %10734 = vmatpush2.bf16.msra.mxu0 %v14415_v25  ;;  %10573 = vmatprep.mubr.bf16.mxu0 %v14435_v57 }
 0x6be   : > { %10735 = vmatprep.subr.bf16.mxu0 %v14426_v41  ;;  %10676 = vmatprep.mubr.bf16.mxu1 %v14438_v60  ;;  %v14474_v41 = vld [vmem:[%s20756_s4 + $0x244] ss:$40 sps:$4 sm:$0xff]  }
 0x6bf   : > { %v8855_v48 = vsel %vm8851_vm15, %v8840_v39, %v8848_v24  ;;  %v8780_v14 = vsel %vm8777_vm9, %v8764_v13, %v8773_v52  ;;  %v14427_v1 = vld [vmem:[#allocation3 + $0x410] ss:$8 sps:$4 sm:$0xff]   ;;  %v14429_v53 = vld [vmem:[#allocation3 + $0x414] ss:$8 sps:$4 sm:$0xff]   ;;  %v14463_v13 = vld [vmem:[%s20756_s4 + $0x1f0] ss:$40 sps:$4 sm:$0xff]  }
 0x6c0   : > { %8867 = vst.msk [vmem:[#allocation3 + $0x408] sm:$0xff] %vm19119_vm1, %v8855_v48  ;;  %8792 = vst.msk [vmem:[#allocation3 + $0x3a0] sm:$0xff] %vm19119_vm1, %v8780_v14  ;;  %v8766_v54 = vpop.permute.xlu0 %8765  ;;  %v8953_v51 = vpop.permute.xlu1 %8952  ;;  %10842 = vmatprep.subr.bf16.mxu1 %v14429_v53  ;;  %v14460_v39 = vld [vmem:[%s20756_s4 + $0x238] ss:$40 sps:$4 sm:$0xff]   ;;  %v14480_v48 = vld [vmem:[%s20756_s4 + $0x1c] ss:$40 sps:$4 sm:$0xff]  }
 0x6c1   : > { %v8774_v61 = vrot.slane %v8766_v54, 4  ;;  %v8960_v63 = vrot.slane %v8953_v51, 4  ;;  %10843 = vmatpush1.bf16.msra.mxu1 %v14427_v1  ;;  %10736 = vmatpush2.bf16.msra.mxu0 %v14424_v59  ;;  %vm12458_vm15 = vcmask 1041408  }
 0x6c2   : > { %10737 = vmatprep.subr.bf16.mxu0 %v14432_v28  ;;  %v14489_v28 = vld [vmem:[%s20756_s4 + $0x6c] ss:$40 sps:$4 sm:$0xff]  }
 0x6c3   : > { %v8781_v45 = vsel %vm8777_vm9, %v8766_v54, %v8774_v61  ;;  %v8967_v34 = vsel %vm8962_vm8, %v8953_v51, %v8960_v63  ;;  %v14447_v22 = vld [vmem:[#allocation3 + $0x3b4] ss:$8 sps:$4 sm:$0xff]   ;;  %v14445_v35 = vld [vmem:[#allocation3 + $0x3b0] ss:$8 sps:$4 sm:$0xff]  }
 0x6c4   : > { %8793 = vst.msk [vmem:[#allocation3 + $0x3a8] sm:$0xff] %vm19119_vm1, %v8781_v45  ;;  %8979 = vst.msk [vmem:[#allocation3 + $0x4a0] sm:$0xff] %vm19119_vm1, %v8967_v34  ;;  %v8955_v18 = vpop.permute.xlu0 %8954  ;;  %v8760_v30 = vpop.permute.xlu1 %8759  ;;  %10574 = vmatmul.mubr.bf16.gmra.mxu0 %v14433_v62  ;;  %10677 = vmatmul.mubr.bf16.gmra.mxu1 %v14436_v32  ;;  %v14472_v51 = vld [vmem:[%s20756_s4 + $0x240] ss:$40 sps:$4 sm:$0xff]   ;;  %v14486_v63 = vld [vmem:[%s20756_s4 + $0x24] ss:$40 sps:$4 sm:$0xff]  }
 0x6c5   : > { %v8961_v47 = vrot.slane %v8955_v18, 4  ;;  %v8771_v37 = vrot.slane %v8760_v30, 4  ;;  %10738 = vmatpush2.bf16.msra.mxu0 %v14430_v46  ;;  %10583 = vmatprep.mubr.bf16.mxu0 %v14450_v43  ;;  %v14484_v34 = vld [vmem:[%s20756_s4 + $0x20] ss:$40 sps:$4 sm:$0xff]   ;;  %v14490_v32 = vld [vmem:[%s20756_s4 + $0x74] ss:$40 sps:$4 sm:$0xff]  }
 0x6c6   : > { %10739 = vmatprep.subr.bf16.mxu0 %v14441_v44  ;;  %10686 = vmatprep.mubr.bf16.mxu1 %v14453_v11  ;;  %v14492_v43 = vld [vmem:[%s20756_s4 + $0x70] ss:$40 sps:$4 sm:$0xff]   ;;  %v14498_v11 = vld [vmem:[%s20756_s4 + $0xc0] ss:$40 sps:$4 sm:$0xff]   ;;  %v14502_v44 = vld [vmem:[%s20756_s4 + $0x114] ss:$40 sps:$4 sm:$0xff]  }
 0x6c7   : > { %v8968_v42 = vsel %vm8962_vm8, %v8955_v18, %v8961_v47  ;;  %v8778_v5 = vsel %vm8777_vm9, %v8760_v30, %v8771_v37  ;;  %v14442_v31 = vld [vmem:[#allocation3 + $0x400] ss:$8 sps:$4 sm:$0xff]   ;;  %v14444_v36 = vld [vmem:[#allocation3 + $0x404] ss:$8 sps:$4 sm:$0xff]   ;;  %v14496_v47 = vld [vmem:[%s20756_s4 + $0xc4] ss:$40 sps:$4 sm:$0xff]  }
 0x6c8   : > { %8980 = vst.msk [vmem:[#allocation3 + $0x4a8] sm:$0xff] %vm19119_vm1, %v8968_v42  ;;  %8790 = vst.msk [vmem:[#allocation3 + $0x390] sm:$0xff] %vm19119_vm1, %v8778_v5  ;;  %v8762_v4 = vpop.permute.xlu0 %8761  ;;  %v8949_v21 = vpop.permute.xlu1 %8948  ;;  %10844 = vmatprep.subr.bf16.mxu1 %v14444_v36  ;;  %v14487_v18 = vld [vmem:[%s20756_s4 + $0x68] ss:$40 sps:$4 sm:$0xff]   ;;  %v14495_v30 = vld [vmem:[%s20756_s4 + $0xbc] ss:$40 sps:$4 sm:$0xff]  }
 0x6c9   : > { %v8772_v38 = vrot.slane %v8762_v4, 4  ;;  %v8958_v20 = vrot.slane %v8949_v21, 4  ;;  %10845 = vmatpush1.bf16.msra.mxu1 %v14442_v31  ;;  %10740 = vmatpush2.bf16.msra.mxu0 %v14439_v58  ;;  %v14493_v46 = vld [vmem:[%s20756_s4 + $0xb8] ss:$40 sps:$4 sm:$0xff]   ;;  %v14501_v37 = vld [vmem:[%s20756_s4 + $0x10c] ss:$40 sps:$4 sm:$0xff]  }
 0x6ca   : > { %10741 = vmatprep.subr.bf16.mxu0 %v14447_v22  ;;  %v14499_v42 = vld [vmem:[%s20756_s4 + $0x108] ss:$40 sps:$4 sm:$0xff]   ;;  %v14507_v5 = vld [vmem:[%s20756_s4 + $0x15c] ss:$40 sps:$4 sm:$0xff]  }
 0x6cb   : > { %v8779_v50 = vsel %vm8777_vm9, %v8762_v4, %v8772_v38  ;;  %v8965_v33 = vsel %vm8962_vm8, %v8949_v21, %v8958_v20  ;;  %v14456_v8 = vld [vmem:[#allocation3 + $0x3a4] ss:$8 sps:$4 sm:$0xff]   ;;  %v14454_v9 = vld [vmem:[#allocation3 + $0x3a0] ss:$8 sps:$4 sm:$0xff]   ;;  %v14508_v36 = vld [vmem:[%s20756_s4 + $0x164] ss:$40 sps:$4 sm:$0xff]  }
 0x6cc   : > { %8791 = vst.msk [vmem:[#allocation3 + $0x398] sm:$0xff] %vm19119_vm1, %v8779_v50  ;;  %8977 = vst.msk [vmem:[#allocation3 + $0x490] sm:$0xff] %vm19119_vm1, %v8965_v33  ;;  %v8951_v29 = vpop.permute.xlu0 %8950  ;;  %v8731_v6 = vpop.permute.xlu1 %8730  ;;  %10584 = vmatmul.mubr.bf16.gmra.mxu0 %v14448_v10  ;;  %10687 = vmatmul.mubr.bf16.gmra.mxu1 %v14451_v26  ;;  %v14504_v31 = vld [vmem:[%s20756_s4 + $0x110] ss:$40 sps:$4 sm:$0xff]   ;;  %v14513_v21 = vld [vmem:[%s20756_s4 + $0x1ac] ss:$40 sps:$4 sm:$0xff]  }
 0x6cd   : > { %v8959_v55 = vrot.slane %v8951_v29, 4  ;;  %v8738_v27 = vrot.slane %v8731_v6, 4  ;;  %10742 = vmatpush2.bf16.msra.mxu0 %v14445_v35  ;;  %10593 = vmatprep.mubr.bf16.mxu0 %v14462_v15  ;;  %v14505_v4 = vld [vmem:[%s20756_s4 + $0x158] ss:$40 sps:$4 sm:$0xff]   ;;  %v14514_v20 = vld [vmem:[%s20756_s4 + $0x1b4] ss:$40 sps:$4 sm:$0xff]  }
 0x6ce   : > { %10743 = vmatprep.subr.bf16.mxu0 %v14456_v8  ;;  %10696 = vmatprep.mubr.bf16.mxu1 %v14465_v17  ;;  %v14529_v38 = vld [vmem:[%s20758_s6 + $0x38] sm:$0xff]   ;;  %v14510_v58 = vld [vmem:[%s20756_s4 + $0x160] ss:$40 sps:$4 sm:$0xff]   ;;  %v14530_v50 = vld [vmem:[%s20758_s6 + $0x30] sm:$0xff]  }
 0x6cf   : > { %v8966_v3 = vsel %vm8962_vm8, %v8951_v29, %v8959_v55  ;;  %v8745_v16 = vsel %vm21763_vm12, %v8731_v6, %v8738_v27  ;;  %v14457_v2 = vld [vmem:[#allocation3 + $0x4a0] ss:$8 sps:$4 sm:$0xff]   ;;  %v14459_v12 = vld [vmem:[#allocation3 + $0x4a4] ss:$8 sps:$4 sm:$0xff]   ;;  %v14520_v26 = vld [vmem:[%s20756_s4 + $0x204] ss:$40 sps:$4 sm:$0xff]  }
 0x6d0   : > { %8978 = vst.msk [vmem:[#allocation3 + $0x498] sm:$0xff] %vm19119_vm1, %v8966_v3  ;;  %8757 = vst.msk [vmem:[#allocation3 + $0x380] sm:$0xff] %vm19119_vm1, %v8745_v16  ;;  %v8733_v0 = vpop.permute.xlu0 %8732  ;;  %v8945_v40 = vpop.permute.xlu1 %8944  ;;  %10856 = vmatprep.subr.bf16.mxu1 %v14459_v12  ;;  %v14511_v22 = vld [vmem:[%s20756_s4 + $0x1a8] ss:$40 sps:$4 sm:$0xff]   ;;  %v14519_v10 = vld [vmem:[%s20756_s4 + $0x1fc] ss:$40 sps:$4 sm:$0xff]  }
 0x6d1   : > { %v8739_v23 = vrot.slane %v8733_v0, 4  ;;  %v8956_v49 = vrot.slane %v8945_v40, 4  ;;  %10857 = vmatpush2.bf16.msra.mxu1 %v14457_v2  ;;  %10744 = vmatpush2.bf16.msra.mxu0 %v14454_v9  ;;  %v14516_v33 = vld [vmem:[%s20756_s4 + $0x1b0] ss:$40 sps:$4 sm:$0xff]   ;;  %v14531_v29 = vld [vmem:[%s20758_s6 + $0x28] sm:$0xff]   ;;  %v14532_v27 = vld [vmem:[%s20758_s6 + $0x20] sm:$0xff]  }
 0x6d2   : > { %v14517_v6 = vld [vmem:[%s20756_s4 + $0x1f8] ss:$40 sps:$4 sm:$0xff]   ;;  %v14525_v15 = vld [vmem:[%s20756_s4 + $0x24c] ss:$40 sps:$4 sm:$0xff]   ;;  %v14523_v17 = vld [vmem:[%s20756_s4 + $0x248] ss:$40 sps:$4 sm:$0xff]  }
 0x6d3   : > { %v8746_v57 = vsel %vm21764_vm4, %v8733_v0, %v8739_v23  ;;  %v8963_v24 = vsel %vm8962_vm8, %v8945_v40, %v8956_v49  ;;  %v14466_v25 = vld [vmem:[#allocation3 + $0x390] ss:$8 sps:$4 sm:$0xff]   ;;  %v14468_v52 = vld [vmem:[#allocation3 + $0x394] ss:$8 sps:$4 sm:$0xff]   ;;  %v14526_v35 = vld [vmem:[%s20756_s4 + $0x254] ss:$40 sps:$4 sm:$0xff]  }
 0x6d4   : > { %8758 = vst.msk [vmem:[#allocation3 + $0x388] sm:$0xff] %vm19119_vm1, %v8746_v57  ;;  %8975 = vst.msk [vmem:[#allocation3 + $0x480] sm:$0xff] %vm19119_vm1, %v8963_v24  ;;  %v8947_v60 = vpop.permute.xlu0 %8946  ;;  %10745 = vmatprep.subr.bf16.mxu0 %v14468_v52  ;;  %10594 = vmatmul.mubr.bf16.gmra.mxu0 %v14460_v39  ;;  %v14522_v55 = vld [vmem:[%s20756_s4 + $0x200] ss:$40 sps:$4 sm:$0xff]   ;;  %v14533_v8 = vld [vmem:[%s20758_s6 + $0x18] sm:$0xff]  }
 0x6d5   : > { %v8957_v14 = vrot.slane %v8947_v60, 4  ;;  %10697 = vmatmul.mubr.bf16.gmra.mxu1 %v14463_v13  ;;  %10746 = vmatpush2.bf16.msra.mxu0 %v14466_v25  ;;  %v14528_v3 = vld [vmem:[%s20756_s4 + $0x250] ss:$40 sps:$4 sm:$0xff]   ;;  %v14535_v2 = vld [vmem:[%s20758_s6 + $0x8] sm:$0xff]   ;;  %v14536_v40 = vld [vmem:[%s20758_s6] sm:$0xff]  }
 0x6d6   : > { %10706 = vmatprep.mubr.bf16.mxu1 %v14474_v41  ;;  %10749 = vmatprep.mubr.bf16.mxu0 %v14480_v48  ;;  %v14534_v16 = vld [vmem:[%s20758_s6 + $0x10] sm:$0xff]   ;;  %v14537_v49 = vld [vmem:[%s20758_s6 + $0x40] sm:$0x3f]  }
 0x6d7   : > { %v8964_v1 = vsel %vm8962_vm8, %v8947_v60, %v8957_v14  ;;  %v14469_v53 = vld [vmem:[#allocation3 + $0x490] ss:$8 sps:$4 sm:$0xff]   ;;  %v14471_v54 = vld [vmem:[#allocation3 + $0x494] ss:$8 sps:$4 sm:$0xff]   ;;  %v11153_v13 = vsel %vm11151_vm13, %v14537_v49, 0 }
 0x6d8   : > { %8976 = vst.msk [vmem:[#allocation3 + $0x488] sm:$0xff] %vm19119_vm1, %v8964_v1  ;;  %10858 = vmatprep.subr.bf16.mxu1 %v14471_v54  ;;  %vm10353_vm1 = vcmask 392192  }
 0x6d9   : > { %10859 = vmatpush2.bf16.msra.mxu1 %v14469_v53 }
 0x6db   : > { %v14475_v61 = vld [vmem:[#allocation3 + $0x380] ss:$8 sps:$4 sm:$0xff]   ;;  %v14477_v59 = vld [vmem:[#allocation3 + $0x384] ss:$8 sps:$4 sm:$0xff]  }
 0x6dc   : > { %10747 = vmatprep.subr.bf16.mxu0 %v14477_v59 }
 0x6dd   : > { %10748 = vmatpush2.bf16.msra.mxu0 %v14475_v61  ;;  %10707 = vmatmul.mubr.bf16.gmra.mxu1 %v14472_v51 }
 0x6de   : > { %11155 = vmatprep.subr.bf16.mxu0 %v21758_v7  ;;  %13315 = vmatprep.mubr.msk.bf16.mxu1 %vm10353_vm1, %v14486_v63 }
 0x6df   : > { %v14481_v62 = vld [vmem:[#allocation3 + $0x480] ss:$8 sps:$4 sm:$0xff]   ;;  %v14483_v45 = vld [vmem:[#allocation3 + $0x484] ss:$8 sps:$4 sm:$0xff]  }
 0x6e0   : > { %10750 = vmatmul.mubr.bf16.vlgmr.msra.gmra.mxu0 %v14478_v56  ;;  %10860 = vmatprep.subr.bf16.mxu1 %v14483_v45 }
 0x6e1   : > { %10861 = vmatpush2.bf16.msra.mxu1 %v14481_v62  ;;  %10759 = vmatprep.mubr.bf16.mxu0 %v14489_v28 }
 0x6e2   : > { %13664 = vmatprep.subr.bf16.mxu1 %v21216_v19  ;;  %11156 = vmatpush1.bf16.msra.mxu0 %v14529_v38 }
 0x6e3   : > { %11157 = vmatprep.subr.bf16.mxu0 %v21758_v7 }
 0x6e5   : > { %10863 = vmatmul.mubr.bf16.vlgmr.msra.gmra.mxu1 %v14484_v34 }
 0x6e6   : > { %13316 = vmatprep.mubr.msk.bf16.mxu1 %vm10353_vm1, %v14490_v32  ;;  %11158 = vmatpush1.bf16.msra.mxu0 %v14530_v50 }
 0x6e7   : > { %11159 = vmatprep.subr.bf16.mxu0 %v21758_v7 }
 0x6e8   : > { %10760 = vmatmul.mubr.bf16.gmra.mxu0 %v14487_v18 }
 0x6e9   : > { %10769 = vmatprep.mubr.bf16.mxu0 %v14495_v30 }
 0x6ea   : > { %11160 = vmatpush1.bf16.msra.mxu0 %v14531_v29 }
 0x6eb   : > { %11161 = vmatprep.subr.bf16.mxu0 %v21758_v7 }
 0x6ed   : > { %10873 = vmatmul.mubr.bf16.gmra.mxu1 %v14492_v43 }
 0x6ee   : > { %13317 = vmatprep.mubr.msk.bf16.mxu1 %vm10353_vm1, %v14496_v47  ;;  %11162 = vmatpush1.bf16.msra.mxu0 %v14532_v27 }
 0x6ef   : > { %11163 = vmatprep.subr.bf16.mxu0 %v21758_v7 }
 0x6f0   : > { %10770 = vmatmul.mubr.bf16.gmra.mxu0 %v14493_v46 }
 0x6f1   : > { %10779 = vmatprep.mubr.bf16.mxu0 %v14501_v37 }
 0x6f2   : > { %11164 = vmatpush1.bf16.msra.mxu0 %v14533_v8 }
 0x6f3   : > { %11165 = vmatprep.subr.bf16.mxu0 %v21758_v7 }
 0x6f5   : > { %10883 = vmatmul.mubr.bf16.gmra.mxu1 %v14498_v11 }
 0x6f6   : > { %13318 = vmatprep.mubr.msk.bf16.mxu1 %vm10353_vm1, %v14502_v44  ;;  %11166 = vmatpush1.bf16.msra.mxu0 %v14534_v16 }
 0x6f7   : > { %11167 = vmatprep.subr.bf16.mxu0 %v21758_v7 }
 0x6f8   : > { %10780 = vmatmul.mubr.bf16.gmra.mxu0 %v14499_v42 }
 0x6f9   : > { %10789 = vmatprep.mubr.bf16.mxu0 %v14507_v5 }
 0x6fa   : > { %11168 = vmatpush1.bf16.msra.mxu0 %v14535_v2 }
 0x6fb   : > { %11169 = vmatprep.subr.bf16.mxu0 %v21758_v7 }
 0x6fd   : > { %10893 = vmatmul.mubr.bf16.gmra.mxu1 %v14504_v31 }
 0x6fe   : > { %13319 = vmatprep.mubr.msk.bf16.mxu1 %vm10353_vm1, %v14508_v36  ;;  %11170 = vmatpush1.bf16.msra.mxu0 %v14536_v40 }
 0x6ff   : > { %11185 = vmatprep.subr.bf16.mxu0 %v21758_v7 }
 0x700   : > { %10790 = vmatmul.mubr.bf16.gmra.mxu0 %v14505_v4 }
 0x701   : > { %10799 = vmatprep.mubr.bf16.mxu0 %v14513_v21 }
 0x702   : > { %11186 = vmatpush2.bf16.msra.mxu0 %v11153_v13 }
 0x703   : > { %13680 = vmatprep.subr.bf16.mxu0 %v21216_v19 }
 0x705   : > { %10903 = vmatmul.mubr.bf16.gmra.mxu1 %v14510_v58 }
 0x706   : > { %13320 = vmatprep.mubr.msk.bf16.mxu1 %vm10353_vm1, %v14514_v20 }
 0x708   : > { %10800 = vmatmul.mubr.bf16.gmra.mxu0 %v14511_v22 }
 0x709   : > { %10809 = vmatprep.mubr.bf16.mxu0 %v14519_v10 }
 0x70d   : > { %10913 = vmatmul.mubr.bf16.gmra.mxu1 %v14516_v33 }
 0x70e   : > { %13321 = vmatprep.mubr.msk.bf16.mxu1 %vm10353_vm1, %v14520_v26  ;;  %v14538_v26 = vld [vmem:[%s20759_s7 + $0x18] sm:$0x1f]  }
 0x710   : > { %10810 = vmatmul.mubr.bf16.gmra.mxu0 %v14517_v6  ;;  %v14743_v6 = vmov 65535  }
 0x711   : > { %10819 = vmatprep.mubr.bf16.mxu0 %v14525_v15  ;;  %v11279_v15 = vsel %vm21770_vm3, 4294967295, %v14743_v6 }
 0x715   : > { %10923 = vmatmul.mubr.bf16.gmra.mxu1 %v14522_v55 }
 0x716   : > { %13322 = vmatprep.mubr.msk.bf16.mxu1 %vm10353_vm1, %v14526_v35  ;;  %v20287_v35 = vsel %vm11278_vm7, %v11279_v15, 0 }
 0x718   : > { %10820 = vmatmul.mubr.bf16.gmra.mxu0 %v14523_v17  ;;  %v11282_v17 = vand.u32 %v14538_v26, %v20287_v35 }
 0x71a   : > { %13665 = vmatpush3.bf16.msra.mxu1 %v11282_v17 }
 0x71b   : > { %13666 = vmatprep.subr.bf16.mxu1 %v21216_v19 }
 0x71d   : > { %10933 = vmatmul.mubr.bf16.gmra.mxu1 %v14528_v3 }
 0x71e   : > { %13668 = vmatprep.mubr.msk.bf16.mxu1 %vm21765_vm6, %v21216_v19 }
 0x724   : > { %v10412_v12 = vpop.f32.mrf.mxu1 }
 0x726   : > { %v10414_v0 = vpop.f32.mrf.mxu1 }
 0x728   : > { %v20212_v23 = vpop.f32.mrf.mxu1 }
 0x72a   : > { %v20214_v9 = vpop.f32.mrf.mxu1 }
 0x72c   : > { %v10422_v39 = vpop.f32.mrf.mxu1 }
 0x72e   : > { %v10424_v57 = vpop.f32.mrf.mxu1 }
 0x730   : > { %v20221_v24 = vpop.f32.mrf.mxu1 }
 0x732   : > { %v20223_v25 = vpop.f32.mrf.mxu1 }
 0x734   : > { %v10432_v52 = vpop.f32.mrf.mxu1 }
 0x736   : > { %v10434_v60 = vpop.f32.mrf.mxu1 }
 0x738   : > { %v20225_v41 = vpop.f32.mrf.mxu1 }
 0x73a   : > { %v20227_v7 = vpop.f32.mrf.mxu1 }
 0x73c   : > { %v10442_v48 = vpop.f32.mrf.mxu1 }
 0x73e   : > { %v20229_v14 = vpop.f32.mrf.mxu1 }
 0x740   : > { %v20231_v1 = vpop.f32.mrf.mxu1 }
 0x742   : > { %v20233_v53 = vpop.f32.mrf.mxu1 }
 0x744   : > { %v20235_v54 = vpop.f32.mrf.mxu1 }
 0x746   : > { %v20237_v51 = vpop.f32.mrf.mxu1 }
 0x748   : > { %v20239_v61 = vpop.f32.mrf.mxu1 }
 0x74a   : > { %v20241_v59 = vpop.f32.mrf.mxu1 }
 0x74c   : > { %v20243_v63 = vpop.f32.mrf.mxu1 }
 0x74e   : > { %v20245_v56 = vpop.f32.mrf.mxu1 }
 0x750   : > { %v20247_v28 = vpop.f32.mrf.mxu1 }
 0x752   : > { %v20249_v62 = vpop.f32.mrf.mxu1 }
 0x754   : > { %v20251_v45 = vpop.f32.mrf.mxu1 }
 0x756   : > { %v20253_v34 = vpop.f32.mrf.mxu1 }
 0x758   : > { %v20255_v32 = vpop.f32.mrf.mxu1 }
 0x759   : > { %21766 = vst [vmem:[#allocation56_spill] sm:$0xff] %v20255_v32 }
 0x75a   : > { %v20257_v18 = vpop.f32.mrf.mxu1 }
 0x75b   : > { %21767 = vst [vmem:[#allocation57_spill] sm:$0xff] %v20257_v18 }
 0x75c   : > { %v10525_v30 = vpop.f32.mrf.mxu0  ;;  %v20259_v43 = vpop.f32.mrf.mxu1 }
 0x75d   : > { %v10526_v47 = vadd.f32 %v10525_v30, %v10412_v12  ;;  %v14540_v12 = vld [vmem:[%s20759_s7 + $0x10] sm:$0xff]  }
 0x75e   : > { %v10527_v46 = vpop.f32.mrf.mxu0  ;;  %v20261_v37 = vpop.f32.mrf.mxu1  ;;  %13667 = vmatpush3.bf16.msra.mxu1 %v14540_v12 }
 0x75f   : > { %v10528_v11 = vadd.f32 %v10527_v46, %v10414_v0  ;;  %13672 = vmatprep.subr.bf16.mxu1 %v21216_v19 }
 0x760   : > { %v20263_v44 = vpop.f32.mrf.mxu0  ;;  %v20265_v42 = vpop.f32.mrf.mxu1 }
 0x761   : > { %21768 = vst [vmem:[#allocation58_spill] sm:$0xff] %v20265_v42 }
 0x762   : > { %v20267_v5 = vpop.f32.mrf.mxu0  ;;  %v20269_v31 = vpop.f32.mrf.mxu1 }
 0x763   : > { %21769 = vst [vmem:[#allocation59_spill] sm:$0xff] %v20269_v31 }
 0x764   : > { %v10535_v36 = vpop.f32.mrf.mxu0  ;;  %v10638_v21 = vpop.f32.mrf.mxu1 }
 0x765   : > { %v10536_v4 = vadd.f32 %v10535_v36, %v10422_v39  ;;  %v20271_v38 = vadd.f32 %v10638_v21, %v10526_v47 }
 0x766   : > { %v10537_v58 = vpop.f32.mrf.mxu0  ;;  %v10640_v22 = vpop.f32.mrf.mxu1 }
 0x767   : > { %v10538_v20 = vadd.f32 %v10537_v58, %v10424_v57  ;;  %v20273_v10 = vadd.f32 %v10640_v22, %v10528_v11 }
 0x768   : > { %v20275_v50 = vpop.f32.mrf.mxu0  ;;  %v20277_v33 = vpop.f32.mrf.mxu1 }
 0x76a   : > { %v20282_v29 = vpop.f32.mrf.mxu0  ;;  %v20285_v55 = vpop.f32.mrf.mxu1 }
 0x76c   : > { %v10545_v27 = vpop.f32.mrf.mxu0  ;;  %v10648_v3 = vpop.f32.mrf.mxu1 }
 0x76d   : > { %v10546_v8 = vadd.f32 %v10545_v27, %v10432_v52  ;;  %v20290_v16 = vadd.f32 %v10648_v3, %v10536_v4 }
 0x76e   : > { %v10547_v2 = vpop.f32.mrf.mxu0  ;;  %v10650_v40 = vpop.f32.mrf.mxu1 }
 0x76f   : > { %v10548_v0 = vadd.f32 %v10547_v2, %v10434_v60  ;;  %v20296_v49 = vadd.f32 %v10650_v40, %v10538_v20 }
 0x770   : > { %v20298_v39 = vpop.f32.mrf.mxu0  ;;  %v20300_v13 = vpop.f32.mrf.mxu1 }
 0x772   : > { %v20302_v57 = vpop.f32.mrf.mxu0  ;;  %v20304_v52 = vpop.f32.mrf.mxu1 }
 0x774   : > { %v10555_v30 = vpop.f32.mrf.mxu0  ;;  %v10658_v46 = vpop.f32.mrf.mxu1 }
 0x775   : > { %v10556_v47 = vadd.f32 %v10555_v30, %v10442_v48  ;;  %v20307_v60 = vadd.f32 %v10658_v46, %v10546_v8 }
 0x776   : > { %v10557_v11 = vpop.f32.mrf.mxu0  ;;  %v10660_v4 = vpop.f32.mrf.mxu1 }
 0x777   : > { %v10558_v36 = vadd.f32 %v10557_v11, %v20229_v14  ;;  %v20310_v21 = vadd.f32 %v10660_v4, %v10548_v0 }
 0x778   : > { %v20312_v58 = vpop.f32.mrf.mxu0  ;;  %v20314_v20 = vpop.f32.mrf.mxu1 }
 0x77a   : > { %v20316_v22 = vpop.f32.mrf.mxu0  ;;  %v20318_v26 = vpop.f32.mrf.mxu1 }
 0x77c   : > { %v10565_v6 = vpop.f32.mrf.mxu0  ;;  %v10668_v15 = vpop.f32.mrf.mxu1 }
 0x77d   : > { %v10566_v48 = vadd.f32 %v10565_v6, %v20235_v54  ;;  %v20321_v27 = vadd.f32 %v10668_v15, %v10556_v47 }
 0x77e   : > { %v10567_v17 = vpop.f32.mrf.mxu0  ;;  %v10670_v8 = vpop.f32.mrf.mxu1 }
 0x77f   : > { %v10568_v14 = vadd.f32 %v10567_v17, %v20237_v51  ;;  %v20324_v3 = vadd.f32 %v10670_v8, %v10558_v36 }
 0x780   : > { %v20326_v2 = vpop.f32.mrf.mxu0  ;;  %v20328_v12 = vpop.f32.mrf.mxu1 }
 0x782   : > { %v20330_v0 = vpop.f32.mrf.mxu0  ;;  %v20332_v40 = vpop.f32.mrf.mxu1 }
 0x784   : > { %v10575_v30 = vpop.f32.mrf.mxu0  ;;  %v10678_v46 = vpop.f32.mrf.mxu1 }
 0x785   : > { %v10576_v54 = vadd.f32 %v10575_v30, %v20243_v63  ;;  %v20335_v47 = vadd.f32 %v10678_v46, %v10566_v48 }
 0x786   : > { %v10577_v11 = vpop.f32.mrf.mxu0  ;;  %v10680_v4 = vpop.f32.mrf.mxu1 }
 0x787   : > { %v10578_v51 = vadd.f32 %v10577_v11, %v20245_v56  ;;  %v20338_v36 = vadd.f32 %v10680_v4, %v10568_v14 }
 0x788   : > { %v20340_v6 = vpop.f32.mrf.mxu0  ;;  %v20342_v15 = vpop.f32.mrf.mxu1 }
 0x78a   : > { %v20344_v17 = vpop.f32.mrf.mxu0  ;;  %v20346_v8 = vpop.f32.mrf.mxu1 }
 0x78c   : > { %v10585_v19 = vpop.f32.mrf.mxu0  ;;  %v10688_v30 = vpop.f32.mrf.mxu1 }
 0x78d   : > { %v10586_v63 = vadd.f32 %v10585_v19, %v20251_v45  ;;  %v20349_v48 = vadd.f32 %v10688_v30, %v10576_v54 }
 0x78e   : > { %v10587_v46 = vpop.f32.mrf.mxu0  ;;  %v10690_v11 = vpop.f32.mrf.mxu1 }
 0x78f   : > { %21771 = vst [vmem:[#allocation60_spill] sm:$0xff] %v20349_v48  ;;  %v10588_v56 = vadd.f32 %v10587_v46, %v20253_v34  ;;  %v20352_v14 = vadd.f32 %v10690_v11, %v10578_v51 }
 0x790   : > { %v20354_v4 = vpop.f32.mrf.mxu0  ;;  %v20356_v31 = vpop.f32.mrf.mxu1 }
 0x791   : > { %21772 = vst [vmem:[#allocation61_spill] sm:$0xff] %v20352_v14  ;;  %21773 = vst [vmem:[#allocation62_spill] sm:$0xff] %v20354_v4 }
 0x792   : > { %v20358_v42 = vpop.f32.mrf.mxu0  ;;  %v20360_v18 = vpop.f32.mrf.mxu1 }
 0x793   : > { %21774 = vst [vmem:[#allocation63_spill] sm:$0xff] %v20358_v42  ;;  %21775 = vst [vmem:[#allocation25_spill] sm:$0xff] %v20360_v18 }
 0x794   : > { %v10595_v32 = vpop.f32.mrf.mxu0 }
 0x795   : > { %v10596_v19 = vadd.f32 %v10595_v32, %v20259_v43  ;;  %v10698_v45 = vpop.f32.mrf.mxu1 }
 0x796   : > { %v20363_v54 = vadd.f32 %v10698_v45, %v10586_v63  ;;  %v10597_v30 = vpop.f32.mrf.mxu0 }
 0x797   : > { %v10598_v34 = vadd.f32 %v10597_v30, %v20261_v37  ;;  %v10700_v46 = vpop.f32.mrf.mxu1 }
 0x798   : > { %21776 = vst [vmem:[#allocation64_spill] sm:$0xff] %v20363_v54  ;;  %v20366_v51 = vadd.f32 %v10700_v46, %v10588_v56  ;;  %v20368_v11 = vpop.f32.mrf.mxu0  ;;  %v10530_v46 = vadd.f32 %v20263_v44, %v20212_v23 }
 0x799   : > { %21778 = vst [vmem:[#allocation26_spill] sm:$0xff] %v20368_v11  ;;  %v20370_v4 = vpop.f32.mrf.mxu1 }
 0x79a   : > { %21777 = vst [vmem:[#allocation65_spill] sm:$0xff] %v20366_v51  ;;  %v20374_v42 = vpop.f32.mrf.mxu0 }
 0x79b   : > { %v20372_v14 = vpop.f32.mrf.mxu1  ;;  %21780 = vst [vmem:[#allocation66_spill] sm:$0xff] %v20374_v42  ;;  %v10532_v42 = vadd.f32 %v20267_v5, %v20214_v9  ;;  %v14539_v9 = vld [vmem:[%s20759_s7 + $0x28] sm:$0x1f]  }
 0x79c   : > { %21779 = vst [vmem:[#allocation29_spill] sm:$0xff] %v20372_v14 }
 0x79d   : > { %v10708_v48 = vpop.f32.mrf.mxu1 }
 0x79e   : > { %v20376_v18 = vadd.f32 %v10708_v48, %v10596_v19  ;;  %v10643_v48 = vadd.f32 %v20277_v33, %v10530_v46  ;;  %v10540_v46 = vadd.f32 %v20275_v50, %v20221_v24 }
 0x79f   : > { %v10710_v32 = vpop.f32.mrf.mxu1 }
 0x7a0   : > { %21781 = vst [vmem:[#allocation67_spill] sm:$0xff] %v20376_v18  ;;  %v10751_v43 = vpop.f32.mrf.mxu0  ;;  %v20378_v63 = vadd.f32 %v10710_v32, %v10598_v34  ;;  %v10645_v34 = vadd.f32 %v20285_v55, %v10532_v42 }
 0x7a1   : > { %v20380_v45 = vpop.f32.mrf.mxu1  ;;  %v10752_v32 = vadd.f32 %v10751_v43, %v20271_v38 }
 0x7a2   : > { %21782 = vst [vmem:[#allocation30_spill] sm:$0xff] %v20378_v63  ;;  %21783 = vst [vmem:[#allocation33_spill] sm:$0xff] %v20380_v45  ;;  %v10753_v37 = vpop.f32.mrf.mxu0 }
 0x7a3   : > { %v20382_v56 = vpop.f32.mrf.mxu1  ;;  %v10754_v54 = vadd.f32 %v10753_v37, %v20273_v10  ;;  %v10542_v10 = vadd.f32 %v20282_v29, %v20223_v25 }
 0x7a4   : > { %21784 = vst [vmem:[#allocation70_spill] sm:$0xff] %v20382_v56  ;;  %v10755_v30 = vpop.f32.mrf.mxu0 }
 0x7a5   : > { %v10864_v11 = vpop.f32.mrf.mxu1  ;;  %v10756_v63 = vadd.f32 %v10755_v30, %v10643_v48  ;;  %v10655_v48 = vadd.f32 %v20304_v52, %v10542_v10  ;;  %v10550_v52 = vadd.f32 %v20298_v39, %v20225_v41 }
 0x7a6   : > { %v10757_v51 = vpop.f32.mrf.mxu0  ;;  %v10865_v14 = vadd.f32 %v10864_v11, %v10752_v32 }
 0x7a7   : > { %v10866_v19 = vpop.f32.mrf.mxu1  ;;  %v10758_v23 = vadd.f32 %v10757_v51, %v10645_v34  ;;  %v10653_v51 = vadd.f32 %v20300_v13, %v10540_v46 }
 0x7a8   : > { %v10761_v18 = vpop.f32.mrf.mxu0  ;;  %v10867_v42 = vadd.f32 %v10866_v19, %v10754_v54 }
 0x7a9   : > { %v10868_v45 = vpop.f32.mrf.mxu1  ;;  %v10762_v24 = vadd.f32 %v10761_v18, %v20290_v16 }
 0x7aa   : > { %v10763_v56 = vpop.f32.mrf.mxu0  ;;  %v10869_v44 = vadd.f32 %v10868_v45, %v10756_v63  ;;  %v11402_v63 = vand.u32 %v14539_v9, %v20287_v35 }
 0x7ab   : > { %v10870_v5 = vpop.f32.mrf.mxu1  ;;  %v10764_v19 = vadd.f32 %v10763_v56, %v20296_v49  ;;  %v10663_v49 = vadd.f32 %v20314_v20, %v10550_v52 }
 0x7ac   : > { %v10765_v33 = vpop.f32.mrf.mxu0  ;;  %v10943_v55 = vpack.c.bf16 %v10869_v44, %v10865_v14  ;;  %v10871_v38 = vadd.f32 %v10870_v5, %v10758_v23  ;;  %v21785_v23 = vmov 0.0  }
 0x7ad   : > { %v10874_v43 = vpop.f32.mrf.mxu1  ;;  %v10766_v50 = vadd.f32 %v10765_v33, %v10653_v51  ;;  %v10552_v33 = vadd.f32 %v20302_v57, %v20227_v7 }
 0x7ae   : > { %v10767_v30 = vpop.f32.mrf.mxu0  ;;  %v10944_v11 = vpack.c.bf16 %v10871_v38, %v10867_v42  ;;  %v10875_v25 = vadd.f32 %v10874_v43, %v10762_v24 }
 0x7af   : > { %v10876_v45 = vpop.f32.mrf.mxu1  ;;  %v10768_v29 = vadd.f32 %v10767_v30, %v10655_v48  ;;  %v10562_v48 = vadd.f32 %v20316_v22, %v20233_v53 }
 0x7b0   : > { %v10771_v37 = vpop.f32.mrf.mxu0  ;;  %13332 = vmatprep.mubr.msk.bf16.mxu0 %vm11126_vm5, %v10944_v11  ;;  %v10877_v18 = vadd.f32 %v10876_v45, %v10764_v19  ;;  %v10560_v11 = vadd.f32 %v20312_v58, %v20231_v1 }
 0x7b1   : > { %v10878_v14 = vpop.f32.mrf.mxu1  ;;  %11188 = vmatmul.mubr.bf16.vlgmr.msra.gmra.mxu0 %v10943_v55  ;;  %v10665_v55 = vadd.f32 %v20318_v26, %v10552_v33  ;;  %v10772_v38 = vadd.f32 %v10771_v37, %v20307_v60 }
 0x7b2   : > { %v10773_v54 = vpop.f32.mrf.mxu0  ;;  %v10879_v13 = vadd.f32 %v10878_v14, %v10766_v50  ;;  %13681 = vmatpush3.bf16.msra.mxu0 %v11402_v63  ;;  %v10673_v24 = vadd.f32 %v20328_v12, %v10560_v11 }
 0x7b3   : > { %v10880_v34 = vpop.f32.mrf.mxu1  ;;  %13682 = vmatprep.subr.bf16.mxu0 %v21785_v23  ;;  %v10774_v30 = vadd.f32 %v10773_v54, %v20310_v21  ;;  %v10675_v54 = vadd.f32 %v20332_v40, %v10562_v48 }
 0x7b4   : > { %v10775_v32 = vpop.f32.mrf.mxu0  ;;  %v10945_v16 = vpack.c.bf16 %v10879_v13, %v10875_v25  ;;  %v10881_v44 = vadd.f32 %v10880_v34, %v10768_v29 }
 0x7b5   : > { %v10884_v9 = vpop.f32.mrf.mxu1  ;;  %v10776_v43 = vadd.f32 %v10775_v32, %v10663_v49  ;;  %v10570_v32 = vadd.f32 %v20326_v2, %v20239_v61 }
 0x7b6   : > { %v10777_v5 = vpop.f32.mrf.mxu0  ;;  %v10946_v56 = vpack.c.bf16 %v10881_v44, %v10877_v18  ;;  %v10885_v10 = vadd.f32 %v10884_v9, %v10772_v38  ;;  %v10572_v44 = vadd.f32 %v20330_v0, %v20241_v59 }
 0x7b7   : > { %v10886_v46 = vpop.f32.mrf.mxu1  ;;  %v10778_v51 = vadd.f32 %v10777_v5, %v10665_v55  ;;  %v10683_v9 = vadd.f32 %v20342_v15, %v10570_v32 }
 0x7b8   : > { %v10781_v42 = vpop.f32.mrf.mxu0  ;;  %13333 = vmatprep.mubr.msk.bf16.mxu0 %vm11126_vm5, %v10946_v56  ;;  %v10887_v63 = vadd.f32 %v10886_v46, %v10774_v30  ;;  %v10685_v49 = vadd.f32 %v20346_v8, %v10572_v44 }
 0x7b9   : > { %v10888_v41 = vpop.f32.mrf.mxu1  ;;  %11196 = vmatmul.mubr.bf16.gmra.mxu0 %v10945_v16  ;;  %v10782_v19 = vadd.f32 %v10781_v42, %v20321_v27 }
 0x7ba   : > { %v10783_v39 = vpop.f32.mrf.mxu0  ;;  %v10889_v7 = vadd.f32 %v10888_v41, %v10776_v43  ;;  %v10580_v43 = vadd.f32 %v20340_v6, %v20247_v28 }
 0x7bb   : > { %v10890_v57 = vpop.f32.mrf.mxu1  ;;  %v10784_v29 = vadd.f32 %v10783_v39, %v20324_v3 }
 0x7bc   : > { %v10785_v20 = vpop.f32.mrf.mxu0  ;;  %v10947_v26 = vpack.c.bf16 %v10889_v7, %v10885_v10  ;;  %v10891_v45 = vadd.f32 %v10890_v57, %v10778_v51  ;;  %v10582_v10 = vadd.f32 %v20344_v17, %v20249_v62  ;;  %v10693_v51 = vadd.f32 %v20356_v31, %v10580_v43  ;;  %v21799_v43 = vld [vmem:[#allocation66_spill] sm:$0xff] }
 0x7bd   : > { %v10894_v60 = vpop.f32.mrf.mxu1  ;;  %v10786_v25 = vadd.f32 %v10785_v20, %v10673_v24  ;;  %v21786_v20 = vld [vmem:[#allocation25_spill] sm:$0xff] }
 0x7be   : > { %v10787_v37 = vpop.f32.mrf.mxu0  ;;  %v10948_v50 = vpack.c.bf16 %v10891_v45, %v10887_v63  ;;  %v10895_v13 = vadd.f32 %v10894_v60, %v10782_v19  ;;  %v10695_v11 = vadd.f32 %v21786_v20, %v10582_v10  ;;  %v21787_v63 = vld [vmem:[#allocation60_spill] sm:$0xff]  ;;  %v21788_v60 = vld [vmem:[#allocation61_spill] sm:$0xff] }
 0x7bf   : > { %v10896_v21 = vpop.f32.mrf.mxu1  ;;  %v10788_v34 = vadd.f32 %v10787_v37, %v10675_v54 }
 0x7c0   : > { %v10791_v14 = vpop.f32.mrf.mxu0  ;;  %13334 = vmatprep.mubr.msk.bf16.mxu0 %vm11126_vm5, %v10948_v50  ;;  %v10897_v52 = vadd.f32 %v10896_v21, %v10784_v29  ;;  %v21789_v50 = vld [vmem:[#allocation56_spill] sm:$0xff]  ;;  %v21790_v21 = vld [vmem:[#allocation62_spill] sm:$0xff]  ;;  %v21791_v29 = vld [vmem:[#allocation57_spill] sm:$0xff] }
 0x7c1   : > { %v10898_v1 = vpop.f32.mrf.mxu1  ;;  %11204 = vmatmul.mubr.bf16.gmra.mxu0 %v10947_v26  ;;  %v10792_v56 = vadd.f32 %v10791_v14, %v20335_v47  ;;  %v10590_v14 = vadd.f32 %v21790_v21, %v21789_v50  ;;  %v11001_v50 = vpop.permute.xlu1 %11000 }
 0x7c2   : > { %v10793_v58 = vpop.f32.mrf.mxu0  ;;  %v10899_v53 = vadd.f32 %v10898_v1, %v10786_v25 }
 0x7c3   : > { %v10900_v22 = vpop.f32.mrf.mxu1  ;;  %v10794_v42 = vadd.f32 %v10793_v58, %v20338_v36 }
 0x7c4   : > { %v10795_v12 = vpop.f32.mrf.mxu0  ;;  %v10949_v40 = vpack.c.bf16 %v10899_v53, %v10895_v13  ;;  %v10901_v18 = vadd.f32 %v10900_v22, %v10788_v34  ;;  %v21792_v13 = vld [vmem:[#allocation63_spill] sm:$0xff]  ;;  %v10703_v53 = vadd.f32 %v20370_v4, %v10590_v14 }
 0x7c5   : > { %v10904_v27 = vpop.f32.mrf.mxu1  ;;  %v10796_v46 = vadd.f32 %v10795_v12, %v10683_v9  ;;  %v10592_v34 = vadd.f32 %v21792_v13, %v21791_v29  ;;  %v14542_v14 = vld [vmem:[%s20759_s7 + $0x8] sm:$0x1f]   ;;  %v11006_v13 = vpop.permute.xlu1 %11005 }
 0x7c6   : > { %v10797_v16 = vpop.f32.mrf.mxu0  ;;  %v10950_v5 = vpack.c.bf16 %v10901_v18, %v10897_v52  ;;  %v10905_v55 = vadd.f32 %v10904_v27, %v10792_v56  ;;  %v21793_v52 = vld [vmem:[#allocation29_spill] sm:$0xff]  ;;  %v21794_v18 = vld [vmem:[#allocation64_spill] sm:$0xff] }
 0x7c7   : > { %v10906_v3 = vpop.f32.mrf.mxu1  ;;  %v10798_v38 = vadd.f32 %v10797_v16, %v10685_v49 }
 0x7c8   : > { %v10801_v33 = vpop.f32.mrf.mxu0  ;;  %13335 = vmatprep.mubr.msk.bf16.mxu0 %vm11126_vm5, %v10950_v5  ;;  %v10907_v41 = vadd.f32 %v10906_v3, %v10794_v42  ;;  %v21795_v5 = vld [vmem:[#allocation65_spill] sm:$0xff] }
 0x7c9   : > { %v10908_v61 = vpop.f32.mrf.mxu1  ;;  %11212 = vmatmul.mubr.bf16.gmra.mxu0 %v10949_v40  ;;  %v10802_v26 = vadd.f32 %v10801_v33, %v21787_v63  ;;  %v10705_v40 = vadd.f32 %v21793_v52, %v10592_v34  ;;  %v21803_v63 = vld [vmem:[#allocation30_spill] sm:$0xff] }
 0x7ca   : > { %v10803_v2 = vpop.f32.mrf.mxu0  ;;  %v10909_v59 = vadd.f32 %v10908_v61, %v10796_v46  ;;  %v21796_v61 = vld [vmem:[#allocation58_spill] sm:$0xff] }
 0x7cb   : > { %v10910_v0 = vpop.f32.mrf.mxu1  ;;  %v10804_v37 = vadd.f32 %v10803_v2, %v21788_v60  ;;  %v21797_v2 = vld [vmem:[#allocation26_spill] sm:$0xff] }
 0x7cc   : > { %v10805_v15 = vpop.f32.mrf.mxu0  ;;  %v10951_v8 = vpack.c.bf16 %v10909_v59, %v10905_v55  ;;  %v10911_v39 = vadd.f32 %v10910_v0, %v10798_v38  ;;  %v10600_v42 = vadd.f32 %v21797_v2, %v21796_v61  ;;  %v14547_v2 = vld [vmem:[%s20759_s7 + $0x30] sm:$0xff]  }
 0x7cd   : > { %v10914_v47 = vpop.f32.mrf.mxu1  ;;  %v10806_v45 = vadd.f32 %v10805_v15, %v10693_v51  ;;  %v21798_v15 = vld [vmem:[#allocation59_spill] sm:$0xff]  ;;  %v21801_v51 = vld [vmem:[#allocation70_spill] sm:$0xff] }
 0x7ce   : > { %v10807_v30 = vpop.f32.mrf.mxu0  ;;  %v10952_v7 = vpack.c.bf16 %v10911_v39, %v10907_v41  ;;  %v10915_v48 = vadd.f32 %v10914_v47, %v10802_v26  ;;  %v10602_v41 = vadd.f32 %v21799_v43, %v21798_v15 }
 0x7cf   : > { %v10916_v36 = vpop.f32.mrf.mxu1  ;;  %v10808_v24 = vadd.f32 %v10807_v30, %v10695_v11 }
 0x7d0   : > { %v10811_v57 = vpop.f32.mrf.mxu0  ;;  %13336 = vmatprep.mubr.msk.bf16.mxu0 %vm11126_vm5, %v10952_v7  ;;  %v10917_v54 = vadd.f32 %v10916_v36, %v10804_v37  ;;  %v10715_v7 = vadd.f32 %v21801_v51, %v10602_v41  ;;  %v21802_v36 = vld [vmem:[#allocation67_spill] sm:$0xff]  ;;  %v14550_v41 = vld [vmem:[%s20759_s7 + $0x60] sm:$0xff]  }
 0x7d1   : > { %v10918_v28 = vpop.f32.mrf.mxu1  ;;  %11220 = vmatmul.mubr.bf16.gmra.mxu0 %v10951_v8  ;;  %v10812_v27 = vadd.f32 %v10811_v57, %v21794_v18  ;;  %v21800_v8 = vld [vmem:[#allocation33_spill] sm:$0xff] }
 0x7d2   : > { %v10813_v6 = vpop.f32.mrf.mxu0  ;;  %v10919_v62 = vadd.f32 %v10918_v28, %v10806_v45  ;;  %v10713_v39 = vadd.f32 %v21800_v8, %v10600_v42  ;;  %v14552_v8 = vld [vmem:[%s20759_s7 + $0x88] sm:$0x1f]  }
 0x7d3   : > { %v10920_v17 = vpop.f32.mrf.mxu1  ;;  %v10814_v3 = vadd.f32 %v10813_v6, %v21795_v5  ;;  %v14546_v5 = vld [vmem:[%s20759_s7 + $0x40] sm:$0xff]  }
 0x7d4   : > { %v10815_v31 = vpop.f32.mrf.mxu0  ;;  %v10953_v19 = vpack.c.bf16 %v10919_v62, %v10915_v48  ;;  %v10921_v25 = vadd.f32 %v10920_v17, %v10808_v24  ;;  %v14541_v17 = vld [vmem:[%s20759_s7 + $0x20] sm:$0xff]  }
 0x7d5   : > { %v10924_v1 = vpop.f32.mrf.mxu1  ;;  %v10816_v16 = vadd.f32 %v10815_v31, %v10703_v53  ;;  %13683 = vmatpush3.bf16.msra.mxu0 %v14541_v17 }
 0x7d6   : > { %v10817_v58 = vpop.f32.mrf.mxu0  ;;  %v10954_v22 = vpack.c.bf16 %v10921_v25, %v10917_v54  ;;  %v10925_v33 = vadd.f32 %v10924_v1, %v10812_v27  ;;  %13696 = vmatprep.subr.bf16.mxu0 %v21785_v23  ;;  %v11339_v1 = vand.u32 %v14542_v14, %v20287_v35  ;;  %v14557_v14 = vld [vmem:[%s20759_s7 + $0x98] sm:$0x1f]  }
 0x7d7   : > { %v10926_v12 = vpop.f32.mrf.mxu1  ;;  %v10818_v49 = vadd.f32 %v10817_v58, %v10705_v40  ;;  %v14544_v58 = vld [vmem:[%s20759_s7 + $0x48] sm:$0x1f]   ;;  %v14545_v40 = vld [vmem:[%s20759_s7 + $0x38] sm:$0x1f]  }
 0x7d8   : > { %v10821_v32 = vpop.f32.mrf.mxu0  ;;  %13337 = vmatprep.mubr.msk.bf16.mxu0 %vm11126_vm5, %v10954_v22  ;;  %v10927_v55 = vadd.f32 %v10926_v12, %v10814_v3  ;;  %v10996_v22 = vpop.permute.xlu0 %10995  ;;  %v11530_v52 = vand.u32 %v14544_v58, %v20287_v35  ;;  %v14548_v3 = vld [vmem:[%s20759_s7 + $0x68] sm:$0x1f]   ;;  %v11850_v58 = vand.u32 %v14557_v14, %v20287_v35  ;;  %v14575_v14 = vld [vmem:[%s20761_s9 + $0x10] sm:$0xff]  }
 0x7d9   : > { %v10928_v44 = vpop.f32.mrf.mxu1  ;;  %11228 = vmatmul.mubr.bf16.gmra.mxu0 %v10953_v19  ;;  %v10822_v57 = vadd.f32 %v10821_v32, %v21802_v36  ;;  %v14543_v32 = vld [vmem:[%s20759_s7] sm:$0xff]   ;;  %v11658_v42 = vand.u32 %v14548_v3, %v20287_v35  ;;  %v14551_v36 = vld [vmem:[%s20759_s7 + $0x50] sm:$0xff]  }
 0x7da   : > { %v10823_v9 = vpop.f32.mrf.mxu0  ;;  %v10929_v56 = vadd.f32 %v10928_v44, %v10816_v16 }
 0x7db   : > { %v10930_v46 = vpop.f32.mrf.mxu1  ;;  %v10824_v26 = vadd.f32 %v10823_v9, %v21803_v63  ;;  %v11466_v9 = vand.u32 %v14545_v40, %v20287_v35  ;;  %v14559_v40 = vld [vmem:[%s20759_s7 + $0x90] sm:$0xff]  }
 0x7dc   : > { %v10825_v4 = vpop.f32.mrf.mxu0  ;;  %v10955_v38 = vpack.c.bf16 %v10929_v56, %v10925_v33  ;;  %v10931_v59 = vadd.f32 %v10930_v46, %v10818_v49  ;;  %v11016_v49 = vpop.permute.xlu1 %11015 }
 0x7dd   : > { %v10934_v0 = vpop.f32.mrf.mxu1  ;;  %v10826_v20 = vadd.f32 %v10825_v4, %v10713_v39  ;;  %v11011_v4 = vpop.permute.xlu0 %11010 }
 0x7de   : > { %v10956_v47 = vpack.c.bf16 %v10931_v59, %v10927_v55  ;;  %v10827_v30 = vpop.f32.mrf.mxu0  ;;  %v10935_v45 = vadd.f32 %v10934_v0, %v10822_v57  ;;  %v14549_v55 = vld [vmem:[%s20759_s7 + $0x58] sm:$0x1f]   ;;  %v11786_v57 = vand.u32 %v14552_v8, %v20287_v35 }
 0x7df   : > { %v10936_v10 = vpop.f32.mrf.mxu1  ;;  %v10828_v28 = vadd.f32 %v10827_v30, %v10715_v7  ;;  %v11594_v43 = vand.u32 %v14549_v55, %v20287_v35  ;;  %v14563_v55 = vld [vmem:[%s20759_s7 + $0xb0] sm:$0xff]  }
 0x7e0   : > { %13338 = vmatprep.mubr.msk.bf16.mxu0 %vm11126_vm5, %v10956_v47  ;;  %v10937_v37 = vadd.f32 %v10936_v10, %v10824_v26  ;;  %v11026_v47 = vpop.permute.xlu1 %11025 }
 0x7e1   : > { %v10938_v11 = vpop.f32.mrf.mxu1  ;;  %11236 = vmatmul.mubr.bf16.gmra.mxu0 %v10955_v38  ;;  %v11021_v51 = vpop.permute.xlu0 %11020 }
 0x7e2   : > { %v10939_v6 = vadd.f32 %v10938_v11, %v10826_v20  ;;  %v14553_v20 = vld [vmem:[%s20759_s7 + $0x78] sm:$0x1f]  }
 0x7e3   : > { %v10940_v60 = vpop.f32.mrf.mxu1 }
 0x7e4   : > { %v10957_v48 = vpack.c.bf16 %v10939_v6, %v10935_v45  ;;  %v10941_v24 = vadd.f32 %v10940_v60, %v10828_v28  ;;  %v11722_v28 = vand.u32 %v14553_v20, %v20287_v35  ;;  %v14554_v6 = vld [vmem:[%s20759_s7 + $0x80] sm:$0xff]   ;;  %v14556_v60 = vld [vmem:[%s20759_s7 + $0xa8] sm:$0x1f]   ;;  %v14568_v20 = vld [vmem:[%s20759_s7 + $0xf8] sm:$0x1f]  }
 0x7e5   : > { %v11031_v17 = vpop.permute.xlu0 %11030 }
 0x7e6   : > { %v10958_v62 = vpack.c.bf16 %v10941_v24, %v10937_v37 }
 0x7e8   : > { %13339 = vmatprep.mubr.msk.bf16.mxu0 %vm11126_vm5, %v10958_v62 }
 0x7e9   : > { %11244 = vmatmul.mubr.bf16.gmra.mxu0 %v10957_v48  ;;  %v11036_v48 = vpop.permute.xlu1 %11035 }
 0x7ea   : > { %13684 = vmatprep.mubr.msk.bf16.mxu0 %vm21765_vm6, %v21785_v23 }
 0x871   : > { %v11189_v31 = vpop.f32.mrf.mxu0 }
 0x872   : > { %v11190_v18 = vadd.f32 %v11189_v31, %v10996_v22 }
 0x873   : > { %v11191_v21 = vpop.f32.mrf.mxu0 }
 0x874   : > { %v11252_v33 = vpack.c.bf16 %v11190_v18, %v11190_v18  ;;  %v11914_v21 = vand.u32 %v14556_v60, %v20287_v35 }
 0x875   : > { %v11192_v54 = vpop.f32.mrf.mxu0 }
 0x876   : > { %v11193_v19 = vadd.f32 %v11192_v54, %v11001_v50  ;;  %v14555_v50 = vld [vmem:[%s20759_s7 + $0x70] sm:$0xff]  }
 0x877   : > { %v11194_v25 = vpop.f32.mrf.mxu0 }
 0x878   : > { %v11257_v29 = vpack.c.bf16 %v11193_v19, %v11193_v19 }
 0x879   : > { %v11197_v34 = vpop.f32.mrf.mxu0 }
 0x87a   : > { %v11198_v53 = vadd.f32 %v11197_v34, %v11006_v13  ;;  %13669 = vmatmul.mubr.msk.bf16.vlgmr.msra.gmra.mxu1 %vm11274_vm0, %v11257_v29  ;;  %v14558_v29 = vld [vmem:[%s20759_s7 + $0xa0] sm:$0xff]   ;;  %v14560_v13 = vld [vmem:[%s20759_s7 + $0xc8] sm:$0x1f]  }
 0x87b   : > { %v11199_v12 = vpop.f32.mrf.mxu0  ;;  %13673 = vmatpush3.bf16.msra.mxu1 %v11339_v1  ;;  %13676 = vmatprep.mubr.msk.bf16.mxu1 %vm21765_vm6, %v21785_v23  ;;  %v12042_v18 = vand.u32 %v14560_v13, %v20287_v35  ;;  %v14581_v13 = vld [vmem:[%s21805_s18 + $0x10] sm:$0xff]  }
 0x87c   : > { %v11381_v27 = vpack.c.bf16 %v11198_v53, %v11198_v53  ;;  %13674 = vmatprep.subr.bf16.mxu1 %v21785_v23  ;;  %v11046_v53 = vpop.permute.xlu1 %11045 }
 0x87d   : > { %v11200_v16 = vpop.f32.mrf.mxu0 }
 0x87e   : > { %13685 = vmatmul.mubr.msk.bf16.vlgmr.msra.gmra.mxu0 %vm11274_vm0, %v11381_v27  ;;  %v11201_v38 = vadd.f32 %v11200_v16, %v11011_v4  ;;  %v14561_v27 = vld [vmem:[%s20759_s7 + $0xb8] sm:$0x1f]  }
 0x87f   : > { %v11202_v44 = vpop.f32.mrf.mxu0  ;;  %13675 = vmatpush3.bf16.msra.mxu1 %v14543_v32  ;;  %13697 = vmatpush3.bf16.msra.mxu0 %v11530_v52  ;;  %v11041_v32 = vpop.permute.xlu0 %11040  ;;  %v11978_v3 = vand.u32 %v14561_v27, %v20287_v35 }
 0x880   : > { %13688 = vmatprep.subr.bf16.mxu1 %v21785_v23  ;;  %13698 = vmatprep.subr.bf16.mxu0 %v21785_v23  ;;  %v11445_v39 = vpack.c.bf16 %v11201_v38, %v11201_v38 }
 0x881   : > { %v11205_v56 = vpop.f32.mrf.mxu0  ;;  %13700 = vmatprep.mubr.msk.bf16.mxu0 %vm21765_vm6, %v21785_v23 }
 0x882   : > { %v11206_v46 = vadd.f32 %v11205_v56, %v11016_v49  ;;  %13677 = vmatmul.mubr.msk.bf16.vlgmr.msra.gmra.mxu1 %vm11274_vm0, %v11252_v33  ;;  %v14562_v33 = vld [vmem:[%s20759_s7 + $0xc0] sm:$0xff]   ;;  %v14564_v49 = vld [vmem:[%s20759_s7 + $0xe8] sm:$0x1f]  }
 0x883   : > { %v11207_v61 = vpop.f32.mrf.mxu0  ;;  %13689 = vmatpush3.bf16.msra.mxu1 %v11466_v9  ;;  %13699 = vmatpush3.bf16.msra.mxu0 %v14546_v5  ;;  %v12170_v38 = vand.u32 %v14564_v49, %v20287_v35 }
 0x884   : > { %v11509_v59 = vpack.c.bf16 %v11206_v46, %v11206_v46  ;;  %13690 = vmatprep.subr.bf16.mxu1 %v21785_v23  ;;  %13712 = vmatprep.subr.bf16.mxu0 %v21785_v23  ;;  %v11056_v46 = vpop.permute.xlu1 %11055 }
 0x885   : > { %v11208_v0 = vpop.f32.mrf.mxu0  ;;  %13692 = vmatprep.mubr.msk.bf16.mxu1 %vm21765_vm6, %v21785_v23 }
 0x886   : > { %13701 = vmatmul.mubr.msk.bf16.vlgmr.msra.gmra.mxu0 %vm11274_vm0, %v11509_v59  ;;  %v11209_v11 = vadd.f32 %v11208_v0, %v11021_v51  ;;  %v14565_v59 = vld [vmem:[%s20759_s7 + $0xd8] sm:$0x1f]  }
 0x887   : > { %v11210_v15 = vpop.f32.mrf.mxu0  ;;  %13691 = vmatpush3.bf16.msra.mxu1 %v14547_v2  ;;  %13713 = vmatpush3.bf16.msra.mxu0 %v11658_v42  ;;  %v11051_v2 = vpop.permute.xlu0 %11050  ;;  %v12106_v8 = vand.u32 %v14565_v59, %v20287_v35 }
 0x888   : > { %13704 = vmatprep.subr.bf16.mxu1 %v21785_v23  ;;  %13714 = vmatprep.subr.bf16.mxu0 %v21785_v23  ;;  %v11573_v37 = vpack.c.bf16 %v11209_v11, %v11209_v11 }
 0x889   : > { %v11213_v30 = vpop.f32.mrf.mxu0  ;;  %13716 = vmatprep.mubr.msk.bf16.mxu0 %vm21765_vm6, %v21785_v23 }
 0x88a   : > { %v11214_v10 = vadd.f32 %v11213_v30, %v11026_v47  ;;  %13693 = vmatmul.mubr.msk.bf16.vlgmr.msra.gmra.mxu1 %vm11274_vm0, %v11445_v39  ;;  %v14566_v39 = vld [vmem:[%s20759_s7 + $0xe0] sm:$0xff]   ;;  %v11066_v30 = vpop.permute.xlu1 %11065 }
 0x88b   : > { %v11215_v7 = vpop.f32.mrf.mxu0  ;;  %13705 = vmatpush3.bf16.msra.mxu1 %v11594_v43  ;;  %13715 = vmatpush3.bf16.msra.mxu0 %v14550_v41 }
 0x88c   : > { %v11637_v63 = vpack.c.bf16 %v11214_v10, %v11214_v10  ;;  %13706 = vmatprep.subr.bf16.mxu1 %v21785_v23  ;;  %13728 = vmatprep.subr.bf16.mxu0 %v21785_v23  ;;  %v11061_v7 = vpop.permute.xlu0 %11060 }
 0x88d   : > { %v11216_v26 = vpop.f32.mrf.mxu0  ;;  %13708 = vmatprep.mubr.msk.bf16.mxu1 %vm21765_vm6, %v21785_v23 }
 0x88e   : > { %13717 = vmatmul.mubr.msk.bf16.vlgmr.msra.gmra.mxu0 %vm11274_vm0, %v11637_v63  ;;  %v11217_v54 = vadd.f32 %v11216_v26, %v11031_v17  ;;  %v14571_v17 = vld [vmem:[%s20761_s9 + $0x30] sm:$0xff]  }
 0x88f   : > { %v11218_v45 = vpop.f32.mrf.mxu0  ;;  %13707 = vmatpush3.bf16.msra.mxu1 %v14551_v36  ;;  %13729 = vmatpush3.bf16.msra.mxu0 %v11786_v57  ;;  %v14567_v57 = vld [vmem:[%s20759_s7 + $0xd0] sm:$0xff]  }
 0x890   : > { %13720 = vmatprep.subr.bf16.mxu1 %v21785_v23  ;;  %13730 = vmatprep.subr.bf16.mxu0 %v21785_v23  ;;  %v11701_v34 = vpack.c.bf16 %v11217_v54, %v11217_v54  ;;  %v11071_v60 = vpop.permute.xlu0 %11070  ;;  %v14576_v54 = vld [vmem:[%s20761_s9 + $0x8] sm:$0xff]  }
 0x891   : > { %v11221_v24 = vpop.f32.mrf.mxu0  ;;  %13732 = vmatprep.mubr.msk.bf16.mxu0 %vm21765_vm6, %v21785_v23 }
 0x892   : > { %v11222_v62 = vadd.f32 %v11221_v24, %v11036_v48  ;;  %13709 = vmatmul.mubr.msk.bf16.vlgmr.msra.gmra.mxu1 %vm11274_vm0, %v11573_v37  ;;  %v14569_v37 = vld [vmem:[%s20759_s7 + $0xf0] sm:$0xff]   ;;  %v14570_v24 = vld [vmem:[%s20761_s9 + $0x38] ss:$0 sps:$4 sm:$0xff]  }
 0x893   : > { %v11223_v31 = vpop.f32.mrf.mxu0  ;;  %13721 = vmatpush3.bf16.msra.mxu1 %v11722_v28  ;;  %13731 = vmatpush3.bf16.msra.mxu0 %v14554_v6  ;;  %v12234_v28 = vand.u32 %v14568_v20, %v20287_v35 }
 0x894   : > { %v11765_v19 = vpack.c.bf16 %v11222_v62, %v11222_v62  ;;  %13722 = vmatprep.subr.bf16.mxu1 %v21785_v23  ;;  %13744 = vmatprep.subr.bf16.mxu0 %v21785_v23  ;;  %v12359_v62 = vsel %vm21804_vm14, %v14570_v24, 0  ;;  %v14572_v31 = vld [vmem:[%s20761_s9 + $0x28] sm:$0xff]  }
 0x895   : > { %v11224_v25 = vpop.f32.mrf.mxu0  ;;  %13724 = vmatprep.mubr.msk.bf16.mxu1 %vm21765_vm6, %v21785_v23 }
 0x896   : > { %13733 = vmatmul.mubr.msk.bf16.vlgmr.msra.gmra.mxu0 %vm11274_vm0, %v11765_v19  ;;  %v11225_v16 = vadd.f32 %v11224_v25, %v11041_v32  ;;  %v14577_v19 = vld [vmem:[%s20761_s9] sm:$0xff]   ;;  %v14578_v25 = vld [vmem:[%s21805_s18 + $0x28] ss:$0 sps:$4 sm:$0x33]  }
 0x897   : > { %v11226_v1 = vpop.f32.mrf.mxu0  ;;  %13723 = vmatpush3.bf16.msra.mxu1 %v14555_v50  ;;  %13745 = vmatpush3.bf16.msra.mxu0 %v11914_v21  ;;  %v14573_v50 = vld [vmem:[%s20761_s9 + $0x20] sm:$0xff]   ;;  %v14574_v21 = vld [vmem:[%s20761_s9 + $0x18] sm:$0xff]  }
 0x898   : > { %13736 = vmatprep.subr.bf16.mxu1 %v21785_v23  ;;  %13746 = vmatprep.subr.bf16.mxu0 %v21785_v23  ;;  %v11829_v56 = vpack.c.bf16 %v11225_v16, %v11225_v16  ;;  %v12460_v1 = vsel %vm12458_vm15, %v14578_v25, 0 }
 0x899   : > { %v11229_v22 = vpop.f32.mrf.mxu0  ;;  %13748 = vmatprep.mubr.msk.bf16.mxu0 %vm21765_vm6, %v21785_v23 }
 0x89a   : > { %v11230_v12 = vadd.f32 %v11229_v22, %v11046_v53  ;;  %13725 = vmatmul.mubr.msk.bf16.vlgmr.msra.gmra.mxu1 %vm11274_vm0, %v11701_v34 }
 0x89b   : > { %v11231_v52 = vpop.f32.mrf.mxu0  ;;  %13737 = vmatpush3.bf16.msra.mxu1 %v11850_v58  ;;  %13747 = vmatpush3.bf16.msra.mxu0 %v14558_v29  ;;  %v14579_v58 = vld [vmem:[%s21805_s18 + $0x20] sm:$0xff]   ;;  %v14580_v29 = vld [vmem:[%s21805_s18 + $0x18] sm:$0xff]  }
 0x89c   : > { %v11893_v44 = vpack.c.bf16 %v11230_v12, %v11230_v12  ;;  %13738 = vmatprep.subr.bf16.mxu1 %v21785_v23  ;;  %13760 = vmatprep.subr.bf16.mxu0 %v21785_v23 }
 0x89d   : > { %v11232_v9 = vpop.f32.mrf.mxu0  ;;  %13740 = vmatprep.mubr.msk.bf16.mxu1 %vm21765_vm6, %v21785_v23 }
 0x89e   : > { %13749 = vmatmul.mubr.msk.bf16.vlgmr.msra.gmra.mxu0 %vm11274_vm0, %v11893_v44  ;;  %v11233_v0 = vadd.f32 %v11232_v9, %v11051_v2 }
 0x89f   : > { %v11234_v5 = vpop.f32.mrf.mxu0  ;;  %13739 = vmatpush3.bf16.msra.mxu1 %v14559_v40  ;;  %13761 = vmatpush3.bf16.msra.mxu0 %v12042_v18 }
 0x8a0   : > { %13752 = vmatprep.subr.bf16.mxu1 %v21785_v23  ;;  %13762 = vmatprep.subr.bf16.mxu0 %v21785_v23  ;;  %v11957_v47 = vpack.c.bf16 %v11233_v0, %v11233_v0 }
 0x8a1   : > { %v11237_v4 = vpop.f32.mrf.mxu0  ;;  %13764 = vmatprep.mubr.msk.bf16.mxu0 %vm21765_vm6, %v21785_v23 }
 0x8a2   : > { %v11238_v61 = vadd.f32 %v11237_v4, %v11056_v46  ;;  %13741 = vmatmul.mubr.msk.bf16.vlgmr.msra.gmra.mxu1 %vm11274_vm0, %v11829_v56 }
 0x8a3   : > { %v11239_v42 = vpop.f32.mrf.mxu0  ;;  %13753 = vmatpush3.bf16.msra.mxu1 %v11978_v3  ;;  %13763 = vmatpush3.bf16.msra.mxu0 %v14562_v33 }
 0x8a4   : > { %v12021_v15 = vpack.c.bf16 %v11238_v61, %v11238_v61  ;;  %13754 = vmatprep.subr.bf16.mxu1 %v21785_v23  ;;  %13776 = vmatprep.subr.bf16.mxu0 %v21785_v23 }
 0x8a5   : > { %v11240_v43 = vpop.f32.mrf.mxu0  ;;  %13756 = vmatprep.mubr.msk.bf16.mxu1 %vm21765_vm6, %v21785_v23 }
 0x8a6   : > { %13765 = vmatmul.mubr.msk.bf16.vlgmr.msra.gmra.mxu0 %vm11274_vm0, %v12021_v15  ;;  %v11241_v11 = vadd.f32 %v11240_v43, %v11061_v7 }
 0x8a7   : > { %v11242_v41 = vpop.f32.mrf.mxu0  ;;  %13755 = vmatpush3.bf16.msra.mxu1 %v14563_v55  ;;  %13777 = vmatpush3.bf16.msra.mxu0 %v12170_v38 }
 0x8a8   : > { %13768 = vmatprep.subr.bf16.mxu1 %v21785_v23  ;;  %13778 = vmatprep.subr.bf16.mxu0 %v21785_v23  ;;  %v12085_v6 = vpack.c.bf16 %v11241_v11, %v11241_v11 }
 0x8a9   : > { %v11245_v10 = vpop.f32.mrf.mxu0  ;;  %13780 = vmatprep.mubr.msk.bf16.mxu0 %vm21765_vm6, %v21785_v23 }
 0x8aa   : > { %v11246_v51 = vadd.f32 %v11245_v10, %v11066_v30  ;;  %13757 = vmatmul.mubr.msk.bf16.vlgmr.msra.gmra.mxu1 %vm11274_vm0, %v11957_v47 }
 0x8ab   : > { %v11247_v36 = vpop.f32.mrf.mxu0  ;;  %13769 = vmatpush3.bf16.msra.mxu1 %v12106_v8  ;;  %13779 = vmatpush3.bf16.msra.mxu0 %v14566_v39 }
 0x8ac   : > { %v12149_v63 = vpack.c.bf16 %v11246_v51, %v11246_v51  ;;  %13770 = vmatprep.subr.bf16.mxu1 %v21785_v23  ;;  %13772 = vmatprep.mubr.msk.bf16.mxu1 %vm21765_vm6, %v21785_v23 }
 0x8ad   : > { %v11248_v26 = vpop.f32.mrf.mxu0  ;;  %13792 = vmatprep.subr.bf16.mxu0 %v21785_v23 }
 0x8ae   : > { %13781 = vmatmul.mubr.msk.bf16.vlgmr.msra.gmra.mxu0 %vm11274_vm0, %v12149_v63  ;;  %v11249_v48 = vadd.f32 %v11248_v26, %v11071_v60 }
 0x8af   : > { %v11250_v45 = vpop.f32.mrf.mxu0  ;;  %13771 = vmatpush3.bf16.msra.mxu1 %v14567_v57  ;;  %13808 = vmatprep.mubr.msk.bf16.mxu0 %vm21765_vm6, %v21785_v23 }
 0x8b0   : > { %13784 = vmatprep.subr.bf16.mxu1 %v21785_v23  ;;  %v12213_v35 = vpack.c.bf16 %v11249_v48, %v11249_v48  ;;  %13793 = vmatpush3.bf16.msra.mxu0 %v12359_v62 }
 0x8b1   : > { %13794 = vmatprep.subr.bf16.mxu0 %v21785_v23 }
 0x8b2   : > { %13773 = vmatmul.mubr.msk.bf16.vlgmr.msra.gmra.mxu1 %vm11274_vm0, %v12085_v6 }
 0x8b3   : > { %13785 = vmatpush3.bf16.msra.mxu1 %v12234_v28  ;;  %13788 = vmatprep.mubr.msk.bf16.mxu1 %vm21765_vm6, %v21785_v23 }
 0x8b4   : > { %13786 = vmatprep.subr.bf16.mxu1 %v21785_v23  ;;  %13795 = vmatpush3.bf16.msra.mxu0 %v14571_v17 }
 0x8b5   : > { %13796 = vmatprep.subr.bf16.mxu0 %v21785_v23 }
 0x8b7   : > { %13787 = vmatpush3.bf16.msra.mxu1 %v14569_v37 }
 0x8b8   : > { %13812 = vmatprep.subr.bf16.mxu1 %v21785_v23  ;;  %13797 = vmatpush3.bf16.msra.mxu0 %v14572_v31 }
 0x8b9   : > { %13798 = vmatprep.subr.bf16.mxu0 %v21785_v23 }
 0x8ba   : > { %13789 = vmatmul.mubr.msk.bf16.vlgmr.msra.gmra.mxu1 %vm11274_vm0, %v12213_v35 }
 0x8bb   : > { %13824 = vmatprep.mubr.msk.bf16.mxu1 %vm21765_vm6, %v21785_v23  ;;  %13813 = vmatpush3.bf16.msra.mxu1 %v12460_v1 }
 0x8bc   : > { %13799 = vmatpush3.bf16.msra.mxu0 %v14573_v50  ;;  %13814 = vmatprep.subr.bf16.mxu1 %v21785_v23 }
 0x8bd   : > { %13800 = vmatprep.subr.bf16.mxu0 %v21785_v23 }
 0x8bf   : > { %13815 = vmatpush3.bf16.msra.mxu1 %v14579_v58 }
 0x8c0   : > { %13801 = vmatpush3.bf16.msra.mxu0 %v14574_v21  ;;  %13816 = vmatprep.subr.bf16.mxu1 %v21785_v23 }
 0x8c1   : > { %13802 = vmatprep.subr.bf16.mxu0 %v21785_v23 }
 0x8c3   : > { %13817 = vmatpush3.bf16.msra.mxu1 %v14580_v29 }
 0x8c4   : > { %13803 = vmatpush3.bf16.msra.mxu0 %v14575_v14  ;;  %13818 = vmatprep.subr.bf16.mxu1 %v21785_v23 }
 0x8c5   : > { %13804 = vmatprep.subr.bf16.mxu0 %v21785_v23 }
 0x8c7   : > { %13819 = vmatpush3.bf16.msra.mxu1 %v14581_v13 }
 0x8c8   : > { %13805 = vmatpush3.bf16.msra.mxu0 %v14576_v54  ;;  %13820 = vmatprep.subr.bf16.mxu1 %v21785_v23 }
 0x8c9   : > { %13806 = vmatprep.subr.bf16.mxu0 %v21785_v23 }
 0x8cc   : > { %13807 = vmatpush3.bf16.msra.mxu0 %v14577_v19 }
 0x93a   : > { %v11318_v34 = vpop.f32.mrf.mxu1 }
 0x93c   : > { %v13670_v53 = vpop.f32.mrf.mxu1 }
 0x93e   : > { %v11321_v22 = vpop.f32.mrf.mxu1  ;;  %v11438_v12 = vpop.f32.mrf.mxu0 }
 0x940   : > { %v13671_v32 = vpop.f32.mrf.mxu1  ;;  %v13686_v52 = vpop.f32.mrf.mxu0 }
 0x942   : > { %v11375_v40 = vpop.f32.mrf.mxu1  ;;  %v11441_v18 = vpop.f32.mrf.mxu0 }
 0x943   : > { %v11376_v55 = vadd.f32 %v11375_v40, %v11318_v34 }
 0x944   : > { %v13678_v27 = vpop.f32.mrf.mxu1  ;;  %v13687_v16 = vpop.f32.mrf.mxu0 }
 0x945   : > { %v11444_v43 = vadd.f32 %v11438_v12, %v11376_v55  ;;  %v13449_v55 = vld [vmem:[%s21809_s29] ss:$0 sm:$0xff] }
 0x946   : > { %v11378_v44 = vpop.f32.mrf.mxu1  ;;  %v11566_v9 = vpop.f32.mrf.mxu0 }
 0x948   : > { %v13679_v5 = vpop.f32.mrf.mxu1  ;;  %v13702_v3 = vpop.f32.mrf.mxu0 }
 0x949   : > { %v13448_v5 = vld [vmem:[%s21806_s14] ss:$0 sm:$0xff]  ;;  %s21813_s14 = smov %s21812_s25 }
 0x94a   : > { %v11502_v33 = vpop.f32.mrf.mxu1  ;;  %v11569_v49 = vpop.f32.mrf.mxu0 }
 0x94b   : > { %v11508_v39 = vadd.f32 %v11502_v33, %v11444_v43 }
 0x94c   : > { %v13694_v56 = vpop.f32.mrf.mxu1  ;;  %v13703_v46 = vpop.f32.mrf.mxu0 }
 0x94d   : > { %v11572_v7 = vadd.f32 %v11566_v9, %v11508_v39 }
 0x94e   : > { %v11505_v4 = vpop.f32.mrf.mxu1  ;;  %v11694_v61 = vpop.f32.mrf.mxu0 }
 0x950   : > { %v13695_v2 = vpop.f32.mrf.mxu1  ;;  %v13718_v42 = vpop.f32.mrf.mxu0 }
 0x951   : > { %v14582_v2 = vld [vmem:[%s21805_s18 + $0x8] sm:$0xff]   ;;  %v14583_v42 = vld [vmem:[%s21805_s18] sm:$0xff]  }
 0x952   : > { %v11630_v38 = vpop.f32.mrf.mxu1  ;;  %v11697_v59 = vpop.f32.mrf.mxu0  ;;  %13821 = vmatpush3.bf16.msra.mxu1 %v14582_v2 }
 0x953   : > { %v11636_v20 = vadd.f32 %v11630_v38, %v11572_v7  ;;  %13822 = vmatprep.subr.bf16.mxu1 %v21785_v23  ;;  %v13459_v23 = vld [vmem:[%s21810_s20] ss:$0 sm:$0xff] }
 0x954   : > { %v13710_v0 = vpop.f32.mrf.mxu1  ;;  %v13719_v15 = vpop.f32.mrf.mxu0 }
 0x955   : > { %v11700_v28 = vadd.f32 %v11694_v61, %v11636_v20 }
 0x956   : > { %v11633_v41 = vpop.f32.mrf.mxu1  ;;  %v11822_v8 = vpop.f32.mrf.mxu0  ;;  %13823 = vmatpush3.bf16.msra.mxu1 %v14583_v42 }
 0x958   : > { %v13711_v47 = vpop.f32.mrf.mxu1  ;;  %v13734_v30 = vpop.f32.mrf.mxu0 }
 0x95a   : > { %v11758_v10 = vpop.f32.mrf.mxu1  ;;  %v11825_v51 = vpop.f32.mrf.mxu0 }
 0x95b   : > { %v11764_v37 = vadd.f32 %v11758_v10, %v11700_v28 }
 0x95c   : > { %v13726_v36 = vpop.f32.mrf.mxu1  ;;  %v13735_v57 = vpop.f32.mrf.mxu0 }
 0x95d   : > { %v11828_v17 = vadd.f32 %v11822_v8, %v11764_v37 }
 0x95e   : > { %v11761_v11 = vpop.f32.mrf.mxu1  ;;  %v11950_v63 = vpop.f32.mrf.mxu0 }
 0x960   : > { %v13727_v26 = vpop.f32.mrf.mxu1  ;;  %v13750_v45 = vpop.f32.mrf.mxu0 }
 0x962   : > { %v11886_v6 = vpop.f32.mrf.mxu1  ;;  %v11953_v60 = vpop.f32.mrf.mxu0 }
 0x963   : > { %v11892_v21 = vadd.f32 %v11886_v6, %v11828_v17 }
 0x964   : > { %v13742_v48 = vpop.f32.mrf.mxu1  ;;  %v13751_v35 = vpop.f32.mrf.mxu0 }
 0x965   : > { %v11956_v1 = vadd.f32 %v11950_v63, %v11892_v21 }
 0x966   : > { %v11889_v24 = vpop.f32.mrf.mxu1  ;;  %v12078_v62 = vpop.f32.mrf.mxu0 }
 0x968   : > { %v13743_v31 = vpop.f32.mrf.mxu1  ;;  %v13766_v50 = vpop.f32.mrf.mxu0 }
 0x96a   : > { %v12014_v14 = vpop.f32.mrf.mxu1  ;;  %v12081_v54 = vpop.f32.mrf.mxu0 }
 0x96b   : > { %v12020_v13 = vadd.f32 %v12014_v14, %v11956_v1 }
 0x96c   : > { %v13758_v19 = vpop.f32.mrf.mxu1  ;;  %v13767_v25 = vpop.f32.mrf.mxu0 }
 0x96d   : > { %v12084_v32 = vadd.f32 %v12078_v62, %v12020_v13 }
 0x96e   : > { %v12017_v58 = vpop.f32.mrf.mxu1  ;;  %v12206_v29 = vpop.f32.mrf.mxu0 }
 0x970   : > { %v13759_v34 = vpop.f32.mrf.mxu1  ;;  %v13782_v53 = vpop.f32.mrf.mxu0 }
 0x972   : > { %v12142_v22 = vpop.f32.mrf.mxu1  ;;  %v12209_v12 = vpop.f32.mrf.mxu0 }
 0x973   : > { %v12148_v18 = vadd.f32 %v12142_v22, %v12084_v32 }
 0x974   : > { %v13774_v52 = vpop.f32.mrf.mxu1  ;;  %v13783_v40 = vpop.f32.mrf.mxu0 }
 0x975   : > { %v12212_v44 = vadd.f32 %v12206_v29, %v12148_v18 }
 0x976   : > { %v12145_v27 = vpop.f32.mrf.mxu1 }
 0x978   : > { %v13775_v16 = vpop.f32.mrf.mxu1 }
 0x97a   : > { %v12270_v9 = vpop.f32.mrf.mxu1 }
 0x97b   : > { %v12276_v3 = vadd.f32 %v12270_v9, %v12212_v44 }
 0x97c   : > { %v13790_v33 = vpop.f32.mrf.mxu1 }
 0x97d   : > { %v12284_v49 = vadd.f32 %v13448_v5, %v12276_v3 }
 0x97e   : > { %v12273_v56 = vpop.f32.mrf.mxu1 }
 0x97f   : > { %v12285_v46 = vmax.f32 %v12284_v49, 0.0 }
 0x980   : > { %v13791_v4 = vpop.f32.mrf.mxu1 }
 0x981   : > { %v12286_v61 = vpack.c.bf16 %v12285_v46, %v12285_v46 }
 0x983   : > { %13809 = vmatmul.mubr.msk.bf16.vlgmr.msra.gmra.mxu0 %vm12354_vm10, %v12286_v61 }
 0xa43   : > { %v12395_v38 = vpop.f32.mrf.mxu0 }
 0xa44   : > { %v12396_v59 = vadd.f32 %v13449_v55, %v12395_v38 }
 0xa45   : > { %v13810_v0 = vpop.f32.mrf.mxu0 }
 0xa46   : > { %v12401_v15 = vmax.f32 %v12396_v59, 0.0 }
 0xa47   : > { %v12398_v43 = vpop.f32.mrf.mxu0 }
 0xa48   : > { %v12402_v41 = vpack.c.bf16 %v12401_v15, %v12401_v15 }
 0xa49   : > { %v13811_v8 = vpop.f32.mrf.mxu0 }
 0xa4a   : > { %13825 = vmatmul.mubr.msk.bf16.vlgmr.msra.gmra.mxu1 %vm8703_vm11, %v12402_v41 }
 0xb0a   : > { %v12496_v39 = vpop.f32.mrf.mxu1 }
 0xb0b   : > { %v12497_v47 = vadd.f32 %v13459_v23, %v12496_v39 }
 0xb0c   : > { %v13826_v30 = vpop.f32.mrf.mxu1 }
 0xb0d   : > { %12503 = vst.msk [vmem:[%s436_s19] sm:$0xff] %vm12502_vm2, %v12497_v47 }
 0xb0e   : > { %v12499_v10 = vpop.f32.mrf.mxu1 }
 0xb0f   : > { %14653 = shalt.err (!%p14650_p3)
}
 0xb10   : > { %s14654_s22 = scalar_lea.hbm %s20711_s30, 128  ;;  %s14658_s12 = scalar_lea.hbm %s21813_s14, 256 }
 0xb11   : > { %p14655_p4 = scmp.ne.s32.totalorder %s20711_s30, %s14654_s22  ;;  %p14659_p9 = scmp.lt.s32.totalorder %s20711_s30, %s21813_s14 }
 0xb12   : > { %p14660_p10 = scmp.lt.s32.totalorder %s14658_s12, %s14654_s22 }
 0xb13   : > { %p14656_p7 = pnand %p14655_p4, %p14853_p5 }
 0xb14   : > { %p14661_p11 = por %p14660_p10, %p14659_p9 }
 0xb15   : > { %p14657_p8 = pneg %p14656_p7 }
 0xb17   : > { %p14662_p12 = pnand %p14661_p11, %p14657_p8 }
 0xb19   : > { %14665 = shalt.err (!%p14662_p12)
}
 0xb1a   : > { %13829 = dma.vmem_to_hbm [thread:$0]  (%p14853_p5), %s20713_s24, 128, %s20711_s30, %s12505_s21   ;;  %v13827_v51 = vpop.f32.mrf.mxu1 }
 0xb1b PF: > { %s21814_s28 = sld [smem:[#allocation10_spill]] }
 0xb1c   : > { %s21815_s20 = sld [smem:[#allocation7_spill]] }
 0xb21   : > { %p13835_p13 = scmp.ge.s32.totalorder %s21814_s28, 2 }
 0xb22   : > { %s12530_s19 = sand.u32 1, %s21815_s20  }
 0xb23   : > { %p13832_p0 = pnand %p13835_p13, %p14857_p6  ;;  %s12531_s13 = scalar_lea.sflag [#allocation5], %s12530_s19 }
 0xb25   : > { %p13833_p1 = pneg %p13832_p0 }
 0xb27   : > { %14683 = dma.done.wait (%p13833_p1), %s12531_s13, 128  }
 0xb28   : > { %14685 = vsyncadd (%p13833_p1), %s12531_s13, 4294967168  ;;  %s21817_s28 = sld [smem:[#allocation12_spill]] }
 0xb29   : > { %s21818_s25 = sld [smem:[#allocation8_spill]] }
 0xb2a   : > { %s21819_s26 = sld [smem:[#allocation9_spill]] }
 0xb2b   : > { %s21820_s27 = sld [smem:[#allocation13_spill]] }
 0xb2e   : > { %p23_p2 = scmp.ge.s32.totalorder %s21817_s28, 4  }
 0xb30   :  { %25 = sbr.rel (!%p23_p2) target bundleno = 10 (0xa), region = 122 }
 0xb35   :  { %12536 = vsyncpa [#allocation5], 1 }
 0xb36   :  { %12538 = vsyncpa [#allocation5 + $0x1], 1 }

</bundles_post_ra>
